<compile_context>
chip_gen: v6e
topology: v6e:2x2x1
jax: 0.10.0
libtpu: 0.0.40
codegen_flags: <defaults>
</compile_context>

<pallas_src>
import functools

import jax
import jax.numpy as jnp
import numpy as np
from jax import lax
from jax.experimental import pallas as pl
from jax.experimental.pallas import tpu as pltpu

_ROW_CHUNK = 8  # sublane-aligned denoiser row chunk (bounds the vreg live set)


# ----------------------------------------------------------------------------
# Fused kernel: m = x @ H^T, then n_iter x (DC step + residual 3x3 CNN denoiser)
# ----------------------------------------------------------------------------
def _em_net_kernel(gamma_ref, w1_ref, b1_ref, w2_ref, b2_ref,
                   x_ref, h_ref, ht_ref, mask_ref, o_ref, m_ref, *,
                   n_iter, h_img, w_img, c1):
    """Per grid step:
         x_ref    (bc_blk, N) f32   flattened images, N = h_img*w_img (lane-dense)
         h_ref    (M, N)      bf16  measurement matrix (VMEM resident)
         ht_ref   (N, M)      bf16  H^T (so both matmul orientations are MXU-native)
         mask_ref (8, N)      f32   border-validity masks, non-center taps only
         o_ref    (bc_blk, N) f32   reconstruction; doubles as the xc buffer
         m_ref    (bc_blk, M) f32   VMEM scratch: preprocessed measurements
       SMEM: gamma (1,), w1 (C1*9,), b1 (C1,), w2 (C1*9,), b2 (1,)
    """
    n = h_img * w_img
    bc_blk = x_ref.shape[0]
    n_chunks = bc_blk // _ROW_CHUNK

    # ---- scalar reads hoisted out of all (unrolled) loops ----
    gamma = gamma_ref[0]
    w1v = [[w1_ref[c * 9 + k] for k in range(9)] for c in range(c1)]
    w2v = [[w2_ref[c * 9 + k] for k in range(9)] for c in range(c1)]
    b1v = [b1_ref[c] for c in range(c1)]
    b2v = b2_ref[0]

    # 3x3 tap (di, dj) == lane roll by di*w+dj (jnp.roll convention) + border mask.
    offs = [di * w_img + dj for di in (-1, 0, 1) for dj in (-1, 0, 1)]

    # ---- Acq + PreP collapse exactly: (2/a)[(a/2)(x+1)@H^T] - H@1 == x @ H^T ----
    m_ref[...] = jnp.dot(x_ref[...].astype(jnp.bfloat16), ht_ref[...],
                         preferred_element_type=jnp.float32)

    # ---- residual denoiser on one 8-row chunk of o_ref, updated in place ----
    def denoise_rows(r0):
        xc = o_ref[pl.ds(r0, _ROW_CHUNK), :]

        mrows = {}
        row = 0
        for k in range(9):
            if k == 4:                       # center tap: mask is all ones, skip it
                continue
            mrows[k] = mask_ref[row:row + 1, :]
            row += 1

        def tap(arr, k):
            if k == 4:
                return arr
            return pltpu.roll(arr, (-offs[k]) % n, axis=1) * mrows[k]

        # conv1 (+ReLU): taps outer, channels inner -> live set ~ (c1+2) chunk tiles
        accs = [None] * c1
        for k in range(9):
            t = tap(xc, k)
            for c in range(c1):
                term = w1v[c][k] * t
                accs[c] = term if accs[c] is None else accs[c] + term
        hmaps = [jnp.maximum(accs[c] + b1v[c], 0.0) for c in range(c1)]

        # conv2 as shift-of-weighted-sum: 9 rolls total, shared across channels
        out = None
        for k in range(9):
            gk = w2v[0][k] * hmaps[0]
            for c in range(1, c1):
                gk = gk + w2v[c][k] * hmaps[c]
            tk = tap(gk, k)
            out = tk if out is None else out + tk

        o_ref[pl.ds(r0, _ROW_CHUNK), :] = xc + (out + b2v)

    for it in range(n_iter):
        # ---- DC step: x = x0 + gamma * (m - x0 @ H^T) @ H   (x0 == 0 at it 0) ----
        if it == 0:
            step = jnp.dot(m_ref[...].astype(jnp.bfloat16), h_ref[...],
                           preferred_element_type=jnp.float32)
            o_ref[...] = gamma * step
        else:
            pred = jnp.dot(o_ref[...].astype(jnp.bfloat16), ht_ref[...],
                           preferred_element_type=jnp.float32)
            resid = m_ref[...] - pred
            step = jnp.dot(resid.astype(jnp.bfloat16), h_ref[...],
                           preferred_element_type=jnp.float32)
            o_ref[...] = o_ref[...] + gamma * step

        # ---- residual 3x3 CNN denoiser, chunked over sublane rows ----
        if n_chunks <= 4:
            for ci in range(n_chunks):       # static offsets, small unroll
                denoise_rows(ci * _ROW_CHUNK)
        else:
            def chunk_body(ci, carry):
                denoise_rows(pl.multiple_of(ci * _ROW_CHUNK, _ROW_CHUNK))
                return carry
            lax.fori_loop(0, n_chunks, chunk_body, 0)


def _tap_masks(h_img, w_img):
    """(8, h*w) 0/1 masks for the 8 non-center taps (k order, center skipped)."""
    n = h_img * w_img
    idx = np.arange(n)
    row, col = idx // w_img, idx % w_img
    ms = []
    for di in (-1, 0, 1):
        for dj in (-1, 0, 1):
            if di == 0 and dj == 0:
                continue
            ok = ((row + di >= 0) & (row + di < h_img) &
                  (col + dj >= 0) & (col + dj < w_img))
            ms.append(ok.astype(np.float32))
    return jnp.asarray(np.stack(ms, axis=0))


# ----------------------------------------------------------------------------
# EM_net.forward
# ----------------------------------------------------------------------------
@functools.partial(jax.jit, static_argnames=("n_iter",))
def em_net_forward(x, hmat, w1, b1, w2, b2, alpha, gamma, n_iter=3):
    # alpha cancels exactly in PreP(Acq(x)); kept only for API parity.
    del alpha
    b, c, h, w = x.shape
    bc, n = b * c, h * w
    m_dim = hmat.shape[0]
    c1 = b1.shape[0]

    xv = x.reshape(bc, n).astype(jnp.float32)          # torch .view(b*c, h*w)
    masks = _tap_masks(h, w)                           # (8, n)

    # Batch tiling: pad bc to a multiple of 8 (clean sublane tiles / stores) and use
    # one maximal block; only very large batches are split into exactly two blocks so
    # the "parallel" grid axis maps onto v7x's two TensorCores.
    bc8 = ((bc + 7) // 8) * 8
    if bc8 <= 256:
        bc_blk = bc8
    else:
        bc_blk = ((bc8 + 15) // 16) * 8                # ceil(bc8/2), rounded up to 8
    grid_steps = -(-bc8 // bc_blk)
    bc_pad = bc_blk * grid_steps
    if bc_pad != bc:
        xv = jnp.pad(xv, ((0, bc_pad - bc), (0, 0)))
    grid = (grid_steps,)

    # bf16 operands for the MXU; H and H^T both provided so neither matmul
    # orientation needs an in-kernel transpose.
    hm_bf = hmat.astype(jnp.bfloat16)                  # (M, N)
    ht_bf = hmat.T.astype(jnp.bfloat16)                # (N, M)

    # Resident operands: constant index map; single-buffer them when the grid
    # actually revisits (no need to double-buffer a block that never changes).
    res_kwargs = {"pipeline_mode": pl.Buffered(1)} if grid_steps > 1 else {}
    h_spec = pl.BlockSpec((m_dim, n), lambda i: (0, 0), **res_kwargs)
    ht_spec = pl.BlockSpec((n, m_dim), lambda i: (0, 0), **res_kwargs)
    mask_spec = pl.BlockSpec((8, n), lambda i: (0, 0), **res_kwargs)
    smem = pl.BlockSpec(memory_space=pltpu.MemorySpace.SMEM)

    # Explicit VMEM budget (v5e's default scoped limit is only 16 MiB); stay under
    # v7x's 64 MiB physical VMEM.
    est = (2 * m_dim * n * 2                           # H + H^T (bf16)
           + 8 * n * 4                                 # tap masks
           + 4 * bc_blk * n * 4                        # x + out blocks, double-buffered
           + bc_blk * m_dim * 4)                       # m scratch
    vmem_limit = int(min(64 * 2 ** 20, max(32 * 2 ** 20, 2 * est)))

    kern = functools.partial(_em_net_kernel, n_iter=n_iter,
                             h_img=h, w_img=w, c1=c1)
    out = pl.pallas_call(
        kern,
        out_shape=jax.ShapeDtypeStruct((bc_pad, n), jnp.float32),
        grid=grid,
        in_specs=[smem, smem, smem, smem, smem,
                  pl.BlockSpec((bc_blk, n), lambda i: (i, 0)),
                  h_spec, ht_spec, mask_spec],
        out_specs=pl.BlockSpec((bc_blk, n), lambda i: (i, 0)),
        scratch_shapes=[pltpu.VMEM((bc_blk, m_dim), jnp.float32)],
        compiler_params=pltpu.CompilerParams(
            dimension_semantics=("parallel",),
            vmem_limit_bytes=vmem_limit),
    )(jnp.asarray(gamma, jnp.float32).reshape(1),
      w1.reshape(c1 * 9).astype(jnp.float32),
      b1.astype(jnp.float32),
      w2.reshape(c1 * 9).astype(jnp.float32),
      b2.astype(jnp.float32),
      xv, hm_bf, ht_bf, masks)
    return out[:bc].reshape(b, c, h, w)                # .view(b, c, h, w)


# ----------------------------------------------------------------------------
# Pure-JAX reference (ORIGINAL, unsimplified module math) for validation
# ----------------------------------------------------------------------------
def _reference_forward(x, hmat, w1, b1, w2, b2, alpha, gamma, n_iter):
    hp = lax.Precision.HIGHEST
    b, c, h, w = x.shape
    bc, n = b * c, h * w
    c1 = b1.shape[0]
    xv = x.reshape(bc, n).astype(jnp.float32)

    y = 0.5 * alpha * jnp.dot(xv + 1.0, hmat.T, precision=hp)     # Acq
    m = (2.0 / alpha) * y - jnp.sum(hmat, axis=1)[None, :]        # PreP

    def denoise(img):                                             # (bc, h, w)
        xp = jnp.pad(img, ((0, 0), (1, 1), (1, 1)))
        out = jnp.full((bc, h, w), b2[0])
        for cc in range(c1):
            acc = jnp.full((bc, h, w), b1[cc])
            for ki in range(3):
                for kj in range(3):
                    acc = acc + w1[cc, 0, ki, kj] * xp[:, ki:ki + h, kj:kj + w]
            hcp = jnp.pad(jnp.maximum(acc, 0.0), ((0, 0), (1, 1), (1, 1)))
            for ki in range(3):
                for kj in range(3):
                    out = out + w2[0, cc, ki, kj] * hcp[:, ki:ki + h, kj:kj + w]
        return img + out

    x0 = jnp.zeros_like(xv)
    xc = xv
    for _ in range(n_iter):
        pred = jnp.dot(x0, hmat.T, precision=hp)
        xc = x0 + gamma * jnp.dot(m - pred, hmat, precision=hp)
        xc = denoise(xc.reshape(bc, h, w)).reshape(bc, n)
        x0 = xc
    return xc.reshape(b, c, h, w)


if __name__ == "__main__":
    key = jax.random.PRNGKey(0)
    b, c, h, w = 4, 4, 16, 16      # bc = 16 -> one 16-row block, 2 denoiser chunks
    n = h * w                      # 256 pixels
    m_dim = n // 2                 # 128 measurements
    c1 = 4                         # denoiser hidden channels

    k_x, k_h, k_w1, k_b1, k_w2, k_b2 = jax.random.split(key, 6)
    x = jax.random.normal(k_x, (b, c, h, w), dtype=jnp.float32)
    hmat = jax.random.normal(k_h, (m_dim, n), dtype=jnp.float32) / jnp.sqrt(n)
    w1 = 0.1 * jax.random.normal(k_w1, (c1, 1, 3, 3), dtype=jnp.float32)
    b1 = 0.01 * jax.random.normal(k_b1, (c1,), dtype=jnp.float32)
    w2 = 0.1 * jax.random.normal(k_w2, (1, c1, 3, 3), dtype=jnp.float32)
    b2 = 0.01 * jax.random.normal(k_b2, (1,), dtype=jnp.float32)

    out = em_net_forward(x, hmat, w1, b1, w2, b2,
                         alpha=10.0, gamma=0.3, n_iter=3)
    out = jax.block_until_ready(out)
    assert out.shape == (b, c, h, w)
    assert bool(jnp.all(jnp.isfinite(out)))

    ref = _reference_forward(x, hmat, w1, b1, w2, b2,
                             alpha=10.0, gamma=0.3, n_iter=3)
    err = float(jnp.max(jnp.abs(out - ref)))
    # Tolerance sized for bf16 MXU operands (~2^-9 relative, K <= 256, f32 accumulate)
    # vs. the Precision.HIGHEST f32 reference.
    tol = 3e-2 * max(1.0, float(jnp.max(jnp.abs(ref))))
    assert err < tol, f"kernel/reference mismatch: max abs err = {err} (tol {tol})"
    print("KERNEL_OK")
</pallas_src>

<mosaic_0001>
module attributes {stable_mosaic.version = 11 : i64} {
  func.func @_em_net_kernel(%arg0: i32, %arg1: memref<1xf32, #tpu.memory_space<smem>>, %arg2: memref<36xf32, #tpu.memory_space<smem>>, %arg3: memref<4xf32, #tpu.memory_space<smem>>, %arg4: memref<36xf32, #tpu.memory_space<smem>>, %arg5: memref<1xf32, #tpu.memory_space<smem>>, %arg6: memref<16x256xf32, #tpu.memory_space<vmem>>, %arg7: memref<128x256xbf16, #tpu.memory_space<vmem>>, %arg8: memref<256x128xbf16, #tpu.memory_space<vmem>>, %arg9: memref<8x256xf32, #tpu.memory_space<vmem>>, %arg10: memref<16x256xf32, #tpu.memory_space<vmem>>, %arg11: memref<16x128xf32, #tpu.memory_space<vmem>>) attributes {dimension_semantics = [#tpu.dimension_semantics<parallel>], iteration_bounds = array<i64: 1>, scalar_prefetch = 0 : i64, scratch_operands = 1 : i64, tpu.core_type = #tpu.core_type<tc>, window_params = [{transform_indices = @transform_0, window_bounds = array<i64: 1>}, {transform_indices = @transform_1, window_bounds = array<i64: 36>}, {transform_indices = @transform_2, window_bounds = array<i64: 4>}, {transform_indices = @transform_3, window_bounds = array<i64: 36>}, {transform_indices = @transform_4, window_bounds = array<i64: 1>}, {transform_indices = @transform_5, window_bounds = array<i64: 16, 256>}, {pipeline_mode = #tpu.pipeline_mode<synchronous>, transform_indices = @transform_6, window_bounds = array<i64: 128, 256>}, {pipeline_mode = #tpu.pipeline_mode<synchronous>, transform_indices = @transform_7, window_bounds = array<i64: 256, 128>}, {pipeline_mode = #tpu.pipeline_mode<synchronous>, transform_indices = @transform_8, window_bounds = array<i64: 8, 256>}, {transform_indices = @transform_9, window_bounds = array<i64: 16, 256>}]} {
    %c0 = arith.constant 0 : index
    %0 = memref.load %arg1[%c0] : memref<1xf32, #tpu.memory_space<smem>>
    %c0_0 = arith.constant 0 : index
    %1 = memref.load %arg2[%c0_0] : memref<36xf32, #tpu.memory_space<smem>>
    %c1 = arith.constant 1 : index
    %2 = memref.load %arg2[%c1] : memref<36xf32, #tpu.memory_space<smem>>
    %c2 = arith.constant 2 : index
    %3 = memref.load %arg2[%c2] : memref<36xf32, #tpu.memory_space<smem>>
    %c3 = arith.constant 3 : index
    %4 = memref.load %arg2[%c3] : memref<36xf32, #tpu.memory_space<smem>>
    %c4 = arith.constant 4 : index
    %5 = memref.load %arg2[%c4] : memref<36xf32, #tpu.memory_space<smem>>
    %c5 = arith.constant 5 : index
    %6 = memref.load %arg2[%c5] : memref<36xf32, #tpu.memory_space<smem>>
    %c6 = arith.constant 6 : index
    %7 = memref.load %arg2[%c6] : memref<36xf32, #tpu.memory_space<smem>>
    %c7 = arith.constant 7 : index
    %8 = memref.load %arg2[%c7] : memref<36xf32, #tpu.memory_space<smem>>
    %c8 = arith.constant 8 : index
    %9 = memref.load %arg2[%c8] : memref<36xf32, #tpu.memory_space<smem>>
    %c9 = arith.constant 9 : index
    %10 = memref.load %arg2[%c9] : memref<36xf32, #tpu.memory_space<smem>>
    %c10 = arith.constant 10 : index
    %11 = memref.load %arg2[%c10] : memref<36xf32, #tpu.memory_space<smem>>
    %c11 = arith.constant 11 : index
    %12 = memref.load %arg2[%c11] : memref<36xf32, #tpu.memory_space<smem>>
    %c12 = arith.constant 12 : index
    %13 = memref.load %arg2[%c12] : memref<36xf32, #tpu.memory_space<smem>>
    %c13 = arith.constant 13 : index
    %14 = memref.load %arg2[%c13] : memref<36xf32, #tpu.memory_space<smem>>
    %c14 = arith.constant 14 : index
    %15 = memref.load %arg2[%c14] : memref<36xf32, #tpu.memory_space<smem>>
    %c15 = arith.constant 15 : index
    %16 = memref.load %arg2[%c15] : memref<36xf32, #tpu.memory_space<smem>>
    %c16 = arith.constant 16 : index
    %17 = memref.load %arg2[%c16] : memref<36xf32, #tpu.memory_space<smem>>
    %c17 = arith.constant 17 : index
    %18 = memref.load %arg2[%c17] : memref<36xf32, #tpu.memory_space<smem>>
    %c18 = arith.constant 18 : index
    %19 = memref.load %arg2[%c18] : memref<36xf32, #tpu.memory_space<smem>>
    %c19 = arith.constant 19 : index
    %20 = memref.load %arg2[%c19] : memref<36xf32, #tpu.memory_space<smem>>
    %c20 = arith.constant 20 : index
    %21 = memref.load %arg2[%c20] : memref<36xf32, #tpu.memory_space<smem>>
    %c21 = arith.constant 21 : index
    %22 = memref.load %arg2[%c21] : memref<36xf32, #tpu.memory_space<smem>>
    %c22 = arith.constant 22 : index
    %23 = memref.load %arg2[%c22] : memref<36xf32, #tpu.memory_space<smem>>
    %c23 = arith.constant 23 : index
    %24 = memref.load %arg2[%c23] : memref<36xf32, #tpu.memory_space<smem>>
    %c24 = arith.constant 24 : index
    %25 = memref.load %arg2[%c24] : memref<36xf32, #tpu.memory_space<smem>>
    %c25 = arith.constant 25 : index
    %26 = memref.load %arg2[%c25] : memref<36xf32, #tpu.memory_space<smem>>
    %c26 = arith.constant 26 : index
    %27 = memref.load %arg2[%c26] : memref<36xf32, #tpu.memory_space<smem>>
    %c27 = arith.constant 27 : index
    %28 = memref.load %arg2[%c27] : memref<36xf32, #tpu.memory_space<smem>>
    %c28 = arith.constant 28 : index
    %29 = memref.load %arg2[%c28] : memref<36xf32, #tpu.memory_space<smem>>
    %c29 = arith.constant 29 : index
    %30 = memref.load %arg2[%c29] : memref<36xf32, #tpu.memory_space<smem>>
    %c30 = arith.constant 30 : index
    %31 = memref.load %arg2[%c30] : memref<36xf32, #tpu.memory_space<smem>>
    %c31 = arith.constant 31 : index
    %32 = memref.load %arg2[%c31] : memref<36xf32, #tpu.memory_space<smem>>
    %c32 = arith.constant 32 : index
    %33 = memref.load %arg2[%c32] : memref<36xf32, #tpu.memory_space<smem>>
    %c33 = arith.constant 33 : index
    %34 = memref.load %arg2[%c33] : memref<36xf32, #tpu.memory_space<smem>>
    %c34 = arith.constant 34 : index
    %35 = memref.load %arg2[%c34] : memref<36xf32, #tpu.memory_space<smem>>
    %c35 = arith.constant 35 : index
    %36 = memref.load %arg2[%c35] : memref<36xf32, #tpu.memory_space<smem>>
    %c0_1 = arith.constant 0 : index
    %37 = memref.load %arg4[%c0_1] : memref<36xf32, #tpu.memory_space<smem>>
    %c1_2 = arith.constant 1 : index
    %38 = memref.load %arg4[%c1_2] : memref<36xf32, #tpu.memory_space<smem>>
    %c2_3 = arith.constant 2 : index
    %39 = memref.load %arg4[%c2_3] : memref<36xf32, #tpu.memory_space<smem>>
    %c3_4 = arith.constant 3 : index
    %40 = memref.load %arg4[%c3_4] : memref<36xf32, #tpu.memory_space<smem>>
    %c4_5 = arith.constant 4 : index
    %41 = memref.load %arg4[%c4_5] : memref<36xf32, #tpu.memory_space<smem>>
    %c5_6 = arith.constant 5 : index
    %42 = memref.load %arg4[%c5_6] : memref<36xf32, #tpu.memory_space<smem>>
    %c6_7 = arith.constant 6 : index
    %43 = memref.load %arg4[%c6_7] : memref<36xf32, #tpu.memory_space<smem>>
    %c7_8 = arith.constant 7 : index
    %44 = memref.load %arg4[%c7_8] : memref<36xf32, #tpu.memory_space<smem>>
    %c8_9 = arith.constant 8 : index
    %45 = memref.load %arg4[%c8_9] : memref<36xf32, #tpu.memory_space<smem>>
    %c9_10 = arith.constant 9 : index
    %46 = memref.load %arg4[%c9_10] : memref<36xf32, #tpu.memory_space<smem>>
    %c10_11 = arith.constant 10 : index
    %47 = memref.load %arg4[%c10_11] : memref<36xf32, #tpu.memory_space<smem>>
    %c11_12 = arith.constant 11 : index
    %48 = memref.load %arg4[%c11_12] : memref<36xf32, #tpu.memory_space<smem>>
    %c12_13 = arith.constant 12 : index
    %49 = memref.load %arg4[%c12_13] : memref<36xf32, #tpu.memory_space<smem>>
    %c13_14 = arith.constant 13 : index
    %50 = memref.load %arg4[%c13_14] : memref<36xf32, #tpu.memory_space<smem>>
    %c14_15 = arith.constant 14 : index
    %51 = memref.load %arg4[%c14_15] : memref<36xf32, #tpu.memory_space<smem>>
    %c15_16 = arith.constant 15 : index
    %52 = memref.load %arg4[%c15_16] : memref<36xf32, #tpu.memory_space<smem>>
    %c16_17 = arith.constant 16 : index
    %53 = memref.load %arg4[%c16_17] : memref<36xf32, #tpu.memory_space<smem>>
    %c17_18 = arith.constant 17 : index
    %54 = memref.load %arg4[%c17_18] : memref<36xf32, #tpu.memory_space<smem>>
    %c18_19 = arith.constant 18 : index
    %55 = memref.load %arg4[%c18_19] : memref<36xf32, #tpu.memory_space<smem>>
    %c19_20 = arith.constant 19 : index
    %56 = memref.load %arg4[%c19_20] : memref<36xf32, #tpu.memory_space<smem>>
    %c20_21 = arith.constant 20 : index
    %57 = memref.load %arg4[%c20_21] : memref<36xf32, #tpu.memory_space<smem>>
    %c21_22 = arith.constant 21 : index
    %58 = memref.load %arg4[%c21_22] : memref<36xf32, #tpu.memory_space<smem>>
    %c22_23 = arith.constant 22 : index
    %59 = memref.load %arg4[%c22_23] : memref<36xf32, #tpu.memory_space<smem>>
    %c23_24 = arith.constant 23 : index
    %60 = memref.load %arg4[%c23_24] : memref<36xf32, #tpu.memory_space<smem>>
    %c24_25 = arith.constant 24 : index
    %61 = memref.load %arg4[%c24_25] : memref<36xf32, #tpu.memory_space<smem>>
    %c25_26 = arith.constant 25 : index
    %62 = memref.load %arg4[%c25_26] : memref<36xf32, #tpu.memory_space<smem>>
    %c26_27 = arith.constant 26 : index
    %63 = memref.load %arg4[%c26_27] : memref<36xf32, #tpu.memory_space<smem>>
    %c27_28 = arith.constant 27 : index
    %64 = memref.load %arg4[%c27_28] : memref<36xf32, #tpu.memory_space<smem>>
    %c28_29 = arith.constant 28 : index
    %65 = memref.load %arg4[%c28_29] : memref<36xf32, #tpu.memory_space<smem>>
    %c29_30 = arith.constant 29 : index
    %66 = memref.load %arg4[%c29_30] : memref<36xf32, #tpu.memory_space<smem>>
    %c30_31 = arith.constant 30 : index
    %67 = memref.load %arg4[%c30_31] : memref<36xf32, #tpu.memory_space<smem>>
    %c31_32 = arith.constant 31 : index
    %68 = memref.load %arg4[%c31_32] : memref<36xf32, #tpu.memory_space<smem>>
    %c32_33 = arith.constant 32 : index
    %69 = memref.load %arg4[%c32_33] : memref<36xf32, #tpu.memory_space<smem>>
    %c33_34 = arith.constant 33 : index
    %70 = memref.load %arg4[%c33_34] : memref<36xf32, #tpu.memory_space<smem>>
    %c34_35 = arith.constant 34 : index
    %71 = memref.load %arg4[%c34_35] : memref<36xf32, #tpu.memory_space<smem>>
    %c35_36 = arith.constant 35 : index
    %72 = memref.load %arg4[%c35_36] : memref<36xf32, #tpu.memory_space<smem>>
    %c0_37 = arith.constant 0 : index
    %73 = memref.load %arg3[%c0_37] : memref<4xf32, #tpu.memory_space<smem>>
    %c1_38 = arith.constant 1 : index
    %74 = memref.load %arg3[%c1_38] : memref<4xf32, #tpu.memory_space<smem>>
    %c2_39 = arith.constant 2 : index
    %75 = memref.load %arg3[%c2_39] : memref<4xf32, #tpu.memory_space<smem>>
    %c3_40 = arith.constant 3 : index
    %76 = memref.load %arg3[%c3_40] : memref<4xf32, #tpu.memory_space<smem>>
    %c0_41 = arith.constant 0 : index
    %77 = memref.load %arg5[%c0_41] : memref<1xf32, #tpu.memory_space<smem>>
    %c0_42 = arith.constant 0 : index
    %c0_43 = arith.constant 0 : index
    %78 = vector.load %arg6[%c0_42, %c0_43] : memref<16x256xf32, #tpu.memory_space<vmem>>, vector<16x256xf32>
    %79 = arith.truncf %78 : vector<16x256xf32> to vector<16x256xbf16>
    %c0_44 = arith.constant 0 : index
    %c0_45 = arith.constant 0 : index
    %80 = vector.load %arg8[%c0_44, %c0_45] : memref<256x128xbf16, #tpu.memory_space<vmem>>, vector<256x128xbf16>
    %cst = arith.constant dense<0.000000e+00> : vector<16x128xf32>
    %81 = tpu.matmul %79, %80, %cst {dimension_numbers = #tpu.dot_dimension_numbers<[1], [0], [0], [1], [0, 0, 1, 1], [], []>} : vector<16x256xbf16>, vector<256x128xbf16>, vector<16x128xf32> -> vector<16x128xf32>
    %c0_46 = arith.constant 0 : index
    %c0_47 = arith.constant 0 : index
    %82 = vector.load %arg11[%c0_46, %c0_47] : memref<16x128xf32, #tpu.memory_space<vmem>>, vector<16x128xf32>
    tpu.vector_store %arg11[%c0_46, %c0_47], %81 {strides = array<i32>} : memref<16x128xf32, #tpu.memory_space<vmem>>, vector<16x128xf32>,
    %c0_48 = arith.constant 0 : index
    %c0_49 = arith.constant 0 : index
    %83 = vector.load %arg11[%c0_48, %c0_49] : memref<16x128xf32, #tpu.memory_space<vmem>>, vector<16x128xf32>
    %84 = arith.truncf %83 : vector<16x128xf32> to vector<16x128xbf16>
    %c0_50 = arith.constant 0 : index
    %c0_51 = arith.constant 0 : index
    %85 = vector.load %arg7[%c0_50, %c0_51] : memref<128x256xbf16, #tpu.memory_space<vmem>>, vector<128x256xbf16>
    %cst_52 = arith.constant dense<0.000000e+00> : vector<16x256xf32>
    %86 = tpu.matmul %84, %85, %cst_52 {dimension_numbers = #tpu.dot_dimension_numbers<[1], [0], [0], [1], [0, 0, 1, 1], [], []>} : vector<16x128xbf16>, vector<128x256xbf16>, vector<16x256xf32> -> vector<16x256xf32>
    %87 = vector.broadcast %0 : f32 to vector<16x256xf32>
    %88 = arith.mulf %87, %86 : vector<16x256xf32>
    %c0_53 = arith.constant 0 : index
    %c0_54 = arith.constant 0 : index
    %89 = vector.load %arg10[%c0_53, %c0_54] : memref<16x256xf32, #tpu.memory_space<vmem>>, vector<16x256xf32>
    tpu.vector_store %arg10[%c0_53, %c0_54], %88 {strides = array<i32>} : memref<16x256xf32, #tpu.memory_space<vmem>>, vector<16x256xf32>,
    %c0_55 = arith.constant 0 : index
    %c0_56 = arith.constant 0 : index
    %90 = vector.load %arg10[%c0_55, %c0_56] : memref<16x256xf32, #tpu.memory_space<vmem>>, vector<8x256xf32>
    %c0_57 = arith.constant 0 : index
    %c0_58 = arith.constant 0 : index
    %91 = vector.load %arg9[%c0_57, %c0_58] : memref<8x256xf32, #tpu.memory_space<vmem>>, vector<1x256xf32>
    %c1_59 = arith.constant 1 : index
    %c0_60 = arith.constant 0 : index
    %92 = vector.load %arg9[%c1_59, %c0_60] : memref<8x256xf32, #tpu.memory_space<vmem>>, vector<1x256xf32>
    %c2_61 = arith.constant 2 : index
    %c0_62 = arith.constant 0 : index
    %93 = vector.load %arg9[%c2_61, %c0_62] : memref<8x256xf32, #tpu.memory_space<vmem>>, vector<1x256xf32>
    %c3_63 = arith.constant 3 : index
    %c0_64 = arith.constant 0 : index
    %94 = vector.load %arg9[%c3_63, %c0_64] : memref<8x256xf32, #tpu.memory_space<vmem>>, vector<1x256xf32>
    %c4_65 = arith.constant 4 : index
    %c0_66 = arith.constant 0 : index
    %95 = vector.load %arg9[%c4_65, %c0_66] : memref<8x256xf32, #tpu.memory_space<vmem>>, vector<1x256xf32>
    %c5_67 = arith.constant 5 : index
    %c0_68 = arith.constant 0 : index
    %96 = vector.load %arg9[%c5_67, %c0_68] : memref<8x256xf32, #tpu.memory_space<vmem>>, vector<1x256xf32>
    %c6_69 = arith.constant 6 : index
    %c0_70 = arith.constant 0 : index
    %97 = vector.load %arg9[%c6_69, %c0_70] : memref<8x256xf32, #tpu.memory_space<vmem>>, vector<1x256xf32>
    %c7_71 = arith.constant 7 : index
    %c0_72 = arith.constant 0 : index
    %98 = vector.load %arg9[%c7_71, %c0_72] : memref<8x256xf32, #tpu.memory_space<vmem>>, vector<1x256xf32>
    %c17_i32 = arith.constant 17 : i32
    %99 = tpu.dynamic_rotate %90 by %c17_i32 dim 1 : vector<8x256xf32>, i32 -> vector<8x256xf32>
    %100 = vector.broadcast %91 : vector<1x256xf32> to vector<8x256xf32>
    %101 = arith.mulf %99, %100 : vector<8x256xf32>
    %102 = vector.broadcast %1 : f32 to vector<8x256xf32>
    %103 = arith.mulf %102, %101 : vector<8x256xf32>
    %104 = vector.broadcast %10 : f32 to vector<8x256xf32>
    %105 = arith.mulf %104, %101 : vector<8x256xf32>
    %106 = vector.broadcast %19 : f32 to vector<8x256xf32>
    %107 = arith.mulf %106, %101 : vector<8x256xf32>
    %108 = vector.broadcast %28 : f32 to vector<8x256xf32>
    %109 = arith.mulf %108, %101 : vector<8x256xf32>
    %c16_i32 = arith.constant 16 : i32
    %110 = tpu.dynamic_rotate %90 by %c16_i32 dim 1 : vector<8x256xf32>, i32 -> vector<8x256xf32>
    %111 = vector.broadcast %92 : vector<1x256xf32> to vector<8x256xf32>
    %112 = arith.mulf %110, %111 : vector<8x256xf32>
    %113 = vector.broadcast %2 : f32 to vector<8x256xf32>
    %114 = arith.mulf %113, %112 : vector<8x256xf32>
    %115 = arith.addf %103, %114 : vector<8x256xf32>
    %116 = vector.broadcast %11 : f32 to vector<8x256xf32>
    %117 = arith.mulf %116, %112 : vector<8x256xf32>
    %118 = arith.addf %105, %117 : vector<8x256xf32>
    %119 = vector.broadcast %20 : f32 to vector<8x256xf32>
    %120 = arith.mulf %119, %112 : vector<8x256xf32>
    %121 = arith.addf %107, %120 : vector<8x256xf32>
    %122 = vector.broadcast %29 : f32 to vector<8x256xf32>
    %123 = arith.mulf %122, %112 : vector<8x256xf32>
    %124 = arith.addf %109, %123 : vector<8x256xf32>
    %c15_i32 = arith.constant 15 : i32
    %125 = tpu.dynamic_rotate %90 by %c15_i32 dim 1 : vector<8x256xf32>, i32 -> vector<8x256xf32>
    %126 = vector.broadcast %93 : vector<1x256xf32> to vector<8x256xf32>
    %127 = arith.mulf %125, %126 : vector<8x256xf32>
    %128 = vector.broadcast %3 : f32 to vector<8x256xf32>
    %129 = arith.mulf %128, %127 : vector<8x256xf32>
    %130 = arith.addf %115, %129 : vector<8x256xf32>
    %131 = vector.broadcast %12 : f32 to vector<8x256xf32>
    %132 = arith.mulf %131, %127 : vector<8x256xf32>
    %133 = arith.addf %118, %132 : vector<8x256xf32>
    %134 = vector.broadcast %21 : f32 to vector<8x256xf32>
    %135 = arith.mulf %134, %127 : vector<8x256xf32>
    %136 = arith.addf %121, %135 : vector<8x256xf32>
    %137 = vector.broadcast %30 : f32 to vector<8x256xf32>
    %138 = arith.mulf %137, %127 : vector<8x256xf32>
    %139 = arith.addf %124, %138 : vector<8x256xf32>
    %c1_i32 = arith.constant 1 : i32
    %140 = tpu.dynamic_rotate %90 by %c1_i32 dim 1 : vector<8x256xf32>, i32 -> vector<8x256xf32>
    %141 = vector.broadcast %94 : vector<1x256xf32> to vector<8x256xf32>
    %142 = arith.mulf %140, %141 : vector<8x256xf32>
    %143 = vector.broadcast %4 : f32 to vector<8x256xf32>
    %144 = arith.mulf %143, %142 : vector<8x256xf32>
    %145 = arith.addf %130, %144 : vector<8x256xf32>
    %146 = vector.broadcast %13 : f32 to vector<8x256xf32>
    %147 = arith.mulf %146, %142 : vector<8x256xf32>
    %148 = arith.addf %133, %147 : vector<8x256xf32>
    %149 = vector.broadcast %22 : f32 to vector<8x256xf32>
    %150 = arith.mulf %149, %142 : vector<8x256xf32>
    %151 = arith.addf %136, %150 : vector<8x256xf32>
    %152 = vector.broadcast %31 : f32 to vector<8x256xf32>
    %153 = arith.mulf %152, %142 : vector<8x256xf32>
    %154 = arith.addf %139, %153 : vector<8x256xf32>
    %155 = vector.broadcast %5 : f32 to vector<8x256xf32>
    %156 = arith.mulf %155, %90 : vector<8x256xf32>
    %157 = arith.addf %145, %156 : vector<8x256xf32>
    %158 = vector.broadcast %14 : f32 to vector<8x256xf32>
    %159 = arith.mulf %158, %90 : vector<8x256xf32>
    %160 = arith.addf %148, %159 : vector<8x256xf32>
    %161 = vector.broadcast %23 : f32 to vector<8x256xf32>
    %162 = arith.mulf %161, %90 : vector<8x256xf32>
    %163 = arith.addf %151, %162 : vector<8x256xf32>
    %164 = vector.broadcast %32 : f32 to vector<8x256xf32>
    %165 = arith.mulf %164, %90 : vector<8x256xf32>
    %166 = arith.addf %154, %165 : vector<8x256xf32>
    %c255_i32 = arith.constant 255 : i32
    %167 = tpu.dynamic_rotate %90 by %c255_i32 dim 1 : vector<8x256xf32>, i32 -> vector<8x256xf32>
    %168 = vector.broadcast %95 : vector<1x256xf32> to vector<8x256xf32>
    %169 = arith.mulf %167, %168 : vector<8x256xf32>
    %170 = vector.broadcast %6 : f32 to vector<8x256xf32>
    %171 = arith.mulf %170, %169 : vector<8x256xf32>
    %172 = arith.addf %157, %171 : vector<8x256xf32>
    %173 = vector.broadcast %15 : f32 to vector<8x256xf32>
    %174 = arith.mulf %173, %169 : vector<8x256xf32>
    %175 = arith.addf %160, %174 : vector<8x256xf32>
    %176 = vector.broadcast %24 : f32 to vector<8x256xf32>
    %177 = arith.mulf %176, %169 : vector<8x256xf32>
    %178 = arith.addf %163, %177 : vector<8x256xf32>
    %179 = vector.broadcast %33 : f32 to vector<8x256xf32>
    %180 = arith.mulf %179, %169 : vector<8x256xf32>
    %181 = arith.addf %166, %180 : vector<8x256xf32>
    %c241_i32 = arith.constant 241 : i32
    %182 = tpu.dynamic_rotate %90 by %c241_i32 dim 1 : vector<8x256xf32>, i32 -> vector<8x256xf32>
    %183 = vector.broadcast %96 : vector<1x256xf32> to vector<8x256xf32>
    %184 = arith.mulf %182, %183 : vector<8x256xf32>
    %185 = vector.broadcast %7 : f32 to vector<8x256xf32>
    %186 = arith.mulf %185, %184 : vector<8x256xf32>
    %187 = arith.addf %172, %186 : vector<8x256xf32>
    %188 = vector.broadcast %16 : f32 to vector<8x256xf32>
    %189 = arith.mulf %188, %184 : vector<8x256xf32>
    %190 = arith.addf %175, %189 : vector<8x256xf32>
    %191 = vector.broadcast %25 : f32 to vector<8x256xf32>
    %192 = arith.mulf %191, %184 : vector<8x256xf32>
    %193 = arith.addf %178, %192 : vector<8x256xf32>
    %194 = vector.broadcast %34 : f32 to vector<8x256xf32>
    %195 = arith.mulf %194, %184 : vector<8x256xf32>
    %196 = arith.addf %181, %195 : vector<8x256xf32>
    %c240_i32 = arith.constant 240 : i32
    %197 = tpu.dynamic_rotate %90 by %c240_i32 dim 1 : vector<8x256xf32>, i32 -> vector<8x256xf32>
    %198 = vector.broadcast %97 : vector<1x256xf32> to vector<8x256xf32>
    %199 = arith.mulf %197, %198 : vector<8x256xf32>
    %200 = vector.broadcast %8 : f32 to vector<8x256xf32>
    %201 = arith.mulf %200, %199 : vector<8x256xf32>
    %202 = arith.addf %187, %201 : vector<8x256xf32>
    %203 = vector.broadcast %17 : f32 to vector<8x256xf32>
    %204 = arith.mulf %203, %199 : vector<8x256xf32>
    %205 = arith.addf %190, %204 : vector<8x256xf32>
    %206 = vector.broadcast %26 : f32 to vector<8x256xf32>
    %207 = arith.mulf %206, %199 : vector<8x256xf32>
    %208 = arith.addf %193, %207 : vector<8x256xf32>
    %209 = vector.broadcast %35 : f32 to vector<8x256xf32>
    %210 = arith.mulf %209, %199 : vector<8x256xf32>
    %211 = arith.addf %196, %210 : vector<8x256xf32>
    %c239_i32 = arith.constant 239 : i32
    %212 = tpu.dynamic_rotate %90 by %c239_i32 dim 1 : vector<8x256xf32>, i32 -> vector<8x256xf32>
    %213 = vector.broadcast %98 : vector<1x256xf32> to vector<8x256xf32>
    %214 = arith.mulf %212, %213 : vector<8x256xf32>
    %215 = vector.broadcast %9 : f32 to vector<8x256xf32>
    %216 = arith.mulf %215, %214 : vector<8x256xf32>
    %217 = arith.addf %202, %216 : vector<8x256xf32>
    %218 = vector.broadcast %18 : f32 to vector<8x256xf32>
    %219 = arith.mulf %218, %214 : vector<8x256xf32>
    %220 = arith.addf %205, %219 : vector<8x256xf32>
    %221 = vector.broadcast %27 : f32 to vector<8x256xf32>
    %222 = arith.mulf %221, %214 : vector<8x256xf32>
    %223 = arith.addf %208, %222 : vector<8x256xf32>
    %224 = vector.broadcast %36 : f32 to vector<8x256xf32>
    %225 = arith.mulf %224, %214 : vector<8x256xf32>
    %226 = arith.addf %211, %225 : vector<8x256xf32>
    %227 = vector.broadcast %73 : f32 to vector<8x256xf32>
    %228 = arith.addf %217, %227 : vector<8x256xf32>
    %cst_73 = arith.constant 0.000000e+00 : f32
    %229 = vector.broadcast %cst_73 : f32 to vector<8x256xf32>
    %230 = arith.maximumf %228, %229 : vector<8x256xf32>
    %231 = vector.broadcast %74 : f32 to vector<8x256xf32>
    %232 = arith.addf %220, %231 : vector<8x256xf32>
    %cst_74 = arith.constant 0.000000e+00 : f32
    %233 = vector.broadcast %cst_74 : f32 to vector<8x256xf32>
    %234 = arith.maximumf %232, %233 : vector<8x256xf32>
    %235 = vector.broadcast %75 : f32 to vector<8x256xf32>
    %236 = arith.addf %223, %235 : vector<8x256xf32>
    %cst_75 = arith.constant 0.000000e+00 : f32
    %237 = vector.broadcast %cst_75 : f32 to vector<8x256xf32>
    %238 = arith.maximumf %236, %237 : vector<8x256xf32>
    %239 = vector.broadcast %76 : f32 to vector<8x256xf32>
    %240 = arith.addf %226, %239 : vector<8x256xf32>
    %cst_76 = arith.constant 0.000000e+00 : f32
    %241 = vector.broadcast %cst_76 : f32 to vector<8x256xf32>
    %242 = arith.maximumf %240, %241 : vector<8x256xf32>
    %243 = vector.broadcast %37 : f32 to vector<8x256xf32>
    %244 = arith.mulf %243, %230 : vector<8x256xf32>
    %245 = vector.broadcast %46 : f32 to vector<8x256xf32>
    %246 = arith.mulf %245, %234 : vector<8x256xf32>
    %247 = arith.addf %244, %246 : vector<8x256xf32>
    %248 = vector.broadcast %55 : f32 to vector<8x256xf32>
    %249 = arith.mulf %248, %238 : vector<8x256xf32>
    %250 = arith.addf %247, %249 : vector<8x256xf32>
    %251 = vector.broadcast %64 : f32 to vector<8x256xf32>
    %252 = arith.mulf %251, %242 : vector<8x256xf32>
    %253 = arith.addf %250, %252 : vector<8x256xf32>
    %c17_i32_77 = arith.constant 17 : i32
    %254 = tpu.dynamic_rotate %253 by %c17_i32_77 dim 1 : vector<8x256xf32>, i32 -> vector<8x256xf32>
    %255 = vector.broadcast %91 : vector<1x256xf32> to vector<8x256xf32>
    %256 = arith.mulf %254, %255 : vector<8x256xf32>
    %257 = vector.broadcast %38 : f32 to vector<8x256xf32>
    %258 = arith.mulf %257, %230 : vector<8x256xf32>
    %259 = vector.broadcast %47 : f32 to vector<8x256xf32>
    %260 = arith.mulf %259, %234 : vector<8x256xf32>
    %261 = arith.addf %258, %260 : vector<8x256xf32>
    %262 = vector.broadcast %56 : f32 to vector<8x256xf32>
    %263 = arith.mulf %262, %238 : vector<8x256xf32>
    %264 = arith.addf %261, %263 : vector<8x256xf32>
    %265 = vector.broadcast %65 : f32 to vector<8x256xf32>
    %266 = arith.mulf %265, %242 : vector<8x256xf32>
    %267 = arith.addf %264, %266 : vector<8x256xf32>
    %c16_i32_78 = arith.constant 16 : i32
    %268 = tpu.dynamic_rotate %267 by %c16_i32_78 dim 1 : vector<8x256xf32>, i32 -> vector<8x256xf32>
    %269 = vector.broadcast %92 : vector<1x256xf32> to vector<8x256xf32>
    %270 = arith.mulf %268, %269 : vector<8x256xf32>
    %271 = arith.addf %256, %270 : vector<8x256xf32>
    %272 = vector.broadcast %39 : f32 to vector<8x256xf32>
    %273 = arith.mulf %272, %230 : vector<8x256xf32>
    %274 = vector.broadcast %48 : f32 to vector<8x256xf32>
    %275 = arith.mulf %274, %234 : vector<8x256xf32>
    %276 = arith.addf %273, %275 : vector<8x256xf32>
    %277 = vector.broadcast %57 : f32 to vector<8x256xf32>
    %278 = arith.mulf %277, %238 : vector<8x256xf32>
    %279 = arith.addf %276, %278 : vector<8x256xf32>
    %280 = vector.broadcast %66 : f32 to vector<8x256xf32>
    %281 = arith.mulf %280, %242 : vector<8x256xf32>
    %282 = arith.addf %279, %281 : vector<8x256xf32>
    %c15_i32_79 = arith.constant 15 : i32
    %283 = tpu.dynamic_rotate %282 by %c15_i32_79 dim 1 : vector<8x256xf32>, i32 -> vector<8x256xf32>
    %284 = vector.broadcast %93 : vector<1x256xf32> to vector<8x256xf32>
    %285 = arith.mulf %283, %284 : vector<8x256xf32>
    %286 = arith.addf %271, %285 : vector<8x256xf32>
    %287 = vector.broadcast %40 : f32 to vector<8x256xf32>
    %288 = arith.mulf %287, %230 : vector<8x256xf32>
    %289 = vector.broadcast %49 : f32 to vector<8x256xf32>
    %290 = arith.mulf %289, %234 : vector<8x256xf32>
    %291 = arith.addf %288, %290 : vector<8x256xf32>
    %292 = vector.broadcast %58 : f32 to vector<8x256xf32>
    %293 = arith.mulf %292, %238 : vector<8x256xf32>
    %294 = arith.addf %291, %293 : vector<8x256xf32>
    %295 = vector.broadcast %67 : f32 to vector<8x256xf32>
    %296 = arith.mulf %295, %242 : vector<8x256xf32>
    %297 = arith.addf %294, %296 : vector<8x256xf32>
    %c1_i32_80 = arith.constant 1 : i32
    %298 = tpu.dynamic_rotate %297 by %c1_i32_80 dim 1 : vector<8x256xf32>, i32 -> vector<8x256xf32>
    %299 = vector.broadcast %94 : vector<1x256xf32> to vector<8x256xf32>
    %300 = arith.mulf %298, %299 : vector<8x256xf32>
    %301 = arith.addf %286, %300 : vector<8x256xf32>
    %302 = vector.broadcast %41 : f32 to vector<8x256xf32>
    %303 = arith.mulf %302, %230 : vector<8x256xf32>
    %304 = vector.broadcast %50 : f32 to vector<8x256xf32>
    %305 = arith.mulf %304, %234 : vector<8x256xf32>
    %306 = arith.addf %303, %305 : vector<8x256xf32>
    %307 = vector.broadcast %59 : f32 to vector<8x256xf32>
    %308 = arith.mulf %307, %238 : vector<8x256xf32>
    %309 = arith.addf %306, %308 : vector<8x256xf32>
    %310 = vector.broadcast %68 : f32 to vector<8x256xf32>
    %311 = arith.mulf %310, %242 : vector<8x256xf32>
    %312 = arith.addf %309, %311 : vector<8x256xf32>
    %313 = arith.addf %301, %312 : vector<8x256xf32>
    %314 = vector.broadcast %42 : f32 to vector<8x256xf32>
    %315 = arith.mulf %314, %230 : vector<8x256xf32>
    %316 = vector.broadcast %51 : f32 to vector<8x256xf32>
    %317 = arith.mulf %316, %234 : vector<8x256xf32>
    %318 = arith.addf %315, %317 : vector<8x256xf32>
    %319 = vector.broadcast %60 : f32 to vector<8x256xf32>
    %320 = arith.mulf %319, %238 : vector<8x256xf32>
    %321 = arith.addf %318, %320 : vector<8x256xf32>
    %322 = vector.broadcast %69 : f32 to vector<8x256xf32>
    %323 = arith.mulf %322, %242 : vector<8x256xf32>
    %324 = arith.addf %321, %323 : vector<8x256xf32>
    %c255_i32_81 = arith.constant 255 : i32
    %325 = tpu.dynamic_rotate %324 by %c255_i32_81 dim 1 : vector<8x256xf32>, i32 -> vector<8x256xf32>
    %326 = vector.broadcast %95 : vector<1x256xf32> to vector<8x256xf32>
    %327 = arith.mulf %325, %326 : vector<8x256xf32>
    %328 = arith.addf %313, %327 : vector<8x256xf32>
    %329 = vector.broadcast %43 : f32 to vector<8x256xf32>
    %330 = arith.mulf %329, %230 : vector<8x256xf32>
    %331 = vector.broadcast %52 : f32 to vector<8x256xf32>
    %332 = arith.mulf %331, %234 : vector<8x256xf32>
    %333 = arith.addf %330, %332 : vector<8x256xf32>
    %334 = vector.broadcast %61 : f32 to vector<8x256xf32>
    %335 = arith.mulf %334, %238 : vector<8x256xf32>
    %336 = arith.addf %333, %335 : vector<8x256xf32>
    %337 = vector.broadcast %70 : f32 to vector<8x256xf32>
    %338 = arith.mulf %337, %242 : vector<8x256xf32>
    %339 = arith.addf %336, %338 : vector<8x256xf32>
    %c241_i32_82 = arith.constant 241 : i32
    %340 = tpu.dynamic_rotate %339 by %c241_i32_82 dim 1 : vector<8x256xf32>, i32 -> vector<8x256xf32>
    %341 = vector.broadcast %96 : vector<1x256xf32> to vector<8x256xf32>
    %342 = arith.mulf %340, %341 : vector<8x256xf32>
    %343 = arith.addf %328, %342 : vector<8x256xf32>
    %344 = vector.broadcast %44 : f32 to vector<8x256xf32>
    %345 = arith.mulf %344, %230 : vector<8x256xf32>
    %346 = vector.broadcast %53 : f32 to vector<8x256xf32>
    %347 = arith.mulf %346, %234 : vector<8x256xf32>
    %348 = arith.addf %345, %347 : vector<8x256xf32>
    %349 = vector.broadcast %62 : f32 to vector<8x256xf32>
    %350 = arith.mulf %349, %238 : vector<8x256xf32>
    %351 = arith.addf %348, %350 : vector<8x256xf32>
    %352 = vector.broadcast %71 : f32 to vector<8x256xf32>
    %353 = arith.mulf %352, %242 : vector<8x256xf32>
    %354 = arith.addf %351, %353 : vector<8x256xf32>
    %c240_i32_83 = arith.constant 240 : i32
    %355 = tpu.dynamic_rotate %354 by %c240_i32_83 dim 1 : vector<8x256xf32>, i32 -> vector<8x256xf32>
    %356 = vector.broadcast %97 : vector<1x256xf32> to vector<8x256xf32>
    %357 = arith.mulf %355, %356 : vector<8x256xf32>
    %358 = arith.addf %343, %357 : vector<8x256xf32>
    %359 = vector.broadcast %45 : f32 to vector<8x256xf32>
    %360 = arith.mulf %359, %230 : vector<8x256xf32>
    %361 = vector.broadcast %54 : f32 to vector<8x256xf32>
    %362 = arith.mulf %361, %234 : vector<8x256xf32>
    %363 = arith.addf %360, %362 : vector<8x256xf32>
    %364 = vector.broadcast %63 : f32 to vector<8x256xf32>
    %365 = arith.mulf %364, %238 : vector<8x256xf32>
    %366 = arith.addf %363, %365 : vector<8x256xf32>
    %367 = vector.broadcast %72 : f32 to vector<8x256xf32>
    %368 = arith.mulf %367, %242 : vector<8x256xf32>
    %369 = arith.addf %366, %368 : vector<8x256xf32>
    %c239_i32_84 = arith.constant 239 : i32
    %370 = tpu.dynamic_rotate %369 by %c239_i32_84 dim 1 : vector<8x256xf32>, i32 -> vector<8x256xf32>
    %371 = vector.broadcast %98 : vector<1x256xf32> to vector<8x256xf32>
    %372 = arith.mulf %370, %371 : vector<8x256xf32>
    %373 = arith.addf %358, %372 : vector<8x256xf32>
    %374 = vector.broadcast %77 : f32 to vector<8x256xf32>
    %375 = arith.addf %373, %374 : vector<8x256xf32>
    %376 = arith.addf %90, %375 : vector<8x256xf32>
    %c0_85 = arith.constant 0 : index
    %c0_86 = arith.constant 0 : index
    %377 = vector.load %arg10[%c0_85, %c0_86] : memref<16x256xf32, #tpu.memory_space<vmem>>, vector<8x256xf32>
    tpu.vector_store %arg10[%c0_85, %c0_86], %376 {strides = array<i32>} : memref<16x256xf32, #tpu.memory_space<vmem>>, vector<8x256xf32>,
    %c8_87 = arith.constant 8 : index
    %c0_88 = arith.constant 0 : index
    %378 = vector.load %arg10[%c8_87, %c0_88] : memref<16x256xf32, #tpu.memory_space<vmem>>, vector<8x256xf32>
    %c0_89 = arith.constant 0 : index
    %c0_90 = arith.constant 0 : index
    %379 = vector.load %arg9[%c0_89, %c0_90] : memref<8x256xf32, #tpu.memory_space<vmem>>, vector<1x256xf32>
    %c1_91 = arith.constant 1 : index
    %c0_92 = arith.constant 0 : index
    %380 = vector.load %arg9[%c1_91, %c0_92] : memref<8x256xf32, #tpu.memory_space<vmem>>, vector<1x256xf32>
    %c2_93 = arith.constant 2 : index
    %c0_94 = arith.constant 0 : index
    %381 = vector.load %arg9[%c2_93, %c0_94] : memref<8x256xf32, #tpu.memory_space<vmem>>, vector<1x256xf32>
    %c3_95 = arith.constant 3 : index
    %c0_96 = arith.constant 0 : index
    %382 = vector.load %arg9[%c3_95, %c0_96] : memref<8x256xf32, #tpu.memory_space<vmem>>, vector<1x256xf32>
    %c4_97 = arith.constant 4 : index
    %c0_98 = arith.constant 0 : index
    %383 = vector.load %arg9[%c4_97, %c0_98] : memref<8x256xf32, #tpu.memory_space<vmem>>, vector<1x256xf32>
    %c5_99 = arith.constant 5 : index
    %c0_100 = arith.constant 0 : index
    %384 = vector.load %arg9[%c5_99, %c0_100] : memref<8x256xf32, #tpu.memory_space<vmem>>, vector<1x256xf32>
    %c6_101 = arith.constant 6 : index
    %c0_102 = arith.constant 0 : index
    %385 = vector.load %arg9[%c6_101, %c0_102] : memref<8x256xf32, #tpu.memory_space<vmem>>, vector<1x256xf32>
    %c7_103 = arith.constant 7 : index
    %c0_104 = arith.constant 0 : index
    %386 = vector.load %arg9[%c7_103, %c0_104] : memref<8x256xf32, #tpu.memory_space<vmem>>, vector<1x256xf32>
    %c17_i32_105 = arith.constant 17 : i32
    %387 = tpu.dynamic_rotate %378 by %c17_i32_105 dim 1 : vector<8x256xf32>, i32 -> vector<8x256xf32>
    %388 = vector.broadcast %379 : vector<1x256xf32> to vector<8x256xf32>
    %389 = arith.mulf %387, %388 : vector<8x256xf32>
    %390 = vector.broadcast %1 : f32 to vector<8x256xf32>
    %391 = arith.mulf %390, %389 : vector<8x256xf32>
    %392 = vector.broadcast %10 : f32 to vector<8x256xf32>
    %393 = arith.mulf %392, %389 : vector<8x256xf32>
    %394 = vector.broadcast %19 : f32 to vector<8x256xf32>
    %395 = arith.mulf %394, %389 : vector<8x256xf32>
    %396 = vector.broadcast %28 : f32 to vector<8x256xf32>
    %397 = arith.mulf %396, %389 : vector<8x256xf32>
    %c16_i32_106 = arith.constant 16 : i32
    %398 = tpu.dynamic_rotate %378 by %c16_i32_106 dim 1 : vector<8x256xf32>, i32 -> vector<8x256xf32>
    %399 = vector.broadcast %380 : vector<1x256xf32> to vector<8x256xf32>
    %400 = arith.mulf %398, %399 : vector<8x256xf32>
    %401 = vector.broadcast %2 : f32 to vector<8x256xf32>
    %402 = arith.mulf %401, %400 : vector<8x256xf32>
    %403 = arith.addf %391, %402 : vector<8x256xf32>
    %404 = vector.broadcast %11 : f32 to vector<8x256xf32>
    %405 = arith.mulf %404, %400 : vector<8x256xf32>
    %406 = arith.addf %393, %405 : vector<8x256xf32>
    %407 = vector.broadcast %20 : f32 to vector<8x256xf32>
    %408 = arith.mulf %407, %400 : vector<8x256xf32>
    %409 = arith.addf %395, %408 : vector<8x256xf32>
    %410 = vector.broadcast %29 : f32 to vector<8x256xf32>
    %411 = arith.mulf %410, %400 : vector<8x256xf32>
    %412 = arith.addf %397, %411 : vector<8x256xf32>
    %c15_i32_107 = arith.constant 15 : i32
    %413 = tpu.dynamic_rotate %378 by %c15_i32_107 dim 1 : vector<8x256xf32>, i32 -> vector<8x256xf32>
    %414 = vector.broadcast %381 : vector<1x256xf32> to vector<8x256xf32>
    %415 = arith.mulf %413, %414 : vector<8x256xf32>
    %416 = vector.broadcast %3 : f32 to vector<8x256xf32>
    %417 = arith.mulf %416, %415 : vector<8x256xf32>
    %418 = arith.addf %403, %417 : vector<8x256xf32>
    %419 = vector.broadcast %12 : f32 to vector<8x256xf32>
    %420 = arith.mulf %419, %415 : vector<8x256xf32>
    %421 = arith.addf %406, %420 : vector<8x256xf32>
    %422 = vector.broadcast %21 : f32 to vector<8x256xf32>
    %423 = arith.mulf %422, %415 : vector<8x256xf32>
    %424 = arith.addf %409, %423 : vector<8x256xf32>
    %425 = vector.broadcast %30 : f32 to vector<8x256xf32>
    %426 = arith.mulf %425, %415 : vector<8x256xf32>
    %427 = arith.addf %412, %426 : vector<8x256xf32>
    %c1_i32_108 = arith.constant 1 : i32
    %428 = tpu.dynamic_rotate %378 by %c1_i32_108 dim 1 : vector<8x256xf32>, i32 -> vector<8x256xf32>
    %429 = vector.broadcast %382 : vector<1x256xf32> to vector<8x256xf32>
    %430 = arith.mulf %428, %429 : vector<8x256xf32>
    %431 = vector.broadcast %4 : f32 to vector<8x256xf32>
    %432 = arith.mulf %431, %430 : vector<8x256xf32>
    %433 = arith.addf %418, %432 : vector<8x256xf32>
    %434 = vector.broadcast %13 : f32 to vector<8x256xf32>
    %435 = arith.mulf %434, %430 : vector<8x256xf32>
    %436 = arith.addf %421, %435 : vector<8x256xf32>
    %437 = vector.broadcast %22 : f32 to vector<8x256xf32>
    %438 = arith.mulf %437, %430 : vector<8x256xf32>
    %439 = arith.addf %424, %438 : vector<8x256xf32>
    %440 = vector.broadcast %31 : f32 to vector<8x256xf32>
    %441 = arith.mulf %440, %430 : vector<8x256xf32>
    %442 = arith.addf %427, %441 : vector<8x256xf32>
    %443 = vector.broadcast %5 : f32 to vector<8x256xf32>
    %444 = arith.mulf %443, %378 : vector<8x256xf32>
    %445 = arith.addf %433, %444 : vector<8x256xf32>
    %446 = vector.broadcast %14 : f32 to vector<8x256xf32>
    %447 = arith.mulf %446, %378 : vector<8x256xf32>
    %448 = arith.addf %436, %447 : vector<8x256xf32>
    %449 = vector.broadcast %23 : f32 to vector<8x256xf32>
    %450 = arith.mulf %449, %378 : vector<8x256xf32>
    %451 = arith.addf %439, %450 : vector<8x256xf32>
    %452 = vector.broadcast %32 : f32 to vector<8x256xf32>
    %453 = arith.mulf %452, %378 : vector<8x256xf32>
    %454 = arith.addf %442, %453 : vector<8x256xf32>
    %c255_i32_109 = arith.constant 255 : i32
    %455 = tpu.dynamic_rotate %378 by %c255_i32_109 dim 1 : vector<8x256xf32>, i32 -> vector<8x256xf32>
    %456 = vector.broadcast %383 : vector<1x256xf32> to vector<8x256xf32>
    %457 = arith.mulf %455, %456 : vector<8x256xf32>
    %458 = vector.broadcast %6 : f32 to vector<8x256xf32>
    %459 = arith.mulf %458, %457 : vector<8x256xf32>
    %460 = arith.addf %445, %459 : vector<8x256xf32>
    %461 = vector.broadcast %15 : f32 to vector<8x256xf32>
    %462 = arith.mulf %461, %457 : vector<8x256xf32>
    %463 = arith.addf %448, %462 : vector<8x256xf32>
    %464 = vector.broadcast %24 : f32 to vector<8x256xf32>
    %465 = arith.mulf %464, %457 : vector<8x256xf32>
    %466 = arith.addf %451, %465 : vector<8x256xf32>
    %467 = vector.broadcast %33 : f32 to vector<8x256xf32>
    %468 = arith.mulf %467, %457 : vector<8x256xf32>
    %469 = arith.addf %454, %468 : vector<8x256xf32>
    %c241_i32_110 = arith.constant 241 : i32
    %470 = tpu.dynamic_rotate %378 by %c241_i32_110 dim 1 : vector<8x256xf32>, i32 -> vector<8x256xf32>
    %471 = vector.broadcast %384 : vector<1x256xf32> to vector<8x256xf32>
    %472 = arith.mulf %470, %471 : vector<8x256xf32>
    %473 = vector.broadcast %7 : f32 to vector<8x256xf32>
    %474 = arith.mulf %473, %472 : vector<8x256xf32>
    %475 = arith.addf %460, %474 : vector<8x256xf32>
    %476 = vector.broadcast %16 : f32 to vector<8x256xf32>
    %477 = arith.mulf %476, %472 : vector<8x256xf32>
    %478 = arith.addf %463, %477 : vector<8x256xf32>
    %479 = vector.broadcast %25 : f32 to vector<8x256xf32>
    %480 = arith.mulf %479, %472 : vector<8x256xf32>
    %481 = arith.addf %466, %480 : vector<8x256xf32>
    %482 = vector.broadcast %34 : f32 to vector<8x256xf32>
    %483 = arith.mulf %482, %472 : vector<8x256xf32>
    %484 = arith.addf %469, %483 : vector<8x256xf32>
    %c240_i32_111 = arith.constant 240 : i32
    %485 = tpu.dynamic_rotate %378 by %c240_i32_111 dim 1 : vector<8x256xf32>, i32 -> vector<8x256xf32>
    %486 = vector.broadcast %385 : vector<1x256xf32> to vector<8x256xf32>
    %487 = arith.mulf %485, %486 : vector<8x256xf32>
    %488 = vector.broadcast %8 : f32 to vector<8x256xf32>
    %489 = arith.mulf %488, %487 : vector<8x256xf32>
    %490 = arith.addf %475, %489 : vector<8x256xf32>
    %491 = vector.broadcast %17 : f32 to vector<8x256xf32>
    %492 = arith.mulf %491, %487 : vector<8x256xf32>
    %493 = arith.addf %478, %492 : vector<8x256xf32>
    %494 = vector.broadcast %26 : f32 to vector<8x256xf32>
    %495 = arith.mulf %494, %487 : vector<8x256xf32>
    %496 = arith.addf %481, %495 : vector<8x256xf32>
    %497 = vector.broadcast %35 : f32 to vector<8x256xf32>
    %498 = arith.mulf %497, %487 : vector<8x256xf32>
    %499 = arith.addf %484, %498 : vector<8x256xf32>
    %c239_i32_112 = arith.constant 239 : i32
    %500 = tpu.dynamic_rotate %378 by %c239_i32_112 dim 1 : vector<8x256xf32>, i32 -> vector<8x256xf32>
    %501 = vector.broadcast %386 : vector<1x256xf32> to vector<8x256xf32>
    %502 = arith.mulf %500, %501 : vector<8x256xf32>
    %503 = vector.broadcast %9 : f32 to vector<8x256xf32>
    %504 = arith.mulf %503, %502 : vector<8x256xf32>
    %505 = arith.addf %490, %504 : vector<8x256xf32>
    %506 = vector.broadcast %18 : f32 to vector<8x256xf32>
    %507 = arith.mulf %506, %502 : vector<8x256xf32>
    %508 = arith.addf %493, %507 : vector<8x256xf32>
    %509 = vector.broadcast %27 : f32 to vector<8x256xf32>
    %510 = arith.mulf %509, %502 : vector<8x256xf32>
    %511 = arith.addf %496, %510 : vector<8x256xf32>
    %512 = vector.broadcast %36 : f32 to vector<8x256xf32>
    %513 = arith.mulf %512, %502 : vector<8x256xf32>
    %514 = arith.addf %499, %513 : vector<8x256xf32>
    %515 = vector.broadcast %73 : f32 to vector<8x256xf32>
    %516 = arith.addf %505, %515 : vector<8x256xf32>
    %cst_113 = arith.constant 0.000000e+00 : f32
    %517 = vector.broadcast %cst_113 : f32 to vector<8x256xf32>
    %518 = arith.maximumf %516, %517 : vector<8x256xf32>
    %519 = vector.broadcast %74 : f32 to vector<8x256xf32>
    %520 = arith.addf %508, %519 : vector<8x256xf32>
    %cst_114 = arith.constant 0.000000e+00 : f32
    %521 = vector.broadcast %cst_114 : f32 to vector<8x256xf32>
    %522 = arith.maximumf %520, %521 : vector<8x256xf32>
    %523 = vector.broadcast %75 : f32 to vector<8x256xf32>
    %524 = arith.addf %511, %523 : vector<8x256xf32>
    %cst_115 = arith.constant 0.000000e+00 : f32
    %525 = vector.broadcast %cst_115 : f32 to vector<8x256xf32>
    %526 = arith.maximumf %524, %525 : vector<8x256xf32>
    %527 = vector.broadcast %76 : f32 to vector<8x256xf32>
    %528 = arith.addf %514, %527 : vector<8x256xf32>
    %cst_116 = arith.constant 0.000000e+00 : f32
    %529 = vector.broadcast %cst_116 : f32 to vector<8x256xf32>
    %530 = arith.maximumf %528, %529 : vector<8x256xf32>
    %531 = vector.broadcast %37 : f32 to vector<8x256xf32>
    %532 = arith.mulf %531, %518 : vector<8x256xf32>
    %533 = vector.broadcast %46 : f32 to vector<8x256xf32>
    %534 = arith.mulf %533, %522 : vector<8x256xf32>
    %535 = arith.addf %532, %534 : vector<8x256xf32>
    %536 = vector.broadcast %55 : f32 to vector<8x256xf32>
    %537 = arith.mulf %536, %526 : vector<8x256xf32>
    %538 = arith.addf %535, %537 : vector<8x256xf32>
    %539 = vector.broadcast %64 : f32 to vector<8x256xf32>
    %540 = arith.mulf %539, %530 : vector<8x256xf32>
    %541 = arith.addf %538, %540 : vector<8x256xf32>
    %c17_i32_117 = arith.constant 17 : i32
    %542 = tpu.dynamic_rotate %541 by %c17_i32_117 dim 1 : vector<8x256xf32>, i32 -> vector<8x256xf32>
    %543 = vector.broadcast %379 : vector<1x256xf32> to vector<8x256xf32>
    %544 = arith.mulf %542, %543 : vector<8x256xf32>
    %545 = vector.broadcast %38 : f32 to vector<8x256xf32>
    %546 = arith.mulf %545, %518 : vector<8x256xf32>
    %547 = vector.broadcast %47 : f32 to vector<8x256xf32>
    %548 = arith.mulf %547, %522 : vector<8x256xf32>
    %549 = arith.addf %546, %548 : vector<8x256xf32>
    %550 = vector.broadcast %56 : f32 to vector<8x256xf32>
    %551 = arith.mulf %550, %526 : vector<8x256xf32>
    %552 = arith.addf %549, %551 : vector<8x256xf32>
    %553 = vector.broadcast %65 : f32 to vector<8x256xf32>
    %554 = arith.mulf %553, %530 : vector<8x256xf32>
    %555 = arith.addf %552, %554 : vector<8x256xf32>
    %c16_i32_118 = arith.constant 16 : i32
    %556 = tpu.dynamic_rotate %555 by %c16_i32_118 dim 1 : vector<8x256xf32>, i32 -> vector<8x256xf32>
    %557 = vector.broadcast %380 : vector<1x256xf32> to vector<8x256xf32>
    %558 = arith.mulf %556, %557 : vector<8x256xf32>
    %559 = arith.addf %544, %558 : vector<8x256xf32>
    %560 = vector.broadcast %39 : f32 to vector<8x256xf32>
    %561 = arith.mulf %560, %518 : vector<8x256xf32>
    %562 = vector.broadcast %48 : f32 to vector<8x256xf32>
    %563 = arith.mulf %562, %522 : vector<8x256xf32>
    %564 = arith.addf %561, %563 : vector<8x256xf32>
    %565 = vector.broadcast %57 : f32 to vector<8x256xf32>
    %566 = arith.mulf %565, %526 : vector<8x256xf32>
    %567 = arith.addf %564, %566 : vector<8x256xf32>
    %568 = vector.broadcast %66 : f32 to vector<8x256xf32>
    %569 = arith.mulf %568, %530 : vector<8x256xf32>
    %570 = arith.addf %567, %569 : vector<8x256xf32>
    %c15_i32_119 = arith.constant 15 : i32
    %571 = tpu.dynamic_rotate %570 by %c15_i32_119 dim 1 : vector<8x256xf32>, i32 -> vector<8x256xf32>
    %572 = vector.broadcast %381 : vector<1x256xf32> to vector<8x256xf32>
    %573 = arith.mulf %571, %572 : vector<8x256xf32>
    %574 = arith.addf %559, %573 : vector<8x256xf32>
    %575 = vector.broadcast %40 : f32 to vector<8x256xf32>
    %576 = arith.mulf %575, %518 : vector<8x256xf32>
    %577 = vector.broadcast %49 : f32 to vector<8x256xf32>
    %578 = arith.mulf %577, %522 : vector<8x256xf32>
    %579 = arith.addf %576, %578 : vector<8x256xf32>
    %580 = vector.broadcast %58 : f32 to vector<8x256xf32>
    %581 = arith.mulf %580, %526 : vector<8x256xf32>
    %582 = arith.addf %579, %581 : vector<8x256xf32>
    %583 = vector.broadcast %67 : f32 to vector<8x256xf32>
    %584 = arith.mulf %583, %530 : vector<8x256xf32>
    %585 = arith.addf %582, %584 : vector<8x256xf32>
    %c1_i32_120 = arith.constant 1 : i32
    %586 = tpu.dynamic_rotate %585 by %c1_i32_120 dim 1 : vector<8x256xf32>, i32 -> vector<8x256xf32>
    %587 = vector.broadcast %382 : vector<1x256xf32> to vector<8x256xf32>
    %588 = arith.mulf %586, %587 : vector<8x256xf32>
    %589 = arith.addf %574, %588 : vector<8x256xf32>
    %590 = vector.broadcast %41 : f32 to vector<8x256xf32>
    %591 = arith.mulf %590, %518 : vector<8x256xf32>
    %592 = vector.broadcast %50 : f32 to vector<8x256xf32>
    %593 = arith.mulf %592, %522 : vector<8x256xf32>
    %594 = arith.addf %591, %593 : vector<8x256xf32>
    %595 = vector.broadcast %59 : f32 to vector<8x256xf32>
    %596 = arith.mulf %595, %526 : vector<8x256xf32>
    %597 = arith.addf %594, %596 : vector<8x256xf32>
    %598 = vector.broadcast %68 : f32 to vector<8x256xf32>
    %599 = arith.mulf %598, %530 : vector<8x256xf32>
    %600 = arith.addf %597, %599 : vector<8x256xf32>
    %601 = arith.addf %589, %600 : vector<8x256xf32>
    %602 = vector.broadcast %42 : f32 to vector<8x256xf32>
    %603 = arith.mulf %602, %518 : vector<8x256xf32>
    %604 = vector.broadcast %51 : f32 to vector<8x256xf32>
    %605 = arith.mulf %604, %522 : vector<8x256xf32>
    %606 = arith.addf %603, %605 : vector<8x256xf32>
    %607 = vector.broadcast %60 : f32 to vector<8x256xf32>
    %608 = arith.mulf %607, %526 : vector<8x256xf32>
    %609 = arith.addf %606, %608 : vector<8x256xf32>
    %610 = vector.broadcast %69 : f32 to vector<8x256xf32>
    %611 = arith.mulf %610, %530 : vector<8x256xf32>
    %612 = arith.addf %609, %611 : vector<8x256xf32>
    %c255_i32_121 = arith.constant 255 : i32
    %613 = tpu.dynamic_rotate %612 by %c255_i32_121 dim 1 : vector<8x256xf32>, i32 -> vector<8x256xf32>
    %614 = vector.broadcast %383 : vector<1x256xf32> to vector<8x256xf32>
    %615 = arith.mulf %613, %614 : vector<8x256xf32>
    %616 = arith.addf %601, %615 : vector<8x256xf32>
    %617 = vector.broadcast %43 : f32 to vector<8x256xf32>
    %618 = arith.mulf %617, %518 : vector<8x256xf32>
    %619 = vector.broadcast %52 : f32 to vector<8x256xf32>
    %620 = arith.mulf %619, %522 : vector<8x256xf32>
    %621 = arith.addf %618, %620 : vector<8x256xf32>
    %622 = vector.broadcast %61 : f32 to vector<8x256xf32>
    %623 = arith.mulf %622, %526 : vector<8x256xf32>
    %624 = arith.addf %621, %623 : vector<8x256xf32>
    %625 = vector.broadcast %70 : f32 to vector<8x256xf32>
    %626 = arith.mulf %625, %530 : vector<8x256xf32>
    %627 = arith.addf %624, %626 : vector<8x256xf32>
    %c241_i32_122 = arith.constant 241 : i32
    %628 = tpu.dynamic_rotate %627 by %c241_i32_122 dim 1 : vector<8x256xf32>, i32 -> vector<8x256xf32>
    %629 = vector.broadcast %384 : vector<1x256xf32> to vector<8x256xf32>
    %630 = arith.mulf %628, %629 : vector<8x256xf32>
    %631 = arith.addf %616, %630 : vector<8x256xf32>
    %632 = vector.broadcast %44 : f32 to vector<8x256xf32>
    %633 = arith.mulf %632, %518 : vector<8x256xf32>
    %634 = vector.broadcast %53 : f32 to vector<8x256xf32>
    %635 = arith.mulf %634, %522 : vector<8x256xf32>
    %636 = arith.addf %633, %635 : vector<8x256xf32>
    %637 = vector.broadcast %62 : f32 to vector<8x256xf32>
    %638 = arith.mulf %637, %526 : vector<8x256xf32>
    %639 = arith.addf %636, %638 : vector<8x256xf32>
    %640 = vector.broadcast %71 : f32 to vector<8x256xf32>
    %641 = arith.mulf %640, %530 : vector<8x256xf32>
    %642 = arith.addf %639, %641 : vector<8x256xf32>
    %c240_i32_123 = arith.constant 240 : i32
    %643 = tpu.dynamic_rotate %642 by %c240_i32_123 dim 1 : vector<8x256xf32>, i32 -> vector<8x256xf32>
    %644 = vector.broadcast %385 : vector<1x256xf32> to vector<8x256xf32>
    %645 = arith.mulf %643, %644 : vector<8x256xf32>
    %646 = arith.addf %631, %645 : vector<8x256xf32>
    %647 = vector.broadcast %45 : f32 to vector<8x256xf32>
    %648 = arith.mulf %647, %518 : vector<8x256xf32>
    %649 = vector.broadcast %54 : f32 to vector<8x256xf32>
    %650 = arith.mulf %649, %522 : vector<8x256xf32>
    %651 = arith.addf %648, %650 : vector<8x256xf32>
    %652 = vector.broadcast %63 : f32 to vector<8x256xf32>
    %653 = arith.mulf %652, %526 : vector<8x256xf32>
    %654 = arith.addf %651, %653 : vector<8x256xf32>
    %655 = vector.broadcast %72 : f32 to vector<8x256xf32>
    %656 = arith.mulf %655, %530 : vector<8x256xf32>
    %657 = arith.addf %654, %656 : vector<8x256xf32>
    %c239_i32_124 = arith.constant 239 : i32
    %658 = tpu.dynamic_rotate %657 by %c239_i32_124 dim 1 : vector<8x256xf32>, i32 -> vector<8x256xf32>
    %659 = vector.broadcast %386 : vector<1x256xf32> to vector<8x256xf32>
    %660 = arith.mulf %658, %659 : vector<8x256xf32>
    %661 = arith.addf %646, %660 : vector<8x256xf32>
    %662 = vector.broadcast %77 : f32 to vector<8x256xf32>
    %663 = arith.addf %661, %662 : vector<8x256xf32>
    %664 = arith.addf %378, %663 : vector<8x256xf32>
    %c8_125 = arith.constant 8 : index
    %c0_126 = arith.constant 0 : index
    %665 = vector.load %arg10[%c8_125, %c0_126] : memref<16x256xf32, #tpu.memory_space<vmem>>, vector<8x256xf32>
    tpu.vector_store %arg10[%c8_125, %c0_126], %664 {strides = array<i32>} : memref<16x256xf32, #tpu.memory_space<vmem>>, vector<8x256xf32>,
    %c0_127 = arith.constant 0 : index
    %c0_128 = arith.constant 0 : index
    %666 = vector.load %arg10[%c0_127, %c0_128] : memref<16x256xf32, #tpu.memory_space<vmem>>, vector<16x256xf32>
    %667 = arith.truncf %666 : vector<16x256xf32> to vector<16x256xbf16>
    %c0_129 = arith.constant 0 : index
    %c0_130 = arith.constant 0 : index
    %668 = vector.load %arg8[%c0_129, %c0_130] : memref<256x128xbf16, #tpu.memory_space<vmem>>, vector<256x128xbf16>
    %cst_131 = arith.constant dense<0.000000e+00> : vector<16x128xf32>
    %669 = tpu.matmul %667, %668, %cst_131 {dimension_numbers = #tpu.dot_dimension_numbers<[1], [0], [0], [1], [0, 0, 1, 1], [], []>} : vector<16x256xbf16>, vector<256x128xbf16>, vector<16x128xf32> -> vector<16x128xf32>
    %c0_132 = arith.constant 0 : index
    %c0_133 = arith.constant 0 : index
    %670 = vector.load %arg11[%c0_132, %c0_133] : memref<16x128xf32, #tpu.memory_space<vmem>>, vector<16x128xf32>
    %671 = arith.subf %670, %669 : vector<16x128xf32>
    %672 = arith.truncf %671 : vector<16x128xf32> to vector<16x128xbf16>
    %c0_134 = arith.constant 0 : index
    %c0_135 = arith.constant 0 : index
    %673 = vector.load %arg7[%c0_134, %c0_135] : memref<128x256xbf16, #tpu.memory_space<vmem>>, vector<128x256xbf16>
    %cst_136 = arith.constant dense<0.000000e+00> : vector<16x256xf32>
    %674 = tpu.matmul %672, %673, %cst_136 {dimension_numbers = #tpu.dot_dimension_numbers<[1], [0], [0], [1], [0, 0, 1, 1], [], []>} : vector<16x128xbf16>, vector<128x256xbf16>, vector<16x256xf32> -> vector<16x256xf32>
    %c0_137 = arith.constant 0 : index
    %c0_138 = arith.constant 0 : index
    %675 = vector.load %arg10[%c0_137, %c0_138] : memref<16x256xf32, #tpu.memory_space<vmem>>, vector<16x256xf32>
    %676 = vector.broadcast %0 : f32 to vector<16x256xf32>
    %677 = arith.mulf %676, %674 : vector<16x256xf32>
    %678 = arith.addf %675, %677 : vector<16x256xf32>
    %c0_139 = arith.constant 0 : index
    %c0_140 = arith.constant 0 : index
    %679 = vector.load %arg10[%c0_139, %c0_140] : memref<16x256xf32, #tpu.memory_space<vmem>>, vector<16x256xf32>
    tpu.vector_store %arg10[%c0_139, %c0_140], %678 {strides = array<i32>} : memref<16x256xf32, #tpu.memory_space<vmem>>, vector<16x256xf32>,
    %c0_141 = arith.constant 0 : index
    %c0_142 = arith.constant 0 : index
    %680 = vector.load %arg10[%c0_141, %c0_142] : memref<16x256xf32, #tpu.memory_space<vmem>>, vector<8x256xf32>
    %c0_143 = arith.constant 0 : index
    %c0_144 = arith.constant 0 : index
    %681 = vector.load %arg9[%c0_143, %c0_144] : memref<8x256xf32, #tpu.memory_space<vmem>>, vector<1x256xf32>
    %c1_145 = arith.constant 1 : index
    %c0_146 = arith.constant 0 : index
    %682 = vector.load %arg9[%c1_145, %c0_146] : memref<8x256xf32, #tpu.memory_space<vmem>>, vector<1x256xf32>
    %c2_147 = arith.constant 2 : index
    %c0_148 = arith.constant 0 : index
    %683 = vector.load %arg9[%c2_147, %c0_148] : memref<8x256xf32, #tpu.memory_space<vmem>>, vector<1x256xf32>
    %c3_149 = arith.constant 3 : index
    %c0_150 = arith.constant 0 : index
    %684 = vector.load %arg9[%c3_149, %c0_150] : memref<8x256xf32, #tpu.memory_space<vmem>>, vector<1x256xf32>
    %c4_151 = arith.constant 4 : index
    %c0_152 = arith.constant 0 : index
    %685 = vector.load %arg9[%c4_151, %c0_152] : memref<8x256xf32, #tpu.memory_space<vmem>>, vector<1x256xf32>
    %c5_153 = arith.constant 5 : index
    %c0_154 = arith.constant 0 : index
    %686 = vector.load %arg9[%c5_153, %c0_154] : memref<8x256xf32, #tpu.memory_space<vmem>>, vector<1x256xf32>
    %c6_155 = arith.constant 6 : index
    %c0_156 = arith.constant 0 : index
    %687 = vector.load %arg9[%c6_155, %c0_156] : memref<8x256xf32, #tpu.memory_space<vmem>>, vector<1x256xf32>
    %c7_157 = arith.constant 7 : index
    %c0_158 = arith.constant 0 : index
    %688 = vector.load %arg9[%c7_157, %c0_158] : memref<8x256xf32, #tpu.memory_space<vmem>>, vector<1x256xf32>
    %c17_i32_159 = arith.constant 17 : i32
    %689 = tpu.dynamic_rotate %680 by %c17_i32_159 dim 1 : vector<8x256xf32>, i32 -> vector<8x256xf32>
    %690 = vector.broadcast %681 : vector<1x256xf32> to vector<8x256xf32>
    %691 = arith.mulf %689, %690 : vector<8x256xf32>
    %692 = vector.broadcast %1 : f32 to vector<8x256xf32>
    %693 = arith.mulf %692, %691 : vector<8x256xf32>
    %694 = vector.broadcast %10 : f32 to vector<8x256xf32>
    %695 = arith.mulf %694, %691 : vector<8x256xf32>
    %696 = vector.broadcast %19 : f32 to vector<8x256xf32>
    %697 = arith.mulf %696, %691 : vector<8x256xf32>
    %698 = vector.broadcast %28 : f32 to vector<8x256xf32>
    %699 = arith.mulf %698, %691 : vector<8x256xf32>
    %c16_i32_160 = arith.constant 16 : i32
    %700 = tpu.dynamic_rotate %680 by %c16_i32_160 dim 1 : vector<8x256xf32>, i32 -> vector<8x256xf32>
    %701 = vector.broadcast %682 : vector<1x256xf32> to vector<8x256xf32>
    %702 = arith.mulf %700, %701 : vector<8x256xf32>
    %703 = vector.broadcast %2 : f32 to vector<8x256xf32>
    %704 = arith.mulf %703, %702 : vector<8x256xf32>
    %705 = arith.addf %693, %704 : vector<8x256xf32>
    %706 = vector.broadcast %11 : f32 to vector<8x256xf32>
    %707 = arith.mulf %706, %702 : vector<8x256xf32>
    %708 = arith.addf %695, %707 : vector<8x256xf32>
    %709 = vector.broadcast %20 : f32 to vector<8x256xf32>
    %710 = arith.mulf %709, %702 : vector<8x256xf32>
    %711 = arith.addf %697, %710 : vector<8x256xf32>
    %712 = vector.broadcast %29 : f32 to vector<8x256xf32>
    %713 = arith.mulf %712, %702 : vector<8x256xf32>
    %714 = arith.addf %699, %713 : vector<8x256xf32>
    %c15_i32_161 = arith.constant 15 : i32
    %715 = tpu.dynamic_rotate %680 by %c15_i32_161 dim 1 : vector<8x256xf32>, i32 -> vector<8x256xf32>
    %716 = vector.broadcast %683 : vector<1x256xf32> to vector<8x256xf32>
    %717 = arith.mulf %715, %716 : vector<8x256xf32>
    %718 = vector.broadcast %3 : f32 to vector<8x256xf32>
    %719 = arith.mulf %718, %717 : vector<8x256xf32>
    %720 = arith.addf %705, %719 : vector<8x256xf32>
    %721 = vector.broadcast %12 : f32 to vector<8x256xf32>
    %722 = arith.mulf %721, %717 : vector<8x256xf32>
    %723 = arith.addf %708, %722 : vector<8x256xf32>
    %724 = vector.broadcast %21 : f32 to vector<8x256xf32>
    %725 = arith.mulf %724, %717 : vector<8x256xf32>
    %726 = arith.addf %711, %725 : vector<8x256xf32>
    %727 = vector.broadcast %30 : f32 to vector<8x256xf32>
    %728 = arith.mulf %727, %717 : vector<8x256xf32>
    %729 = arith.addf %714, %728 : vector<8x256xf32>
    %c1_i32_162 = arith.constant 1 : i32
    %730 = tpu.dynamic_rotate %680 by %c1_i32_162 dim 1 : vector<8x256xf32>, i32 -> vector<8x256xf32>
    %731 = vector.broadcast %684 : vector<1x256xf32> to vector<8x256xf32>
    %732 = arith.mulf %730, %731 : vector<8x256xf32>
    %733 = vector.broadcast %4 : f32 to vector<8x256xf32>
    %734 = arith.mulf %733, %732 : vector<8x256xf32>
    %735 = arith.addf %720, %734 : vector<8x256xf32>
    %736 = vector.broadcast %13 : f32 to vector<8x256xf32>
    %737 = arith.mulf %736, %732 : vector<8x256xf32>
    %738 = arith.addf %723, %737 : vector<8x256xf32>
    %739 = vector.broadcast %22 : f32 to vector<8x256xf32>
    %740 = arith.mulf %739, %732 : vector<8x256xf32>
    %741 = arith.addf %726, %740 : vector<8x256xf32>
    %742 = vector.broadcast %31 : f32 to vector<8x256xf32>
    %743 = arith.mulf %742, %732 : vector<8x256xf32>
    %744 = arith.addf %729, %743 : vector<8x256xf32>
    %745 = vector.broadcast %5 : f32 to vector<8x256xf32>
    %746 = arith.mulf %745, %680 : vector<8x256xf32>
    %747 = arith.addf %735, %746 : vector<8x256xf32>
    %748 = vector.broadcast %14 : f32 to vector<8x256xf32>
    %749 = arith.mulf %748, %680 : vector<8x256xf32>
    %750 = arith.addf %738, %749 : vector<8x256xf32>
    %751 = vector.broadcast %23 : f32 to vector<8x256xf32>
    %752 = arith.mulf %751, %680 : vector<8x256xf32>
    %753 = arith.addf %741, %752 : vector<8x256xf32>
    %754 = vector.broadcast %32 : f32 to vector<8x256xf32>
    %755 = arith.mulf %754, %680 : vector<8x256xf32>
    %756 = arith.addf %744, %755 : vector<8x256xf32>
    %c255_i32_163 = arith.constant 255 : i32
    %757 = tpu.dynamic_rotate %680 by %c255_i32_163 dim 1 : vector<8x256xf32>, i32 -> vector<8x256xf32>
    %758 = vector.broadcast %685 : vector<1x256xf32> to vector<8x256xf32>
    %759 = arith.mulf %757, %758 : vector<8x256xf32>
    %760 = vector.broadcast %6 : f32 to vector<8x256xf32>
    %761 = arith.mulf %760, %759 : vector<8x256xf32>
    %762 = arith.addf %747, %761 : vector<8x256xf32>
    %763 = vector.broadcast %15 : f32 to vector<8x256xf32>
    %764 = arith.mulf %763, %759 : vector<8x256xf32>
    %765 = arith.addf %750, %764 : vector<8x256xf32>
    %766 = vector.broadcast %24 : f32 to vector<8x256xf32>
    %767 = arith.mulf %766, %759 : vector<8x256xf32>
    %768 = arith.addf %753, %767 : vector<8x256xf32>
    %769 = vector.broadcast %33 : f32 to vector<8x256xf32>
    %770 = arith.mulf %769, %759 : vector<8x256xf32>
    %771 = arith.addf %756, %770 : vector<8x256xf32>
    %c241_i32_164 = arith.constant 241 : i32
    %772 = tpu.dynamic_rotate %680 by %c241_i32_164 dim 1 : vector<8x256xf32>, i32 -> vector<8x256xf32>
    %773 = vector.broadcast %686 : vector<1x256xf32> to vector<8x256xf32>
    %774 = arith.mulf %772, %773 : vector<8x256xf32>
    %775 = vector.broadcast %7 : f32 to vector<8x256xf32>
    %776 = arith.mulf %775, %774 : vector<8x256xf32>
    %777 = arith.addf %762, %776 : vector<8x256xf32>
    %778 = vector.broadcast %16 : f32 to vector<8x256xf32>
    %779 = arith.mulf %778, %774 : vector<8x256xf32>
    %780 = arith.addf %765, %779 : vector<8x256xf32>
    %781 = vector.broadcast %25 : f32 to vector<8x256xf32>
    %782 = arith.mulf %781, %774 : vector<8x256xf32>
    %783 = arith.addf %768, %782 : vector<8x256xf32>
    %784 = vector.broadcast %34 : f32 to vector<8x256xf32>
    %785 = arith.mulf %784, %774 : vector<8x256xf32>
    %786 = arith.addf %771, %785 : vector<8x256xf32>
    %c240_i32_165 = arith.constant 240 : i32
    %787 = tpu.dynamic_rotate %680 by %c240_i32_165 dim 1 : vector<8x256xf32>, i32 -> vector<8x256xf32>
    %788 = vector.broadcast %687 : vector<1x256xf32> to vector<8x256xf32>
    %789 = arith.mulf %787, %788 : vector<8x256xf32>
    %790 = vector.broadcast %8 : f32 to vector<8x256xf32>
    %791 = arith.mulf %790, %789 : vector<8x256xf32>
    %792 = arith.addf %777, %791 : vector<8x256xf32>
    %793 = vector.broadcast %17 : f32 to vector<8x256xf32>
    %794 = arith.mulf %793, %789 : vector<8x256xf32>
    %795 = arith.addf %780, %794 : vector<8x256xf32>
    %796 = vector.broadcast %26 : f32 to vector<8x256xf32>
    %797 = arith.mulf %796, %789 : vector<8x256xf32>
    %798 = arith.addf %783, %797 : vector<8x256xf32>
    %799 = vector.broadcast %35 : f32 to vector<8x256xf32>
    %800 = arith.mulf %799, %789 : vector<8x256xf32>
    %801 = arith.addf %786, %800 : vector<8x256xf32>
    %c239_i32_166 = arith.constant 239 : i32
    %802 = tpu.dynamic_rotate %680 by %c239_i32_166 dim 1 : vector<8x256xf32>, i32 -> vector<8x256xf32>
    %803 = vector.broadcast %688 : vector<1x256xf32> to vector<8x256xf32>
    %804 = arith.mulf %802, %803 : vector<8x256xf32>
    %805 = vector.broadcast %9 : f32 to vector<8x256xf32>
    %806 = arith.mulf %805, %804 : vector<8x256xf32>
    %807 = arith.addf %792, %806 : vector<8x256xf32>
    %808 = vector.broadcast %18 : f32 to vector<8x256xf32>
    %809 = arith.mulf %808, %804 : vector<8x256xf32>
    %810 = arith.addf %795, %809 : vector<8x256xf32>
    %811 = vector.broadcast %27 : f32 to vector<8x256xf32>
    %812 = arith.mulf %811, %804 : vector<8x256xf32>
    %813 = arith.addf %798, %812 : vector<8x256xf32>
    %814 = vector.broadcast %36 : f32 to vector<8x256xf32>
    %815 = arith.mulf %814, %804 : vector<8x256xf32>
    %816 = arith.addf %801, %815 : vector<8x256xf32>
    %817 = vector.broadcast %73 : f32 to vector<8x256xf32>
    %818 = arith.addf %807, %817 : vector<8x256xf32>
    %cst_167 = arith.constant 0.000000e+00 : f32
    %819 = vector.broadcast %cst_167 : f32 to vector<8x256xf32>
    %820 = arith.maximumf %818, %819 : vector<8x256xf32>
    %821 = vector.broadcast %74 : f32 to vector<8x256xf32>
    %822 = arith.addf %810, %821 : vector<8x256xf32>
    %cst_168 = arith.constant 0.000000e+00 : f32
    %823 = vector.broadcast %cst_168 : f32 to vector<8x256xf32>
    %824 = arith.maximumf %822, %823 : vector<8x256xf32>
    %825 = vector.broadcast %75 : f32 to vector<8x256xf32>
    %826 = arith.addf %813, %825 : vector<8x256xf32>
    %cst_169 = arith.constant 0.000000e+00 : f32
    %827 = vector.broadcast %cst_169 : f32 to vector<8x256xf32>
    %828 = arith.maximumf %826, %827 : vector<8x256xf32>
    %829 = vector.broadcast %76 : f32 to vector<8x256xf32>
    %830 = arith.addf %816, %829 : vector<8x256xf32>
    %cst_170 = arith.constant 0.000000e+00 : f32
    %831 = vector.broadcast %cst_170 : f32 to vector<8x256xf32>
    %832 = arith.maximumf %830, %831 : vector<8x256xf32>
    %833 = vector.broadcast %37 : f32 to vector<8x256xf32>
    %834 = arith.mulf %833, %820 : vector<8x256xf32>
    %835 = vector.broadcast %46 : f32 to vector<8x256xf32>
    %836 = arith.mulf %835, %824 : vector<8x256xf32>
    %837 = arith.addf %834, %836 : vector<8x256xf32>
    %838 = vector.broadcast %55 : f32 to vector<8x256xf32>
    %839 = arith.mulf %838, %828 : vector<8x256xf32>
    %840 = arith.addf %837, %839 : vector<8x256xf32>
    %841 = vector.broadcast %64 : f32 to vector<8x256xf32>
    %842 = arith.mulf %841, %832 : vector<8x256xf32>
    %843 = arith.addf %840, %842 : vector<8x256xf32>
    %c17_i32_171 = arith.constant 17 : i32
    %844 = tpu.dynamic_rotate %843 by %c17_i32_171 dim 1 : vector<8x256xf32>, i32 -> vector<8x256xf32>
    %845 = vector.broadcast %681 : vector<1x256xf32> to vector<8x256xf32>
    %846 = arith.mulf %844, %845 : vector<8x256xf32>
    %847 = vector.broadcast %38 : f32 to vector<8x256xf32>
    %848 = arith.mulf %847, %820 : vector<8x256xf32>
    %849 = vector.broadcast %47 : f32 to vector<8x256xf32>
    %850 = arith.mulf %849, %824 : vector<8x256xf32>
    %851 = arith.addf %848, %850 : vector<8x256xf32>
    %852 = vector.broadcast %56 : f32 to vector<8x256xf32>
    %853 = arith.mulf %852, %828 : vector<8x256xf32>
    %854 = arith.addf %851, %853 : vector<8x256xf32>
    %855 = vector.broadcast %65 : f32 to vector<8x256xf32>
    %856 = arith.mulf %855, %832 : vector<8x256xf32>
    %857 = arith.addf %854, %856 : vector<8x256xf32>
    %c16_i32_172 = arith.constant 16 : i32
    %858 = tpu.dynamic_rotate %857 by %c16_i32_172 dim 1 : vector<8x256xf32>, i32 -> vector<8x256xf32>
    %859 = vector.broadcast %682 : vector<1x256xf32> to vector<8x256xf32>
    %860 = arith.mulf %858, %859 : vector<8x256xf32>
    %861 = arith.addf %846, %860 : vector<8x256xf32>
    %862 = vector.broadcast %39 : f32 to vector<8x256xf32>
    %863 = arith.mulf %862, %820 : vector<8x256xf32>
    %864 = vector.broadcast %48 : f32 to vector<8x256xf32>
    %865 = arith.mulf %864, %824 : vector<8x256xf32>
    %866 = arith.addf %863, %865 : vector<8x256xf32>
    %867 = vector.broadcast %57 : f32 to vector<8x256xf32>
    %868 = arith.mulf %867, %828 : vector<8x256xf32>
    %869 = arith.addf %866, %868 : vector<8x256xf32>
    %870 = vector.broadcast %66 : f32 to vector<8x256xf32>
    %871 = arith.mulf %870, %832 : vector<8x256xf32>
    %872 = arith.addf %869, %871 : vector<8x256xf32>
    %c15_i32_173 = arith.constant 15 : i32
    %873 = tpu.dynamic_rotate %872 by %c15_i32_173 dim 1 : vector<8x256xf32>, i32 -> vector<8x256xf32>
    %874 = vector.broadcast %683 : vector<1x256xf32> to vector<8x256xf32>
    %875 = arith.mulf %873, %874 : vector<8x256xf32>
    %876 = arith.addf %861, %875 : vector<8x256xf32>
    %877 = vector.broadcast %40 : f32 to vector<8x256xf32>
    %878 = arith.mulf %877, %820 : vector<8x256xf32>
    %879 = vector.broadcast %49 : f32 to vector<8x256xf32>
    %880 = arith.mulf %879, %824 : vector<8x256xf32>
    %881 = arith.addf %878, %880 : vector<8x256xf32>
    %882 = vector.broadcast %58 : f32 to vector<8x256xf32>
    %883 = arith.mulf %882, %828 : vector<8x256xf32>
    %884 = arith.addf %881, %883 : vector<8x256xf32>
    %885 = vector.broadcast %67 : f32 to vector<8x256xf32>
    %886 = arith.mulf %885, %832 : vector<8x256xf32>
    %887 = arith.addf %884, %886 : vector<8x256xf32>
    %c1_i32_174 = arith.constant 1 : i32
    %888 = tpu.dynamic_rotate %887 by %c1_i32_174 dim 1 : vector<8x256xf32>, i32 -> vector<8x256xf32>
    %889 = vector.broadcast %684 : vector<1x256xf32> to vector<8x256xf32>
    %890 = arith.mulf %888, %889 : vector<8x256xf32>
    %891 = arith.addf %876, %890 : vector<8x256xf32>
    %892 = vector.broadcast %41 : f32 to vector<8x256xf32>
    %893 = arith.mulf %892, %820 : vector<8x256xf32>
    %894 = vector.broadcast %50 : f32 to vector<8x256xf32>
    %895 = arith.mulf %894, %824 : vector<8x256xf32>
    %896 = arith.addf %893, %895 : vector<8x256xf32>
    %897 = vector.broadcast %59 : f32 to vector<8x256xf32>
    %898 = arith.mulf %897, %828 : vector<8x256xf32>
    %899 = arith.addf %896, %898 : vector<8x256xf32>
    %900 = vector.broadcast %68 : f32 to vector<8x256xf32>
    %901 = arith.mulf %900, %832 : vector<8x256xf32>
    %902 = arith.addf %899, %901 : vector<8x256xf32>
    %903 = arith.addf %891, %902 : vector<8x256xf32>
    %904 = vector.broadcast %42 : f32 to vector<8x256xf32>
    %905 = arith.mulf %904, %820 : vector<8x256xf32>
    %906 = vector.broadcast %51 : f32 to vector<8x256xf32>
    %907 = arith.mulf %906, %824 : vector<8x256xf32>
    %908 = arith.addf %905, %907 : vector<8x256xf32>
    %909 = vector.broadcast %60 : f32 to vector<8x256xf32>
    %910 = arith.mulf %909, %828 : vector<8x256xf32>
    %911 = arith.addf %908, %910 : vector<8x256xf32>
    %912 = vector.broadcast %69 : f32 to vector<8x256xf32>
    %913 = arith.mulf %912, %832 : vector<8x256xf32>
    %914 = arith.addf %911, %913 : vector<8x256xf32>
    %c255_i32_175 = arith.constant 255 : i32
    %915 = tpu.dynamic_rotate %914 by %c255_i32_175 dim 1 : vector<8x256xf32>, i32 -> vector<8x256xf32>
    %916 = vector.broadcast %685 : vector<1x256xf32> to vector<8x256xf32>
    %917 = arith.mulf %915, %916 : vector<8x256xf32>
    %918 = arith.addf %903, %917 : vector<8x256xf32>
    %919 = vector.broadcast %43 : f32 to vector<8x256xf32>
    %920 = arith.mulf %919, %820 : vector<8x256xf32>
    %921 = vector.broadcast %52 : f32 to vector<8x256xf32>
    %922 = arith.mulf %921, %824 : vector<8x256xf32>
    %923 = arith.addf %920, %922 : vector<8x256xf32>
    %924 = vector.broadcast %61 : f32 to vector<8x256xf32>
    %925 = arith.mulf %924, %828 : vector<8x256xf32>
    %926 = arith.addf %923, %925 : vector<8x256xf32>
    %927 = vector.broadcast %70 : f32 to vector<8x256xf32>
    %928 = arith.mulf %927, %832 : vector<8x256xf32>
    %929 = arith.addf %926, %928 : vector<8x256xf32>
    %c241_i32_176 = arith.constant 241 : i32
    %930 = tpu.dynamic_rotate %929 by %c241_i32_176 dim 1 : vector<8x256xf32>, i32 -> vector<8x256xf32>
    %931 = vector.broadcast %686 : vector<1x256xf32> to vector<8x256xf32>
    %932 = arith.mulf %930, %931 : vector<8x256xf32>
    %933 = arith.addf %918, %932 : vector<8x256xf32>
    %934 = vector.broadcast %44 : f32 to vector<8x256xf32>
    %935 = arith.mulf %934, %820 : vector<8x256xf32>
    %936 = vector.broadcast %53 : f32 to vector<8x256xf32>
    %937 = arith.mulf %936, %824 : vector<8x256xf32>
    %938 = arith.addf %935, %937 : vector<8x256xf32>
    %939 = vector.broadcast %62 : f32 to vector<8x256xf32>
    %940 = arith.mulf %939, %828 : vector<8x256xf32>
    %941 = arith.addf %938, %940 : vector<8x256xf32>
    %942 = vector.broadcast %71 : f32 to vector<8x256xf32>
    %943 = arith.mulf %942, %832 : vector<8x256xf32>
    %944 = arith.addf %941, %943 : vector<8x256xf32>
    %c240_i32_177 = arith.constant 240 : i32
    %945 = tpu.dynamic_rotate %944 by %c240_i32_177 dim 1 : vector<8x256xf32>, i32 -> vector<8x256xf32>
    %946 = vector.broadcast %687 : vector<1x256xf32> to vector<8x256xf32>
    %947 = arith.mulf %945, %946 : vector<8x256xf32>
    %948 = arith.addf %933, %947 : vector<8x256xf32>
    %949 = vector.broadcast %45 : f32 to vector<8x256xf32>
    %950 = arith.mulf %949, %820 : vector<8x256xf32>
    %951 = vector.broadcast %54 : f32 to vector<8x256xf32>
    %952 = arith.mulf %951, %824 : vector<8x256xf32>
    %953 = arith.addf %950, %952 : vector<8x256xf32>
    %954 = vector.broadcast %63 : f32 to vector<8x256xf32>
    %955 = arith.mulf %954, %828 : vector<8x256xf32>
    %956 = arith.addf %953, %955 : vector<8x256xf32>
    %957 = vector.broadcast %72 : f32 to vector<8x256xf32>
    %958 = arith.mulf %957, %832 : vector<8x256xf32>
    %959 = arith.addf %956, %958 : vector<8x256xf32>
    %c239_i32_178 = arith.constant 239 : i32
    %960 = tpu.dynamic_rotate %959 by %c239_i32_178 dim 1 : vector<8x256xf32>, i32 -> vector<8x256xf32>
    %961 = vector.broadcast %688 : vector<1x256xf32> to vector<8x256xf32>
    %962 = arith.mulf %960, %961 : vector<8x256xf32>
    %963 = arith.addf %948, %962 : vector<8x256xf32>
    %964 = vector.broadcast %77 : f32 to vector<8x256xf32>
    %965 = arith.addf %963, %964 : vector<8x256xf32>
    %966 = arith.addf %680, %965 : vector<8x256xf32>
    %c0_179 = arith.constant 0 : index
    %c0_180 = arith.constant 0 : index
    %967 = vector.load %arg10[%c0_179, %c0_180] : memref<16x256xf32, #tpu.memory_space<vmem>>, vector<8x256xf32>
    tpu.vector_store %arg10[%c0_179, %c0_180], %966 {strides = array<i32>} : memref<16x256xf32, #tpu.memory_space<vmem>>, vector<8x256xf32>,
    %c8_181 = arith.constant 8 : index
    %c0_182 = arith.constant 0 : index
    %968 = vector.load %arg10[%c8_181, %c0_182] : memref<16x256xf32, #tpu.memory_space<vmem>>, vector<8x256xf32>
    %c0_183 = arith.constant 0 : index
    %c0_184 = arith.constant 0 : index
    %969 = vector.load %arg9[%c0_183, %c0_184] : memref<8x256xf32, #tpu.memory_space<vmem>>, vector<1x256xf32>
    %c1_185 = arith.constant 1 : index
    %c0_186 = arith.constant 0 : index
    %970 = vector.load %arg9[%c1_185, %c0_186] : memref<8x256xf32, #tpu.memory_space<vmem>>, vector<1x256xf32>
    %c2_187 = arith.constant 2 : index
    %c0_188 = arith.constant 0 : index
    %971 = vector.load %arg9[%c2_187, %c0_188] : memref<8x256xf32, #tpu.memory_space<vmem>>, vector<1x256xf32>
    %c3_189 = arith.constant 3 : index
    %c0_190 = arith.constant 0 : index
    %972 = vector.load %arg9[%c3_189, %c0_190] : memref<8x256xf32, #tpu.memory_space<vmem>>, vector<1x256xf32>
    %c4_191 = arith.constant 4 : index
    %c0_192 = arith.constant 0 : index
    %973 = vector.load %arg9[%c4_191, %c0_192] : memref<8x256xf32, #tpu.memory_space<vmem>>, vector<1x256xf32>
    %c5_193 = arith.constant 5 : index
    %c0_194 = arith.constant 0 : index
    %974 = vector.load %arg9[%c5_193, %c0_194] : memref<8x256xf32, #tpu.memory_space<vmem>>, vector<1x256xf32>
    %c6_195 = arith.constant 6 : index
    %c0_196 = arith.constant 0 : index
    %975 = vector.load %arg9[%c6_195, %c0_196] : memref<8x256xf32, #tpu.memory_space<vmem>>, vector<1x256xf32>
    %c7_197 = arith.constant 7 : index
    %c0_198 = arith.constant 0 : index
    %976 = vector.load %arg9[%c7_197, %c0_198] : memref<8x256xf32, #tpu.memory_space<vmem>>, vector<1x256xf32>
    %c17_i32_199 = arith.constant 17 : i32
    %977 = tpu.dynamic_rotate %968 by %c17_i32_199 dim 1 : vector<8x256xf32>, i32 -> vector<8x256xf32>
    %978 = vector.broadcast %969 : vector<1x256xf32> to vector<8x256xf32>
    %979 = arith.mulf %977, %978 : vector<8x256xf32>
    %980 = vector.broadcast %1 : f32 to vector<8x256xf32>
    %981 = arith.mulf %980, %979 : vector<8x256xf32>
    %982 = vector.broadcast %10 : f32 to vector<8x256xf32>
    %983 = arith.mulf %982, %979 : vector<8x256xf32>
    %984 = vector.broadcast %19 : f32 to vector<8x256xf32>
    %985 = arith.mulf %984, %979 : vector<8x256xf32>
    %986 = vector.broadcast %28 : f32 to vector<8x256xf32>
    %987 = arith.mulf %986, %979 : vector<8x256xf32>
    %c16_i32_200 = arith.constant 16 : i32
    %988 = tpu.dynamic_rotate %968 by %c16_i32_200 dim 1 : vector<8x256xf32>, i32 -> vector<8x256xf32>
    %989 = vector.broadcast %970 : vector<1x256xf32> to vector<8x256xf32>
    %990 = arith.mulf %988, %989 : vector<8x256xf32>
    %991 = vector.broadcast %2 : f32 to vector<8x256xf32>
    %992 = arith.mulf %991, %990 : vector<8x256xf32>
    %993 = arith.addf %981, %992 : vector<8x256xf32>
    %994 = vector.broadcast %11 : f32 to vector<8x256xf32>
    %995 = arith.mulf %994, %990 : vector<8x256xf32>
    %996 = arith.addf %983, %995 : vector<8x256xf32>
    %997 = vector.broadcast %20 : f32 to vector<8x256xf32>
    %998 = arith.mulf %997, %990 : vector<8x256xf32>
    %999 = arith.addf %985, %998 : vector<8x256xf32>
    %1000 = vector.broadcast %29 : f32 to vector<8x256xf32>
    %1001 = arith.mulf %1000, %990 : vector<8x256xf32>
    %1002 = arith.addf %987, %1001 : vector<8x256xf32>
    %c15_i32_201 = arith.constant 15 : i32
    %1003 = tpu.dynamic_rotate %968 by %c15_i32_201 dim 1 : vector<8x256xf32>, i32 -> vector<8x256xf32>
    %1004 = vector.broadcast %971 : vector<1x256xf32> to vector<8x256xf32>
    %1005 = arith.mulf %1003, %1004 : vector<8x256xf32>
    %1006 = vector.broadcast %3 : f32 to vector<8x256xf32>
    %1007 = arith.mulf %1006, %1005 : vector<8x256xf32>
    %1008 = arith.addf %993, %1007 : vector<8x256xf32>
    %1009 = vector.broadcast %12 : f32 to vector<8x256xf32>
    %1010 = arith.mulf %1009, %1005 : vector<8x256xf32>
    %1011 = arith.addf %996, %1010 : vector<8x256xf32>
    %1012 = vector.broadcast %21 : f32 to vector<8x256xf32>
    %1013 = arith.mulf %1012, %1005 : vector<8x256xf32>
    %1014 = arith.addf %999, %1013 : vector<8x256xf32>
    %1015 = vector.broadcast %30 : f32 to vector<8x256xf32>
    %1016 = arith.mulf %1015, %1005 : vector<8x256xf32>
    %1017 = arith.addf %1002, %1016 : vector<8x256xf32>
    %c1_i32_202 = arith.constant 1 : i32
    %1018 = tpu.dynamic_rotate %968 by %c1_i32_202 dim 1 : vector<8x256xf32>, i32 -> vector<8x256xf32>
    %1019 = vector.broadcast %972 : vector<1x256xf32> to vector<8x256xf32>
    %1020 = arith.mulf %1018, %1019 : vector<8x256xf32>
    %1021 = vector.broadcast %4 : f32 to vector<8x256xf32>
    %1022 = arith.mulf %1021, %1020 : vector<8x256xf32>
    %1023 = arith.addf %1008, %1022 : vector<8x256xf32>
    %1024 = vector.broadcast %13 : f32 to vector<8x256xf32>
    %1025 = arith.mulf %1024, %1020 : vector<8x256xf32>
    %1026 = arith.addf %1011, %1025 : vector<8x256xf32>
    %1027 = vector.broadcast %22 : f32 to vector<8x256xf32>
    %1028 = arith.mulf %1027, %1020 : vector<8x256xf32>
    %1029 = arith.addf %1014, %1028 : vector<8x256xf32>
    %1030 = vector.broadcast %31 : f32 to vector<8x256xf32>
    %1031 = arith.mulf %1030, %1020 : vector<8x256xf32>
    %1032 = arith.addf %1017, %1031 : vector<8x256xf32>
    %1033 = vector.broadcast %5 : f32 to vector<8x256xf32>
    %1034 = arith.mulf %1033, %968 : vector<8x256xf32>
    %1035 = arith.addf %1023, %1034 : vector<8x256xf32>
    %1036 = vector.broadcast %14 : f32 to vector<8x256xf32>
    %1037 = arith.mulf %1036, %968 : vector<8x256xf32>
    %1038 = arith.addf %1026, %1037 : vector<8x256xf32>
    %1039 = vector.broadcast %23 : f32 to vector<8x256xf32>
    %1040 = arith.mulf %1039, %968 : vector<8x256xf32>
    %1041 = arith.addf %1029, %1040 : vector<8x256xf32>
    %1042 = vector.broadcast %32 : f32 to vector<8x256xf32>
    %1043 = arith.mulf %1042, %968 : vector<8x256xf32>
    %1044 = arith.addf %1032, %1043 : vector<8x256xf32>
    %c255_i32_203 = arith.constant 255 : i32
    %1045 = tpu.dynamic_rotate %968 by %c255_i32_203 dim 1 : vector<8x256xf32>, i32 -> vector<8x256xf32>
    %1046 = vector.broadcast %973 : vector<1x256xf32> to vector<8x256xf32>
    %1047 = arith.mulf %1045, %1046 : vector<8x256xf32>
    %1048 = vector.broadcast %6 : f32 to vector<8x256xf32>
    %1049 = arith.mulf %1048, %1047 : vector<8x256xf32>
    %1050 = arith.addf %1035, %1049 : vector<8x256xf32>
    %1051 = vector.broadcast %15 : f32 to vector<8x256xf32>
    %1052 = arith.mulf %1051, %1047 : vector<8x256xf32>
    %1053 = arith.addf %1038, %1052 : vector<8x256xf32>
    %1054 = vector.broadcast %24 : f32 to vector<8x256xf32>
    %1055 = arith.mulf %1054, %1047 : vector<8x256xf32>
    %1056 = arith.addf %1041, %1055 : vector<8x256xf32>
    %1057 = vector.broadcast %33 : f32 to vector<8x256xf32>
    %1058 = arith.mulf %1057, %1047 : vector<8x256xf32>
    %1059 = arith.addf %1044, %1058 : vector<8x256xf32>
    %c241_i32_204 = arith.constant 241 : i32
    %1060 = tpu.dynamic_rotate %968 by %c241_i32_204 dim 1 : vector<8x256xf32>, i32 -> vector<8x256xf32>
    %1061 = vector.broadcast %974 : vector<1x256xf32> to vector<8x256xf32>
    %1062 = arith.mulf %1060, %1061 : vector<8x256xf32>
    %1063 = vector.broadcast %7 : f32 to vector<8x256xf32>
    %1064 = arith.mulf %1063, %1062 : vector<8x256xf32>
    %1065 = arith.addf %1050, %1064 : vector<8x256xf32>
    %1066 = vector.broadcast %16 : f32 to vector<8x256xf32>
    %1067 = arith.mulf %1066, %1062 : vector<8x256xf32>
    %1068 = arith.addf %1053, %1067 : vector<8x256xf32>
    %1069 = vector.broadcast %25 : f32 to vector<8x256xf32>
    %1070 = arith.mulf %1069, %1062 : vector<8x256xf32>
    %1071 = arith.addf %1056, %1070 : vector<8x256xf32>
    %1072 = vector.broadcast %34 : f32 to vector<8x256xf32>
    %1073 = arith.mulf %1072, %1062 : vector<8x256xf32>
    %1074 = arith.addf %1059, %1073 : vector<8x256xf32>
    %c240_i32_205 = arith.constant 240 : i32
    %1075 = tpu.dynamic_rotate %968 by %c240_i32_205 dim 1 : vector<8x256xf32>, i32 -> vector<8x256xf32>
    %1076 = vector.broadcast %975 : vector<1x256xf32> to vector<8x256xf32>
    %1077 = arith.mulf %1075, %1076 : vector<8x256xf32>
    %1078 = vector.broadcast %8 : f32 to vector<8x256xf32>
    %1079 = arith.mulf %1078, %1077 : vector<8x256xf32>
    %1080 = arith.addf %1065, %1079 : vector<8x256xf32>
    %1081 = vector.broadcast %17 : f32 to vector<8x256xf32>
    %1082 = arith.mulf %1081, %1077 : vector<8x256xf32>
    %1083 = arith.addf %1068, %1082 : vector<8x256xf32>
    %1084 = vector.broadcast %26 : f32 to vector<8x256xf32>
    %1085 = arith.mulf %1084, %1077 : vector<8x256xf32>
    %1086 = arith.addf %1071, %1085 : vector<8x256xf32>
    %1087 = vector.broadcast %35 : f32 to vector<8x256xf32>
    %1088 = arith.mulf %1087, %1077 : vector<8x256xf32>
    %1089 = arith.addf %1074, %1088 : vector<8x256xf32>
    %c239_i32_206 = arith.constant 239 : i32
    %1090 = tpu.dynamic_rotate %968 by %c239_i32_206 dim 1 : vector<8x256xf32>, i32 -> vector<8x256xf32>
    %1091 = vector.broadcast %976 : vector<1x256xf32> to vector<8x256xf32>
    %1092 = arith.mulf %1090, %1091 : vector<8x256xf32>
    %1093 = vector.broadcast %9 : f32 to vector<8x256xf32>
    %1094 = arith.mulf %1093, %1092 : vector<8x256xf32>
    %1095 = arith.addf %1080, %1094 : vector<8x256xf32>
    %1096 = vector.broadcast %18 : f32 to vector<8x256xf32>
    %1097 = arith.mulf %1096, %1092 : vector<8x256xf32>
    %1098 = arith.addf %1083, %1097 : vector<8x256xf32>
    %1099 = vector.broadcast %27 : f32 to vector<8x256xf32>
    %1100 = arith.mulf %1099, %1092 : vector<8x256xf32>
    %1101 = arith.addf %1086, %1100 : vector<8x256xf32>
    %1102 = vector.broadcast %36 : f32 to vector<8x256xf32>
    %1103 = arith.mulf %1102, %1092 : vector<8x256xf32>
    %1104 = arith.addf %1089, %1103 : vector<8x256xf32>
    %1105 = vector.broadcast %73 : f32 to vector<8x256xf32>
    %1106 = arith.addf %1095, %1105 : vector<8x256xf32>
    %cst_207 = arith.constant 0.000000e+00 : f32
    %1107 = vector.broadcast %cst_207 : f32 to vector<8x256xf32>
    %1108 = arith.maximumf %1106, %1107 : vector<8x256xf32>
    %1109 = vector.broadcast %74 : f32 to vector<8x256xf32>
    %1110 = arith.addf %1098, %1109 : vector<8x256xf32>
    %cst_208 = arith.constant 0.000000e+00 : f32
    %1111 = vector.broadcast %cst_208 : f32 to vector<8x256xf32>
    %1112 = arith.maximumf %1110, %1111 : vector<8x256xf32>
    %1113 = vector.broadcast %75 : f32 to vector<8x256xf32>
    %1114 = arith.addf %1101, %1113 : vector<8x256xf32>
    %cst_209 = arith.constant 0.000000e+00 : f32
    %1115 = vector.broadcast %cst_209 : f32 to vector<8x256xf32>
    %1116 = arith.maximumf %1114, %1115 : vector<8x256xf32>
    %1117 = vector.broadcast %76 : f32 to vector<8x256xf32>
    %1118 = arith.addf %1104, %1117 : vector<8x256xf32>
    %cst_210 = arith.constant 0.000000e+00 : f32
    %1119 = vector.broadcast %cst_210 : f32 to vector<8x256xf32>
    %1120 = arith.maximumf %1118, %1119 : vector<8x256xf32>
    %1121 = vector.broadcast %37 : f32 to vector<8x256xf32>
    %1122 = arith.mulf %1121, %1108 : vector<8x256xf32>
    %1123 = vector.broadcast %46 : f32 to vector<8x256xf32>
    %1124 = arith.mulf %1123, %1112 : vector<8x256xf32>
    %1125 = arith.addf %1122, %1124 : vector<8x256xf32>
    %1126 = vector.broadcast %55 : f32 to vector<8x256xf32>
    %1127 = arith.mulf %1126, %1116 : vector<8x256xf32>
    %1128 = arith.addf %1125, %1127 : vector<8x256xf32>
    %1129 = vector.broadcast %64 : f32 to vector<8x256xf32>
    %1130 = arith.mulf %1129, %1120 : vector<8x256xf32>
    %1131 = arith.addf %1128, %1130 : vector<8x256xf32>
    %c17_i32_211 = arith.constant 17 : i32
    %1132 = tpu.dynamic_rotate %1131 by %c17_i32_211 dim 1 : vector<8x256xf32>, i32 -> vector<8x256xf32>
    %1133 = vector.broadcast %969 : vector<1x256xf32> to vector<8x256xf32>
    %1134 = arith.mulf %1132, %1133 : vector<8x256xf32>
    %1135 = vector.broadcast %38 : f32 to vector<8x256xf32>
    %1136 = arith.mulf %1135, %1108 : vector<8x256xf32>
    %1137 = vector.broadcast %47 : f32 to vector<8x256xf32>
    %1138 = arith.mulf %1137, %1112 : vector<8x256xf32>
    %1139 = arith.addf %1136, %1138 : vector<8x256xf32>
    %1140 = vector.broadcast %56 : f32 to vector<8x256xf32>
    %1141 = arith.mulf %1140, %1116 : vector<8x256xf32>
    %1142 = arith.addf %1139, %1141 : vector<8x256xf32>
    %1143 = vector.broadcast %65 : f32 to vector<8x256xf32>
    %1144 = arith.mulf %1143, %1120 : vector<8x256xf32>
    %1145 = arith.addf %1142, %1144 : vector<8x256xf32>
    %c16_i32_212 = arith.constant 16 : i32
    %1146 = tpu.dynamic_rotate %1145 by %c16_i32_212 dim 1 : vector<8x256xf32>, i32 -> vector<8x256xf32>
    %1147 = vector.broadcast %970 : vector<1x256xf32> to vector<8x256xf32>
    %1148 = arith.mulf %1146, %1147 : vector<8x256xf32>
    %1149 = arith.addf %1134, %1148 : vector<8x256xf32>
    %1150 = vector.broadcast %39 : f32 to vector<8x256xf32>
    %1151 = arith.mulf %1150, %1108 : vector<8x256xf32>
    %1152 = vector.broadcast %48 : f32 to vector<8x256xf32>
    %1153 = arith.mulf %1152, %1112 : vector<8x256xf32>
    %1154 = arith.addf %1151, %1153 : vector<8x256xf32>
    %1155 = vector.broadcast %57 : f32 to vector<8x256xf32>
    %1156 = arith.mulf %1155, %1116 : vector<8x256xf32>
    %1157 = arith.addf %1154, %1156 : vector<8x256xf32>
    %1158 = vector.broadcast %66 : f32 to vector<8x256xf32>
    %1159 = arith.mulf %1158, %1120 : vector<8x256xf32>
    %1160 = arith.addf %1157, %1159 : vector<8x256xf32>
    %c15_i32_213 = arith.constant 15 : i32
    %1161 = tpu.dynamic_rotate %1160 by %c15_i32_213 dim 1 : vector<8x256xf32>, i32 -> vector<8x256xf32>
    %1162 = vector.broadcast %971 : vector<1x256xf32> to vector<8x256xf32>
    %1163 = arith.mulf %1161, %1162 : vector<8x256xf32>
    %1164 = arith.addf %1149, %1163 : vector<8x256xf32>
    %1165 = vector.broadcast %40 : f32 to vector<8x256xf32>
    %1166 = arith.mulf %1165, %1108 : vector<8x256xf32>
    %1167 = vector.broadcast %49 : f32 to vector<8x256xf32>
    %1168 = arith.mulf %1167, %1112 : vector<8x256xf32>
    %1169 = arith.addf %1166, %1168 : vector<8x256xf32>
    %1170 = vector.broadcast %58 : f32 to vector<8x256xf32>
    %1171 = arith.mulf %1170, %1116 : vector<8x256xf32>
    %1172 = arith.addf %1169, %1171 : vector<8x256xf32>
    %1173 = vector.broadcast %67 : f32 to vector<8x256xf32>
    %1174 = arith.mulf %1173, %1120 : vector<8x256xf32>
    %1175 = arith.addf %1172, %1174 : vector<8x256xf32>
    %c1_i32_214 = arith.constant 1 : i32
    %1176 = tpu.dynamic_rotate %1175 by %c1_i32_214 dim 1 : vector<8x256xf32>, i32 -> vector<8x256xf32>
    %1177 = vector.broadcast %972 : vector<1x256xf32> to vector<8x256xf32>
    %1178 = arith.mulf %1176, %1177 : vector<8x256xf32>
    %1179 = arith.addf %1164, %1178 : vector<8x256xf32>
    %1180 = vector.broadcast %41 : f32 to vector<8x256xf32>
    %1181 = arith.mulf %1180, %1108 : vector<8x256xf32>
    %1182 = vector.broadcast %50 : f32 to vector<8x256xf32>
    %1183 = arith.mulf %1182, %1112 : vector<8x256xf32>
    %1184 = arith.addf %1181, %1183 : vector<8x256xf32>
    %1185 = vector.broadcast %59 : f32 to vector<8x256xf32>
    %1186 = arith.mulf %1185, %1116 : vector<8x256xf32>
    %1187 = arith.addf %1184, %1186 : vector<8x256xf32>
    %1188 = vector.broadcast %68 : f32 to vector<8x256xf32>
    %1189 = arith.mulf %1188, %1120 : vector<8x256xf32>
    %1190 = arith.addf %1187, %1189 : vector<8x256xf32>
    %1191 = arith.addf %1179, %1190 : vector<8x256xf32>
    %1192 = vector.broadcast %42 : f32 to vector<8x256xf32>
    %1193 = arith.mulf %1192, %1108 : vector<8x256xf32>
    %1194 = vector.broadcast %51 : f32 to vector<8x256xf32>
    %1195 = arith.mulf %1194, %1112 : vector<8x256xf32>
    %1196 = arith.addf %1193, %1195 : vector<8x256xf32>
    %1197 = vector.broadcast %60 : f32 to vector<8x256xf32>
    %1198 = arith.mulf %1197, %1116 : vector<8x256xf32>
    %1199 = arith.addf %1196, %1198 : vector<8x256xf32>
    %1200 = vector.broadcast %69 : f32 to vector<8x256xf32>
    %1201 = arith.mulf %1200, %1120 : vector<8x256xf32>
    %1202 = arith.addf %1199, %1201 : vector<8x256xf32>
    %c255_i32_215 = arith.constant 255 : i32
    %1203 = tpu.dynamic_rotate %1202 by %c255_i32_215 dim 1 : vector<8x256xf32>, i32 -> vector<8x256xf32>
    %1204 = vector.broadcast %973 : vector<1x256xf32> to vector<8x256xf32>
    %1205 = arith.mulf %1203, %1204 : vector<8x256xf32>
    %1206 = arith.addf %1191, %1205 : vector<8x256xf32>
    %1207 = vector.broadcast %43 : f32 to vector<8x256xf32>
    %1208 = arith.mulf %1207, %1108 : vector<8x256xf32>
    %1209 = vector.broadcast %52 : f32 to vector<8x256xf32>
    %1210 = arith.mulf %1209, %1112 : vector<8x256xf32>
    %1211 = arith.addf %1208, %1210 : vector<8x256xf32>
    %1212 = vector.broadcast %61 : f32 to vector<8x256xf32>
    %1213 = arith.mulf %1212, %1116 : vector<8x256xf32>
    %1214 = arith.addf %1211, %1213 : vector<8x256xf32>
    %1215 = vector.broadcast %70 : f32 to vector<8x256xf32>
    %1216 = arith.mulf %1215, %1120 : vector<8x256xf32>
    %1217 = arith.addf %1214, %1216 : vector<8x256xf32>
    %c241_i32_216 = arith.constant 241 : i32
    %1218 = tpu.dynamic_rotate %1217 by %c241_i32_216 dim 1 : vector<8x256xf32>, i32 -> vector<8x256xf32>
    %1219 = vector.broadcast %974 : vector<1x256xf32> to vector<8x256xf32>
    %1220 = arith.mulf %1218, %1219 : vector<8x256xf32>
    %1221 = arith.addf %1206, %1220 : vector<8x256xf32>
    %1222 = vector.broadcast %44 : f32 to vector<8x256xf32>
    %1223 = arith.mulf %1222, %1108 : vector<8x256xf32>
    %1224 = vector.broadcast %53 : f32 to vector<8x256xf32>
    %1225 = arith.mulf %1224, %1112 : vector<8x256xf32>
    %1226 = arith.addf %1223, %1225 : vector<8x256xf32>
    %1227 = vector.broadcast %62 : f32 to vector<8x256xf32>
    %1228 = arith.mulf %1227, %1116 : vector<8x256xf32>
    %1229 = arith.addf %1226, %1228 : vector<8x256xf32>
    %1230 = vector.broadcast %71 : f32 to vector<8x256xf32>
    %1231 = arith.mulf %1230, %1120 : vector<8x256xf32>
    %1232 = arith.addf %1229, %1231 : vector<8x256xf32>
    %c240_i32_217 = arith.constant 240 : i32
    %1233 = tpu.dynamic_rotate %1232 by %c240_i32_217 dim 1 : vector<8x256xf32>, i32 -> vector<8x256xf32>
    %1234 = vector.broadcast %975 : vector<1x256xf32> to vector<8x256xf32>
    %1235 = arith.mulf %1233, %1234 : vector<8x256xf32>
    %1236 = arith.addf %1221, %1235 : vector<8x256xf32>
    %1237 = vector.broadcast %45 : f32 to vector<8x256xf32>
    %1238 = arith.mulf %1237, %1108 : vector<8x256xf32>
    %1239 = vector.broadcast %54 : f32 to vector<8x256xf32>
    %1240 = arith.mulf %1239, %1112 : vector<8x256xf32>
    %1241 = arith.addf %1238, %1240 : vector<8x256xf32>
    %1242 = vector.broadcast %63 : f32 to vector<8x256xf32>
    %1243 = arith.mulf %1242, %1116 : vector<8x256xf32>
    %1244 = arith.addf %1241, %1243 : vector<8x256xf32>
    %1245 = vector.broadcast %72 : f32 to vector<8x256xf32>
    %1246 = arith.mulf %1245, %1120 : vector<8x256xf32>
    %1247 = arith.addf %1244, %1246 : vector<8x256xf32>
    %c239_i32_218 = arith.constant 239 : i32
    %1248 = tpu.dynamic_rotate %1247 by %c239_i32_218 dim 1 : vector<8x256xf32>, i32 -> vector<8x256xf32>
    %1249 = vector.broadcast %976 : vector<1x256xf32> to vector<8x256xf32>
    %1250 = arith.mulf %1248, %1249 : vector<8x256xf32>
    %1251 = arith.addf %1236, %1250 : vector<8x256xf32>
    %1252 = vector.broadcast %77 : f32 to vector<8x256xf32>
    %1253 = arith.addf %1251, %1252 : vector<8x256xf32>
    %1254 = arith.addf %968, %1253 : vector<8x256xf32>
    %c8_219 = arith.constant 8 : index
    %c0_220 = arith.constant 0 : index
    %1255 = vector.load %arg10[%c8_219, %c0_220] : memref<16x256xf32, #tpu.memory_space<vmem>>, vector<8x256xf32>
    tpu.vector_store %arg10[%c8_219, %c0_220], %1254 {strides = array<i32>} : memref<16x256xf32, #tpu.memory_space<vmem>>, vector<8x256xf32>,
    %c0_221 = arith.constant 0 : index
    %c0_222 = arith.constant 0 : index
    %1256 = vector.load %arg10[%c0_221, %c0_222] : memref<16x256xf32, #tpu.memory_space<vmem>>, vector<16x256xf32>
    %1257 = arith.truncf %1256 : vector<16x256xf32> to vector<16x256xbf16>
    %c0_223 = arith.constant 0 : index
    %c0_224 = arith.constant 0 : index
    %1258 = vector.load %arg8[%c0_223, %c0_224] : memref<256x128xbf16, #tpu.memory_space<vmem>>, vector<256x128xbf16>
    %cst_225 = arith.constant dense<0.000000e+00> : vector<16x128xf32>
    %1259 = tpu.matmul %1257, %1258, %cst_225 {dimension_numbers = #tpu.dot_dimension_numbers<[1], [0], [0], [1], [0, 0, 1, 1], [], []>} : vector<16x256xbf16>, vector<256x128xbf16>, vector<16x128xf32> -> vector<16x128xf32>
    %c0_226 = arith.constant 0 : index
    %c0_227 = arith.constant 0 : index
    %1260 = vector.load %arg11[%c0_226, %c0_227] : memref<16x128xf32, #tpu.memory_space<vmem>>, vector<16x128xf32>
    %1261 = arith.subf %1260, %1259 : vector<16x128xf32>
    %1262 = arith.truncf %1261 : vector<16x128xf32> to vector<16x128xbf16>
    %c0_228 = arith.constant 0 : index
    %c0_229 = arith.constant 0 : index
    %1263 = vector.load %arg7[%c0_228, %c0_229] : memref<128x256xbf16, #tpu.memory_space<vmem>>, vector<128x256xbf16>
    %cst_230 = arith.constant dense<0.000000e+00> : vector<16x256xf32>
    %1264 = tpu.matmul %1262, %1263, %cst_230 {dimension_numbers = #tpu.dot_dimension_numbers<[1], [0], [0], [1], [0, 0, 1, 1], [], []>} : vector<16x128xbf16>, vector<128x256xbf16>, vector<16x256xf32> -> vector<16x256xf32>
    %c0_231 = arith.constant 0 : index
    %c0_232 = arith.constant 0 : index
    %1265 = vector.load %arg10[%c0_231, %c0_232] : memref<16x256xf32, #tpu.memory_space<vmem>>, vector<16x256xf32>
    %1266 = vector.broadcast %0 : f32 to vector<16x256xf32>
    %1267 = arith.mulf %1266, %1264 : vector<16x256xf32>
    %1268 = arith.addf %1265, %1267 : vector<16x256xf32>
    %c0_233 = arith.constant 0 : index
    %c0_234 = arith.constant 0 : index
    %1269 = vector.load %arg10[%c0_233, %c0_234] : memref<16x256xf32, #tpu.memory_space<vmem>>, vector<16x256xf32>
    tpu.vector_store %arg10[%c0_233, %c0_234], %1268 {strides = array<i32>} : memref<16x256xf32, #tpu.memory_space<vmem>>, vector<16x256xf32>,
    %c0_235 = arith.constant 0 : index
    %c0_236 = arith.constant 0 : index
    %1270 = vector.load %arg10[%c0_235, %c0_236] : memref<16x256xf32, #tpu.memory_space<vmem>>, vector<8x256xf32>
    %c0_237 = arith.constant 0 : index
    %c0_238 = arith.constant 0 : index
    %1271 = vector.load %arg9[%c0_237, %c0_238] : memref<8x256xf32, #tpu.memory_space<vmem>>, vector<1x256xf32>
    %c1_239 = arith.constant 1 : index
    %c0_240 = arith.constant 0 : index
    %1272 = vector.load %arg9[%c1_239, %c0_240] : memref<8x256xf32, #tpu.memory_space<vmem>>, vector<1x256xf32>
    %c2_241 = arith.constant 2 : index
    %c0_242 = arith.constant 0 : index
    %1273 = vector.load %arg9[%c2_241, %c0_242] : memref<8x256xf32, #tpu.memory_space<vmem>>, vector<1x256xf32>
    %c3_243 = arith.constant 3 : index
    %c0_244 = arith.constant 0 : index
    %1274 = vector.load %arg9[%c3_243, %c0_244] : memref<8x256xf32, #tpu.memory_space<vmem>>, vector<1x256xf32>
    %c4_245 = arith.constant 4 : index
    %c0_246 = arith.constant 0 : index
    %1275 = vector.load %arg9[%c4_245, %c0_246] : memref<8x256xf32, #tpu.memory_space<vmem>>, vector<1x256xf32>
    %c5_247 = arith.constant 5 : index
    %c0_248 = arith.constant 0 : index
    %1276 = vector.load %arg9[%c5_247, %c0_248] : memref<8x256xf32, #tpu.memory_space<vmem>>, vector<1x256xf32>
    %c6_249 = arith.constant 6 : index
    %c0_250 = arith.constant 0 : index
    %1277 = vector.load %arg9[%c6_249, %c0_250] : memref<8x256xf32, #tpu.memory_space<vmem>>, vector<1x256xf32>
    %c7_251 = arith.constant 7 : index
    %c0_252 = arith.constant 0 : index
    %1278 = vector.load %arg9[%c7_251, %c0_252] : memref<8x256xf32, #tpu.memory_space<vmem>>, vector<1x256xf32>
    %c17_i32_253 = arith.constant 17 : i32
    %1279 = tpu.dynamic_rotate %1270 by %c17_i32_253 dim 1 : vector<8x256xf32>, i32 -> vector<8x256xf32>
    %1280 = vector.broadcast %1271 : vector<1x256xf32> to vector<8x256xf32>
    %1281 = arith.mulf %1279, %1280 : vector<8x256xf32>
    %1282 = vector.broadcast %1 : f32 to vector<8x256xf32>
    %1283 = arith.mulf %1282, %1281 : vector<8x256xf32>
    %1284 = vector.broadcast %10 : f32 to vector<8x256xf32>
    %1285 = arith.mulf %1284, %1281 : vector<8x256xf32>
    %1286 = vector.broadcast %19 : f32 to vector<8x256xf32>
    %1287 = arith.mulf %1286, %1281 : vector<8x256xf32>
    %1288 = vector.broadcast %28 : f32 to vector<8x256xf32>
    %1289 = arith.mulf %1288, %1281 : vector<8x256xf32>
    %c16_i32_254 = arith.constant 16 : i32
    %1290 = tpu.dynamic_rotate %1270 by %c16_i32_254 dim 1 : vector<8x256xf32>, i32 -> vector<8x256xf32>
    %1291 = vector.broadcast %1272 : vector<1x256xf32> to vector<8x256xf32>
    %1292 = arith.mulf %1290, %1291 : vector<8x256xf32>
    %1293 = vector.broadcast %2 : f32 to vector<8x256xf32>
    %1294 = arith.mulf %1293, %1292 : vector<8x256xf32>
    %1295 = arith.addf %1283, %1294 : vector<8x256xf32>
    %1296 = vector.broadcast %11 : f32 to vector<8x256xf32>
    %1297 = arith.mulf %1296, %1292 : vector<8x256xf32>
    %1298 = arith.addf %1285, %1297 : vector<8x256xf32>
    %1299 = vector.broadcast %20 : f32 to vector<8x256xf32>
    %1300 = arith.mulf %1299, %1292 : vector<8x256xf32>
    %1301 = arith.addf %1287, %1300 : vector<8x256xf32>
    %1302 = vector.broadcast %29 : f32 to vector<8x256xf32>
    %1303 = arith.mulf %1302, %1292 : vector<8x256xf32>
    %1304 = arith.addf %1289, %1303 : vector<8x256xf32>
    %c15_i32_255 = arith.constant 15 : i32
    %1305 = tpu.dynamic_rotate %1270 by %c15_i32_255 dim 1 : vector<8x256xf32>, i32 -> vector<8x256xf32>
    %1306 = vector.broadcast %1273 : vector<1x256xf32> to vector<8x256xf32>
    %1307 = arith.mulf %1305, %1306 : vector<8x256xf32>
    %1308 = vector.broadcast %3 : f32 to vector<8x256xf32>
    %1309 = arith.mulf %1308, %1307 : vector<8x256xf32>
    %1310 = arith.addf %1295, %1309 : vector<8x256xf32>
    %1311 = vector.broadcast %12 : f32 to vector<8x256xf32>
    %1312 = arith.mulf %1311, %1307 : vector<8x256xf32>
    %1313 = arith.addf %1298, %1312 : vector<8x256xf32>
    %1314 = vector.broadcast %21 : f32 to vector<8x256xf32>
    %1315 = arith.mulf %1314, %1307 : vector<8x256xf32>
    %1316 = arith.addf %1301, %1315 : vector<8x256xf32>
    %1317 = vector.broadcast %30 : f32 to vector<8x256xf32>
    %1318 = arith.mulf %1317, %1307 : vector<8x256xf32>
    %1319 = arith.addf %1304, %1318 : vector<8x256xf32>
    %c1_i32_256 = arith.constant 1 : i32
    %1320 = tpu.dynamic_rotate %1270 by %c1_i32_256 dim 1 : vector<8x256xf32>, i32 -> vector<8x256xf32>
    %1321 = vector.broadcast %1274 : vector<1x256xf32> to vector<8x256xf32>
    %1322 = arith.mulf %1320, %1321 : vector<8x256xf32>
    %1323 = vector.broadcast %4 : f32 to vector<8x256xf32>
    %1324 = arith.mulf %1323, %1322 : vector<8x256xf32>
    %1325 = arith.addf %1310, %1324 : vector<8x256xf32>
    %1326 = vector.broadcast %13 : f32 to vector<8x256xf32>
    %1327 = arith.mulf %1326, %1322 : vector<8x256xf32>
    %1328 = arith.addf %1313, %1327 : vector<8x256xf32>
    %1329 = vector.broadcast %22 : f32 to vector<8x256xf32>
    %1330 = arith.mulf %1329, %1322 : vector<8x256xf32>
    %1331 = arith.addf %1316, %1330 : vector<8x256xf32>
    %1332 = vector.broadcast %31 : f32 to vector<8x256xf32>
    %1333 = arith.mulf %1332, %1322 : vector<8x256xf32>
    %1334 = arith.addf %1319, %1333 : vector<8x256xf32>
    %1335 = vector.broadcast %5 : f32 to vector<8x256xf32>
    %1336 = arith.mulf %1335, %1270 : vector<8x256xf32>
    %1337 = arith.addf %1325, %1336 : vector<8x256xf32>
    %1338 = vector.broadcast %14 : f32 to vector<8x256xf32>
    %1339 = arith.mulf %1338, %1270 : vector<8x256xf32>
    %1340 = arith.addf %1328, %1339 : vector<8x256xf32>
    %1341 = vector.broadcast %23 : f32 to vector<8x256xf32>
    %1342 = arith.mulf %1341, %1270 : vector<8x256xf32>
    %1343 = arith.addf %1331, %1342 : vector<8x256xf32>
    %1344 = vector.broadcast %32 : f32 to vector<8x256xf32>
    %1345 = arith.mulf %1344, %1270 : vector<8x256xf32>
    %1346 = arith.addf %1334, %1345 : vector<8x256xf32>
    %c255_i32_257 = arith.constant 255 : i32
    %1347 = tpu.dynamic_rotate %1270 by %c255_i32_257 dim 1 : vector<8x256xf32>, i32 -> vector<8x256xf32>
    %1348 = vector.broadcast %1275 : vector<1x256xf32> to vector<8x256xf32>
    %1349 = arith.mulf %1347, %1348 : vector<8x256xf32>
    %1350 = vector.broadcast %6 : f32 to vector<8x256xf32>
    %1351 = arith.mulf %1350, %1349 : vector<8x256xf32>
    %1352 = arith.addf %1337, %1351 : vector<8x256xf32>
    %1353 = vector.broadcast %15 : f32 to vector<8x256xf32>
    %1354 = arith.mulf %1353, %1349 : vector<8x256xf32>
    %1355 = arith.addf %1340, %1354 : vector<8x256xf32>
    %1356 = vector.broadcast %24 : f32 to vector<8x256xf32>
    %1357 = arith.mulf %1356, %1349 : vector<8x256xf32>
    %1358 = arith.addf %1343, %1357 : vector<8x256xf32>
    %1359 = vector.broadcast %33 : f32 to vector<8x256xf32>
    %1360 = arith.mulf %1359, %1349 : vector<8x256xf32>
    %1361 = arith.addf %1346, %1360 : vector<8x256xf32>
    %c241_i32_258 = arith.constant 241 : i32
    %1362 = tpu.dynamic_rotate %1270 by %c241_i32_258 dim 1 : vector<8x256xf32>, i32 -> vector<8x256xf32>
    %1363 = vector.broadcast %1276 : vector<1x256xf32> to vector<8x256xf32>
    %1364 = arith.mulf %1362, %1363 : vector<8x256xf32>
    %1365 = vector.broadcast %7 : f32 to vector<8x256xf32>
    %1366 = arith.mulf %1365, %1364 : vector<8x256xf32>
    %1367 = arith.addf %1352, %1366 : vector<8x256xf32>
    %1368 = vector.broadcast %16 : f32 to vector<8x256xf32>
    %1369 = arith.mulf %1368, %1364 : vector<8x256xf32>
    %1370 = arith.addf %1355, %1369 : vector<8x256xf32>
    %1371 = vector.broadcast %25 : f32 to vector<8x256xf32>
    %1372 = arith.mulf %1371, %1364 : vector<8x256xf32>
    %1373 = arith.addf %1358, %1372 : vector<8x256xf32>
    %1374 = vector.broadcast %34 : f32 to vector<8x256xf32>
    %1375 = arith.mulf %1374, %1364 : vector<8x256xf32>
    %1376 = arith.addf %1361, %1375 : vector<8x256xf32>
    %c240_i32_259 = arith.constant 240 : i32
    %1377 = tpu.dynamic_rotate %1270 by %c240_i32_259 dim 1 : vector<8x256xf32>, i32 -> vector<8x256xf32>
    %1378 = vector.broadcast %1277 : vector<1x256xf32> to vector<8x256xf32>
    %1379 = arith.mulf %1377, %1378 : vector<8x256xf32>
    %1380 = vector.broadcast %8 : f32 to vector<8x256xf32>
    %1381 = arith.mulf %1380, %1379 : vector<8x256xf32>
    %1382 = arith.addf %1367, %1381 : vector<8x256xf32>
    %1383 = vector.broadcast %17 : f32 to vector<8x256xf32>
    %1384 = arith.mulf %1383, %1379 : vector<8x256xf32>
    %1385 = arith.addf %1370, %1384 : vector<8x256xf32>
    %1386 = vector.broadcast %26 : f32 to vector<8x256xf32>
    %1387 = arith.mulf %1386, %1379 : vector<8x256xf32>
    %1388 = arith.addf %1373, %1387 : vector<8x256xf32>
    %1389 = vector.broadcast %35 : f32 to vector<8x256xf32>
    %1390 = arith.mulf %1389, %1379 : vector<8x256xf32>
    %1391 = arith.addf %1376, %1390 : vector<8x256xf32>
    %c239_i32_260 = arith.constant 239 : i32
    %1392 = tpu.dynamic_rotate %1270 by %c239_i32_260 dim 1 : vector<8x256xf32>, i32 -> vector<8x256xf32>
    %1393 = vector.broadcast %1278 : vector<1x256xf32> to vector<8x256xf32>
    %1394 = arith.mulf %1392, %1393 : vector<8x256xf32>
    %1395 = vector.broadcast %9 : f32 to vector<8x256xf32>
    %1396 = arith.mulf %1395, %1394 : vector<8x256xf32>
    %1397 = arith.addf %1382, %1396 : vector<8x256xf32>
    %1398 = vector.broadcast %18 : f32 to vector<8x256xf32>
    %1399 = arith.mulf %1398, %1394 : vector<8x256xf32>
    %1400 = arith.addf %1385, %1399 : vector<8x256xf32>
    %1401 = vector.broadcast %27 : f32 to vector<8x256xf32>
    %1402 = arith.mulf %1401, %1394 : vector<8x256xf32>
    %1403 = arith.addf %1388, %1402 : vector<8x256xf32>
    %1404 = vector.broadcast %36 : f32 to vector<8x256xf32>
    %1405 = arith.mulf %1404, %1394 : vector<8x256xf32>
    %1406 = arith.addf %1391, %1405 : vector<8x256xf32>
    %1407 = vector.broadcast %73 : f32 to vector<8x256xf32>
    %1408 = arith.addf %1397, %1407 : vector<8x256xf32>
    %cst_261 = arith.constant 0.000000e+00 : f32
    %1409 = vector.broadcast %cst_261 : f32 to vector<8x256xf32>
    %1410 = arith.maximumf %1408, %1409 : vector<8x256xf32>
    %1411 = vector.broadcast %74 : f32 to vector<8x256xf32>
    %1412 = arith.addf %1400, %1411 : vector<8x256xf32>
    %cst_262 = arith.constant 0.000000e+00 : f32
    %1413 = vector.broadcast %cst_262 : f32 to vector<8x256xf32>
    %1414 = arith.maximumf %1412, %1413 : vector<8x256xf32>
    %1415 = vector.broadcast %75 : f32 to vector<8x256xf32>
    %1416 = arith.addf %1403, %1415 : vector<8x256xf32>
    %cst_263 = arith.constant 0.000000e+00 : f32
    %1417 = vector.broadcast %cst_263 : f32 to vector<8x256xf32>
    %1418 = arith.maximumf %1416, %1417 : vector<8x256xf32>
    %1419 = vector.broadcast %76 : f32 to vector<8x256xf32>
    %1420 = arith.addf %1406, %1419 : vector<8x256xf32>
    %cst_264 = arith.constant 0.000000e+00 : f32
    %1421 = vector.broadcast %cst_264 : f32 to vector<8x256xf32>
    %1422 = arith.maximumf %1420, %1421 : vector<8x256xf32>
    %1423 = vector.broadcast %37 : f32 to vector<8x256xf32>
    %1424 = arith.mulf %1423, %1410 : vector<8x256xf32>
    %1425 = vector.broadcast %46 : f32 to vector<8x256xf32>
    %1426 = arith.mulf %1425, %1414 : vector<8x256xf32>
    %1427 = arith.addf %1424, %1426 : vector<8x256xf32>
    %1428 = vector.broadcast %55 : f32 to vector<8x256xf32>
    %1429 = arith.mulf %1428, %1418 : vector<8x256xf32>
    %1430 = arith.addf %1427, %1429 : vector<8x256xf32>
    %1431 = vector.broadcast %64 : f32 to vector<8x256xf32>
    %1432 = arith.mulf %1431, %1422 : vector<8x256xf32>
    %1433 = arith.addf %1430, %1432 : vector<8x256xf32>
    %c17_i32_265 = arith.constant 17 : i32
    %1434 = tpu.dynamic_rotate %1433 by %c17_i32_265 dim 1 : vector<8x256xf32>, i32 -> vector<8x256xf32>
    %1435 = vector.broadcast %1271 : vector<1x256xf32> to vector<8x256xf32>
    %1436 = arith.mulf %1434, %1435 : vector<8x256xf32>
    %1437 = vector.broadcast %38 : f32 to vector<8x256xf32>
    %1438 = arith.mulf %1437, %1410 : vector<8x256xf32>
    %1439 = vector.broadcast %47 : f32 to vector<8x256xf32>
    %1440 = arith.mulf %1439, %1414 : vector<8x256xf32>
    %1441 = arith.addf %1438, %1440 : vector<8x256xf32>
    %1442 = vector.broadcast %56 : f32 to vector<8x256xf32>
    %1443 = arith.mulf %1442, %1418 : vector<8x256xf32>
    %1444 = arith.addf %1441, %1443 : vector<8x256xf32>
    %1445 = vector.broadcast %65 : f32 to vector<8x256xf32>
    %1446 = arith.mulf %1445, %1422 : vector<8x256xf32>
    %1447 = arith.addf %1444, %1446 : vector<8x256xf32>
    %c16_i32_266 = arith.constant 16 : i32
    %1448 = tpu.dynamic_rotate %1447 by %c16_i32_266 dim 1 : vector<8x256xf32>, i32 -> vector<8x256xf32>
    %1449 = vector.broadcast %1272 : vector<1x256xf32> to vector<8x256xf32>
    %1450 = arith.mulf %1448, %1449 : vector<8x256xf32>
    %1451 = arith.addf %1436, %1450 : vector<8x256xf32>
    %1452 = vector.broadcast %39 : f32 to vector<8x256xf32>
    %1453 = arith.mulf %1452, %1410 : vector<8x256xf32>
    %1454 = vector.broadcast %48 : f32 to vector<8x256xf32>
    %1455 = arith.mulf %1454, %1414 : vector<8x256xf32>
    %1456 = arith.addf %1453, %1455 : vector<8x256xf32>
    %1457 = vector.broadcast %57 : f32 to vector<8x256xf32>
    %1458 = arith.mulf %1457, %1418 : vector<8x256xf32>
    %1459 = arith.addf %1456, %1458 : vector<8x256xf32>
    %1460 = vector.broadcast %66 : f32 to vector<8x256xf32>
    %1461 = arith.mulf %1460, %1422 : vector<8x256xf32>
    %1462 = arith.addf %1459, %1461 : vector<8x256xf32>
    %c15_i32_267 = arith.constant 15 : i32
    %1463 = tpu.dynamic_rotate %1462 by %c15_i32_267 dim 1 : vector<8x256xf32>, i32 -> vector<8x256xf32>
    %1464 = vector.broadcast %1273 : vector<1x256xf32> to vector<8x256xf32>
    %1465 = arith.mulf %1463, %1464 : vector<8x256xf32>
    %1466 = arith.addf %1451, %1465 : vector<8x256xf32>
    %1467 = vector.broadcast %40 : f32 to vector<8x256xf32>
    %1468 = arith.mulf %1467, %1410 : vector<8x256xf32>
    %1469 = vector.broadcast %49 : f32 to vector<8x256xf32>
    %1470 = arith.mulf %1469, %1414 : vector<8x256xf32>
    %1471 = arith.addf %1468, %1470 : vector<8x256xf32>
    %1472 = vector.broadcast %58 : f32 to vector<8x256xf32>
    %1473 = arith.mulf %1472, %1418 : vector<8x256xf32>
    %1474 = arith.addf %1471, %1473 : vector<8x256xf32>
    %1475 = vector.broadcast %67 : f32 to vector<8x256xf32>
    %1476 = arith.mulf %1475, %1422 : vector<8x256xf32>
    %1477 = arith.addf %1474, %1476 : vector<8x256xf32>
    %c1_i32_268 = arith.constant 1 : i32
    %1478 = tpu.dynamic_rotate %1477 by %c1_i32_268 dim 1 : vector<8x256xf32>, i32 -> vector<8x256xf32>
    %1479 = vector.broadcast %1274 : vector<1x256xf32> to vector<8x256xf32>
    %1480 = arith.mulf %1478, %1479 : vector<8x256xf32>
    %1481 = arith.addf %1466, %1480 : vector<8x256xf32>
    %1482 = vector.broadcast %41 : f32 to vector<8x256xf32>
    %1483 = arith.mulf %1482, %1410 : vector<8x256xf32>
    %1484 = vector.broadcast %50 : f32 to vector<8x256xf32>
    %1485 = arith.mulf %1484, %1414 : vector<8x256xf32>
    %1486 = arith.addf %1483, %1485 : vector<8x256xf32>
    %1487 = vector.broadcast %59 : f32 to vector<8x256xf32>
    %1488 = arith.mulf %1487, %1418 : vector<8x256xf32>
    %1489 = arith.addf %1486, %1488 : vector<8x256xf32>
    %1490 = vector.broadcast %68 : f32 to vector<8x256xf32>
    %1491 = arith.mulf %1490, %1422 : vector<8x256xf32>
    %1492 = arith.addf %1489, %1491 : vector<8x256xf32>
    %1493 = arith.addf %1481, %1492 : vector<8x256xf32>
    %1494 = vector.broadcast %42 : f32 to vector<8x256xf32>
    %1495 = arith.mulf %1494, %1410 : vector<8x256xf32>
    %1496 = vector.broadcast %51 : f32 to vector<8x256xf32>
    %1497 = arith.mulf %1496, %1414 : vector<8x256xf32>
    %1498 = arith.addf %1495, %1497 : vector<8x256xf32>
    %1499 = vector.broadcast %60 : f32 to vector<8x256xf32>
    %1500 = arith.mulf %1499, %1418 : vector<8x256xf32>
    %1501 = arith.addf %1498, %1500 : vector<8x256xf32>
    %1502 = vector.broadcast %69 : f32 to vector<8x256xf32>
    %1503 = arith.mulf %1502, %1422 : vector<8x256xf32>
    %1504 = arith.addf %1501, %1503 : vector<8x256xf32>
    %c255_i32_269 = arith.constant 255 : i32
    %1505 = tpu.dynamic_rotate %1504 by %c255_i32_269 dim 1 : vector<8x256xf32>, i32 -> vector<8x256xf32>
    %1506 = vector.broadcast %1275 : vector<1x256xf32> to vector<8x256xf32>
    %1507 = arith.mulf %1505, %1506 : vector<8x256xf32>
    %1508 = arith.addf %1493, %1507 : vector<8x256xf32>
    %1509 = vector.broadcast %43 : f32 to vector<8x256xf32>
    %1510 = arith.mulf %1509, %1410 : vector<8x256xf32>
    %1511 = vector.broadcast %52 : f32 to vector<8x256xf32>
    %1512 = arith.mulf %1511, %1414 : vector<8x256xf32>
    %1513 = arith.addf %1510, %1512 : vector<8x256xf32>
    %1514 = vector.broadcast %61 : f32 to vector<8x256xf32>
    %1515 = arith.mulf %1514, %1418 : vector<8x256xf32>
    %1516 = arith.addf %1513, %1515 : vector<8x256xf32>
    %1517 = vector.broadcast %70 : f32 to vector<8x256xf32>
    %1518 = arith.mulf %1517, %1422 : vector<8x256xf32>
    %1519 = arith.addf %1516, %1518 : vector<8x256xf32>
    %c241_i32_270 = arith.constant 241 : i32
    %1520 = tpu.dynamic_rotate %1519 by %c241_i32_270 dim 1 : vector<8x256xf32>, i32 -> vector<8x256xf32>
    %1521 = vector.broadcast %1276 : vector<1x256xf32> to vector<8x256xf32>
    %1522 = arith.mulf %1520, %1521 : vector<8x256xf32>
    %1523 = arith.addf %1508, %1522 : vector<8x256xf32>
    %1524 = vector.broadcast %44 : f32 to vector<8x256xf32>
    %1525 = arith.mulf %1524, %1410 : vector<8x256xf32>
    %1526 = vector.broadcast %53 : f32 to vector<8x256xf32>
    %1527 = arith.mulf %1526, %1414 : vector<8x256xf32>
    %1528 = arith.addf %1525, %1527 : vector<8x256xf32>
    %1529 = vector.broadcast %62 : f32 to vector<8x256xf32>
    %1530 = arith.mulf %1529, %1418 : vector<8x256xf32>
    %1531 = arith.addf %1528, %1530 : vector<8x256xf32>
    %1532 = vector.broadcast %71 : f32 to vector<8x256xf32>
    %1533 = arith.mulf %1532, %1422 : vector<8x256xf32>
    %1534 = arith.addf %1531, %1533 : vector<8x256xf32>
    %c240_i32_271 = arith.constant 240 : i32
    %1535 = tpu.dynamic_rotate %1534 by %c240_i32_271 dim 1 : vector<8x256xf32>, i32 -> vector<8x256xf32>
    %1536 = vector.broadcast %1277 : vector<1x256xf32> to vector<8x256xf32>
    %1537 = arith.mulf %1535, %1536 : vector<8x256xf32>
    %1538 = arith.addf %1523, %1537 : vector<8x256xf32>
    %1539 = vector.broadcast %45 : f32 to vector<8x256xf32>
    %1540 = arith.mulf %1539, %1410 : vector<8x256xf32>
    %1541 = vector.broadcast %54 : f32 to vector<8x256xf32>
    %1542 = arith.mulf %1541, %1414 : vector<8x256xf32>
    %1543 = arith.addf %1540, %1542 : vector<8x256xf32>
    %1544 = vector.broadcast %63 : f32 to vector<8x256xf32>
    %1545 = arith.mulf %1544, %1418 : vector<8x256xf32>
    %1546 = arith.addf %1543, %1545 : vector<8x256xf32>
    %1547 = vector.broadcast %72 : f32 to vector<8x256xf32>
    %1548 = arith.mulf %1547, %1422 : vector<8x256xf32>
    %1549 = arith.addf %1546, %1548 : vector<8x256xf32>
    %c239_i32_272 = arith.constant 239 : i32
    %1550 = tpu.dynamic_rotate %1549 by %c239_i32_272 dim 1 : vector<8x256xf32>, i32 -> vector<8x256xf32>
    %1551 = vector.broadcast %1278 : vector<1x256xf32> to vector<8x256xf32>
    %1552 = arith.mulf %1550, %1551 : vector<8x256xf32>
    %1553 = arith.addf %1538, %1552 : vector<8x256xf32>
    %1554 = vector.broadcast %77 : f32 to vector<8x256xf32>
    %1555 = arith.addf %1553, %1554 : vector<8x256xf32>
    %1556 = arith.addf %1270, %1555 : vector<8x256xf32>
    %c0_273 = arith.constant 0 : index
    %c0_274 = arith.constant 0 : index
    %1557 = vector.load %arg10[%c0_273, %c0_274] : memref<16x256xf32, #tpu.memory_space<vmem>>, vector<8x256xf32>
    tpu.vector_store %arg10[%c0_273, %c0_274], %1556 {strides = array<i32>} : memref<16x256xf32, #tpu.memory_space<vmem>>, vector<8x256xf32>,
    %c8_275 = arith.constant 8 : index
    %c0_276 = arith.constant 0 : index
    %1558 = vector.load %arg10[%c8_275, %c0_276] : memref<16x256xf32, #tpu.memory_space<vmem>>, vector<8x256xf32>
    %c0_277 = arith.constant 0 : index
    %c0_278 = arith.constant 0 : index
    %1559 = vector.load %arg9[%c0_277, %c0_278] : memref<8x256xf32, #tpu.memory_space<vmem>>, vector<1x256xf32>
    %c1_279 = arith.constant 1 : index
    %c0_280 = arith.constant 0 : index
    %1560 = vector.load %arg9[%c1_279, %c0_280] : memref<8x256xf32, #tpu.memory_space<vmem>>, vector<1x256xf32>
    %c2_281 = arith.constant 2 : index
    %c0_282 = arith.constant 0 : index
    %1561 = vector.load %arg9[%c2_281, %c0_282] : memref<8x256xf32, #tpu.memory_space<vmem>>, vector<1x256xf32>
    %c3_283 = arith.constant 3 : index
    %c0_284 = arith.constant 0 : index
    %1562 = vector.load %arg9[%c3_283, %c0_284] : memref<8x256xf32, #tpu.memory_space<vmem>>, vector<1x256xf32>
    %c4_285 = arith.constant 4 : index
    %c0_286 = arith.constant 0 : index
    %1563 = vector.load %arg9[%c4_285, %c0_286] : memref<8x256xf32, #tpu.memory_space<vmem>>, vector<1x256xf32>
    %c5_287 = arith.constant 5 : index
    %c0_288 = arith.constant 0 : index
    %1564 = vector.load %arg9[%c5_287, %c0_288] : memref<8x256xf32, #tpu.memory_space<vmem>>, vector<1x256xf32>
    %c6_289 = arith.constant 6 : index
    %c0_290 = arith.constant 0 : index
    %1565 = vector.load %arg9[%c6_289, %c0_290] : memref<8x256xf32, #tpu.memory_space<vmem>>, vector<1x256xf32>
    %c7_291 = arith.constant 7 : index
    %c0_292 = arith.constant 0 : index
    %1566 = vector.load %arg9[%c7_291, %c0_292] : memref<8x256xf32, #tpu.memory_space<vmem>>, vector<1x256xf32>
    %c17_i32_293 = arith.constant 17 : i32
    %1567 = tpu.dynamic_rotate %1558 by %c17_i32_293 dim 1 : vector<8x256xf32>, i32 -> vector<8x256xf32>
    %1568 = vector.broadcast %1559 : vector<1x256xf32> to vector<8x256xf32>
    %1569 = arith.mulf %1567, %1568 : vector<8x256xf32>
    %1570 = vector.broadcast %1 : f32 to vector<8x256xf32>
    %1571 = arith.mulf %1570, %1569 : vector<8x256xf32>
    %1572 = vector.broadcast %10 : f32 to vector<8x256xf32>
    %1573 = arith.mulf %1572, %1569 : vector<8x256xf32>
    %1574 = vector.broadcast %19 : f32 to vector<8x256xf32>
    %1575 = arith.mulf %1574, %1569 : vector<8x256xf32>
    %1576 = vector.broadcast %28 : f32 to vector<8x256xf32>
    %1577 = arith.mulf %1576, %1569 : vector<8x256xf32>
    %c16_i32_294 = arith.constant 16 : i32
    %1578 = tpu.dynamic_rotate %1558 by %c16_i32_294 dim 1 : vector<8x256xf32>, i32 -> vector<8x256xf32>
    %1579 = vector.broadcast %1560 : vector<1x256xf32> to vector<8x256xf32>
    %1580 = arith.mulf %1578, %1579 : vector<8x256xf32>
    %1581 = vector.broadcast %2 : f32 to vector<8x256xf32>
    %1582 = arith.mulf %1581, %1580 : vector<8x256xf32>
    %1583 = arith.addf %1571, %1582 : vector<8x256xf32>
    %1584 = vector.broadcast %11 : f32 to vector<8x256xf32>
    %1585 = arith.mulf %1584, %1580 : vector<8x256xf32>
    %1586 = arith.addf %1573, %1585 : vector<8x256xf32>
    %1587 = vector.broadcast %20 : f32 to vector<8x256xf32>
    %1588 = arith.mulf %1587, %1580 : vector<8x256xf32>
    %1589 = arith.addf %1575, %1588 : vector<8x256xf32>
    %1590 = vector.broadcast %29 : f32 to vector<8x256xf32>
    %1591 = arith.mulf %1590, %1580 : vector<8x256xf32>
    %1592 = arith.addf %1577, %1591 : vector<8x256xf32>
    %c15_i32_295 = arith.constant 15 : i32
    %1593 = tpu.dynamic_rotate %1558 by %c15_i32_295 dim 1 : vector<8x256xf32>, i32 -> vector<8x256xf32>
    %1594 = vector.broadcast %1561 : vector<1x256xf32> to vector<8x256xf32>
    %1595 = arith.mulf %1593, %1594 : vector<8x256xf32>
    %1596 = vector.broadcast %3 : f32 to vector<8x256xf32>
    %1597 = arith.mulf %1596, %1595 : vector<8x256xf32>
    %1598 = arith.addf %1583, %1597 : vector<8x256xf32>
    %1599 = vector.broadcast %12 : f32 to vector<8x256xf32>
    %1600 = arith.mulf %1599, %1595 : vector<8x256xf32>
    %1601 = arith.addf %1586, %1600 : vector<8x256xf32>
    %1602 = vector.broadcast %21 : f32 to vector<8x256xf32>
    %1603 = arith.mulf %1602, %1595 : vector<8x256xf32>
    %1604 = arith.addf %1589, %1603 : vector<8x256xf32>
    %1605 = vector.broadcast %30 : f32 to vector<8x256xf32>
    %1606 = arith.mulf %1605, %1595 : vector<8x256xf32>
    %1607 = arith.addf %1592, %1606 : vector<8x256xf32>
    %c1_i32_296 = arith.constant 1 : i32
    %1608 = tpu.dynamic_rotate %1558 by %c1_i32_296 dim 1 : vector<8x256xf32>, i32 -> vector<8x256xf32>
    %1609 = vector.broadcast %1562 : vector<1x256xf32> to vector<8x256xf32>
    %1610 = arith.mulf %1608, %1609 : vector<8x256xf32>
    %1611 = vector.broadcast %4 : f32 to vector<8x256xf32>
    %1612 = arith.mulf %1611, %1610 : vector<8x256xf32>
    %1613 = arith.addf %1598, %1612 : vector<8x256xf32>
    %1614 = vector.broadcast %13 : f32 to vector<8x256xf32>
    %1615 = arith.mulf %1614, %1610 : vector<8x256xf32>
    %1616 = arith.addf %1601, %1615 : vector<8x256xf32>
    %1617 = vector.broadcast %22 : f32 to vector<8x256xf32>
    %1618 = arith.mulf %1617, %1610 : vector<8x256xf32>
    %1619 = arith.addf %1604, %1618 : vector<8x256xf32>
    %1620 = vector.broadcast %31 : f32 to vector<8x256xf32>
    %1621 = arith.mulf %1620, %1610 : vector<8x256xf32>
    %1622 = arith.addf %1607, %1621 : vector<8x256xf32>
    %1623 = vector.broadcast %5 : f32 to vector<8x256xf32>
    %1624 = arith.mulf %1623, %1558 : vector<8x256xf32>
    %1625 = arith.addf %1613, %1624 : vector<8x256xf32>
    %1626 = vector.broadcast %14 : f32 to vector<8x256xf32>
    %1627 = arith.mulf %1626, %1558 : vector<8x256xf32>
    %1628 = arith.addf %1616, %1627 : vector<8x256xf32>
    %1629 = vector.broadcast %23 : f32 to vector<8x256xf32>
    %1630 = arith.mulf %1629, %1558 : vector<8x256xf32>
    %1631 = arith.addf %1619, %1630 : vector<8x256xf32>
    %1632 = vector.broadcast %32 : f32 to vector<8x256xf32>
    %1633 = arith.mulf %1632, %1558 : vector<8x256xf32>
    %1634 = arith.addf %1622, %1633 : vector<8x256xf32>
    %c255_i32_297 = arith.constant 255 : i32
    %1635 = tpu.dynamic_rotate %1558 by %c255_i32_297 dim 1 : vector<8x256xf32>, i32 -> vector<8x256xf32>
    %1636 = vector.broadcast %1563 : vector<1x256xf32> to vector<8x256xf32>
    %1637 = arith.mulf %1635, %1636 : vector<8x256xf32>
    %1638 = vector.broadcast %6 : f32 to vector<8x256xf32>
    %1639 = arith.mulf %1638, %1637 : vector<8x256xf32>
    %1640 = arith.addf %1625, %1639 : vector<8x256xf32>
    %1641 = vector.broadcast %15 : f32 to vector<8x256xf32>
    %1642 = arith.mulf %1641, %1637 : vector<8x256xf32>
    %1643 = arith.addf %1628, %1642 : vector<8x256xf32>
    %1644 = vector.broadcast %24 : f32 to vector<8x256xf32>
    %1645 = arith.mulf %1644, %1637 : vector<8x256xf32>
    %1646 = arith.addf %1631, %1645 : vector<8x256xf32>
    %1647 = vector.broadcast %33 : f32 to vector<8x256xf32>
    %1648 = arith.mulf %1647, %1637 : vector<8x256xf32>
    %1649 = arith.addf %1634, %1648 : vector<8x256xf32>
    %c241_i32_298 = arith.constant 241 : i32
    %1650 = tpu.dynamic_rotate %1558 by %c241_i32_298 dim 1 : vector<8x256xf32>, i32 -> vector<8x256xf32>
    %1651 = vector.broadcast %1564 : vector<1x256xf32> to vector<8x256xf32>
    %1652 = arith.mulf %1650, %1651 : vector<8x256xf32>
    %1653 = vector.broadcast %7 : f32 to vector<8x256xf32>
    %1654 = arith.mulf %1653, %1652 : vector<8x256xf32>
    %1655 = arith.addf %1640, %1654 : vector<8x256xf32>
    %1656 = vector.broadcast %16 : f32 to vector<8x256xf32>
    %1657 = arith.mulf %1656, %1652 : vector<8x256xf32>
    %1658 = arith.addf %1643, %1657 : vector<8x256xf32>
    %1659 = vector.broadcast %25 : f32 to vector<8x256xf32>
    %1660 = arith.mulf %1659, %1652 : vector<8x256xf32>
    %1661 = arith.addf %1646, %1660 : vector<8x256xf32>
    %1662 = vector.broadcast %34 : f32 to vector<8x256xf32>
    %1663 = arith.mulf %1662, %1652 : vector<8x256xf32>
    %1664 = arith.addf %1649, %1663 : vector<8x256xf32>
    %c240_i32_299 = arith.constant 240 : i32
    %1665 = tpu.dynamic_rotate %1558 by %c240_i32_299 dim 1 : vector<8x256xf32>, i32 -> vector<8x256xf32>
    %1666 = vector.broadcast %1565 : vector<1x256xf32> to vector<8x256xf32>
    %1667 = arith.mulf %1665, %1666 : vector<8x256xf32>
    %1668 = vector.broadcast %8 : f32 to vector<8x256xf32>
    %1669 = arith.mulf %1668, %1667 : vector<8x256xf32>
    %1670 = arith.addf %1655, %1669 : vector<8x256xf32>
    %1671 = vector.broadcast %17 : f32 to vector<8x256xf32>
    %1672 = arith.mulf %1671, %1667 : vector<8x256xf32>
    %1673 = arith.addf %1658, %1672 : vector<8x256xf32>
    %1674 = vector.broadcast %26 : f32 to vector<8x256xf32>
    %1675 = arith.mulf %1674, %1667 : vector<8x256xf32>
    %1676 = arith.addf %1661, %1675 : vector<8x256xf32>
    %1677 = vector.broadcast %35 : f32 to vector<8x256xf32>
    %1678 = arith.mulf %1677, %1667 : vector<8x256xf32>
    %1679 = arith.addf %1664, %1678 : vector<8x256xf32>
    %c239_i32_300 = arith.constant 239 : i32
    %1680 = tpu.dynamic_rotate %1558 by %c239_i32_300 dim 1 : vector<8x256xf32>, i32 -> vector<8x256xf32>
    %1681 = vector.broadcast %1566 : vector<1x256xf32> to vector<8x256xf32>
    %1682 = arith.mulf %1680, %1681 : vector<8x256xf32>
    %1683 = vector.broadcast %9 : f32 to vector<8x256xf32>
    %1684 = arith.mulf %1683, %1682 : vector<8x256xf32>
    %1685 = arith.addf %1670, %1684 : vector<8x256xf32>
    %1686 = vector.broadcast %18 : f32 to vector<8x256xf32>
    %1687 = arith.mulf %1686, %1682 : vector<8x256xf32>
    %1688 = arith.addf %1673, %1687 : vector<8x256xf32>
    %1689 = vector.broadcast %27 : f32 to vector<8x256xf32>
    %1690 = arith.mulf %1689, %1682 : vector<8x256xf32>
    %1691 = arith.addf %1676, %1690 : vector<8x256xf32>
    %1692 = vector.broadcast %36 : f32 to vector<8x256xf32>
    %1693 = arith.mulf %1692, %1682 : vector<8x256xf32>
    %1694 = arith.addf %1679, %1693 : vector<8x256xf32>
    %1695 = vector.broadcast %73 : f32 to vector<8x256xf32>
    %1696 = arith.addf %1685, %1695 : vector<8x256xf32>
    %cst_301 = arith.constant 0.000000e+00 : f32
    %1697 = vector.broadcast %cst_301 : f32 to vector<8x256xf32>
    %1698 = arith.maximumf %1696, %1697 : vector<8x256xf32>
    %1699 = vector.broadcast %74 : f32 to vector<8x256xf32>
    %1700 = arith.addf %1688, %1699 : vector<8x256xf32>
    %cst_302 = arith.constant 0.000000e+00 : f32
    %1701 = vector.broadcast %cst_302 : f32 to vector<8x256xf32>
    %1702 = arith.maximumf %1700, %1701 : vector<8x256xf32>
    %1703 = vector.broadcast %75 : f32 to vector<8x256xf32>
    %1704 = arith.addf %1691, %1703 : vector<8x256xf32>
    %cst_303 = arith.constant 0.000000e+00 : f32
    %1705 = vector.broadcast %cst_303 : f32 to vector<8x256xf32>
    %1706 = arith.maximumf %1704, %1705 : vector<8x256xf32>
    %1707 = vector.broadcast %76 : f32 to vector<8x256xf32>
    %1708 = arith.addf %1694, %1707 : vector<8x256xf32>
    %cst_304 = arith.constant 0.000000e+00 : f32
    %1709 = vector.broadcast %cst_304 : f32 to vector<8x256xf32>
    %1710 = arith.maximumf %1708, %1709 : vector<8x256xf32>
    %1711 = vector.broadcast %37 : f32 to vector<8x256xf32>
    %1712 = arith.mulf %1711, %1698 : vector<8x256xf32>
    %1713 = vector.broadcast %46 : f32 to vector<8x256xf32>
    %1714 = arith.mulf %1713, %1702 : vector<8x256xf32>
    %1715 = arith.addf %1712, %1714 : vector<8x256xf32>
    %1716 = vector.broadcast %55 : f32 to vector<8x256xf32>
    %1717 = arith.mulf %1716, %1706 : vector<8x256xf32>
    %1718 = arith.addf %1715, %1717 : vector<8x256xf32>
    %1719 = vector.broadcast %64 : f32 to vector<8x256xf32>
    %1720 = arith.mulf %1719, %1710 : vector<8x256xf32>
    %1721 = arith.addf %1718, %1720 : vector<8x256xf32>
    %c17_i32_305 = arith.constant 17 : i32
    %1722 = tpu.dynamic_rotate %1721 by %c17_i32_305 dim 1 : vector<8x256xf32>, i32 -> vector<8x256xf32>
    %1723 = vector.broadcast %1559 : vector<1x256xf32> to vector<8x256xf32>
    %1724 = arith.mulf %1722, %1723 : vector<8x256xf32>
    %1725 = vector.broadcast %38 : f32 to vector<8x256xf32>
    %1726 = arith.mulf %1725, %1698 : vector<8x256xf32>
    %1727 = vector.broadcast %47 : f32 to vector<8x256xf32>
    %1728 = arith.mulf %1727, %1702 : vector<8x256xf32>
    %1729 = arith.addf %1726, %1728 : vector<8x256xf32>
    %1730 = vector.broadcast %56 : f32 to vector<8x256xf32>
    %1731 = arith.mulf %1730, %1706 : vector<8x256xf32>
    %1732 = arith.addf %1729, %1731 : vector<8x256xf32>
    %1733 = vector.broadcast %65 : f32 to vector<8x256xf32>
    %1734 = arith.mulf %1733, %1710 : vector<8x256xf32>
    %1735 = arith.addf %1732, %1734 : vector<8x256xf32>
    %c16_i32_306 = arith.constant 16 : i32
    %1736 = tpu.dynamic_rotate %1735 by %c16_i32_306 dim 1 : vector<8x256xf32>, i32 -> vector<8x256xf32>
    %1737 = vector.broadcast %1560 : vector<1x256xf32> to vector<8x256xf32>
    %1738 = arith.mulf %1736, %1737 : vector<8x256xf32>
    %1739 = arith.addf %1724, %1738 : vector<8x256xf32>
    %1740 = vector.broadcast %39 : f32 to vector<8x256xf32>
    %1741 = arith.mulf %1740, %1698 : vector<8x256xf32>
    %1742 = vector.broadcast %48 : f32 to vector<8x256xf32>
    %1743 = arith.mulf %1742, %1702 : vector<8x256xf32>
    %1744 = arith.addf %1741, %1743 : vector<8x256xf32>
    %1745 = vector.broadcast %57 : f32 to vector<8x256xf32>
    %1746 = arith.mulf %1745, %1706 : vector<8x256xf32>
    %1747 = arith.addf %1744, %1746 : vector<8x256xf32>
    %1748 = vector.broadcast %66 : f32 to vector<8x256xf32>
    %1749 = arith.mulf %1748, %1710 : vector<8x256xf32>
    %1750 = arith.addf %1747, %1749 : vector<8x256xf32>
    %c15_i32_307 = arith.constant 15 : i32
    %1751 = tpu.dynamic_rotate %1750 by %c15_i32_307 dim 1 : vector<8x256xf32>, i32 -> vector<8x256xf32>
    %1752 = vector.broadcast %1561 : vector<1x256xf32> to vector<8x256xf32>
    %1753 = arith.mulf %1751, %1752 : vector<8x256xf32>
    %1754 = arith.addf %1739, %1753 : vector<8x256xf32>
    %1755 = vector.broadcast %40 : f32 to vector<8x256xf32>
    %1756 = arith.mulf %1755, %1698 : vector<8x256xf32>
    %1757 = vector.broadcast %49 : f32 to vector<8x256xf32>
    %1758 = arith.mulf %1757, %1702 : vector<8x256xf32>
    %1759 = arith.addf %1756, %1758 : vector<8x256xf32>
    %1760 = vector.broadcast %58 : f32 to vector<8x256xf32>
    %1761 = arith.mulf %1760, %1706 : vector<8x256xf32>
    %1762 = arith.addf %1759, %1761 : vector<8x256xf32>
    %1763 = vector.broadcast %67 : f32 to vector<8x256xf32>
    %1764 = arith.mulf %1763, %1710 : vector<8x256xf32>
    %1765 = arith.addf %1762, %1764 : vector<8x256xf32>
    %c1_i32_308 = arith.constant 1 : i32
    %1766 = tpu.dynamic_rotate %1765 by %c1_i32_308 dim 1 : vector<8x256xf32>, i32 -> vector<8x256xf32>
    %1767 = vector.broadcast %1562 : vector<1x256xf32> to vector<8x256xf32>
    %1768 = arith.mulf %1766, %1767 : vector<8x256xf32>
    %1769 = arith.addf %1754, %1768 : vector<8x256xf32>
    %1770 = vector.broadcast %41 : f32 to vector<8x256xf32>
    %1771 = arith.mulf %1770, %1698 : vector<8x256xf32>
    %1772 = vector.broadcast %50 : f32 to vector<8x256xf32>
    %1773 = arith.mulf %1772, %1702 : vector<8x256xf32>
    %1774 = arith.addf %1771, %1773 : vector<8x256xf32>
    %1775 = vector.broadcast %59 : f32 to vector<8x256xf32>
    %1776 = arith.mulf %1775, %1706 : vector<8x256xf32>
    %1777 = arith.addf %1774, %1776 : vector<8x256xf32>
    %1778 = vector.broadcast %68 : f32 to vector<8x256xf32>
    %1779 = arith.mulf %1778, %1710 : vector<8x256xf32>
    %1780 = arith.addf %1777, %1779 : vector<8x256xf32>
    %1781 = arith.addf %1769, %1780 : vector<8x256xf32>
    %1782 = vector.broadcast %42 : f32 to vector<8x256xf32>
    %1783 = arith.mulf %1782, %1698 : vector<8x256xf32>
    %1784 = vector.broadcast %51 : f32 to vector<8x256xf32>
    %1785 = arith.mulf %1784, %1702 : vector<8x256xf32>
    %1786 = arith.addf %1783, %1785 : vector<8x256xf32>
    %1787 = vector.broadcast %60 : f32 to vector<8x256xf32>
    %1788 = arith.mulf %1787, %1706 : vector<8x256xf32>
    %1789 = arith.addf %1786, %1788 : vector<8x256xf32>
    %1790 = vector.broadcast %69 : f32 to vector<8x256xf32>
    %1791 = arith.mulf %1790, %1710 : vector<8x256xf32>
    %1792 = arith.addf %1789, %1791 : vector<8x256xf32>
    %c255_i32_309 = arith.constant 255 : i32
    %1793 = tpu.dynamic_rotate %1792 by %c255_i32_309 dim 1 : vector<8x256xf32>, i32 -> vector<8x256xf32>
    %1794 = vector.broadcast %1563 : vector<1x256xf32> to vector<8x256xf32>
    %1795 = arith.mulf %1793, %1794 : vector<8x256xf32>
    %1796 = arith.addf %1781, %1795 : vector<8x256xf32>
    %1797 = vector.broadcast %43 : f32 to vector<8x256xf32>
    %1798 = arith.mulf %1797, %1698 : vector<8x256xf32>
    %1799 = vector.broadcast %52 : f32 to vector<8x256xf32>
    %1800 = arith.mulf %1799, %1702 : vector<8x256xf32>
    %1801 = arith.addf %1798, %1800 : vector<8x256xf32>
    %1802 = vector.broadcast %61 : f32 to vector<8x256xf32>
    %1803 = arith.mulf %1802, %1706 : vector<8x256xf32>
    %1804 = arith.addf %1801, %1803 : vector<8x256xf32>
    %1805 = vector.broadcast %70 : f32 to vector<8x256xf32>
    %1806 = arith.mulf %1805, %1710 : vector<8x256xf32>
    %1807 = arith.addf %1804, %1806 : vector<8x256xf32>
    %c241_i32_310 = arith.constant 241 : i32
    %1808 = tpu.dynamic_rotate %1807 by %c241_i32_310 dim 1 : vector<8x256xf32>, i32 -> vector<8x256xf32>
    %1809 = vector.broadcast %1564 : vector<1x256xf32> to vector<8x256xf32>
    %1810 = arith.mulf %1808, %1809 : vector<8x256xf32>
    %1811 = arith.addf %1796, %1810 : vector<8x256xf32>
    %1812 = vector.broadcast %44 : f32 to vector<8x256xf32>
    %1813 = arith.mulf %1812, %1698 : vector<8x256xf32>
    %1814 = vector.broadcast %53 : f32 to vector<8x256xf32>
    %1815 = arith.mulf %1814, %1702 : vector<8x256xf32>
    %1816 = arith.addf %1813, %1815 : vector<8x256xf32>
    %1817 = vector.broadcast %62 : f32 to vector<8x256xf32>
    %1818 = arith.mulf %1817, %1706 : vector<8x256xf32>
    %1819 = arith.addf %1816, %1818 : vector<8x256xf32>
    %1820 = vector.broadcast %71 : f32 to vector<8x256xf32>
    %1821 = arith.mulf %1820, %1710 : vector<8x256xf32>
    %1822 = arith.addf %1819, %1821 : vector<8x256xf32>
    %c240_i32_311 = arith.constant 240 : i32
    %1823 = tpu.dynamic_rotate %1822 by %c240_i32_311 dim 1 : vector<8x256xf32>, i32 -> vector<8x256xf32>
    %1824 = vector.broadcast %1565 : vector<1x256xf32> to vector<8x256xf32>
    %1825 = arith.mulf %1823, %1824 : vector<8x256xf32>
    %1826 = arith.addf %1811, %1825 : vector<8x256xf32>
    %1827 = vector.broadcast %45 : f32 to vector<8x256xf32>
    %1828 = arith.mulf %1827, %1698 : vector<8x256xf32>
    %1829 = vector.broadcast %54 : f32 to vector<8x256xf32>
    %1830 = arith.mulf %1829, %1702 : vector<8x256xf32>
    %1831 = arith.addf %1828, %1830 : vector<8x256xf32>
    %1832 = vector.broadcast %63 : f32 to vector<8x256xf32>
    %1833 = arith.mulf %1832, %1706 : vector<8x256xf32>
    %1834 = arith.addf %1831, %1833 : vector<8x256xf32>
    %1835 = vector.broadcast %72 : f32 to vector<8x256xf32>
    %1836 = arith.mulf %1835, %1710 : vector<8x256xf32>
    %1837 = arith.addf %1834, %1836 : vector<8x256xf32>
    %c239_i32_312 = arith.constant 239 : i32
    %1838 = tpu.dynamic_rotate %1837 by %c239_i32_312 dim 1 : vector<8x256xf32>, i32 -> vector<8x256xf32>
    %1839 = vector.broadcast %1566 : vector<1x256xf32> to vector<8x256xf32>
    %1840 = arith.mulf %1838, %1839 : vector<8x256xf32>
    %1841 = arith.addf %1826, %1840 : vector<8x256xf32>
    %1842 = vector.broadcast %77 : f32 to vector<8x256xf32>
    %1843 = arith.addf %1841, %1842 : vector<8x256xf32>
    %1844 = arith.addf %1558, %1843 : vector<8x256xf32>
    %c8_313 = arith.constant 8 : index
    %c0_314 = arith.constant 0 : index
    %1845 = vector.load %arg10[%c8_313, %c0_314] : memref<16x256xf32, #tpu.memory_space<vmem>>, vector<8x256xf32>
    tpu.vector_store %arg10[%c8_313, %c0_314], %1844 {strides = array<i32>} : memref<16x256xf32, #tpu.memory_space<vmem>>, vector<8x256xf32>,
    return
  }
  func.func @transform_0(%arg0: i32) -> i32 {
    %c0_i32 = arith.constant 0 : i32
    %c0_i32_0 = arith.constant 0 : i32
    return %c0_i32 : i32
  }
  func.func @transform_1(%arg0: i32) -> i32 {
    %c0_i32 = arith.constant 0 : i32
    %c0_i32_0 = arith.constant 0 : i32
    return %c0_i32 : i32
  }
  func.func @transform_2(%arg0: i32) -> i32 {
    %c0_i32 = arith.constant 0 : i32
    %c0_i32_0 = arith.constant 0 : i32
    return %c0_i32 : i32
  }
  func.func @transform_3(%arg0: i32) -> i32 {
    %c0_i32 = arith.constant 0 : i32
    %c0_i32_0 = arith.constant 0 : i32
    return %c0_i32 : i32
  }
  func.func @transform_4(%arg0: i32) -> i32 {
    %c0_i32 = arith.constant 0 : i32
    %c0_i32_0 = arith.constant 0 : i32
    return %c0_i32 : i32
  }
  func.func @transform_5(%arg0: i32) -> (i32, i32) {
    %c0_i32 = arith.constant 0 : i32
    %c0_i32_0 = arith.constant 0 : i32
    return %arg0, %c0_i32 : i32, i32
  }
  func.func @transform_6(%arg0: i32) -> (i32, i32) {
    %c0_i32 = arith.constant 0 : i32
    %c0_i32_0 = arith.constant 0 : i32
    %c0_i32_1 = arith.constant 0 : i32
    return %c0_i32, %c0_i32_0 : i32, i32
  }
  func.func @transform_7(%arg0: i32) -> (i32, i32) {
    %c0_i32 = arith.constant 0 : i32
    %c0_i32_0 = arith.constant 0 : i32
    %c0_i32_1 = arith.constant 0 : i32
    return %c0_i32, %c0_i32_0 : i32, i32
  }
  func.func @transform_8(%arg0: i32) -> (i32, i32) {
    %c0_i32 = arith.constant 0 : i32
    %c0_i32_0 = arith.constant 0 : i32
    %c0_i32_1 = arith.constant 0 : i32
    return %c0_i32, %c0_i32_0 : i32, i32
  }
  func.func @transform_9(%arg0: i32) -> (i32, i32) {
    %c0_i32 = arith.constant 0 : i32
    %c0_i32_0 = arith.constant 0 : i32
    return %arg0, %c0_i32 : i32, i32
  }
}

</mosaic_0001>

<bundles_post_ra>
// kernel: em_net_forward.1
= control target key start
LH: loop header
LB: loop body
LE: loop exit
PB: predicated region body
PF: predicated region fallthrough
CT: control target
= control target key end

     0   :  { %s8916_s0 = inlined_call_operand.<no memory space> [shape: f32[1], index: 0, kind: input, shape index: {}]   ;;  %s8917_s1 = inlined_call_operand.vmem [shape: f32[36], index: 1, kind: input, shape index: {}]   ;;  %s8918_s2 = inlined_call_operand.vmem [shape: f32[4], index: 2, kind: input, shape index: {}]   ;;  %s8919_s3 = inlined_call_operand.vmem [shape: f32[36], index: 3, kind: input, shape index: {}]   ;;  %s8920_s4 = inlined_call_operand.<no memory space> [shape: f32[1], index: 4, kind: input, shape index: {}]   ;;  %s8921_s5 = inlined_call_operand.vmem [shape: f32[16,256], index: 5, kind: input, shape index: {}]   ;;  %s8922_s6 = inlined_call_operand.vmem [shape: bf16[128,256], index: 6, kind: input, shape index: {}]   ;;  %s8923_s7 = inlined_call_operand.vmem [shape: bf16[256,128], index: 7, kind: input, shape index: {}]   ;;  %s8924_s8 = inlined_call_operand.vmem [shape: f32[8,256], index: 8, kind: input, shape index: {}]   ;;  %s8925_s9 = inlined_call_operand.vmem [shape: f32[16,256], index: 9, kind: output, shape index: {}]  }
   0x1   :  { %9383 = sst [smem:[#allocation169_spill]] %s8920_s4 }
   0x2   :  { %9384 = sst [smem:[#allocation170_spill]] %s8922_s6 }
   0x3   :  { %9385 = sst [smem:[#allocation171_spill]] %s8923_s7 }
   0x4   :  { %9386 = sst [smem:[#allocation172_spill]] %s8925_s9 }
   0x5   :  { %16 = vsyncpa [#allocation6], 0 }
   0x6   :  { %17 = vsyncpa [#allocation8], 0  ;;  %s36_s11 = sshll.u32 %s8918_s2, 4  ;;  %s26_s14 = sshll.u32 %s8917_s1, 4  ;;  %s37_s11 = int_to_ptr.vmem [resolvable:$true] %s36_s11  ;;  %s27_s14 = int_to_ptr.vmem [resolvable:$true] %s26_s14 }
   0x7   :  { %s4804_s15 = scalar_lea.vmem %s37_s11, 16  ;;  %p4809_p1 = scmp.lt.s32.totalorder %s37_s11, %s37_s11 }
   0x8   :  { %p4805_p0 = scmp.ne.s32.totalorder %s37_s11, %s4804_s15  ;;  %p4810_p2 = scmp.lt.s32.totalorder %s4804_s15, %s4804_s15 }
   0xa   :  { %p4811_p3 = por %p4810_p2, %p4809_p1 }
   0xc   :  { %p4812_p4 = pnand %p4811_p3, %p4805_p0 }
   0xe   :  { %4815 = shalt.err (!%p4812_p4)
}
   0xf   :  { %s4844_s16 = smov [#allocation7]   ;;  %s4816_s17 = scalar_lea.vmem %s27_s14, 16 }
  0x10   :  { %39 = dma.vmem_to_smem %s37_s11, 16, %s4844_s16, [#allocation8]  }
  0x11   :  { %p4817_p5 = scmp.ne.s32.totalorder %s27_s14, %s4816_s17  ;;  %p4821_p6 = scmp.lt.s32.totalorder %s27_s14, %s27_s14 }
  0x12   :  { %p4822_p7 = scmp.lt.s32.totalorder %s4816_s17, %s4816_s17 }
  0x14   :  { %p4823_p8 = por %p4822_p7, %p4821_p6 }
  0x16   :  { %p4824_p9 = pnand %p4823_p8, %p4817_p5 }
  0x18   :  { %4827 = shalt.err (!%p4824_p9)
}
  0x19   :  { %s4845_s2 = smov [#allocation5]   ;;  %s46_s19 = sshll.u32 %s8919_s3, 4  ;;  %s47_s19 = int_to_ptr.vmem [resolvable:$true] %s46_s19 }
  0x1a   :  { %29 = dma.vmem_to_smem %s27_s14, 16, %s4845_s2, [#allocation6]  }
  0x1b   :  { %s4828_s20 = scalar_lea.vmem %s47_s19, 16  ;;  %p4833_p11 = scmp.lt.s32.totalorder %s47_s19, %s47_s19 }
  0x1c   :  { %p4829_p10 = scmp.ne.s32.totalorder %s47_s19, %s4828_s20  ;;  %p4834_p12 = scmp.lt.s32.totalorder %s4828_s20, %s4828_s20 }
  0x1e   :  { %p4835_p13 = por %p4834_p12, %p4833_p11 }
  0x20   :  { %p4836_p0 = pnand %p4835_p13, %p4829_p10 }
  0x22   :  { %4839 = shalt.err (!%p4836_p0)
}
  0x23   :  { %s4846_s21 = smov [#allocation9]  }
  0x24   :  { %49 = dma.vmem_to_smem %s47_s19, 16, %s4846_s21, [#allocation8]  }
  0x25   :  { %4840 = dma.done.wait [#allocation6], 16  }
  0x26   :  { %4841 = vsyncadd [#allocation6], 4294967280 }
  0x27   :  { %4842 = dma.done.wait [#allocation8], 32  }
  0x28   :  { %4843 = vsyncadd [#allocation8], 4294967264 }
  0x29   :  { %69 = sfence }
  0x2a   :  { %v4684_v0 = vld [vmem:[%s8923_s7 + $0x78] sm:$0xff]   ;;  %v4686_v2 = vld [vmem:[%s8923_s7 + $0x70] sm:$0xff]   ;;  %v4688_v4 = vld [vmem:[%s8923_s7 + $0x68] sm:$0xff]   ;;  %v8947_v38 = vmov 0   ;;  %v5034_v46 = vstv %s8916_s0  ;;  %s8938_s23 = smov 16   ;;  %s8940_s3 = smov 17   ;;  %v498_v55 = vlaneseq }
  0x2b   :  { %v4685_v1 = vld [vmem:[%s8923_s7 + $0x38] sm:$0xff]   ;;  %4606 = vmatprep.subr.bf16.mxu0 %v4684_v0  ;;  %v4687_v3 = vld [vmem:[%s8923_s7 + $0x30] sm:$0xff]   ;;  %v4689_v5 = vld [vmem:[%s8923_s7 + $0x28] sm:$0xff]   ;;  %457 = vmatprep.mubr.bf16.mxu1 %v8947_v38  ;;  %9389 = vst [vmem:[#allocation14_spill] sm:$0xff] %v5034_v46  ;;  %s8936_s24 = smov 15   ;;  %s8934_s0 = smov 1  }
  0x2c   :  { %4607 = vmatpush3.bf16.msra.mxu0 %v4685_v1  ;;  %v4690_v6 = vld [vmem:[%s8923_s7 + $0x60] sm:$0xff]   ;;  %v4692_v8 = vld [vmem:[%s8923_s7 + $0x58] sm:$0xff]   ;;  %v4694_v10 = vld [vmem:[%s8923_s7 + $0x50] sm:$0xff]   ;;  %s8932_s25 = smov 127   ;;  %s8930_s26 = smov 113   ;;  %v505_v56 = vshrl.u32 %v498_v55, 7 }
  0x2d   :  { %4608 = vmatprep.subr.bf16.mxu0 %v4686_v2  ;;  %v4691_v7 = vld [vmem:[%s8923_s7 + $0x20] sm:$0xff]   ;;  %v4693_v9 = vld [vmem:[%s8923_s7 + $0x18] sm:$0xff]   ;;  %v150_v11 = vld [vmem:[%s8921_s5 + $0x8] sm:$0xff]  ;;  %s8928_s27 = smov 112   ;;  %s8926_s28 = smov 111   ;;  %v5218_v63 = vand.u32 127, %v498_v55 }
  0x2e   :  { %v152_v12 = vld [vmem:[%s8921_s5 + $0x18] sm:$0xff]  ;;  %v4695_v16 = vld [vmem:[%s8923_s7 + $0x10] sm:$0xff]   ;;  %v4703_v17 = vld [vmem:[%s8922_s6 + $0x64] ss:$8 sps:$4 sm:$0xff]   ;;  %s5104_s29 = sld [smem:[#allocation5 + $0x4]]  ;;  %v5194_v57 = vsub.s32 0, %v505_v56 }
  0x2f   :  { %v154_v13 = vpack.c.bf16 %v152_v12, %v150_v11  ;;  %v4700_v14 = vld [vmem:[%s8922_s6 + $0x74] ss:$8 sps:$4 sm:$0xff]   ;;  %v4702_v15 = vld [vmem:[%s8922_s6 + $0x70] ss:$8 sps:$4 sm:$0xff]   ;;  %v4696_v18 = vld [vmem:[%s8923_s7 + $0x48] sm:$0xff]   ;;  %s5106_s30 = sld [smem:[#allocation5 + $0xd]] }
  0x30   :  { %4609 = vmatpush3.bf16.msra.mxu0 %v4687_v3  ;;  %425 = vmatprep.subr.bf16.mxu1 %v4700_v14  ;;  %v4705_v19 = vld [vmem:[%s8922_s6 + $0x60] ss:$8 sps:$4 sm:$0xff]   ;;  %v4706_v21 = vld [vmem:[%s8922_s6 + $0x54] ss:$8 sps:$4 sm:$0xff]   ;;  %v4708_v23 = vld [vmem:[%s8922_s6 + $0x50] ss:$8 sps:$4 sm:$0xff]  }
  0x31   :  { %4610 = vmatprep.subr.bf16.mxu0 %v4688_v4  ;;  %315 = vmatprep.mubr.bf16.mxu0 %v154_v13  ;;  %v4697_v20 = vld [vmem:[%s8923_s7 + $0x8] sm:$0xff]   ;;  %v4698_v22 = vld [vmem:[%s8923_s7 + $0x40] sm:$0xff]   ;;  %v151_v27 = vld [vmem:[%s8921_s5 + $0x10] sm:$0xff]  ;;  %s5112_s10 = sld [smem:[#allocation5 + $0x16]]  ;;  %9412 = vst [vmem:[#allocation37_spill] sm:$0xff] %v5194_v57  ;;  %v5201_v59 = vsub.s32 1, %v505_v56 }
  0x32   :  { %426 = vmatpush1.bf16.msra.mxu1 %v4702_v15  ;;  %v4709_v24 = vld [vmem:[%s8922_s6 + $0x44] ss:$8 sps:$4 sm:$0xff]   ;;  %v4711_v28 = vld [vmem:[%s8922_s6 + $0x40] ss:$8 sps:$4 sm:$0xff]   ;;  %v4712_v29 = vld [vmem:[%s8922_s6 + $0x34] ss:$8 sps:$4 sm:$0xff]  }
  0x33   :  { %427 = vmatprep.subr.bf16.mxu1 %v4703_v17  ;;  %v4699_v25 = vld [vmem:[%s8923_s7] sm:$0xff]   ;;  %v4714_v31 = vld [vmem:[%s8922_s6 + $0x30] ss:$8 sps:$4 sm:$0xff]   ;;  %v4718_v34 = vld [vmem:[%s8922_s6 + $0x14] ss:$8 sps:$4 sm:$0xff]   ;;  %s5114_s11 = sld [smem:[#allocation5 + $0x1f]] }
  0x34   :  { %4611 = vmatpush3.bf16.msra.mxu0 %v4689_v5  ;;  %v149_v26 = vld [vmem:[%s8921_s5] sm:$0xff]  ;;  %v4720_v35 = vld [vmem:[%s8922_s6 + $0x10] ss:$8 sps:$4 sm:$0xff]   ;;  %s5116_s5 = sld [smem:[#allocation5 + $0x1]]  ;;  %9413 = vst [vmem:[#allocation38_spill] sm:$0xff] %v5201_v59  ;;  %v5211_v61 = vstv %s5104_s29  ;;  %9417 = vst [vmem:[#allocation42_spill] sm:$0xff] %v5218_v63 }
  0x35   :  { %4612 = vmatprep.subr.bf16.mxu0 %v4690_v6  ;;  %v153_v30 = vpack.c.bf16 %v151_v27, %v149_v26  ;;  %v4715_v32 = vld [vmem:[%s8922_s6 + $0x24] ss:$8 sps:$4 sm:$0xff]   ;;  %v4717_v33 = vld [vmem:[%s8922_s6 + $0x20] ss:$8 sps:$4 sm:$0xff]   ;;  %s5118_s12 = sld [smem:[#allocation5 + $0xa]]  ;;  %9415 = vst [vmem:[#allocation40_spill] sm:$0xff] %v5211_v61  ;;  %v5214_v62 = vstv %s5106_s30 }
  0x36   :  { %428 = vmatpush1.bf16.msra.mxu1 %v4705_v19  ;;  %v4721_v36 = vld [vmem:[%s8922_s6 + $0x4] ss:$8 sps:$4 sm:$0xff]   ;;  %v4723_v37 = vld [vmem:[%s8922_s6] ss:$8 sps:$4 sm:$0xff]   ;;  %s5124_s13 = sld [smem:[#allocation5 + $0x13]]  ;;  %9416 = vst [vmem:[#allocation41_spill] sm:$0xff] %v5214_v62 }
  0x37   :  { %429 = vmatprep.subr.bf16.mxu1 %v4706_v21  ;;  %s5126_s14 = sld [smem:[#allocation5 + $0x1c]]  ;;  %v4500_v58 = vld [vmem:[%s8924_s8 + $0x1] ss:$8 sm:$0x3]  ;;  %v5227_v2 = vstv %s5112_s10  ;;  %vm532_vm0 = vcmp.lt.s32.totalorder %v5218_v63, 16  ;;  %vm572_vm1 = vcmp.lt.s32.totalorder %v5218_v63, 15 }
  0x38   :  { %4613 = vmatpush3.bf16.msra.mxu0 %v4691_v7  ;;  %s5128_s15 = sld [smem:[#allocation5 + $0x2]]  ;;  %v4501_v60 = vld [vmem:[%s8924_s8 + $0x2] ss:$8 sm:$0x3]  ;;  %v5221_v0 = vrot.slane %v4500_v58, %v5194_v57  ;;  %9419 = vst [vmem:[#allocation44_spill] sm:$0xff] %v5227_v2  ;;  %v5235_v4 = vrot.slane %v4500_v58, %v5201_v59  ;;  %vm612_vm2 = vcmp.lt.s32.totalorder %v5218_v63, 1 }
  0x39   :  { %4614 = vmatprep.subr.bf16.mxu0 %v4692_v8  ;;  %s5130_s16 = sld [smem:[#allocation5 + $0xb]]  ;;  %v4502_v1 = vld [vmem:[%s8924_s8 + $0x3] ss:$8 sm:$0x3]  ;;  %v5230_v3 = vstv %s5114_s11  ;;  %vm672_vm3 = vcmp.lt.s32.totalorder %v5218_v63, 127  ;;  %vm712_vm4 = vcmp.lt.s32.totalorder %v5218_v63, 113 }
  0x3a   :  { %430 = vmatpush1.bf16.msra.mxu1 %v4708_v23  ;;  %s5132_s17 = sld [smem:[#allocation5 + $0x14]]  ;;  %9418 = vst [vmem:[#allocation43_spill] sm:$0xff] %v5221_v0  ;;  %9420 = vst [vmem:[#allocation45_spill] sm:$0xff] %v5230_v3  ;;  %v5238_v5 = vstv %s5116_s5  ;;  %v5272_v15 = vrot.slane %v4502_v1, %v5194_v57  ;;  %v4503_v17 = vld [vmem:[%s8924_s8 + $0x4] ss:$8 sm:$0x3] }
  0x3b   :  { %431 = vmatprep.subr.bf16.mxu1 %v4709_v24  ;;  %s5134_s2 = sld [smem:[#allocation5 + $0x1d]]  ;;  %9421 = vst [vmem:[#allocation46_spill] sm:$0xff] %v5235_v4  ;;  %9422 = vst [vmem:[#allocation47_spill] sm:$0xff] %v5238_v5  ;;  %v5241_v6 = vstv %s5118_s12  ;;  %v4506_v55 = vld [vmem:[%s8924_s8 + $0x7] ss:$8 sm:$0x3] }
  0x3c   :  { %4615 = vmatpush3.bf16.msra.mxu0 %v4693_v9  ;;  %s5136_s1 = sld [smem:[#allocation5 + $0x3]]  ;;  %9423 = vst [vmem:[#allocation48_spill] sm:$0xff] %v5241_v6  ;;  %v5244_v7 = vstv %s5124_s13  ;;  %v5252_v9 = vrot.slane %v4501_v60, %v5194_v57  ;;  %9432 = vst [vmem:[#allocation57_spill] sm:$0xff] %v5272_v15  ;;  %vm752_vm5 = vcmp.lt.s32.totalorder %v5218_v63, 112  ;;  %vm792_vm6 = vcmp.lt.s32.totalorder %v5218_v63, 111 }
  0x3d   :  { %4616 = vmatprep.subr.bf16.mxu0 %v4694_v10  ;;  %s5138_s18 = sld [smem:[#allocation5 + $0xc]]  ;;  %9424 = vst [vmem:[#allocation49_spill] sm:$0xff] %v5244_v7  ;;  %v5249_v8 = vstv %s5126_s14  ;;  %v5255_v10 = vrot.slane %v4501_v60, %v5201_v59  ;;  %vm500_vm7 = vcmp.lt.s32.totalorder %v5218_v63, 17 }
  0x3e   :  { %432 = vmatpush1.bf16.msra.mxu1 %v4711_v28  ;;  %s5140_s19 = sld [smem:[#allocation5 + $0x15]]  ;;  %9425 = vst [vmem:[#allocation50_spill] sm:$0xff] %v5249_v8  ;;  %9426 = vst [vmem:[#allocation51_spill] sm:$0xff] %v5252_v9  ;;  %v5258_v11 = vstv %s5128_s15 }
  0x3f   :  { %433 = vmatprep.subr.bf16.mxu1 %v4712_v29  ;;  %s5142_s20 = sld [smem:[#allocation5 + $0x1e]]  ;;  %9427 = vst [vmem:[#allocation52_spill] sm:$0xff] %v5255_v10  ;;  %9428 = vst [vmem:[#allocation53_spill] sm:$0xff] %v5258_v11  ;;  %v5263_v12 = vstv %s5130_s16 }
  0x40   :  { %4617 = vmatpush3.bf16.msra.mxu0 %v4695_v16  ;;  %s5144_s21 = sld [smem:[#allocation5 + $0x5]]  ;;  %9429 = vst [vmem:[#allocation54_spill] sm:$0xff] %v5263_v12  ;;  %v5266_v13 = vstv %s5132_s17  ;;  %v5277_v16 = vrot.slane %v4502_v1, %v5201_v59 }
  0x41   :  { %4618 = vmatprep.subr.bf16.mxu0 %v4696_v18  ;;  %s5146_s22 = sld [smem:[#allocation5 + $0xe]]  ;;  %9430 = vst [vmem:[#allocation55_spill] sm:$0xff] %v5266_v13  ;;  %v5269_v14 = vstv %s5134_s2 }
  0x42   :  { %434 = vmatpush1.bf16.msra.mxu1 %v4714_v31  ;;  %s5164_s9 = sld [smem:[#allocation5 + $0x19]]  ;;  %9431 = vst [vmem:[#allocation56_spill] sm:$0xff] %v5269_v14  ;;  %9433 = vst [vmem:[#allocation58_spill] sm:$0xff] %v5277_v16  ;;  %v5297_v21 = vstv %s5136_s1  ;;  %v5337_v31 = vrot.slane %v4503_v17, %v5201_v59 }
  0x43   :  { %435 = vmatprep.subr.bf16.mxu1 %v4715_v32  ;;  %s5166_s4 = sld [smem:[#allocation5 + $0x22]]  ;;  %9437 = vst [vmem:[#allocation62_spill] sm:$0xff] %v5297_v21  ;;  %v4504_v32 = vld [vmem:[%s8924_s8 + $0x5] ss:$8 sm:$0x3] }
  0x44   :  { %4619 = vmatpush3.bf16.msra.mxu0 %v4697_v20  ;;  %s5168_s6 = sld [smem:[#allocation5 + $0x8]]  ;;  %v5331_v29 = vstv %s5140_s19  ;;  %9447 = vst [vmem:[#allocation72_spill] sm:$0xff] %v5337_v31 }
  0x45   :  { %4620 = vmatprep.subr.bf16.mxu0 %v4698_v22  ;;  %s5170_s7 = sld [smem:[#allocation5 + $0x11]]  ;;  %9445 = vst [vmem:[#allocation70_spill] sm:$0xff] %v5331_v29 }
  0x46   :  { %436 = vmatpush1.bf16.msra.mxu1 %v4717_v33  ;;  %s5274_s29 = sld [smem:[#allocation9 + $0x2]] }
  0x47   :  { %437 = vmatprep.subr.bf16.mxu1 %v4718_v34  ;;  %s5294_s11 = sld [smem:[#allocation9 + $0xb]]  ;;  %v5349_v34 = vstv %s5142_s20 }
  0x48   :  { %4621 = vmatpush3.bf16.msra.mxu0 %v4699_v25  ;;  %9399 = sst [smem:[#allocation24_spill]] %s5164_s9  ;;  %v5314_v25 = vstv %s5138_s18  ;;  %9449 = vst [vmem:[#allocation74_spill] sm:$0xff] %v5349_v34 }
  0x49   :  { %9400 = sst [smem:[#allocation25_spill]] %s5166_s4  ;;  %9441 = vst [vmem:[#allocation66_spill] sm:$0xff] %v5314_v25 }
  0x4a   :  { %438 = vmatpush1.bf16.msra.mxu1 %v4720_v35  ;;  %9401 = sst [smem:[#allocation26_spill]] %s5168_s6  ;;  %v4505_v35 = vld [vmem:[%s8924_s8 + $0x6] ss:$8 sm:$0x3] }
  0x4b   :  { %316 = vmatmul.mubr.bf16.vlgmr.msra.gmra.mxu0 %v153_v30  ;;  %439 = vmatprep.subr.bf16.mxu1 %v4721_v36  ;;  %9402 = sst [smem:[#allocation27_spill]] %s5170_s7  ;;  %v5334_v30 = vrot.slane %v4503_v17, %v5194_v57  ;;  %v5412_v1 = vrot.slane %v4505_v35, %v5194_v57  ;;  %v479_v17 = vld [vmem:[%s8924_s8] ss:$8 sm:$0x3] }
  0x4c   :  { %s5182_s9 = sld [smem:[#allocation5 + $0x1b]] }
  0x4d   :  { %s5184_s4 = sld [smem:[#allocation7]]  ;;  %9446 = vst [vmem:[#allocation71_spill] sm:$0xff] %v5334_v30  ;;  %9470 = vst [vmem:[#allocation89_spill] sm:$0xff] %v5412_v1 }
  0x4e   :  { %440 = vmatpush1.bf16.msra.mxu1 %v4723_v37  ;;  %s5186_s6 = sld [smem:[#allocation7 + $0x1]] }
  0x4f   :  { %s5188_s7 = sld [smem:[#allocation7 + $0x2]] }
  0x50   :  { %s5311_s5 = sld [smem:[#allocation9 + $0x14]] }
  0x51   :  { %s5328_s12 = sld [smem:[#allocation9 + $0x1d]] }
  0x52   :  { %s5346_s15 = sld [smem:[#allocation9 + $0x3]] }
  0x53   :  { %9408 = sst [smem:[#allocation33_spill]] %s5184_s4 }
  0x54   :  { %9409 = sst [smem:[#allocation34_spill]] %s5186_s6 }
  0x55   :  { %9410 = sst [smem:[#allocation35_spill]] %s5188_s7 }
  0x56   :  { %s5203_s7 = sld [smem:[#allocation9 + $0x12]] }
  0x57   :  { %s5205_s6 = sld [smem:[#allocation9 + $0x1b]] }
  0x58   :  { %s5232_s4 = sld [smem:[#allocation9 + $0xa]] }
  0x59   :  { %s5366_s19 = sld [smem:[#allocation9 + $0xc]] }
  0x5a   :  { %s9466_s13 = sld [smem:[#allocation24_spill]] }
  0x5b   :  { %s5400_s14 = sld [smem:[#allocation9 + $0x1e]] }
  0x5c   :  { %s9471_s16 = sld [smem:[#allocation25_spill]] }
  0x5d   :  { %9414 = sst [smem:[#allocation39_spill]] %s5205_s6 }
  0x5e   :  { %s5260_s6 = sld [smem:[#allocation9 + $0x1c]] }
  0x5f   :  { %s5417_s17 = sld [smem:[#allocation9 + $0x5]] }
  0x60   :  { %s9474_s10 = sld [smem:[#allocation27_spill]] }
 0x10b   :  { %v4622_v39 = vpop.f32.mrf.mxu0 }
 0x10d   :  { %v4623_v40 = vpop.f32.mrf.mxu0 }
 0x10e   :  { %v5024_v43 = vadd.f32 %v4623_v40, %v4622_v39  ;;  %v5369_v40 = vstv %s5144_s21  ;;  %s9472_s21 = sld [smem:[#allocation26_spill]] }
 0x10f   :  { %v4625_v41 = vpop.f32.mrf.mxu0  ;;  %9456 = vst [vmem:[#allocation78_spill] sm:$0xff] %v5369_v40 }
 0x110   :  { %9387 = vst [vmem:[#allocation12_spill] sm:$0xff] %v5024_v43 }
 0x111   :  { %v4626_v42 = vpop.f32.mrf.mxu0 }
 0x112   :  { %v5026_v44 = vadd.f32 %v4626_v42, %v4625_v41 }
 0x114   :  { %9388 = vst [vmem:[#allocation13_spill] sm:$0xff] %v5026_v44  ;;  %v328_v45 = vpack.c.bf16 %v5026_v44, %v5024_v43  ;;  %v5444_v44 = vrot.slane %v4506_v55, %v5194_v57  ;;  %v4507_v43 = vld [vmem:[%s8924_s8 + $0x1] ss:$8 sm:$0x3] }
 0x116   :  { %458 = vmatmul.mubr.bf16.vlgmr.msra.gmra.mxu1 %v328_v45  ;;  %9483 = vst [vmem:[#allocation96_spill] sm:$0xff] %v5444_v44 }
 0x117   :  { %1931 = vmatprep.mubr.bf16.mxu1 %v8947_v38 }
 0x1d6   :  { %v459_v47 = vpop.f32.mrf.mxu1 }
 0x1d7   :  { %v5037_v48 = vmul.f32 %v5034_v46, %v459_v47  ;;  %v5386_v47 = vstv %s5146_s22  ;;  %s5491_s22 = sld [smem:[#allocation9 + $0x6]] }
 0x1d8   :  { %v461_v49 = vpop.f32.mrf.mxu1  ;;  %9462 = vst [vmem:[#allocation82_spill] sm:$0xff] %v5386_v47 }
 0x1d9   :  { %9390 = vst [vmem:[#allocation15_spill] sm:$0xff] %v5037_v48  ;;  %528 = vrot.lane.b32.xlu1 %v5037_v48, %s8938_s23  ;;  %494 = vrot.lane.b32.xlu0 %v5037_v48, %s8940_s3  ;;  %v5044_v50 = vmul.f32 %v5034_v46, %v461_v49  ;;  %v5284_v18 = vmul.f32 %v5211_v61, %v5037_v48 }
 0x1da   :  { %v463_v51 = vpop.f32.mrf.mxu1  ;;  %v5292_v20 = vmul.f32 %v5214_v62, %v5037_v48  ;;  %v5305_v23 = vmul.f32 %v5227_v2, %v5037_v48  ;;  %v5318_v26 = vmul.f32 %v5230_v3, %v5037_v48 }
 0x1db   :  { %9391 = vst [vmem:[#allocation16_spill] sm:$0xff] %v5044_v50  ;;  %v5075_v53 = vmul.f32 %v5034_v46, %v463_v51  ;;  %9434 = vst [vmem:[#allocation59_spill] sm:$0xff] %v5284_v18  ;;  %v5288_v19 = vmul.f32 %v5211_v61, %v5044_v50  ;;  %v5301_v22 = vmul.f32 %v5214_v62, %v5044_v50 }
 0x1dc   :  { %v465_v52 = vpop.f32.mrf.mxu1  ;;  %9436 = vst [vmem:[#allocation61_spill] sm:$0xff] %v5292_v20  ;;  %9439 = vst [vmem:[#allocation64_spill] sm:$0xff] %v5305_v23  ;;  %v5309_v24 = vmul.f32 %v5227_v2, %v5044_v50  ;;  %v5322_v27 = vmul.f32 %v5230_v3, %v5044_v50  ;;  %v5392_v51 = vrot.slane %v4504_v32, %v5194_v57  ;;  %v4511_v23 = vld [vmem:[%s8924_s8 + $0x5] ss:$8 sm:$0x3] }
 0x1dd   :  { %568 = vrot.lane.b32.xlu0 %v5037_v48, %s8936_s24  ;;  %530 = vrot.lane.b32.xlu1 %v5044_v50, %s8938_s23  ;;  %9392 = vst [vmem:[#allocation17_spill] sm:$0xff] %v5075_v53  ;;  %v5078_v54 = vmul.f32 %v5034_v46, %v465_v52  ;;  %9435 = vst [vmem:[#allocation60_spill] sm:$0xff] %v5288_v19  ;;  %v5326_v28 = vmul.f32 %v5211_v61, %v5075_v53  ;;  %v5441_v46 = vstv %s9466_s13 }
 0x1de   :  { %9438 = vst [vmem:[#allocation63_spill] sm:$0xff] %v5301_v22  ;;  %9440 = vst [vmem:[#allocation65_spill] sm:$0xff] %v5309_v24  ;;  %v5344_v33 = vmul.f32 %v5214_v62, %v5075_v53  ;;  %v5364_v39 = vmul.f32 %v5227_v2, %v5075_v53  ;;  %v5377_v42 = vmul.f32 %v5230_v3, %v5075_v53  ;;  %v5501_v24 = vstv %s5182_s9 }
 0x1df   :  { %9393 = vst [vmem:[#allocation18_spill] sm:$0xff] %v5078_v54  ;;  %9442 = vst [vmem:[#allocation67_spill] sm:$0xff] %v5318_v26  ;;  %v5356_v36 = vmul.f32 %v5211_v61, %v5078_v54  ;;  %v5360_v37 = vmul.f32 %v5214_v62, %v5078_v54  ;;  %v5373_v41 = vmul.f32 %v5227_v2, %v5078_v54  ;;  %v1099_v62 = vld [vmem:[%s8924_s8] ss:$8 sm:$0x3] }
 0x1e0   :  { %9443 = vst [vmem:[#allocation68_spill] sm:$0xff] %v5322_v27  ;;  %9444 = vst [vmem:[#allocation69_spill] sm:$0xff] %v5326_v28  ;;  %v5381_v45 = vmul.f32 %v5230_v3, %v5078_v54  ;;  %v5395_v52 = vrot.slane %v4504_v32, %v5201_v59  ;;  %v5426_v3 = vrot.slane %v4505_v35, %v5201_v59  ;;  %v4510_v28 = vld [vmem:[%s8924_s8 + $0x4] ss:$8 sm:$0x3] }
 0x1e1   :  { %608 = vrot.lane.b32.xlu0 %v5037_v48, %s8934_s0  ;;  %570 = vrot.lane.b32.xlu1 %v5044_v50, %s8936_s24  ;;  %9448 = vst [vmem:[#allocation73_spill] sm:$0xff] %v5344_v33  ;;  %9451 = vst [vmem:[#allocation75_spill] sm:$0xff] %v5356_v36  ;;  %v5447_v35 = vrot.slane %v4506_v55, %v5201_v59  ;;  %v5467_v55 = vrot.slane %v479_v17, %v5194_v57 }
 0x1e2   :  { %9453 = vst [vmem:[#allocation76_spill] sm:$0xff] %v5360_v37  ;;  %9455 = vst [vmem:[#allocation77_spill] sm:$0xff] %v5364_v39  ;;  %v5483_v33 = vrot.slane %v479_v17, %v5201_v59  ;;  %v5504_v17 = vrot.slane %v1099_v62, %v5194_v57  ;;  %v5521_v18 = vrot.slane %v1099_v62, %v5201_v59  ;;  %v4513_v62 = vld [vmem:[%s8924_s8 + $0x7] ss:$8 sm:$0x3] }
 0x1e3   :  { %9457 = vst [vmem:[#allocation79_spill] sm:$0xff] %v5373_v41  ;;  %9458 = vst [vmem:[#allocation80_spill] sm:$0xff] %v5377_v42 }
 0x1e4   :  { %9460 = vst [vmem:[#allocation81_spill] sm:$0xff] %v5381_v45  ;;  %9464 = vst [vmem:[#allocation84_spill] sm:$0xff] %v5392_v51  ;;  %v4509_v45 = vld [vmem:[%s8924_s8 + $0x3] ss:$8 sm:$0x3] }
 0x1e5   :  { %668 = vrot.lane.b32.xlu0 %v5037_v48, %s8932_s25  ;;  %610 = vrot.lane.b32.xlu1 %v5044_v50, %s8934_s0  ;;  %9465 = vst [vmem:[#allocation85_spill] sm:$0xff] %v5395_v52  ;;  %9476 = vst [vmem:[#allocation92_spill] sm:$0xff] %v5426_v3 }
 0x1e6   :  { %9482 = vst [vmem:[#allocation95_spill] sm:$0xff] %v5441_v46  ;;  %9485 = vst [vmem:[#allocation97_spill] sm:$0xff] %v5447_v35 }
 0x1e7   :  { %9492 = vst [vmem:[#allocation101_spill] sm:$0xff] %v5467_v55  ;;  %9498 = vst [vmem:[#allocation104_spill] sm:$0xff] %v5483_v33 }
 0x1e8   :  { %9503 = vst [vmem:[#allocation108_spill] sm:$0xff] %v5501_v24  ;;  %9504 = vst [vmem:[#allocation109_spill] sm:$0xff] %v5504_v17  ;;  %v4512_v24 = vld [vmem:[%s8924_s8 + $0x6] ss:$8 sm:$0x3] }
 0x1e9   :  { %708 = vrot.lane.b32.xlu0 %v5037_v48, %s8930_s26  ;;  %670 = vrot.lane.b32.xlu1 %v5044_v50, %s8932_s25  ;;  %9508 = vst [vmem:[#allocation113_spill] sm:$0xff] %v5521_v18 }
 0x1ed   :  { %748 = vrot.lane.b32.xlu0 %v5037_v48, %s8928_s27  ;;  %710 = vrot.lane.b32.xlu1 %v5044_v50, %s8930_s26 }
 0x1f1   :  { %788 = vrot.lane.b32.xlu0 %v5037_v48, %s8926_s28  ;;  %750 = vrot.lane.b32.xlu1 %v5044_v50, %s8928_s27  ;;  %v5464_v48 = vstv %s9474_s10  ;;  %s5558_s10 = sld [smem:[#allocation9 + $0x7]] }
 0x1f2   :  { %9491 = vst [vmem:[#allocation100_spill] sm:$0xff] %v5464_v48 }
 0x1f5   :  { %790 = vrot.lane.b32.xlu1 %v5044_v50, %s8926_s28  ;;  %496 = vrot.lane.b32.xlu0 %v5044_v50, %s8940_s3  ;;  %v5461_v50 = vstv %s9472_s21  ;;  %s9516_s21 = sld [smem:[#allocation39_spill]] }
 0x1f6   :  { %9490 = vst [vmem:[#allocation99_spill] sm:$0xff] %v5461_v50 }
 0x1f9   :  { %1107 = vrot.lane.b32.xlu0 %v5075_v53, %s8940_s3  ;;  %1109 = vrot.lane.b32.xlu1 %v5078_v54, %s8940_s3  ;;  %s5162_s3 = sld [smem:[#allocation5 + $0x10]] }
 0x1fd   :  { %1134 = vrot.lane.b32.xlu0 %v5075_v53, %s8938_s23  ;;  %1136 = vrot.lane.b32.xlu1 %v5078_v54, %s8938_s23  ;;  %s5160_s23 = sld [smem:[#allocation5 + $0x7]] }
 0x1ff   :  { %v5438_v61 = vstv %s5162_s3  ;;  %s5455_s3 = sld [smem:[#allocation9 + $0x17]] }
 0x200   :  { %9480 = vst [vmem:[#allocation94_spill] sm:$0xff] %v5438_v61 }
 0x201   :  { %1169 = vrot.lane.b32.xlu0 %v5075_v53, %s8936_s24  ;;  %1171 = vrot.lane.b32.xlu1 %v5078_v54, %s8936_s24  ;;  %s5158_s24 = sld [smem:[#allocation5 + $0x21]] }
 0x203   :  { %9398 = sst [smem:[#allocation23_spill]] %s5160_s23 }
 0x204   :  { %s5180_s23 = sld [smem:[#allocation5 + $0x12]] }
 0x205   :  { %1204 = vrot.lane.b32.xlu0 %v5075_v53, %s8934_s0  ;;  %1206 = vrot.lane.b32.xlu1 %v5078_v54, %s8934_s0  ;;  %s5156_s0 = sld [smem:[#allocation5 + $0x18]] }
 0x206   :  { %s9461_s30 = sld [smem:[#allocation23_spill]] }
 0x207   :  { %9397 = sst [smem:[#allocation22_spill]] %s5158_s24 }
 0x208   :  { %s5178_s24 = sld [smem:[#allocation5 + $0x9]] }
 0x209   :  { %1255 = vrot.lane.b32.xlu0 %v5075_v53, %s8932_s25  ;;  %1257 = vrot.lane.b32.xlu1 %v5078_v54, %s8932_s25  ;;  %s5154_s25 = sld [smem:[#allocation5 + $0xf]] }
 0x20a   :  { %9407 = sst [smem:[#allocation32_spill]] %s5180_s23 }
 0x20b   :  { %s5216_s23 = sld [smem:[#allocation9 + $0x1]]  ;;  %v5420_v32 = vstv %s5156_s0 }
 0x20c   :  { %s9459_s20 = sld [smem:[#allocation22_spill]]  ;;  %9473 = vst [vmem:[#allocation90_spill] sm:$0xff] %v5420_v32  ;;  %v5429_v2 = vstv %s9461_s30 }
 0x20d   :  { %1290 = vrot.lane.b32.xlu0 %v5075_v53, %s8930_s26  ;;  %1292 = vrot.lane.b32.xlu1 %v5078_v54, %s8930_s26  ;;  %s5152_s26 = sld [smem:[#allocation5 + $0x6]]  ;;  %9477 = vst [vmem:[#allocation93_spill] sm:$0xff] %v5429_v2 }
 0x20e   :  { %9406 = sst [smem:[#allocation31_spill]] %s5178_s24 }
 0x20f   :  { %9396 = sst [smem:[#allocation21_spill]] %s5154_s25 }
 0x210   :  { %s5176_s25 = sld [smem:[#allocation5]] }
 0x211   :  { %1325 = vrot.lane.b32.xlu0 %v5075_v53, %s8928_s27  ;;  %1327 = vrot.lane.b32.xlu1 %v5078_v54, %s8928_s27  ;;  %s5150_s27 = sld [smem:[#allocation5 + $0x20]] }
 0x212   :  { %s5196_s24 = sld [smem:[#allocation9 + $0x9]]  ;;  %v5423_v38 = vstv %s9459_s20 }
 0x213   :  { %9395 = sst [smem:[#allocation20_spill]] %s5152_s26  ;;  %9475 = vst [vmem:[#allocation91_spill] sm:$0xff] %v5423_v38 }
 0x214   :  { %s5174_s26 = sld [smem:[#allocation5 + $0x23]] }
 0x215   :  { %1360 = vrot.lane.b32.xlu0 %v5075_v53, %s8926_s28  ;;  %1362 = vrot.lane.b32.xlu1 %v5078_v54, %s8926_s28  ;;  %s5148_s28 = sld [smem:[#allocation5 + $0x17]]  ;;  %v4508_v54 = vld [vmem:[%s8924_s8 + $0x2] ss:$8 sm:$0x3]  ;;  %v5458_v53 = vstv %s9471_s16 }
 0x216   :  { %9405 = sst [smem:[#allocation30_spill]] %s5176_s25  ;;  %9488 = vst [vmem:[#allocation98_spill] sm:$0xff] %v5458_v53 }
 0x217   :  { %9394 = sst [smem:[#allocation19_spill]] %s5150_s27 }
 0x218   :  { %s5172_s27 = sld [smem:[#allocation5 + $0x1a]] }
 0x219   :  { %s5192_s25 = sld [smem:[#allocation9]] }
 0x21a   :  { %9404 = sst [smem:[#allocation29_spill]] %s5174_s26 }
 0x21b   :  { %s5190_s26 = sld [smem:[#allocation7 + $0x3]]  ;;  %v5389_v49 = vstv %s5148_s28 }
 0x21c   :  { %s9450_s2 = sld [smem:[#allocation19_spill]]  ;;  %9463 = vst [vmem:[#allocation83_spill] sm:$0xff] %v5389_v49 }
 0x21d   :  { %s9452_s1 = sld [smem:[#allocation20_spill]] }
 0x21e   :  { %9403 = sst [smem:[#allocation28_spill]] %s5172_s27 }
 0x21f   :  { %s9454_s18 = sld [smem:[#allocation21_spill]] }
 0x220   :  { %s5383_s27 = sld [smem:[#allocation9 + $0x15]] }
 0x221   :  { %9411 = sst [smem:[#allocation36_spill]] %s5190_s26 }
 0x222   :  { %s5246_s26 = sld [smem:[#allocation9 + $0x13]]  ;;  %v5403_v56 = vstv %s9450_s2 }
 0x223   :  { %9467 = vst [vmem:[#allocation86_spill] sm:$0xff] %v5403_v56  ;;  %v5406_v58 = vstv %s9452_s1  ;;  %s9479_s28 = sld [smem:[#allocation28_spill]] }
 0x224   :  { %9468 = vst [vmem:[#allocation87_spill] sm:$0xff] %v5406_v58  ;;  %s9481_s0 = sld [smem:[#allocation29_spill]] }
 0x225   :  { %v5409_v60 = vstv %s9454_s18  ;;  %s5434_s18 = sld [smem:[#allocation9 + $0xe]] }
 0x226   :  { %9469 = vst [vmem:[#allocation88_spill] sm:$0xff] %v5409_v60  ;;  %s9484_s20 = sld [smem:[#allocation30_spill]] }
 0x227   :  { %9486 = sst [smem:[#allocation20_spill]] %s5455_s3 }
 0x228   :  { %s9489_s13 = sld [smem:[#allocation32_spill]] }
 0x229   :  { %s5472_s2 = sld [smem:[#allocation9 + $0x20]]  ;;  %v5477_v39 = vstv %s9479_s28 }
 0x22a   :  { %s9493_s1 = sld [smem:[#allocation33_spill]]  ;;  %9496 = vst [vmem:[#allocation102_spill] sm:$0xff] %v5477_v39  ;;  %v5480_v37 = vstv %s9481_s0  ;;  %s9692_s0 = smov 111  }
 0x22b   :  { %9478 = sst [smem:[#allocation19_spill]] %s5434_s18  ;;  %9497 = vst [vmem:[#allocation103_spill] sm:$0xff] %v5480_v37 }
 0x22c   :  { %s9487_s18 = sld [smem:[#allocation31_spill]]  ;;  %v5486_v36 = vstv %s9484_s20 }
 0x22d   :  { %s9494_s3 = sld [smem:[#allocation34_spill]]  ;;  %9499 = vst [vmem:[#allocation105_spill] sm:$0xff] %v5486_v36 }
 0x22e   :  { %s9495_s16 = sld [smem:[#allocation35_spill]]  ;;  %v5498_v26 = vstv %s9489_s13 }
 0x22f   :  { %s9500_s30 = sld [smem:[#allocation36_spill]]  ;;  %9502 = vst [vmem:[#allocation107_spill] sm:$0xff] %v5498_v26  ;;  %v5532_v26 = vrot.slane %v4507_v43, %v5194_v57 }
 0x230   :  { %s5509_s20 = sld [smem:[#allocation9 + $0xf]]  ;;  %v5512_v22 = vstv %s9493_s1 }
 0x231   :  { %9505 = vst [vmem:[#allocation110_spill] sm:$0xff] %v5512_v22  ;;  %s5526_s13 = sld [smem:[#allocation9 + $0x18]]  ;;  %9510 = vst [vmem:[#allocation115_spill] sm:$0xff] %v5532_v26  ;;  %v5535_v22 = vrot.slane %v4507_v43, %v5201_v59  ;;  %v5547_v26 = vrot.slane %v4508_v54, %v5201_v59  ;;  %v5550_v43 = vrot.slane %v4509_v45, %v5194_v57 }
 0x232   :  { %v5495_v27 = vstv %s9487_s18  ;;  %s5586_s28 = sld [smem:[#allocation9 + $0x19]] }
 0x233   :  { %9501 = vst [vmem:[#allocation106_spill] sm:$0xff] %v5495_v27  ;;  %v5515_v20 = vstv %s9494_s3  ;;  %9511 = vst [vmem:[#allocation116_spill] sm:$0xff] %v5535_v22  ;;  %v5556_v22 = vrot.slane %v4510_v28, %v5194_v57  ;;  %s9697_s18 = sld [smem:[#allocation171_spill]] }
 0x234   :  { %9506 = vst [vmem:[#allocation111_spill] sm:$0xff] %v5515_v20  ;;  %v5518_v19 = vstv %s9495_s16  ;;  %s5543_s16 = sld [smem:[#allocation9 + $0x21]]  ;;  %9513 = vst [vmem:[#allocation118_spill] sm:$0xff] %v5547_v26  ;;  %v5567_v26 = vrot.slane %v4511_v23, %v5201_v59 }
 0x235   :  { %9507 = vst [vmem:[#allocation112_spill] sm:$0xff] %v5518_v19  ;;  %v5529_v17 = vstv %s9500_s30  ;;  %v5538_v19 = vrot.slane %v4508_v54, %v5194_v57  ;;  %9514 = vst [vmem:[#allocation119_spill] sm:$0xff] %v5550_v43  ;;  %v5564_v54 = vrot.slane %v4511_v23, %v5194_v57  ;;  %v5570_v43 = vstv %s5192_s25  ;;  %s5572_s30 = sld [smem:[#allocation9 + $0x10]] }
 0x236   :  { %9509 = vst [vmem:[#allocation114_spill] sm:$0xff] %v5529_v17  ;;  %9517 = vst [vmem:[#allocation121_spill] sm:$0xff] %v5556_v22  ;;  %v5561_v17 = vrot.slane %v4510_v28, %v5201_v59  ;;  %v5578_v28 = vrot.slane %v4512_v24, %v5201_v59  ;;  %v5590_v23 = vrot.slane %v4513_v62, %v5201_v59  ;;  %s9531_s25 = sld [smem:[#allocation19_spill]]  ;;  %v5659_v22 = vstv %s5472_s2  ;;  %s9690_s2 = smov 113  }
 0x237   :  { %9512 = vst [vmem:[#allocation117_spill] sm:$0xff] %v5538_v19  ;;  %v5553_v19 = vrot.slane %v4509_v45, %v5201_v59  ;;  %9519 = vst [vmem:[#allocation123_spill] sm:$0xff] %v5564_v54  ;;  %v5575_v45 = vrot.slane %v4512_v24, %v5194_v57  ;;  %v5584_v54 = vstv %s5196_s24  ;;  %v5599_v24 = vstv %s5216_s23  ;;  %s5601_s24 = sld [smem:[#allocation9 + $0x22]] }
 0x238   :  { %9518 = vst [vmem:[#allocation122_spill] sm:$0xff] %v5561_v17  ;;  %9520 = vst [vmem:[#allocation124_spill] sm:$0xff] %v5567_v26  ;;  %v5581_v17 = vrot.slane %v4513_v62, %v5194_v57  ;;  %v5607_v62 = vstv %s5246_s26  ;;  %v5610_v59 = vstv %s5260_s6  ;;  %s5615_s23 = sld [smem:[#allocation9 + $0x8]] }
 0x239   :  { %9515 = vst [vmem:[#allocation120_spill] sm:$0xff] %v5553_v19  ;;  %9521 = vst [vmem:[#allocation125_spill] sm:$0xff] %v5570_v43  ;;  %v5593_v43 = vstv %s5203_s7  ;;  %s9533_s7 = sld [smem:[#allocation20_spill]] }
 0x23a   :  { %9522 = vst [vmem:[#allocation126_spill] sm:$0xff] %v5575_v45  ;;  %9523 = vst [vmem:[#allocation127_spill] sm:$0xff] %v5578_v28  ;;  %v5596_v45 = vstv %s9516_s21  ;;  %v5625_v28 = vstv %s5311_s5  ;;  %s5941_s26 = sld [smem:[#allocation9 + $0x1a]] }
 0x23b   :  { %9524 = vst [vmem:[#allocation128_spill] sm:$0xff] %v5581_v17  ;;  %9525 = vst [vmem:[#allocation129_spill] sm:$0xff] %v5584_v54  ;;  %v5604_v17 = vstv %s5232_s4  ;;  %s5935_s4 = sld [smem:[#allocation9 + $0x11]] }
 0x23c   :  { %9526 = vst [vmem:[#allocation130_spill] sm:$0xff] %v5590_v23  ;;  %9527 = vst [vmem:[#allocation131_spill] sm:$0xff] %v5593_v43  ;;  %v5622_v23 = vstv %s5294_s11  ;;  %s5947_s6 = sld [smem:[#allocation9 + $0x23]] }
 0x23d   :  { %9528 = vst [vmem:[#allocation132_spill] sm:$0xff] %v5596_v45  ;;  %9529 = vst [vmem:[#allocation133_spill] sm:$0xff] %v5599_v24  ;;  %v5613_v45 = vstv %s5274_s29  ;;  %s5953_s29 = sld [smem:[#allocation9 + $0x4]] }
 0x23e   :  { %9530 = vst [vmem:[#allocation134_spill] sm:$0xff] %v5604_v17  ;;  %9532 = vst [vmem:[#allocation135_spill] sm:$0xff] %v5607_v62  ;;  %v5629_v62 = vstv %s5328_s12  ;;  %v5638_v17 = vstv %s5383_s27  ;;  %s5959_s11 = sld [smem:[#allocation9 + $0xd]]  ;;  %s9676_s27 = smov 15  }
 0x23f   :  { %9534 = vst [vmem:[#allocation136_spill] sm:$0xff] %v5610_v59  ;;  %9535 = vst [vmem:[#allocation137_spill] sm:$0xff] %v5613_v45  ;;  %v5632_v59 = vstv %s5346_s15  ;;  %v5635_v45 = vstv %s5366_s19  ;;  %s5965_s5 = sld [smem:[#allocation9 + $0x16]]  ;;  %s9665_s15 = smov 17  }
 0x240   :  { %9536 = vst [vmem:[#allocation138_spill] sm:$0xff] %v5622_v23  ;;  %9537 = vst [vmem:[#allocation139_spill] sm:$0xff] %v5625_v28  ;;  %v5647_v28 = vstv %s9531_s25  ;;  %v5650_v23 = vstv %s9533_s7  ;;  %s6150_s12 = sld [smem:[#allocation9 + $0x1f]]  ;;  %s9671_s19 = smov 16  }
 0x241   :  { %9538 = vst [vmem:[#allocation140_spill] sm:$0xff] %v5629_v62  ;;  %9539 = vst [vmem:[#allocation141_spill] sm:$0xff] %v5632_v59  ;;  %s9703_s3 = sld [smem:[#allocation170_spill]] }
 0x242   :  { %9540 = vst [vmem:[#allocation142_spill] sm:$0xff] %v5635_v45  ;;  %9541 = vst [vmem:[#allocation143_spill] sm:$0xff] %v5638_v17 }
 0x243   :  { %9544 = vst [vmem:[#allocation146_spill] sm:$0xff] %v5647_v28  ;;  %9545 = vst [vmem:[#allocation147_spill] sm:$0xff] %v5650_v23  ;;  %v5665_v28 = vstv %s5509_s20  ;;  %v5668_v23 = vstv %s5526_s13 }
 0x244   :  { %9546 = vst [vmem:[#allocation148_spill] sm:$0xff] %v5659_v22  ;;  %9548 = vst [vmem:[#allocation150_spill] sm:$0xff] %v5665_v28 }
 0x245   :  { %9549 = vst [vmem:[#allocation151_spill] sm:$0xff] %v5668_v23 }
 0x24b   :  { %v529_v42 = vpop.permute.xlu1 %528  ;;  %v5474_v41 = vpop.permute.xlu0 %494 }
 0x24f   :  { %v569_v18 = vpop.permute.xlu0 %568  ;;  %v531_v20 = vpop.permute.xlu1 %530 }
 0x250   :  { %v533_v24 = vsel %vm532_vm0, %v529_v42, %v531_v20  ;;  %v534_v43 = vsel %vm532_vm0, %v531_v20, %v529_v42  ;;  %v5641_v20 = vstv %s5400_s14  ;;  %v5644_v42 = vstv %s5417_s17  ;;  %s9680_s14 = smov 1   ;;  %s9686_s17 = smov 127  }
 0x251   :  { %9542 = vst [vmem:[#allocation144_spill] sm:$0xff] %v5641_v20  ;;  %9543 = vst [vmem:[#allocation145_spill] sm:$0xff] %v5644_v42  ;;  %v546_v62 = vmul.f32 %v5221_v0, %v534_v43  ;;  %v547_v59 = vmul.f32 %v5235_v4, %v533_v24  ;;  %v5662_v42 = vstv %s5491_s22  ;;  %v5672_v43 = vstv %s5543_s16  ;;  %s9691_s22 = smov 112  }
 0x252   :  { %9547 = vst [vmem:[#allocation149_spill] sm:$0xff] %v5662_v42  ;;  %9550 = vst [vmem:[#allocation152_spill] sm:$0xff] %v5672_v43  ;;  %v5675_v24 = vstv %s5558_s10  ;;  %v5678_v4 = vstv %s5572_s30  ;;  %v5696_v42 = vstv %s5601_s24 }
 0x253   :  { %v609_v57 = vpop.permute.xlu0 %608  ;;  %v571_v54 = vpop.permute.xlu1 %570  ;;  %9551 = vst [vmem:[#allocation153_spill] sm:$0xff] %v5675_v24  ;;  %9552 = vst [vmem:[#allocation154_spill] sm:$0xff] %v5678_v4  ;;  %v5690_v28 = vmul.f32 %v5238_v5, %v546_v62  ;;  %v5693_v43 = vmul.f32 %v5238_v5, %v547_v59  ;;  %v5722_v19 = vmul.f32 %v5249_v8, %v546_v62 }
 0x254   :  { %v573_v45 = vsel %vm572_vm1, %v569_v18, %v571_v54  ;;  %v574_v17 = vsel %vm572_vm1, %v571_v54, %v569_v18  ;;  %v5681_v18 = vstv %s5586_s28  ;;  %9554 = vst [vmem:[#allocation156_spill] sm:$0xff] %v5696_v42 }
 0x255   :  { %9553 = vst [vmem:[#allocation155_spill] sm:$0xff] %v5681_v18  ;;  %v586_v54 = vmul.f32 %v5252_v9, %v574_v17  ;;  %v587_v0 = vmul.f32 %v5255_v10, %v573_v45  ;;  %v5699_v18 = vstv %s5615_s23  ;;  %v5702_v17 = vmul.f32 %v5241_v6, %v546_v62 }
 0x256   :  { %9555 = vst [vmem:[#allocation157_spill] sm:$0xff] %v5699_v18  ;;  %v5705_v45 = vmul.f32 %v5241_v6, %v547_v59 }
 0x257   :  { %v669_v20 = vpop.permute.xlu0 %668  ;;  %v611_v26 = vpop.permute.xlu1 %610 }
 0x258   :  { %v613_v22 = vsel %vm612_vm2, %v609_v57, %v611_v26  ;;  %v614_v23 = vsel %vm612_vm2, %v611_v26, %v609_v57  ;;  %v5708_v57 = vmul.f32 %v5244_v7, %v546_v62  ;;  %v5711_v26 = vmul.f32 %v5244_v7, %v547_v59 }
 0x259   :  { %v626_v10 = vmul.f32 %v5272_v15, %v614_v23  ;;  %v627_v9 = vmul.f32 %v5277_v16, %v613_v22  ;;  %v5725_v7 = vmul.f32 %v5249_v8, %v547_v59  ;;  %v5728_v23 = vmul.f32 %v5258_v11, %v586_v54 }
 0x25a   :  { %v5731_v22 = vmul.f32 %v5258_v11, %v587_v0  ;;  %v5734_v16 = vmul.f32 %v5263_v12, %v586_v54  ;;  %v5743_v62 = vmul.f32 %v5266_v13, %v587_v0 }
 0x25b   :  { %v709_v24 = vpop.permute.xlu0 %708  ;;  %v671_v4 = vpop.permute.xlu1 %670 }
 0x25c   :  { %v673_v42 = vsel %vm672_vm3, %v669_v20, %v671_v4  ;;  %v674_v18 = vsel %vm672_vm3, %v671_v4, %v669_v20  ;;  %v5737_v4 = vmul.f32 %v5263_v12, %v587_v0  ;;  %v5740_v20 = vmul.f32 %v5266_v13, %v586_v54  ;;  %9557 = vst [vmem:[#allocation159_spill] sm:$0xff] %v5743_v62 }
 0x25d   :  { %v686_v8 = vmul.f32 %v5334_v30, %v673_v42  ;;  %v687_v6 = vmul.f32 %v5337_v31, %v674_v18  ;;  %v5752_v12 = vmul.f32 %v5269_v14, %v586_v54  ;;  %v5758_v13 = vmul.f32 %v5297_v21, %v626_v10 }
 0x25e   :  { %9556 = vst [vmem:[#allocation158_spill] sm:$0xff] %v5740_v20  ;;  %v5755_v20 = vmul.f32 %v5269_v14, %v587_v0  ;;  %v5761_v62 = vmul.f32 %v5297_v21, %v627_v9  ;;  %v5764_v42 = vmul.f32 %v5314_v25, %v626_v10  ;;  %v5767_v18 = vmul.f32 %v5314_v25, %v627_v9 }
 0x25f   :  { %v749_v59 = vpop.permute.xlu0 %748  ;;  %v711_v15 = vpop.permute.xlu1 %710  ;;  %v5776_v0 = vmul.f32 %v5349_v34, %v626_v10  ;;  %v5779_v54 = vmul.f32 %v5349_v34, %v627_v9  ;;  %v5784_v25 = vmul.f32 %v5369_v40, %v686_v8 }
 0x260   :  { %v713_v11 = vsel %vm712_vm4, %v709_v24, %v711_v15  ;;  %v714_v5 = vsel %vm712_vm4, %v711_v15, %v709_v24  ;;  %v5770_v15 = vmul.f32 %v5331_v29, %v626_v10  ;;  %v5773_v24 = vmul.f32 %v5331_v29, %v627_v9 }
 0x261   :  { %v726_v31 = vmul.f32 %v5392_v51, %v713_v11  ;;  %v727_v30 = vmul.f32 %v5395_v52, %v714_v5  ;;  %v5794_v9 = vmul.f32 %v5386_v47, %v686_v8  ;;  %v5797_v11 = vmul.f32 %v5386_v47, %v687_v6 }
 0x262   :  { %9558 = vst [vmem:[#allocation160_spill] sm:$0xff] %v5770_v15  ;;  %v5787_v15 = vmul.f32 %v5369_v40, %v687_v6  ;;  %v5800_v5 = vmul.f32 %v5389_v49, %v686_v8  ;;  %v5803_v52 = vmul.f32 %v5389_v49, %v687_v6  ;;  %v5806_v51 = vmul.f32 %v5403_v56, %v686_v8 }
 0x263   :  { %v789_v21 = vpop.permute.xlu0 %788  ;;  %v751_v14 = vpop.permute.xlu1 %750  ;;  %v5809_v40 = vmul.f32 %v5403_v56, %v687_v6  ;;  %v5818_v47 = vmul.f32 %v5409_v60, %v726_v31  ;;  %v5821_v34 = vmul.f32 %v5409_v60, %v727_v30 }
 0x264   :  { %v753_v29 = vsel %vm752_vm5, %v749_v59, %v751_v14  ;;  %v754_v10 = vsel %vm752_vm5, %v751_v14, %v749_v59  ;;  %9559 = vst [vmem:[#allocation161_spill] sm:$0xff] %v5803_v52  ;;  %9560 = vst [vmem:[#allocation162_spill] sm:$0xff] %v5806_v51  ;;  %v5812_v14 = vmul.f32 %v5406_v58, %v726_v31 }
 0x265   :  { %v5815_v59 = vmul.f32 %v5406_v58, %v727_v30  ;;  %v766_v49 = vmul.f32 %v5412_v1, %v753_v29  ;;  %v767_v8 = vmul.f32 %v5426_v3, %v754_v10  ;;  %v5836_v29 = vmul.f32 %v5420_v32, %v726_v31 }
 0x266   :  { %v5839_v10 = vmul.f32 %v5420_v32, %v727_v30  ;;  %v5842_v3 = vmul.f32 %v5423_v38, %v726_v31  ;;  %v5845_v1 = vmul.f32 %v5423_v38, %v727_v30 }
 0x267   :  { %v791_v51 = vpop.permute.xlu1 %790  ;;  %v497_v52 = vpop.permute.xlu0 %496  ;;  %v5864_v38 = vmul.f32 %v5441_v46, %v766_v49 }
 0x268   :  { %v793_v6 = vsel %vm792_vm6, %v789_v21, %v791_v51  ;;  %v794_v56 = vsel %vm792_vm6, %v791_v51, %v789_v21  ;;  %v501_v58 = vsel %vm500_vm7, %v5474_v41, %v497_v52  ;;  %v502_v60 = vsel %vm500_vm7, %v497_v52, %v5474_v41 }
 0x269   :  { %v5848_v21 = vmul.f32 %v5429_v2, %v766_v49  ;;  %v5851_v51 = vmul.f32 %v5429_v2, %v767_v8  ;;  %v5854_v41 = vmul.f32 %v5438_v61, %v766_v49  ;;  %v5857_v52 = vmul.f32 %v5438_v61, %v767_v8 }
 0x26a   :  { %v806_v32 = vmul.f32 %v5444_v44, %v793_v6  ;;  %v807_v31 = vmul.f32 %v5447_v35, %v794_v56  ;;  %v514_v63 = vmul.f32 %v5467_v55, %v502_v60  ;;  %v515_v30 = vmul.f32 %v5483_v33, %v501_v58 }
 0x26b   :  { %9561 = vst [vmem:[#allocation163_spill] sm:$0xff] %v5851_v51  ;;  %v5867_v2 = vmul.f32 %v5441_v46, %v767_v8  ;;  %v5870_v51 = vmul.f32 %v5458_v53, %v766_v49  ;;  %v5873_v61 = vmul.f32 %v5458_v53, %v767_v8  ;;  %v9567_v53 = vld [vmem:[#allocation107_spill] sm:$0xff] }
 0x26c   :  { %v5876_v6 = vmul.f32 %v5461_v50, %v806_v32  ;;  %v5879_v56 = vmul.f32 %v5461_v50, %v807_v31  ;;  %v5882_v58 = vmul.f32 %v5464_v48, %v806_v32  ;;  %v5885_v60 = vmul.f32 %v5464_v48, %v807_v31 }
 0x26d   :  { %v5888_v35 = vmul.f32 %v5477_v39, %v806_v32  ;;  %v5891_v49 = vmul.f32 %v5477_v39, %v807_v31  ;;  %v5894_v8 = vmul.f32 %v5480_v37, %v806_v32  ;;  %v5897_v44 = vmul.f32 %v5480_v37, %v807_v31  ;;  %v9568_v39 = vld [vmem:[#allocation108_spill] sm:$0xff] }
 0x26e   :  { %9562 = vst [vmem:[#allocation164_spill] sm:$0xff] %v5885_v60  ;;  %v517_v33 = vmul.f32 %v5486_v36, %v514_v63  ;;  %v518_v55 = vmul.f32 %v5486_v36, %v515_v30  ;;  %v520_v50 = vmul.f32 %v5495_v27, %v514_v63  ;;  %v521_v48 = vmul.f32 %v5495_v27, %v515_v30 }
 0x26f   :  { %9563 = vst [vmem:[#allocation165_spill] sm:$0xff] %v5888_v35  ;;  %9564 = vst [vmem:[#allocation166_spill] sm:$0xff] %v5891_v49  ;;  %v523_v46 = vmul.f32 %v9567_v53, %v514_v63  ;;  %v524_v35 = vmul.f32 %v9567_v53, %v515_v30  ;;  %v526_v49 = vmul.f32 %v9568_v39, %v514_v63 }
 0x270   :  { %9565 = vst [vmem:[#allocation167_spill] sm:$0xff] %v5894_v8  ;;  %9566 = vst [vmem:[#allocation168_spill] sm:$0xff] %v5897_v44  ;;  %v527_v32 = vmul.f32 %v9568_v39, %v515_v30  ;;  %v551_v8 = vadd.f32 %v5690_v28, %v517_v33  ;;  %v552_v31 = vadd.f32 %v5693_v43, %v518_v55  ;;  %v5919_v28 = vpop.permute.xlu0 %1107  ;;  %v9570_v43 = vld [vmem:[#allocation159_spill] sm:$0xff] }
 0x271   :  { %v556_v37 = vadd.f32 %v5702_v17, %v520_v50  ;;  %v557_v36 = vadd.f32 %v5705_v45, %v521_v48  ;;  %v561_v44 = vadd.f32 %v5708_v57, %v523_v46  ;;  %v562_v27 = vadd.f32 %v5711_v26, %v524_v35  ;;  %v5921_v50 = vpop.permute.xlu1 %1109  ;;  %v9569_v48 = vld [vmem:[#allocation158_spill] sm:$0xff] }
 0x272   :  { %v566_v60 = vadd.f32 %v5722_v19, %v526_v49  ;;  %v567_v53 = vadd.f32 %v5725_v7, %v527_v32  ;;  %v591_v63 = vadd.f32 %v5728_v23, %v551_v8  ;;  %v592_v30 = vadd.f32 %v5731_v22, %v552_v31  ;;  %v9573_v23 = vld [vmem:[#allocation60_spill] sm:$0xff]  ;;  %v9574_v22 = vld [vmem:[#allocation61_spill] sm:$0xff]  ;;  %v9578_v49 = vld [vmem:[#allocation67_spill] sm:$0xff] }
 0x273   :  { %v596_v33 = vadd.f32 %v5734_v16, %v556_v37  ;;  %v597_v55 = vadd.f32 %v5737_v4, %v557_v36  ;;  %v601_v46 = vadd.f32 %v9569_v48, %v561_v44  ;;  %v602_v35 = vadd.f32 %v9570_v43, %v562_v27  ;;  %v9571_v37 = vld [vmem:[#allocation160_spill] sm:$0xff] }
 0x274   :  { %v606_v19 = vadd.f32 %v5752_v12, %v566_v60  ;;  %v607_v7 = vadd.f32 %v5755_v20, %v567_v53  ;;  %v631_v17 = vadd.f32 %v5758_v13, %v591_v63  ;;  %v632_v45 = vadd.f32 %v5761_v62, %v592_v30  ;;  %v9572_v12 = vld [vmem:[#allocation59_spill] sm:$0xff]  ;;  %v9577_v60 = vld [vmem:[#allocation65_spill] sm:$0xff]  ;;  %v9579_v8 = vld [vmem:[#allocation68_spill] sm:$0xff] }
 0x275   :  { %v636_v16 = vadd.f32 %v5764_v42, %v596_v33  ;;  %v637_v36 = vadd.f32 %v5767_v18, %v597_v55  ;;  %v641_v57 = vadd.f32 %v9571_v37, %v601_v46  ;;  %v642_v26 = vadd.f32 %v5773_v24, %v602_v35  ;;  %v9575_v20 = vld [vmem:[#allocation63_spill] sm:$0xff]  ;;  %v9576_v42 = vld [vmem:[#allocation64_spill] sm:$0xff]  ;;  %v1135_v33 = vpop.permute.xlu0 %1134  ;;  %v1137_v55 = vpop.permute.xlu1 %1136  ;;  %v9580_v46 = vld [vmem:[#allocation161_spill] sm:$0xff] }
 0x276   :  { %v646_v44 = vadd.f32 %v5776_v0, %v606_v19  ;;  %v647_v27 = vadd.f32 %v5779_v54, %v607_v7  ;;  %v651_v53 = vadd.f32 %v9572_v12, %v631_v17  ;;  %v652_v13 = vadd.f32 %v9573_v23, %v632_v45  ;;  %v9581_v35 = vld [vmem:[#allocation162_spill] sm:$0xff]  ;;  %v9583_v37 = vld [vmem:[#allocation164_spill] sm:$0xff] }
 0x277   :  { %v656_v4 = vadd.f32 %v9574_v22, %v636_v16  ;;  %v657_v62 = vadd.f32 %v9575_v20, %v637_v36  ;;  %v661_v18 = vadd.f32 %v9576_v42, %v641_v57  ;;  %v662_v24 = vadd.f32 %v9577_v60, %v642_v26  ;;  %v9582_v36 = vld [vmem:[#allocation163_spill] sm:$0xff] }
 0x278   :  { %v666_v0 = vadd.f32 %v9578_v49, %v646_v44  ;;  %v667_v54 = vadd.f32 %v9579_v8, %v647_v27  ;;  %v691_v32 = vadd.f32 %v5784_v25, %v651_v53  ;;  %v692_v31 = vadd.f32 %v5787_v15, %v652_v13  ;;  %v9586_v12 = vld [vmem:[#allocation167_spill] sm:$0xff]  ;;  %v9587_v53 = vld [vmem:[#allocation168_spill] sm:$0xff]  ;;  %v9592_v13 = vld [vmem:[#allocation110_spill] sm:$0xff] }
 0x279   :  { %v696_v63 = vadd.f32 %v5794_v9, %v656_v4  ;;  %v697_v30 = vadd.f32 %v5797_v11, %v657_v62  ;;  %v701_v48 = vadd.f32 %v5800_v5, %v661_v18  ;;  %v702_v43 = vadd.f32 %v9580_v46, %v662_v24  ;;  %v1170_v57 = vpop.permute.xlu0 %1169  ;;  %v1172_v26 = vpop.permute.xlu1 %1171  ;;  %v9595_v60 = vld [vmem:[#allocation111_spill] sm:$0xff]  ;;  %v9597_v8 = vld [vmem:[#allocation112_spill] sm:$0xff]  ;;  %v9684_v4 = vld [vmem:[#allocation154_spill] sm:$0xff] }
 0x27a   :  { %v706_v19 = vadd.f32 %v9581_v35, %v666_v0  ;;  %v707_v7 = vadd.f32 %v5809_v40, %v667_v54  ;;  %v731_v25 = vadd.f32 %v5812_v14, %v691_v32  ;;  %v732_v15 = vadd.f32 %v5815_v59, %v692_v31 }
 0x27b   :  { %v736_v9 = vadd.f32 %v5818_v47, %v696_v63  ;;  %v737_v11 = vadd.f32 %v5821_v34, %v697_v30  ;;  %v741_v5 = vadd.f32 %v5836_v29, %v701_v48  ;;  %v742_v17 = vadd.f32 %v5839_v10, %v702_v43  ;;  %v9599_v63 = vld [vmem:[#allocation109_spill] sm:$0xff] }
 0x27c   :  { %v746_v45 = vadd.f32 %v5842_v3, %v706_v19  ;;  %v747_v40 = vadd.f32 %v5845_v1, %v707_v7  ;;  %v771_v16 = vadd.f32 %v5848_v21, %v731_v25  ;;  %v772_v14 = vadd.f32 %v9582_v36, %v732_v15  ;;  %v9600_v48 = vld [vmem:[#allocation113_spill] sm:$0xff]  ;;  %v9601_v15 = vld [vmem:[#allocation115_spill] sm:$0xff]  ;;  %v9604_v36 = vld [vmem:[#allocation106_spill] sm:$0xff] }
 0x27d   :  { %v776_v59 = vadd.f32 %v5854_v41, %v736_v9  ;;  %v777_v47 = vadd.f32 %v5857_v52, %v737_v11  ;;  %v781_v34 = vadd.f32 %v5864_v38, %v741_v5  ;;  %v782_v29 = vadd.f32 %v5867_v2, %v742_v17  ;;  %v9584_v38 = vld [vmem:[#allocation165_spill] sm:$0xff]  ;;  %v9585_v2 = vld [vmem:[#allocation166_spill] sm:$0xff]  ;;  %v1205_v19 = vpop.permute.xlu0 %1204  ;;  %v1207_v7 = vpop.permute.xlu1 %1206  ;;  %v9602_v11 = vld [vmem:[#allocation116_spill] sm:$0xff] }
 0x27e   :  { %v786_v3 = vadd.f32 %v5870_v51, %v746_v45  ;;  %v787_v1 = vadd.f32 %v5873_v61, %v747_v40  ;;  %v811_v10 = vadd.f32 %v5876_v6, %v771_v16  ;;  %v812_v21 = vadd.f32 %v5879_v56, %v772_v14  ;;  %v9603_v45 = vld [vmem:[#allocation105_spill] sm:$0xff] }
 0x27f   :  { %v816_v41 = vadd.f32 %v5882_v58, %v776_v59  ;;  %v817_v52 = vadd.f32 %v9583_v37, %v777_v47  ;;  %v821_v44 = vadd.f32 %v9584_v38, %v781_v34  ;;  %v822_v27 = vadd.f32 %v9585_v2, %v782_v29  ;;  %v9605_v59 = vld [vmem:[#allocation107_spill] sm:$0xff] }
 0x280   :  { %v826_v51 = vadd.f32 %v9586_v12, %v786_v3  ;;  %v827_v61 = vadd.f32 %v9587_v53, %v787_v1  ;;  %v5988_v23 = vstv %s5935_s4  ;;  %v5991_v6 = vstv %s5941_s26  ;;  %v9606_v3 = vld [vmem:[#allocation47_spill] sm:$0xff]  ;;  %s9735_s4 = sld [smem:[#allocation169_spill]] }
 0x281   :  { %9588 = vst [vmem:[#allocation158_spill] sm:$0xff] %v5988_v23  ;;  %9589 = vst [vmem:[#allocation159_spill] sm:$0xff] %v5991_v6  ;;  %v5994_v56 = vstv %s5947_s6  ;;  %v5997_v58 = vstv %s5953_s29  ;;  %v829_v22 = vadd.f32 %v9592_v13, %v811_v10  ;;  %v1111_v20 = vsel %vm500_vm7, %v5919_v28, %v5921_v50 }
 0x282   :  { %9590 = vst [vmem:[#allocation160_spill] sm:$0xff] %v5994_v56  ;;  %9591 = vst [vmem:[#allocation59_spill] sm:$0xff] %v5997_v58  ;;  %v1112_v62 = vsel %vm500_vm7, %v5921_v50, %v5919_v28  ;;  %v6009_v42 = vstv %s5959_s11  ;;  %v6012_v18 = vadd.f32 %v9592_v13, %v812_v21  ;;  %v6015_v24 = vadd.f32 %v9595_v60, %v816_v41  ;;  %v9598_v28 = vld [vmem:[#allocation114_spill] sm:$0xff]  ;;  %v9607_v21 = vld [vmem:[#allocation48_spill] sm:$0xff] }
 0x283   :  { %9594 = vst [vmem:[#allocation60_spill] sm:$0xff] %v6009_v42  ;;  %v6018_v49 = vadd.f32 %v9595_v60, %v817_v52  ;;  %v6021_v0 = vstv %s5965_s5  ;;  %v6024_v54 = vadd.f32 %v9597_v8, %v821_v44  ;;  %v6027_v32 = vadd.f32 %v9597_v8, %v822_v27  ;;  %v9608_v52 = vld [vmem:[#allocation49_spill] sm:$0xff] }
 0x284   :  { %9596 = vst [vmem:[#allocation61_spill] sm:$0xff] %v6021_v0  ;;  %v6030_v50 = vadd.f32 %v9598_v28, %v826_v51  ;;  %v6033_v31 = vadd.f32 %v9598_v28, %v827_v61  ;;  %v1124_v30 = vmul.f32 %v9599_v63, %v1112_v62  ;;  %v1125_v46 = vmul.f32 %v9600_v48, %v1111_v20  ;;  %v1256_v61 = vpop.permute.xlu0 %1255  ;;  %v9679_v63 = vld [vmem:[#allocation150_spill] sm:$0xff] }
 0x285   :  { %v1138_v43 = vsel %vm532_vm0, %v1135_v33, %v1137_v55  ;;  %v1139_v35 = vsel %vm532_vm0, %v1137_v55, %v1135_v33  ;;  %v6041_v25 = vmax.f32 %v829_v22, 0.0  ;;  %v1173_v17 = vsel %vm572_vm1, %v1170_v57, %v1172_v26  ;;  %v1258_v22 = vpop.permute.xlu1 %1257 }
 0x286   :  { %v1151_v9 = vmul.f32 %v9601_v15, %v1139_v35  ;;  %v1152_v5 = vmul.f32 %v9602_v11, %v1138_v43  ;;  %v1126_v40 = vmul.f32 %v1124_v30, %v9603_v45  ;;  %v1127_v16 = vmul.f32 %v1125_v46, %v9603_v45  ;;  %v9610_v35 = vld [vmem:[#allocation117_spill] sm:$0xff]  ;;  %v9619_v45 = vld [vmem:[#allocation66_spill] sm:$0xff] }
 0x287   :  { %v1128_v14 = vmul.f32 %v1124_v30, %v9604_v36  ;;  %v1174_v33 = vsel %vm572_vm1, %v1172_v26, %v1170_v57  ;;  %v1129_v55 = vmul.f32 %v1125_v46, %v9604_v36  ;;  %v1130_v47 = vmul.f32 %v1124_v30, %v9605_v59  ;;  %v9609_v26 = vld [vmem:[#allocation50_spill] sm:$0xff] }
 0x288   :  { %v1131_v34 = vmul.f32 %v1125_v46, %v9605_v59  ;;  %v1132_v29 = vmul.f32 %v1124_v30, %v9568_v39  ;;  %v1153_v1 = vmul.f32 %v1151_v9, %v9606_v3  ;;  %v1154_v10 = vmul.f32 %v1152_v5, %v9606_v3 }
 0x289   :  { %v1157_v41 = vmul.f32 %v1151_v9, %v9607_v21  ;;  %v1158_v37 = vmul.f32 %v1152_v5, %v9607_v21  ;;  %v1161_v38 = vmul.f32 %v1151_v9, %v9608_v52  ;;  %v1162_v57 = vmul.f32 %v1152_v5, %v9608_v52  ;;  %v9611_v21 = vld [vmem:[#allocation118_spill] sm:$0xff] }
 0x28a   :  { %v1165_v44 = vmul.f32 %v1151_v9, %v9609_v26  ;;  %v1166_v2 = vmul.f32 %v1152_v5, %v9609_v26  ;;  %v1133_v27 = vmul.f32 %v1125_v46, %v9568_v39  ;;  %v1155_v12 = vadd.f32 %v1153_v1, %v1126_v40  ;;  %v9612_v40 = vld [vmem:[#allocation119_spill] sm:$0xff]  ;;  %v9618_v52 = vld [vmem:[#allocation62_spill] sm:$0xff] }
 0x28b   :  { %v1156_v51 = vadd.f32 %v1154_v10, %v1127_v16  ;;  %v1159_v53 = vadd.f32 %v1157_v41, %v1128_v14  ;;  %v1160_v20 = vadd.f32 %v1158_v37, %v1129_v55  ;;  %v1163_v62 = vadd.f32 %v1161_v38, %v1130_v47  ;;  %v9613_v14 = vld [vmem:[#allocation120_spill] sm:$0xff]  ;;  %v9614_v47 = vld [vmem:[#allocation53_spill] sm:$0xff]  ;;  %v9616_v41 = vld [vmem:[#allocation55_spill] sm:$0xff] }
 0x28c   :  { %v1164_v30 = vadd.f32 %v1162_v57, %v1131_v34  ;;  %v1167_v43 = vadd.f32 %v1165_v44, %v1132_v29  ;;  %v1186_v59 = vmul.f32 %v9610_v35, %v1174_v33  ;;  %v1187_v3 = vmul.f32 %v9611_v21, %v1173_v17  ;;  %v9615_v29 = vld [vmem:[#allocation54_spill] sm:$0xff] }
 0x28d   :  { %v1208_v9 = vsel %vm612_vm2, %v1205_v19, %v1207_v7  ;;  %v1209_v5 = vsel %vm612_vm2, %v1207_v7, %v1205_v19  ;;  %v1168_v46 = vadd.f32 %v1166_v2, %v1133_v27  ;;  %v1259_v55 = vsel %vm672_vm3, %v1256_v61, %v1258_v22  ;;  %v9617_v7 = vld [vmem:[#allocation56_spill] sm:$0xff]  ;;  %v9620_v21 = vld [vmem:[#allocation70_spill] sm:$0xff] }
 0x28e   :  { %v1221_v16 = vmul.f32 %v9612_v40, %v1209_v5  ;;  %v1222_v1 = vmul.f32 %v9613_v14, %v1208_v9  ;;  %v1188_v34 = vmul.f32 %v1186_v59, %v9614_v47  ;;  %v1189_v33 = vmul.f32 %v1187_v3, %v9614_v47  ;;  %v1291_v40 = vpop.permute.xlu0 %1290 }
 0x28f   :  { %v1192_v17 = vmul.f32 %v1186_v59, %v9615_v29  ;;  %v1193_v10 = vmul.f32 %v1187_v3, %v9615_v29  ;;  %v1196_v37 = vmul.f32 %v1186_v59, %v9616_v41  ;;  %v1197_v19 = vmul.f32 %v1187_v3, %v9616_v41 }
 0x290   :  { %v1200_v38 = vmul.f32 %v1186_v59, %v9617_v7  ;;  %v1201_v57 = vmul.f32 %v1187_v3, %v9617_v7  ;;  %v1190_v44 = vadd.f32 %v1188_v34, %v1155_v12  ;;  %v1191_v2 = vadd.f32 %v1189_v33, %v1156_v51  ;;  %v1293_v59 = vpop.permute.xlu1 %1292  ;;  %v9621_v51 = vld [vmem:[#allocation74_spill] sm:$0xff] }
 0x291   :  { %v1194_v27 = vadd.f32 %v1192_v17, %v1159_v53  ;;  %v1195_v9 = vadd.f32 %v1193_v10, %v1160_v20  ;;  %v1198_v5 = vadd.f32 %v1196_v37, %v1163_v62  ;;  %v1199_v26 = vadd.f32 %v1197_v19, %v1164_v30 }
 0x292   :  { %v1202_v39 = vadd.f32 %v1200_v38, %v1167_v43  ;;  %v1203_v47 = vadd.f32 %v1201_v57, %v1168_v46  ;;  %v1223_v36 = vmul.f32 %v1221_v16, %v9618_v52  ;;  %v1224_v29 = vmul.f32 %v1222_v1, %v9618_v52 }
 0x293   :  { %v1227_v14 = vmul.f32 %v1221_v16, %v9619_v45  ;;  %v1228_v41 = vmul.f32 %v1222_v1, %v9619_v45  ;;  %v1231_v3 = vmul.f32 %v1221_v16, %v9620_v21  ;;  %v1232_v12 = vmul.f32 %v1222_v1, %v9620_v21 }
 0x294   :  { %v1235_v53 = vmul.f32 %v1221_v16, %v9621_v51  ;;  %v1236_v20 = vmul.f32 %v1222_v1, %v9621_v51  ;;  %v1225_v62 = vadd.f32 %v1223_v36, %v1190_v44  ;;  %v1226_v30 = vadd.f32 %v1224_v29, %v1191_v2  ;;  %v9623_v16 = vld [vmem:[#allocation69_spill] sm:$0xff]  ;;  %v9624_v1 = vld [vmem:[#allocation75_spill] sm:$0xff] }
 0x295   :  { %v1229_v43 = vadd.f32 %v1227_v14, %v1194_v27  ;;  %v1230_v46 = vadd.f32 %v1228_v41, %v1195_v9  ;;  %v1233_v34 = vadd.f32 %v1231_v3, %v1198_v5  ;;  %v1234_v33 = vadd.f32 %v1232_v12, %v1199_v26  ;;  %v9625_v29 = vld [vmem:[#allocation73_spill] sm:$0xff]  ;;  %v9626_v41 = vld [vmem:[#allocation76_spill] sm:$0xff]  ;;  %v1328_v9 = vpop.permute.xlu1 %1327  ;;  %v9630_v5 = vld [vmem:[#allocation79_spill] sm:$0xff] }
 0x296   :  { %v1237_v17 = vadd.f32 %v1235_v53, %v1202_v39  ;;  %v1260_v10 = vsel %vm672_vm3, %v1258_v22, %v1256_v61  ;;  %v6094_v37 = vmax.f32 %v6012_v18, 0.0  ;;  %v6097_v19 = vmax.f32 %v6018_v49, 0.0  ;;  %v9627_v26 = vld [vmem:[#allocation77_spill] sm:$0xff]  ;;  %v9629_v61 = vld [vmem:[#allocation122_spill] sm:$0xff]  ;;  %v9631_v12 = vld [vmem:[#allocation80_spill] sm:$0xff] }
 0x297   :  { %v1238_v38 = vadd.f32 %v1236_v20, %v1203_v47  ;;  %v1241_v57 = vadd.f32 %v9623_v16, %v1225_v62  ;;  %v1242_v36 = vadd.f32 %v9624_v1, %v1226_v30  ;;  %v1245_v14 = vadd.f32 %v9625_v29, %v1229_v43  ;;  %v9628_v2 = vld [vmem:[#allocation121_spill] sm:$0xff]  ;;  %v1326_v47 = vpop.permute.xlu0 %1325  ;;  %v9632_v20 = vld [vmem:[#allocation123_spill] sm:$0xff]  ;;  %v9633_v30 = vld [vmem:[#allocation124_spill] sm:$0xff] }
 0x298   :  { %9622 = vst [vmem:[#allocation63_spill] sm:$0xff] %v6097_v19  ;;  %v1246_v44 = vadd.f32 %v9626_v41, %v1230_v46  ;;  %v1249_v39 = vadd.f32 %v9627_v26, %v1233_v34  ;;  %v1272_v27 = vmul.f32 %v9628_v2, %v1259_v55  ;;  %v1273_v22 = vmul.f32 %v9629_v61, %v1260_v10  ;;  %v9634_v46 = vld [vmem:[#allocation78_spill] sm:$0xff]  ;;  %v9636_v29 = vld [vmem:[#allocation81_spill] sm:$0xff] }
 0x299   :  { %v1294_v18 = vsel %vm712_vm4, %v1291_v40, %v1293_v59  ;;  %v1295_v49 = vsel %vm712_vm4, %v1293_v59, %v1291_v40  ;;  %v1250_v3 = vadd.f32 %v9630_v5, %v1234_v33  ;;  %v1253_v53 = vadd.f32 %v9631_v12, %v1237_v17  ;;  %v9635_v10 = vld [vmem:[#allocation82_spill] sm:$0xff]  ;;  %v9637_v59 = vld [vmem:[#allocation83_spill] sm:$0xff]  ;;  %v9673_v61 = vld [vmem:[#allocation145_spill] sm:$0xff] }
 0x29a   :  { %v1307_v62 = vmul.f32 %v9632_v20, %v1294_v18  ;;  %v1308_v43 = vmul.f32 %v9633_v30, %v1295_v49  ;;  %v1274_v55 = vmul.f32 %v1272_v27, %v9634_v46  ;;  %v1275_v34 = vmul.f32 %v1273_v22, %v9634_v46  ;;  %v9638_v18 = vld [vmem:[#allocation86_spill] sm:$0xff] }
 0x29b   :  { %v1278_v16 = vmul.f32 %v1272_v27, %v9635_v10  ;;  %v1279_v1 = vmul.f32 %v1273_v22, %v9635_v10  ;;  %v1254_v40 = vadd.f32 %v9636_v29, %v1238_v38  ;;  %v1282_v41 = vmul.f32 %v1272_v27, %v9637_v59  ;;  %v9639_v38 = vld [vmem:[#allocation87_spill] sm:$0xff] }
 0x29c   :  { %v1283_v33 = vmul.f32 %v1273_v22, %v9637_v59  ;;  %v1329_v17 = vsel %vm752_vm5, %v1326_v47, %v1328_v9  ;;  %v1276_v26 = vadd.f32 %v1274_v55, %v1241_v57  ;;  %v1286_v49 = vmul.f32 %v1272_v27, %v9638_v18  ;;  %v9640_v59 = vld [vmem:[#allocation88_spill] sm:$0xff]  ;;  %v9641_v55 = vld [vmem:[#allocation90_spill] sm:$0xff] }
 0x29d   :  { %v1287_v5 = vmul.f32 %v1273_v22, %v9638_v18  ;;  %v1330_v12 = vsel %vm752_vm5, %v1328_v9, %v1326_v47  ;;  %v1277_v46 = vadd.f32 %v1275_v34, %v1242_v36  ;;  %v1280_v51 = vadd.f32 %v1278_v16, %v1245_v14  ;;  %v9642_v18 = vld [vmem:[#allocation91_spill] sm:$0xff]  ;;  %v1361_v47 = vpop.permute.xlu0 %1360  ;;  %v1363_v36 = vpop.permute.xlu1 %1362 }
 0x29e   :  { %v1281_v10 = vadd.f32 %v1279_v1, %v1246_v44  ;;  %v1284_v21 = vadd.f32 %v1282_v41, %v1249_v39  ;;  %v1309_v29 = vmul.f32 %v1307_v62, %v9639_v38  ;;  %v1310_v45 = vmul.f32 %v1308_v43, %v9639_v38  ;;  %v9643_v38 = vld [vmem:[#allocation126_spill] sm:$0xff] }
 0x29f   :  { %v1313_v52 = vmul.f32 %v1307_v62, %v9640_v59  ;;  %v1314_v7 = vmul.f32 %v1308_v43, %v9640_v59  ;;  %v1285_v57 = vadd.f32 %v1283_v33, %v1250_v3  ;;  %v1317_v27 = vmul.f32 %v1307_v62, %v9641_v55  ;;  %v9644_v3 = vld [vmem:[#allocation127_spill] sm:$0xff] }
 0x2a0   :  { %v1318_v22 = vmul.f32 %v1308_v43, %v9641_v55  ;;  %v1321_v30 = vmul.f32 %v1307_v62, %v9642_v18  ;;  %v1288_v14 = vadd.f32 %v1286_v49, %v1253_v53  ;;  %v1289_v44 = vadd.f32 %v1287_v5, %v1254_v40  ;;  %v9645_v40 = vld [vmem:[#allocation128_spill] sm:$0xff]  ;;  %v9646_v49 = vld [vmem:[#allocation130_spill] sm:$0xff] }
 0x2a1   :  { %v1311_v39 = vadd.f32 %v1309_v29, %v1276_v26  ;;  %v1322_v9 = vmul.f32 %v1308_v43, %v9642_v18  ;;  %v1312_v34 = vadd.f32 %v1310_v45, %v1277_v46  ;;  %v1315_v16 = vadd.f32 %v1313_v52, %v1280_v51  ;;  %v9647_v45 = vld [vmem:[#allocation93_spill] sm:$0xff]  ;;  %v9650_v29 = vld [vmem:[#allocation98_spill] sm:$0xff] }
 0x2a2   :  { %v1316_v1 = vadd.f32 %v1314_v7, %v1281_v10  ;;  %v1319_v41 = vadd.f32 %v1317_v27, %v1284_v21  ;;  %v1342_v59 = vmul.f32 %v9643_v38, %v1329_v17  ;;  %v1343_v33 = vmul.f32 %v9644_v3, %v1330_v12  ;;  %v9648_v7 = vld [vmem:[#allocation94_spill] sm:$0xff]  ;;  %v9649_v17 = vld [vmem:[#allocation95_spill] sm:$0xff]  ;;  %v9669_v3 = vld [vmem:[#allocation140_spill] sm:$0xff] }
 0x2a3   :  { %v1364_v55 = vsel %vm792_vm6, %v1361_v47, %v1363_v36  ;;  %v1365_v62 = vsel %vm792_vm6, %v1363_v36, %v1361_v47  ;;  %v1320_v20 = vadd.f32 %v1318_v22, %v1285_v57  ;;  %v1323_v53 = vadd.f32 %v1321_v30, %v1288_v14 }
 0x2a4   :  { %v1377_v26 = vmul.f32 %v9645_v40, %v1364_v55  ;;  %v1378_v43 = vmul.f32 %v9646_v49, %v1365_v62  ;;  %v1344_v52 = vmul.f32 %v1342_v59, %v9647_v45  ;;  %v1345_v21 = vmul.f32 %v1343_v33, %v9647_v45  ;;  %v9651_v45 = vld [vmem:[#allocation99_spill] sm:$0xff] }
 0x2a5   :  { %v1348_v51 = vmul.f32 %v1342_v59, %v9648_v7  ;;  %v1349_v46 = vmul.f32 %v1343_v33, %v9648_v7  ;;  %v1324_v10 = vadd.f32 %v1322_v9, %v1289_v44  ;;  %v1352_v5 = vmul.f32 %v1342_v59, %v9649_v17  ;;  %v9652_v9 = vld [vmem:[#allocation100_spill] sm:$0xff] }
 0x2a6   :  { %v1353_v12 = vmul.f32 %v1343_v33, %v9649_v17  ;;  %v1356_v57 = vmul.f32 %v1342_v59, %v9650_v29  ;;  %v1346_v30 = vadd.f32 %v1344_v52, %v1311_v39  ;;  %v1347_v55 = vadd.f32 %v1345_v21, %v1312_v34  ;;  %v9653_v59 = vld [vmem:[#allocation102_spill] sm:$0xff]  ;;  %v9654_v34 = vld [vmem:[#allocation103_spill] sm:$0xff] }
 0x2a7   :  { %v1350_v27 = vadd.f32 %v1348_v51, %v1315_v16  ;;  %v1357_v22 = vmul.f32 %v1343_v33, %v9650_v29  ;;  %v1351_v47 = vadd.f32 %v1349_v46, %v1316_v1  ;;  %v1354_v36 = vadd.f32 %v1352_v5, %v1319_v41 }
 0x2a8   :  { %v1355_v14 = vadd.f32 %v1353_v12, %v1320_v20  ;;  %v1358_v62 = vadd.f32 %v1356_v57, %v1323_v53  ;;  %v1379_v7 = vmul.f32 %v1377_v26, %v9651_v45  ;;  %v1380_v44 = vmul.f32 %v1378_v43, %v9651_v45  ;;  %v9655_v57 = vld [vmem:[#allocation125_spill] sm:$0xff] }
 0x2a9   :  { %v1383_v18 = vmul.f32 %v1377_v26, %v9652_v9  ;;  %v1384_v17 = vmul.f32 %v1378_v43, %v9652_v9  ;;  %v1387_v49 = vmul.f32 %v1377_v26, %v9653_v59  ;;  %v1388_v39 = vmul.f32 %v1378_v43, %v9653_v59 }
 0x2aa   :  { %v1391_v16 = vmul.f32 %v1377_v26, %v9654_v34  ;;  %v1392_v33 = vmul.f32 %v1378_v43, %v9654_v34  ;;  %v1359_v1 = vadd.f32 %v1357_v22, %v1324_v10  ;;  %v1381_v20 = vadd.f32 %v1379_v7, %v1346_v30  ;;  %v9656_v26 = vld [vmem:[#allocation129_spill] sm:$0xff] }
 0x2ab   :  { %v1382_v41 = vadd.f32 %v1380_v44, %v1347_v55  ;;  %v1385_v53 = vadd.f32 %v1383_v18, %v1350_v27  ;;  %v1386_v52 = vadd.f32 %v1384_v17, %v1351_v47  ;;  %v1389_v21 = vadd.f32 %v1387_v49, %v1354_v36 }
 0x2ac   :  { %v1390_v51 = vadd.f32 %v1388_v39, %v1355_v14  ;;  %v1393_v46 = vadd.f32 %v1391_v16, %v1358_v62  ;;  %v6162_v5 = vmax.f32 %v6027_v32, 0.0  ;;  %v1394_v12 = vadd.f32 %v1392_v33, %v1359_v1  ;;  %v9659_v39 = vld [vmem:[#allocation133_spill] sm:$0xff]  ;;  %v9660_v1 = vld [vmem:[#allocation132_spill] sm:$0xff] }
 0x2ad   :  { %v850_v59 = vmul.f32 %v9655_v57, %v6094_v37  ;;  %v853_v9 = vmul.f32 %v9656_v26, %v6097_v19  ;;  %v6169_v43 = vmax.f32 %v6015_v24, 0.0  ;;  %v1395_v7 = vadd.f32 %v1381_v20, %v9592_v13  ;;  %v9661_v20 = vld [vmem:[#allocation134_spill] sm:$0xff] }
 0x2ae   :  { %v1396_v18 = vadd.f32 %v1382_v41, %v9592_v13  ;;  %v6174_v49 = vstv %s6150_s12  ;;  %v6177_v10 = vmax.f32 %v6024_v54, 0.0  ;;  %v6180_v32 = vmax.f32 %v6030_v50, 0.0 }
 0x2af   :  { %9657 = vst [vmem:[#allocation64_spill] sm:$0xff] %v6174_v49  ;;  %v6183_v17 = vmax.f32 %v6033_v31, 0.0  ;;  %v1399_v30 = vadd.f32 %v1385_v53, %v9595_v60  ;;  %v6187_v24 = vadd.f32 %v1386_v52, %v9595_v60  ;;  %v6190_v55 = vadd.f32 %v1389_v21, %v9597_v8  ;;  %v9658_v31 = vld [vmem:[#allocation131_spill] sm:$0xff] }
 0x2b0   :  { %v6193_v27 = vadd.f32 %v1390_v51, %v9597_v8  ;;  %v6196_v54 = vadd.f32 %v1393_v46, %v9598_v28  ;;  %v6199_v50 = vadd.f32 %v1394_v12, %v9598_v28  ;;  %v855_v22 = vadd.f32 %v853_v9, %v850_v59 }
 0x2b1   :  { %v858_v47 = vmul.f32 %v9658_v31, %v6162_v5  ;;  %v849_v36 = vmul.f32 %v9655_v57, %v6041_v25  ;;  %v6205_v14 = vmax.f32 %v1395_v7, 0.0  ;;  %v6207_v62 = vmax.f32 %v1396_v18, 0.0  ;;  %v9662_v7 = vld [vmem:[#allocation135_spill] sm:$0xff] }
 0x2b2   :  { %v852_v44 = vmul.f32 %v9656_v26, %v6169_v43  ;;  %v876_v16 = vmul.f32 %v9659_v39, %v6094_v37  ;;  %v863_v9 = vmul.f32 %v9660_v1, %v6183_v17  ;;  %v857_v59 = vmul.f32 %v9658_v31, %v6177_v10 }
 0x2b3   :  { %v860_v33 = vadd.f32 %v858_v47, %v855_v22  ;;  %v879_v41 = vmul.f32 %v9661_v20, %v6097_v19  ;;  %v862_v52 = vmul.f32 %v9660_v1, %v6180_v32  ;;  %v875_v21 = vmul.f32 %v9659_v39, %v6041_v25  ;;  %v9663_v22 = vld [vmem:[#allocation137_spill] sm:$0xff] }
 0x2b4   :  { %v854_v53 = vadd.f32 %v852_v44, %v849_v36  ;;  %v878_v51 = vmul.f32 %v9661_v20, %v6169_v43  ;;  %v884_v18 = vmul.f32 %v9662_v7, %v6162_v5  ;;  %v904_v47 = vmul.f32 %v9663_v22, %v6094_v37  ;;  %v9664_v44 = vld [vmem:[#allocation138_spill] sm:$0xff] }
 0x2b5   :  { %v865_v46 = vadd.f32 %v863_v9, %v860_v33  ;;  %v881_v12 = vadd.f32 %v879_v41, %v876_v16  ;;  %v883_v36 = vmul.f32 %v9662_v7, %v6177_v10  ;;  %v907_v60 = vmul.f32 %v9664_v44, %v6097_v19  ;;  %v9666_v33 = vld [vmem:[#allocation136_spill] sm:$0xff] }
 0x2b6   :  { %v859_v28 = vadd.f32 %v857_v59, %v854_v53  ;;  %v880_v8 = vadd.f32 %v878_v51, %v875_v21  ;;  %v889_v16 = vmul.f32 %v9666_v33, %v6183_v17  ;;  %v903_v9 = vmul.f32 %v9663_v22, %v6041_v25  ;;  %v9667_v51 = vld [vmem:[#allocation139_spill] sm:$0xff] }
 0x2b7   :  { %868 = vrot.lane.b32.xlu1 %v865_v46, %s9665_s15  ;;  %v886_v13 = vadd.f32 %v884_v18, %v881_v12  ;;  %v906_v41 = vmul.f32 %v9664_v44, %v6169_v43  ;;  %v909_v21 = vadd.f32 %v907_v60, %v904_v47  ;;  %v912_v34 = vmul.f32 %v9667_v51, %v6162_v5  ;;  %v9668_v18 = vld [vmem:[#allocation141_spill] sm:$0xff] }
 0x2b8   :  { %v864_v59 = vadd.f32 %v862_v52, %v859_v28  ;;  %v885_v53 = vadd.f32 %v883_v36, %v880_v8  ;;  %v888_v46 = vmul.f32 %v9666_v33, %v6180_v32  ;;  %v932_v29 = vmul.f32 %v9668_v18, %v6094_v37  ;;  %v9670_v8 = vld [vmem:[#allocation142_spill] sm:$0xff] }
 0x2b9   :  { %v891_v45 = vadd.f32 %v889_v16, %v886_v13  ;;  %v908_v12 = vadd.f32 %v906_v41, %v903_v9  ;;  %v914_v40 = vadd.f32 %v912_v34, %v909_v21  ;;  %v917_v38 = vmul.f32 %v9669_v3, %v6183_v17  ;;  %v9672_v41 = vld [vmem:[#allocation143_spill] sm:$0xff] }
 0x2ba   :  { %866 = vrot.lane.b32.xlu0 %v864_v59, %s9665_s15  ;;  %v911_v60 = vmul.f32 %v9667_v51, %v6177_v10  ;;  %v935_v28 = vmul.f32 %v9670_v8, %v6097_v19  ;;  %v6253_v13 = vmax.f32 %v1399_v30, 0.0  ;;  %v890_v52 = vadd.f32 %v888_v46, %v885_v53  ;;  %v9674_v53 = vld [vmem:[#allocation146_spill] sm:$0xff] }
 0x2bb   :  { %894 = vrot.lane.b32.xlu1 %v891_v45, %s9671_s19  ;;  %v931_v47 = vmul.f32 %v9668_v18, %v6041_v25  ;;  %v934_v34 = vmul.f32 %v9670_v8, %v6169_v43  ;;  %v919_v36 = vadd.f32 %v917_v38, %v914_v40  ;;  %v940_v59 = vmul.f32 %v9672_v41, %v6162_v5 }
 0x2bc   :  { %v913_v16 = vadd.f32 %v911_v60, %v908_v12  ;;  %v937_v9 = vadd.f32 %v935_v28, %v932_v29  ;;  %v939_v30 = vmul.f32 %v9672_v41, %v6177_v10  ;;  %v980_v45 = vmul.f32 %v9673_v61, %v6094_v37  ;;  %v9675_v29 = vld [vmem:[#allocation144_spill] sm:$0xff] }
 0x2bd   :  { %v936_v21 = vadd.f32 %v934_v34, %v931_v47  ;;  %v983_v46 = vmul.f32 %v9674_v53, %v6097_v19  ;;  %v916_v38 = vmul.f32 %v9669_v3, %v6180_v32  ;;  %v945_v12 = vmul.f32 %v9675_v29, %v6183_v17  ;;  %v9677_v34 = vld [vmem:[#allocation147_spill] sm:$0xff] }
 0x2be   :  { %892 = vrot.lane.b32.xlu0 %v890_v52, %s9671_s19  ;;  %v942_v40 = vadd.f32 %v940_v59, %v937_v9  ;;  %v979_v60 = vmul.f32 %v9673_v61, %v6041_v25  ;;  %v988_v2 = vmul.f32 %v9677_v34, %v6162_v5  ;;  %v982_v52 = vmul.f32 %v9674_v53, %v6169_v43  ;;  %v9678_v59 = vld [vmem:[#allocation149_spill] sm:$0xff] }
 0x2bf   :  { %922 = vrot.lane.b32.xlu1 %v919_v36, %s9676_s27  ;;  %v941_v28 = vadd.f32 %v939_v30, %v936_v21  ;;  %v985_v47 = vadd.f32 %v983_v46, %v980_v45  ;;  %v6281_v35 = vmax.f32 %v6187_v24, 0.0  ;;  %v918_v9 = vadd.f32 %v916_v38, %v913_v16 }
 0x2c0   :  { %v1008_v48 = vmul.f32 %v9678_v59, %v6094_v37  ;;  %v1011_v11 = vmul.f32 %v9679_v63, %v6097_v19  ;;  %v947_v15 = vadd.f32 %v945_v12, %v942_v40  ;;  %v944_v36 = vmul.f32 %v9675_v29, %v6180_v32 }
 0x2c1   :  { %v990_v21 = vadd.f32 %v988_v2, %v985_v47  ;;  %v984_v30 = vadd.f32 %v982_v52, %v979_v60  ;;  %v987_v45 = vmul.f32 %v9677_v34, %v6177_v10  ;;  %v1007_v16 = vmul.f32 %v9678_v59, %v6041_v25  ;;  %v9681_v2 = vld [vmem:[#allocation148_spill] sm:$0xff]  ;;  %v9682_v60 = vld [vmem:[#allocation151_spill] sm:$0xff] }
 0x2c2   :  { %920 = vrot.lane.b32.xlu0 %v918_v9, %s9676_s27  ;;  %v1013_v24 = vadd.f32 %v1011_v11, %v1008_v48  ;;  %v1010_v46 = vmul.f32 %v9679_v63, %v6169_v43  ;;  %v6297_v38 = vmax.f32 %v6190_v55, 0.0  ;;  %v946_v40 = vadd.f32 %v944_v36, %v941_v28  ;;  %v9683_v11 = vld [vmem:[#allocation153_spill] sm:$0xff] }
 0x2c3   :  { %950 = vrot.lane.b32.xlu1 %v947_v15, %s9680_s14  ;;  %v993_v12 = vmul.f32 %v9681_v2, %v6183_v17  ;;  %v1016_v47 = vmul.f32 %v9682_v60, %v6162_v5  ;;  %v989_v52 = vadd.f32 %v987_v45, %v984_v30  ;;  %v1036_v9 = vmul.f32 %v9683_v11, %v6094_v37  ;;  %v9685_v45 = vld [vmem:[#allocation155_spill] sm:$0xff] }
 0x2c4   :  { %v1012_v48 = vadd.f32 %v1010_v46, %v1007_v16  ;;  %v1039_v49 = vmul.f32 %v9684_v4, %v6097_v19  ;;  %v992_v55 = vmul.f32 %v9681_v2, %v6180_v32  ;;  %v1035_v28 = vmul.f32 %v9683_v11, %v6041_v25 }
 0x2c5   :  { %v995_v0 = vadd.f32 %v993_v12, %v990_v21  ;;  %v1018_v15 = vadd.f32 %v1016_v47, %v1013_v24  ;;  %v1015_v36 = vmul.f32 %v9682_v60, %v6177_v10  ;;  %v1044_v16 = vmul.f32 %v9685_v45, %v6162_v5  ;;  %v9687_v24 = vld [vmem:[#allocation152_spill] sm:$0xff] }
 0x2c6   :  { %948 = vrot.lane.b32.xlu0 %v946_v40, %s9680_s14  ;;  %v1041_v30 = vadd.f32 %v1039_v49, %v1036_v9  ;;  %v1038_v46 = vmul.f32 %v9684_v4, %v6169_v43  ;;  %v6320_v21 = vmax.f32 %v6193_v27, 0.0  ;;  %v1021_v12 = vmul.f32 %v9687_v24, %v6183_v17  ;;  %v9688_v40 = vld [vmem:[#allocation157_spill] sm:$0xff] }
 0x2c7   :  { %998 = vrot.lane.b32.xlu1 %v995_v0, %s9686_s17  ;;  %v1064_v47 = vmul.f32 %v9688_v40, %v6094_v37  ;;  %v1067_v49 = vmul.f32 %v5988_v23, %v6097_v19  ;;  %v994_v9 = vadd.f32 %v992_v55, %v989_v52  ;;  %v1017_v42 = vadd.f32 %v1015_v36, %v1012_v48  ;;  %v9689_v52 = vld [vmem:[#allocation156_spill] sm:$0xff] }
 0x2c8   :  { %v1046_v58 = vadd.f32 %v1044_v16, %v1041_v30  ;;  %v1040_v11 = vadd.f32 %v1038_v46, %v1035_v28  ;;  %v1023_v60 = vadd.f32 %v1021_v12, %v1018_v15  ;;  %v1063_v27 = vmul.f32 %v9688_v40, %v6041_v25 }
 0x2c9   :  { %v1069_v4 = vadd.f32 %v1067_v49, %v1064_v47  ;;  %v1066_v0 = vmul.f32 %v5988_v23, %v6169_v43  ;;  %v6334_v2 = vmax.f32 %v6196_v54, 0.0  ;;  %v1020_v19 = vmul.f32 %v9687_v24, %v6180_v32 }
 0x2ca   :  { %996 = vrot.lane.b32.xlu0 %v994_v9, %s9686_s17  ;;  %v1049_v48 = vmul.f32 %v9689_v52, %v6183_v17  ;;  %v1043_v55 = vmul.f32 %v9685_v45, %v6177_v10  ;;  %v1072_v15 = vmul.f32 %v5991_v6, %v6162_v5  ;;  %v1412_v54 = vmul.f32 %v6207_v62, %v9655_v57 }
 0x2cb   :  { %1026 = vrot.lane.b32.xlu1 %v1023_v60, %s9690_s2  ;;  %v1068_v28 = vadd.f32 %v1066_v0, %v1063_v27  ;;  %v1414_v36 = vmul.f32 %v6281_v35, %v9656_v26  ;;  %v1022_v30 = vadd.f32 %v1020_v19, %v1017_v42  ;;  %v1411_v12 = vmul.f32 %v6205_v14, %v9655_v57 }
 0x2cc   :  { %v1051_v16 = vadd.f32 %v1049_v48, %v1046_v58  ;;  %v1045_v46 = vadd.f32 %v1043_v55, %v1040_v11  ;;  %v1074_v47 = vadd.f32 %v1072_v15, %v1069_v4  ;;  %v1071_v60 = vmul.f32 %v5991_v6, %v6177_v10 }
 0x2cd   :  { %v1416_v49 = vadd.f32 %v1414_v36, %v1412_v54  ;;  %v1413_v9 = vmul.f32 %v6253_v13, %v9656_v26  ;;  %v6357_v27 = vmax.f32 %v6199_v50, 0.0  ;;  %v1048_v58 = vmul.f32 %v9689_v52, %v6180_v32 }
 0x2ce   :  { %1024 = vrot.lane.b32.xlu0 %v1022_v30, %s9690_s2  ;;  %v1434_v42 = vmul.f32 %v6207_v62, %v9659_v39  ;;  %v1436_v4 = vmul.f32 %v6281_v35, %v9661_v20  ;;  %v1077_v19 = vmul.f32 %v5994_v56, %v6183_v17  ;;  %v1073_v11 = vadd.f32 %v1071_v60, %v1068_v28 }
 0x2cf   :  { %1054 = vrot.lane.b32.xlu1 %v1051_v16, %s9691_s22  ;;  %v1418_v50 = vmul.f32 %v6320_v21, %v9658_v31  ;;  %v1415_v0 = vadd.f32 %v1413_v9, %v1411_v12  ;;  %v1050_v48 = vadd.f32 %v1048_v58, %v1045_v46  ;;  %v1433_v15 = vmul.f32 %v6205_v14, %v9659_v39 }
 0x2d0   :  { %v1438_v55 = vadd.f32 %v1436_v4, %v1434_v42  ;;  %v1435_v54 = vmul.f32 %v6253_v13, %v9661_v20  ;;  %v1079_v36 = vadd.f32 %v1077_v19, %v1074_v47  ;;  %v1076_v30 = vmul.f32 %v5994_v56, %v6180_v32 }
 0x2d1   :  { %v1420_v16 = vadd.f32 %v1418_v50, %v1416_v49  ;;  %v1417_v28 = vmul.f32 %v6297_v38, %v9658_v31  ;;  %v1440_v46 = vmul.f32 %v6320_v21, %v9662_v7  ;;  %v1458_v60 = vmul.f32 %v6207_v62, %v9663_v22 }
 0x2d2   :  { %1052 = vrot.lane.b32.xlu0 %v1050_v48, %s9691_s22  ;;  %v1437_v12 = vadd.f32 %v1435_v54, %v1433_v15  ;;  %v1460_v9 = vmul.f32 %v6281_v35, %v9664_v44  ;;  %v1078_v47 = vadd.f32 %v1076_v30, %v1073_v11  ;;  %v1422_v49 = vmul.f32 %v6357_v27, %v9660_v1 }
 0x2d3   :  { %1082 = vrot.lane.b32.xlu1 %v1079_v36, %s9692_s0  ;;  %v1419_v58 = vadd.f32 %v1417_v28, %v1415_v0  ;;  %v1457_v42 = vmul.f32 %v6205_v14, %v9663_v22  ;;  %v1442_v4 = vadd.f32 %v1440_v46, %v1438_v55  ;;  %v1439_v19 = vmul.f32 %v6297_v38, %v9662_v7 }
 0x2d4   :  { %v1462_v50 = vadd.f32 %v1460_v9, %v1458_v60  ;;  %v1459_v48 = vmul.f32 %v6253_v13, %v9664_v44  ;;  %v1424_v15 = vadd.f32 %v1422_v49, %v1420_v16  ;;  %v1421_v54 = vmul.f32 %v6334_v2, %v9660_v1 }
 0x2d5   :  { %v1482_v11 = vmul.f32 %v6207_v62, %v9668_v18  ;;  %v1484_v0 = vmul.f32 %v6281_v35, %v9670_v8  ;;  %v1444_v55 = vmul.f32 %v6357_v27, %v9666_v33  ;;  %v1441_v36 = vadd.f32 %v1439_v19, %v1437_v12 }
 0x2d6   :  { %1080 = vrot.lane.b32.xlu0 %v1078_v47, %s9692_s0  ;;  %v1464_v30 = vmul.f32 %v6320_v21, %v9667_v51  ;;  %v1461_v28 = vadd.f32 %v1459_v48, %v1457_v42  ;;  %v1443_v16 = vmul.f32 %v6334_v2, %v9666_v33  ;;  %v1463_v46 = vmul.f32 %v6297_v38, %v9667_v51  ;;  %v9793_v33 = vld [vmem:[#allocation105_spill] sm:$0xff] }
 0x2d7   :  { %1427 = vrot.lane.b32.xlu1 %v1424_v15, %s9665_s15  ;;  %v1481_v60 = vmul.f32 %v6205_v14, %v9668_v18  ;;  %v1483_v9 = vmul.f32 %v6253_v13, %v9670_v8  ;;  %v1423_v47 = vadd.f32 %v1421_v54, %v1419_v58  ;;  %v1446_v12 = vadd.f32 %v1444_v55, %v1442_v4 }
 0x2d8   :  { %v1466_v49 = vadd.f32 %v1464_v30, %v1462_v50  ;;  %v1468_v42 = vmul.f32 %v6357_v27, %v9669_v3  ;;  %v1465_v19 = vadd.f32 %v1463_v46, %v1461_v28  ;;  %v1486_v48 = vadd.f32 %v1484_v0, %v1482_v11 }
 0x2d9   :  { %v1522_v15 = vmul.f32 %v6207_v62, %v9673_v61  ;;  %v1524_v51 = vmul.f32 %v6281_v35, %v9674_v53  ;;  %v1445_v18 = vadd.f32 %v1443_v16, %v1441_v36  ;;  %v1467_v8 = vmul.f32 %v6334_v2, %v9669_v3 }
 0x2da   :  { %1425 = vrot.lane.b32.xlu0 %v1423_v47, %s9665_s15  ;;  %v1488_v58 = vmul.f32 %v6320_v21, %v9672_v41  ;;  %v1521_v4 = vmul.f32 %v6205_v14, %v9673_v61  ;;  %v1492_v50 = vmul.f32 %v6357_v27, %v9675_v29  ;;  %v1485_v54 = vadd.f32 %v1483_v9, %v1481_v60 }
 0x2db   :  { %1449 = vrot.lane.b32.xlu1 %v1446_v12, %s9671_s19  ;;  %v1526_v11 = vadd.f32 %v1524_v51, %v1522_v15  ;;  %v1523_v0 = vmul.f32 %v6253_v13, %v9674_v53  ;;  %v1470_v55 = vadd.f32 %v1468_v42, %v1466_v49  ;;  %v1487_v36 = vmul.f32 %v6297_v38, %v9672_v41 }
 0x2dc   :  { %v1546_v30 = vmul.f32 %v6207_v62, %v9678_v59  ;;  %v1548_v28 = vmul.f32 %v6281_v35, %v9679_v63  ;;  %v1469_v16 = vadd.f32 %v1467_v8, %v1465_v19  ;;  %v1490_v46 = vadd.f32 %v1488_v58, %v1486_v48  ;;  %v9693_v19 = vld [vmem:[#allocation148_spill] sm:$0xff]  ;;  %v9694_v58 = vld [vmem:[#allocation151_spill] sm:$0xff] }
 0x2dd   :  { %v1491_v47 = vmul.f32 %v6334_v2, %v9675_v29  ;;  %v1528_v51 = vmul.f32 %v6320_v21, %v9677_v34  ;;  %v1525_v60 = vadd.f32 %v1523_v0, %v1521_v4  ;;  %v1545_v12 = vmul.f32 %v6205_v14, %v9678_v59  ;;  %v9695_v0 = vld [vmem:[#allocation153_spill] sm:$0xff] }
 0x2de   :  { %1447 = vrot.lane.b32.xlu0 %v1445_v18, %s9671_s19  ;;  %v1550_v9 = vadd.f32 %v1548_v28, %v1546_v30  ;;  %v1547_v49 = vmul.f32 %v6253_v13, %v9679_v63  ;;  %v1489_v8 = vadd.f32 %v1487_v36, %v1485_v54  ;;  %v1532_v48 = vmul.f32 %v6357_v27, %v9693_v19  ;;  %v9696_v28 = vld [vmem:[#allocation154_spill] sm:$0xff] }
 0x2df   :  { %1473 = vrot.lane.b32.xlu1 %v1470_v55, %s9676_s27  ;;  %v1530_v42 = vadd.f32 %v1528_v51, %v1526_v11  ;;  %v1527_v15 = vmul.f32 %v6297_v38, %v9677_v34  ;;  %v1552_v18 = vmul.f32 %v6320_v21, %v9694_v58  ;;  %v1570_v30 = vmul.f32 %v6207_v62, %v9695_v0  ;;  %v4724_v54 = vld [vmem:[%s9697_s18 + $0x78] sm:$0xff]  }
 0x2e0   :  { %v1549_v4 = vadd.f32 %v1547_v49, %v1545_v12  ;;  %v1572_v63 = vmul.f32 %v6281_v35, %v9696_v28  ;;  %v1494_v11 = vadd.f32 %v1492_v50, %v1490_v46  ;;  %v1531_v55 = vmul.f32 %v6334_v2, %v9693_v19  ;;  %v4725_v12 = vld [vmem:[%s9697_s18 + $0x38] sm:$0xff]   ;;  %4628 = vmatprep.subr.bf16.mxu0 %v4724_v54 }
 0x2e1   :  { %v1551_v36 = vmul.f32 %v6297_v38, %v9694_v58  ;;  %v1569_v51 = vmul.f32 %v6205_v14, %v9695_v0  ;;  %v1529_v49 = vadd.f32 %v1527_v15, %v1525_v60  ;;  %v1554_v59 = vadd.f32 %v1552_v18, %v1550_v9  ;;  %4629 = vmatpush3.bf16.msra.mxu0 %v4725_v12 }
 0x2e2   :  { %1471 = vrot.lane.b32.xlu0 %v1469_v16, %s9676_s27  ;;  %v1574_v34 = vadd.f32 %v1572_v63, %v1570_v30  ;;  %v1571_v50 = vmul.f32 %v6253_v13, %v9696_v28  ;;  %v1493_v46 = vadd.f32 %v1491_v47, %v1489_v8  ;;  %v1556_v58 = vmul.f32 %v6357_v27, %v9687_v24  ;;  %v4726_v47 = vld [vmem:[%s9697_s18 + $0x70] sm:$0xff]  }
 0x2e3   :  { %1497 = vrot.lane.b32.xlu1 %v1494_v11, %s9680_s14  ;;  %v1553_v19 = vadd.f32 %v1551_v36, %v1549_v4  ;;  %v1576_v0 = vmul.f32 %v6320_v21, %v9685_v45  ;;  %v1534_v53 = vadd.f32 %v1532_v48, %v1530_v42  ;;  %v1555_v16 = vmul.f32 %v6334_v2, %v9687_v24  ;;  %v4727_v48 = vld [vmem:[%s9697_s18 + $0x30] sm:$0xff]   ;;  %v9698_v11 = vld [vmem:[#allocation59_spill] sm:$0xff] }
 0x2e4   :  { %v1594_v63 = vmul.f32 %v6207_v62, %v9688_v40  ;;  %v1596_v60 = vmul.f32 %v6281_v35, %v5988_v23  ;;  %v1573_v8 = vadd.f32 %v1571_v50, %v1569_v51  ;;  %v1593_v15 = vmul.f32 %v6205_v14, %v9688_v40  ;;  %4630 = vmatprep.subr.bf16.mxu0 %v4726_v47  ;;  %v4556_v40 = vld [vmem:[%s8924_s8 + $0x4] ss:$8 sm:$0x3] }
 0x2e5   :  { %v1578_v9 = vadd.f32 %v1576_v0, %v1574_v34  ;;  %v1595_v42 = vmul.f32 %v6253_v13, %v5988_v23  ;;  %v1533_v18 = vadd.f32 %v1531_v55, %v1529_v49  ;;  %v1558_v4 = vadd.f32 %v1556_v58, %v1554_v59  ;;  %v9699_v58 = vld [vmem:[#allocation60_spill] sm:$0xff]  ;;  %v9700_v49 = vld [vmem:[#allocation63_spill] sm:$0xff]  ;;  %4631 = vmatpush3.bf16.msra.mxu0 %v4727_v48 }
 0x2e6   :  { %1495 = vrot.lane.b32.xlu0 %v1493_v46, %s9680_s14  ;;  %v1580_v30 = vmul.f32 %v6357_v27, %v9689_v52  ;;  %v1575_v34 = vmul.f32 %v6297_v38, %v9685_v45  ;;  %v1557_v0 = vadd.f32 %v1555_v16, %v1553_v19  ;;  %v1579_v54 = vmul.f32 %v6334_v2, %v9689_v52  ;;  %v4728_v19 = vld [vmem:[%s9697_s18 + $0x68] sm:$0xff]  }
 0x2e7   :  { %1537 = vrot.lane.b32.xlu1 %v1534_v53, %s9686_s17  ;;  %v959_v36 = vmul.f32 %v9698_v11, %v6041_v25  ;;  %v960_v51 = vmul.f32 %v9698_v11, %v6094_v37  ;;  %v1598_v55 = vadd.f32 %v1596_v60, %v1594_v63  ;;  %v1600_v59 = vmul.f32 %v6320_v21, %v5991_v6  ;;  %v9701_v37 = vld [vmem:[#allocation61_spill] sm:$0xff]  ;;  %v4729_v63 = vld [vmem:[%s9697_s18 + $0x28] sm:$0xff]  }
 0x2e8   :  { %v962_v12 = vmul.f32 %v9699_v58, %v6169_v43  ;;  %v963_v53 = vmul.f32 %v9699_v58, %v9700_v49  ;;  %v1582_v50 = vadd.f32 %v1580_v30, %v1578_v9  ;;  %v1577_v25 = vadd.f32 %v1575_v34, %v1573_v8  ;;  %4632 = vmatprep.subr.bf16.mxu0 %v4728_v19  ;;  %v9702_v9 = vld [vmem:[#allocation64_spill] sm:$0xff]  ;;  %v4730_v49 = vld [vmem:[%s9697_s18 + $0x60] sm:$0xff]  }
 0x2e9   :  { %v1597_v46 = vadd.f32 %v1595_v42, %v1593_v15  ;;  %v967_v16 = vmul.f32 %v9701_v37, %v6177_v10  ;;  %v968_v47 = vmul.f32 %v9701_v37, %v6162_v5  ;;  %v972_v8 = vmul.f32 %v9702_v9, %v6180_v32  ;;  %4633 = vmatpush3.bf16.msra.mxu0 %v4729_v63  ;;  %v4742_v63 = vld [vmem:[%s9703_s3 + $0x74] ss:$8 sps:$4 sm:$0xff]  }
 0x2ea   :  { %1535 = vrot.lane.b32.xlu0 %v1533_v18, %s9686_s17  ;;  %v964_v43 = vadd.f32 %v962_v12, %v959_v36  ;;  %v965_v60 = vadd.f32 %v963_v53, %v960_v51  ;;  %v1505_v10 = vmul.f32 %v6205_v14, %v9698_v11  ;;  %v1506_v15 = vmul.f32 %v6207_v62, %v9698_v11  ;;  %v4732_v53 = vld [vmem:[%s9697_s18 + $0x58] sm:$0xff]  }
 0x2eb   :  { %1561 = vrot.lane.b32.xlu1 %v1558_v4, %s9690_s2  ;;  %v1507_v42 = vmul.f32 %v6253_v13, %v9699_v58  ;;  %v973_v5 = vmul.f32 %v9702_v9, %v6183_v17  ;;  %v1508_v4 = vmul.f32 %v6281_v35, %v9699_v58  ;;  %v1602_v30 = vadd.f32 %v1600_v59, %v1598_v55 }
 0x2ec   :  { %v969_v48 = vadd.f32 %v967_v16, %v964_v43  ;;  %v970_v18 = vadd.f32 %v968_v47, %v965_v60  ;;  %v1599_v32 = vmul.f32 %v6297_v38, %v5991_v6  ;;  %v1511_v14 = vmul.f32 %v6297_v38, %v9701_v37  ;;  %4634 = vmatprep.subr.bf16.mxu0 %v4730_v49  ;;  %v4734_v16 = vld [vmem:[%s9697_s18 + $0x50] sm:$0xff]   ;;  %v4745_v43 = vld [vmem:[%s9703_s3 + $0x64] ss:$8 sps:$4 sm:$0xff]  }
 0x2ed   :  { %v1509_v34 = vadd.f32 %v1507_v42, %v1505_v10  ;;  %v1510_v36 = vadd.f32 %v1508_v4, %v1506_v15  ;;  %v1512_v17 = vmul.f32 %v6320_v21, %v9701_v37  ;;  %v1604_v35 = vmul.f32 %v6357_v27, %v5994_v56  ;;  %v4731_v21 = vld [vmem:[%s9697_s18 + $0x20] sm:$0xff]   ;;  %v4735_v60 = vld [vmem:[%s9697_s18 + $0x10] sm:$0xff]   ;;  %1899 = vmatprep.subr.bf16.mxu1 %v4742_v63  ;;  %v4736_v47 = vld [vmem:[%s9697_s18 + $0x48] sm:$0xff]  }
 0x2ee   :  { %1559 = vrot.lane.b32.xlu0 %v1557_v0, %s9690_s2  ;;  %v6542_v62 = vadd.f32 %v972_v8, %v969_v48  ;;  %v6544_v13 = vadd.f32 %v973_v5, %v970_v18  ;;  %v1515_v38 = vmul.f32 %v6334_v2, %v9702_v9  ;;  %v1581_v55 = vadd.f32 %v1579_v54, %v1577_v25  ;;  %v4733_v25 = vld [vmem:[%s9697_s18 + $0x18] sm:$0xff]   ;;  %v4743_v8 = vld [vmem:[%s9703_s3 + $0x60] ss:$8 sps:$4 sm:$0xff]   ;;  %v4751_v18 = vld [vmem:[%s9703_s3 + $0x44] ss:$8 sps:$4 sm:$0xff]  }
 0x2ef   :  { %1585 = vrot.lane.b32.xlu1 %v1582_v50, %s9691_s22  ;;  %v1513_v51 = vadd.f32 %v1511_v14, %v1509_v34  ;;  %v1601_v59 = vadd.f32 %v1599_v32, %v1597_v46  ;;  %v1514_v0 = vadd.f32 %v1512_v17, %v1510_v36  ;;  %v1516_v12 = vmul.f32 %v6357_v27, %v9702_v9  ;;  %v4748_v10 = vld [vmem:[%s9703_s3 + $0x54] ss:$8 sps:$4 sm:$0xff]   ;;  %v4737_v15 = vld [vmem:[%s9697_s18 + $0x8] sm:$0xff]   ;;  %v4738_v42 = vld [vmem:[%s9697_s18 + $0x40] sm:$0xff]  }
 0x2f0   :  { %v1606_v19 = vadd.f32 %v1604_v35, %v1602_v30  ;;  %v1603_v27 = vmul.f32 %v6334_v2, %v5994_v56  ;;  %4635 = vmatpush3.bf16.msra.mxu0 %v4731_v21  ;;  %v4740_v2 = vld [vmem:[%s9703_s3 + $0x70] ss:$8 sps:$4 sm:$0xff]   ;;  %v4739_v5 = vld [vmem:[%s9697_s18] sm:$0xff]   ;;  %v4754_v30 = vld [vmem:[%s9703_s3 + $0x34] ss:$8 sps:$4 sm:$0xff]  }
 0x2f1   :  { %v6564_v50 = vadd.f32 %v1515_v38, %v1513_v51  ;;  %v6569_v54 = vadd.f32 %v1516_v12, %v1514_v0  ;;  %4636 = vmatprep.subr.bf16.mxu0 %v4732_v53  ;;  %1900 = vmatpush1.bf16.msra.mxu1 %v4740_v2  ;;  %v4746_v48 = vld [vmem:[%s9703_s3 + $0x50] ss:$8 sps:$4 sm:$0xff]   ;;  %v4749_v4 = vld [vmem:[%s9703_s3 + $0x40] ss:$8 sps:$4 sm:$0xff]  }
 0x2f2   :  { %1583 = vrot.lane.b32.xlu0 %v1581_v55, %s9691_s22  ;;  %v1605_v46 = vadd.f32 %v1603_v27, %v1601_v59  ;;  %1901 = vmatprep.subr.bf16.mxu1 %v4745_v43  ;;  %v4752_v32 = vld [vmem:[%s9703_s3 + $0x30] ss:$8 sps:$4 sm:$0xff]   ;;  %v9710_v9 = vld [vmem:[#allocation52_spill] sm:$0xff] }
 0x2f3   :  { %1609 = vrot.lane.b32.xlu1 %v1606_v19, %s9692_s0 }
 0x2f4   :  { %4637 = vmatpush3.bf16.msra.mxu0 %v4733_v25 }
 0x2f5   :  { %4638 = vmatprep.subr.bf16.mxu0 %v4734_v16  ;;  %1902 = vmatpush1.bf16.msra.mxu1 %v4743_v8 }
 0x2f6   :  { %1607 = vrot.lane.b32.xlu0 %v1605_v46, %s9692_s0  ;;  %1903 = vmatprep.subr.bf16.mxu1 %v4748_v10 }
 0x2f8   :  { %4639 = vmatpush3.bf16.msra.mxu0 %v4735_v60 }
 0x2f9   :  { %4640 = vmatprep.subr.bf16.mxu0 %v4736_v47  ;;  %1904 = vmatpush1.bf16.msra.mxu1 %v4746_v48  ;;  %v9706_v48 = vld [vmem:[#allocation46_spill] sm:$0xff] }
 0x2fa   :  { %1905 = vmatprep.subr.bf16.mxu1 %v4751_v18 }
 0x2fc   :  { %4641 = vmatpush3.bf16.msra.mxu0 %v4737_v15  ;;  %v9705_v15 = vld [vmem:[#allocation43_spill] sm:$0xff] }
 0x2fd   :  { %4642 = vmatprep.subr.bf16.mxu0 %v4738_v42  ;;  %1906 = vmatpush1.bf16.msra.mxu1 %v4749_v4 }
 0x2fe   :  { %1907 = vmatprep.subr.bf16.mxu1 %v4754_v30  ;;  %v9708_v30 = vld [vmem:[#allocation104_spill] sm:$0xff] }
 0x300   :  { %4643 = vmatpush3.bf16.msra.mxu0 %v4739_v5  ;;  %v9707_v5 = vld [vmem:[#allocation101_spill] sm:$0xff] }
 0x301   :  { %1908 = vmatpush1.bf16.msra.mxu1 %v4752_v32 }
 0x329   :  { %v869_v34 = vpop.permute.xlu1 %868 }
 0x32c   :  { %v867_v14 = vpop.permute.xlu0 %866 }
 0x32d   :  { %v895_v36 = vpop.permute.xlu1 %894  ;;  %v870_v63 = vsel %vm500_vm7, %v867_v14, %v869_v34  ;;  %v871_v43 = vsel %vm500_vm7, %v869_v34, %v867_v14 }
 0x32e   :  { %v872_v4 = vmul.f32 %v871_v43, %v9707_v5  ;;  %v873_v32 = vmul.f32 %v870_v63, %v9708_v30 }
 0x330   :  { %v893_v17 = vpop.permute.xlu0 %892 }
 0x331   :  { %v923_v35 = vpop.permute.xlu1 %922  ;;  %v896_v16 = vsel %vm532_vm0, %v893_v17, %v895_v36  ;;  %v897_v2 = vsel %vm532_vm0, %v895_v36, %v893_v17  ;;  %v9709_v36 = vld [vmem:[#allocation51_spill] sm:$0xff] }
 0x332   :  { %v898_v42 = vmul.f32 %v897_v2, %v9705_v15  ;;  %v899_v18 = vmul.f32 %v896_v16, %v9706_v48  ;;  %v9711_v15 = vld [vmem:[#allocation57_spill] sm:$0xff]  ;;  %v9712_v48 = vld [vmem:[#allocation58_spill] sm:$0xff] }
 0x334   :  { %v921_v51 = vpop.permute.xlu0 %920  ;;  %v900_v58 = vadd.f32 %v898_v42, %v872_v4  ;;  %v901_v2 = vadd.f32 %v899_v18, %v873_v32  ;;  %v9713_v4 = vld [vmem:[#allocation115_spill] sm:$0xff]  ;;  %v9714_v32 = vld [vmem:[#allocation116_spill] sm:$0xff] }
 0x335   :  { %v951_v38 = vpop.permute.xlu1 %950  ;;  %v924_v47 = vsel %vm572_vm1, %v921_v51, %v923_v35  ;;  %v925_v8 = vsel %vm572_vm1, %v923_v35, %v921_v51 }
 0x336   :  { %v926_v17 = vmul.f32 %v925_v8, %v9709_v36  ;;  %v927_v34 = vmul.f32 %v924_v47, %v9710_v9 }
 0x338   :  { %v949_v55 = vpop.permute.xlu0 %948  ;;  %v928_v47 = vadd.f32 %v926_v17, %v900_v58  ;;  %v929_v8 = vadd.f32 %v927_v34, %v901_v2  ;;  %v9717_v2 = vld [vmem:[#allocation117_spill] sm:$0xff] }
 0x339   :  { %v999_v59 = vpop.permute.xlu1 %998  ;;  %v952_v14 = vsel %vm612_vm2, %v949_v55, %v951_v38  ;;  %v953_v37 = vsel %vm612_vm2, %v951_v38, %v949_v55 }
 0x33a   :  { %v954_v16 = vmul.f32 %v953_v37, %v9711_v15  ;;  %v955_v43 = vmul.f32 %v952_v14, %v9712_v48  ;;  %v9716_v14 = vld [vmem:[#allocation113_spill] sm:$0xff] }
 0x33c   :  { %v997_v0 = vpop.permute.xlu0 %996  ;;  %v956_v58 = vadd.f32 %v954_v16, %v928_v47  ;;  %v957_v36 = vadd.f32 %v955_v43, %v929_v8  ;;  %v9719_v8 = vld [vmem:[#allocation119_spill] sm:$0xff] }
 0x33d   :  { %v6624_v12 = vpop.permute.xlu1 %1026  ;;  %v1000_v17 = vsel %vm672_vm3, %v997_v0, %v999_v59  ;;  %v1001_v34 = vsel %vm672_vm3, %v999_v59, %v997_v0  ;;  %v9720_v0 = vld [vmem:[#allocation120_spill] sm:$0xff] }
 0x340   :  { %v1025_v49 = vpop.permute.xlu0 %1024 }
 0x341   :  { %v6626_v21 = vpop.permute.xlu1 %1054 }
 0x344   :  { %v6628_v53 = vpop.permute.xlu0 %1052 }
 0x345   :  { %v6630_v19 = vpop.permute.xlu1 %1082 }
 0x348   :  { %v6632_v27 = vpop.permute.xlu0 %1080 }
 0x349   :  { %v1428_v25 = vpop.permute.xlu1 %1427 }
 0x34c   :  { %v1426_v60 = vpop.permute.xlu0 %1425 }
 0x34d   :  { %v1450_v10 = vpop.permute.xlu1 %1449  ;;  %v1429_v38 = vsel %vm500_vm7, %v1426_v60, %v1428_v25  ;;  %v1430_v55 = vsel %vm500_vm7, %v1428_v25, %v1426_v60  ;;  %v9715_v25 = vld [vmem:[#allocation109_spill] sm:$0xff] }
 0x34e   :  { %v1431_v60 = vmul.f32 %v1430_v55, %v9715_v25 }
 0x350   :  { %v1448_v35 = vpop.permute.xlu0 %1447 }
 0x351   :  { %v1474_v51 = vpop.permute.xlu1 %1473  ;;  %v1451_v63 = vsel %vm532_vm0, %v1448_v35, %v1450_v10  ;;  %v1452_v9 = vsel %vm532_vm0, %v1450_v10, %v1448_v35  ;;  %v1432_v35 = vmul.f32 %v1429_v38, %v9716_v14  ;;  %v976_v38 = vadd.f32 %v6542_v62, %v956_v58 }
 0x352   :  { %v1453_v30 = vmul.f32 %v1452_v9, %v9713_v4  ;;  %v1454_v10 = vmul.f32 %v1451_v63, %v9714_v32  ;;  %v9721_v4 = vld [vmem:[#allocation71_spill] sm:$0xff]  ;;  %v9722_v32 = vld [vmem:[#allocation72_spill] sm:$0xff]  ;;  %v1028_v14 = vsel %vm712_vm4, %v1025_v49, %v6624_v12  ;;  %v1056_v62 = vsel %vm752_vm5, %v6628_v53, %v6626_v21 }
 0x353   :  { %v1003_v25 = vmul.f32 %v1001_v34, %v9722_v32  ;;  %v9723_v34 = vld [vmem:[#allocation84_spill] sm:$0xff] }
 0x354   :  { %v1472_v5 = vpop.permute.xlu0 %1471  ;;  %v1455_v9 = vadd.f32 %v1453_v30, %v1431_v60  ;;  %v1456_v47 = vadd.f32 %v1454_v10, %v1432_v35  ;;  %v1030_v35 = vmul.f32 %v1028_v14, %v9723_v34  ;;  %v9729_v14 = vld [vmem:[#allocation96_spill] sm:$0xff] }
 0x355   :  { %v1475_v37 = vsel %vm572_vm1, %v1472_v5, %v1474_v51  ;;  %v1476_v42 = vsel %vm572_vm1, %v1474_v51, %v1472_v5  ;;  %v1498_v18 = vpop.permute.xlu1 %1497  ;;  %v9718_v51 = vld [vmem:[#allocation118_spill] sm:$0xff] }
 0x356   :  { %v1477_v15 = vmul.f32 %v1476_v42, %v9717_v2  ;;  %v1478_v48 = vmul.f32 %v1475_v37, %v9718_v51  ;;  %v977_v42 = vadd.f32 %v6544_v13, %v957_v36  ;;  %v1002_v37 = vmul.f32 %v1000_v17, %v9721_v4  ;;  %v9724_v2 = vld [vmem:[#allocation85_spill] sm:$0xff]  ;;  %v9728_v4 = vld [vmem:[#allocation122_spill] sm:$0xff] }
 0x357   :  { %v1057_v13 = vsel %vm752_vm5, %v6626_v21, %v6628_v53  ;;  %v1084_v53 = vsel %vm792_vm6, %v6632_v27, %v6630_v19 }
 0x358   :  { %v1496_v5 = vpop.permute.xlu0 %1495  ;;  %v1479_v30 = vadd.f32 %v1477_v15, %v1455_v9  ;;  %v1480_v10 = vadd.f32 %v1478_v48, %v1456_v47  ;;  %v1004_v51 = vadd.f32 %v1002_v37, %v976_v38  ;;  %v1005_v48 = vadd.f32 %v1003_v25, %v977_v42  ;;  %v9727_v38 = vld [vmem:[#allocation121_spill] sm:$0xff] }
 0x359   :  { %v1499_v63 = vsel %vm612_vm2, %v1496_v5, %v1498_v18  ;;  %v1500_v16 = vsel %vm612_vm2, %v1498_v18, %v1496_v5  ;;  %v1538_v43 = vpop.permute.xlu1 %1537  ;;  %v1029_v18 = vsel %vm712_vm4, %v6624_v12, %v1025_v49  ;;  %v9725_v5 = vld [vmem:[#allocation89_spill] sm:$0xff]  ;;  %v1085_v47 = vsel %vm792_vm6, %v6630_v19, %v6632_v27 }
 0x35a   :  { %v1501_v59 = vmul.f32 %v1500_v16, %v9719_v8  ;;  %v1502_v55 = vmul.f32 %v1499_v63, %v9720_v0  ;;  %v1031_v12 = vmul.f32 %v1029_v18, %v9724_v2  ;;  %v1058_v63 = vmul.f32 %v1056_v62, %v9725_v5  ;;  %v9726_v16 = vld [vmem:[#allocation92_spill] sm:$0xff]  ;;  %v9730_v19 = vld [vmem:[#allocation97_spill] sm:$0xff] }
 0x35b   :  { %v1059_v9 = vmul.f32 %v1057_v13, %v9726_v16  ;;  %v1032_v32 = vadd.f32 %v1030_v35, %v1004_v51  ;;  %v1086_v18 = vmul.f32 %v1084_v53, %v9729_v14  ;;  %v1087_v27 = vmul.f32 %v1085_v47, %v9730_v19  ;;  %v9733_v35 = vld [vmem:[#allocation126_spill] sm:$0xff]  ;;  %v9740_v19 = vld [vmem:[#allocation16_spill] sm:$0xff] }
 0x35c   :  { %v1536_v60 = vpop.permute.xlu0 %1535  ;;  %v1503_v36 = vadd.f32 %v1501_v59, %v1479_v30  ;;  %v1504_v17 = vadd.f32 %v1502_v55, %v1480_v10  ;;  %v1033_v25 = vadd.f32 %v1031_v12, %v1005_v48  ;;  %v9731_v30 = vld [vmem:[#allocation123_spill] sm:$0xff]  ;;  %v9739_v14 = vld [vmem:[#allocation15_spill] sm:$0xff] }
 0x35d   :  { %v1562_v58 = vpop.permute.xlu1 %1561  ;;  %v1539_v49 = vsel %vm672_vm3, %v1536_v60, %v1538_v43  ;;  %v1540_v15 = vsel %vm672_vm3, %v1538_v43, %v1536_v60  ;;  %v9732_v60 = vld [vmem:[#allocation124_spill] sm:$0xff]  ;;  %v9734_v12 = vld [vmem:[#allocation127_spill] sm:$0xff] }
 0x35e   :  { %v1519_v0 = vadd.f32 %v6564_v50, %v1503_v36  ;;  %v1520_v55 = vadd.f32 %v6569_v54, %v1504_v17  ;;  %v1541_v42 = vmul.f32 %v1539_v49, %v9727_v38  ;;  %v1542_v37 = vmul.f32 %v1540_v15, %v9728_v4 }
 0x35f   :  { %v1061_v34 = vadd.f32 %v1059_v9, %v1033_v25 }
 0x360   :  { %v1560_v21 = vpop.permute.xlu0 %1559  ;;  %v1543_v36 = vadd.f32 %v1541_v42, %v1519_v0  ;;  %v1544_v17 = vadd.f32 %v1542_v37, %v1520_v55  ;;  %v9738_v0 = vld [vmem:[#allocation130_spill] sm:$0xff] }
 0x361   :  { %v1563_v43 = vsel %vm712_vm4, %v1560_v21, %v1562_v58  ;;  %v1564_v8 = vsel %vm712_vm4, %v1562_v58, %v1560_v21  ;;  %v1586_v59 = vpop.permute.xlu1 %1585  ;;  %v1060_v58 = vadd.f32 %v1058_v63, %v1032_v32  ;;  %v1089_v48 = vadd.f32 %v1087_v27, %v1061_v34  ;;  %v4755_v34 = vld [vmem:[%s9703_s3 + $0x20] ss:$8 sps:$4 sm:$0xff]  }
 0x362   :  { %v1565_v10 = vmul.f32 %v1563_v43, %v9731_v30  ;;  %v1566_v62 = vmul.f32 %v1564_v8, %v9732_v60  ;;  %v6741_v63 = vstv %s9735_s4  ;;  %v9737_v8 = vld [vmem:[#allocation128_spill] sm:$0xff]  ;;  %v9742_v60 = vld [vmem:[#allocation18_spill] sm:$0xff] }
 0x363   :  { %v1088_v51 = vadd.f32 %v1086_v18, %v1060_v58  ;;  %9736 = vst [vmem:[#allocation65_spill] sm:$0xff] %v6741_v63  ;;  %v1092_v42 = vadd.f32 %v6741_v63, %v1089_v48  ;;  %v9741_v30 = vld [vmem:[#allocation17_spill] sm:$0xff] }
 0x364   :  { %v1584_v13 = vpop.permute.xlu0 %1583  ;;  %v1567_v5 = vadd.f32 %v1565_v10, %v1543_v36  ;;  %v1568_v16 = vadd.f32 %v1566_v62, %v1544_v17  ;;  %v4760_v36 = vld [vmem:[%s9703_s3 + $0x14] ss:$8 sps:$4 sm:$0xff]   ;;  %v4761_v17 = vld [vmem:[%s9703_s3] ss:$8 sps:$4 sm:$0xff]  }
 0x365   :  { %v1587_v50 = vsel %vm752_vm5, %v1584_v13, %v1586_v59  ;;  %v1588_v54 = vsel %vm752_vm5, %v1586_v59, %v1584_v13  ;;  %v1610_v15 = vpop.permute.xlu1 %1609  ;;  %v1091_v38 = vadd.f32 %v6741_v63, %v1088_v51  ;;  %v1094_v27 = vadd.f32 %v1092_v42, %v9740_v19  ;;  %v1956_v19 = vld [vmem:[%s8924_s8] ss:$8 sm:$0x3] }
 0x366   :  { %v1589_v2 = vmul.f32 %v1587_v50, %v9733_v35  ;;  %v1590_v49 = vmul.f32 %v1588_v54, %v9734_v12  ;;  %v4757_v50 = vld [vmem:[%s9703_s3 + $0x24] ss:$8 sps:$4 sm:$0xff]   ;;  %v4758_v54 = vld [vmem:[%s9703_s3 + $0x10] ss:$8 sps:$4 sm:$0xff]  }
 0x367   :  { %v1093_v18 = vadd.f32 %v1091_v38, %v9739_v14  ;;  %1909 = vmatprep.subr.bf16.mxu1 %v4757_v50  ;;  %v4763_v35 = vld [vmem:[%s9703_s3 + $0x4] ss:$8 sps:$4 sm:$0xff]  }
 0x368   :  { %v1608_v21 = vpop.permute.xlu0 %1607  ;;  %v1591_v47 = vadd.f32 %v1589_v2, %v1567_v5  ;;  %v1592_v43 = vadd.f32 %v1590_v49, %v1568_v16  ;;  %1910 = vmatpush1.bf16.msra.mxu1 %v4755_v34  ;;  %v9743_v5 = vld [vmem:[#allocation12_spill] sm:$0xff] }
 0x369   :  { %v1611_v9 = vsel %vm792_vm6, %v1608_v21, %v1610_v15  ;;  %v1612_v53 = vsel %vm792_vm6, %v1610_v15, %v1608_v21  ;;  %1911 = vmatprep.subr.bf16.mxu1 %v4760_v36  ;;  %v9744_v21 = vld [vmem:[#allocation13_spill] sm:$0xff] }
 0x36a   :  { %v1613_v59 = vmul.f32 %v1611_v9, %v9737_v8  ;;  %v1614_v55 = vmul.f32 %v1612_v53, %v9738_v0  ;;  %v9746_v8 = vld [vmem:[#allocation14_spill] sm:$0xff]  ;;  %v9759_v36 = vld [vmem:[#allocation40_spill] sm:$0xff] }
 0x36c   :  { %v1615_v4 = vadd.f32 %v1613_v59, %v1591_v47  ;;  %v1616_v37 = vadd.f32 %v1614_v55, %v1592_v43  ;;  %1912 = vmatpush1.bf16.msra.mxu1 %v4758_v54  ;;  %v9745_v47 = vmov 0  }
 0x36d   :  { %1913 = vmatprep.subr.bf16.mxu1 %v4763_v35  ;;  %v9760_v35 = vld [vmem:[#allocation41_spill] sm:$0xff] }
 0x36e   :  { %v1617_v32 = vadd.f32 %v1615_v4, %v6741_v63  ;;  %v1618_v25 = vadd.f32 %v1616_v37, %v6741_v63 }
 0x370   :  { %v1619_v10 = vadd.f32 %v1617_v32, %v9741_v30  ;;  %v1620_v62 = vadd.f32 %v1618_v25, %v9742_v60  ;;  %1914 = vmatpush1.bf16.msra.mxu1 %v4761_v17  ;;  %v4547_v30 = vld [vmem:[%s8924_s8 + $0x2] ss:$8 sm:$0x3] }
 0x372   :  { %v1628_v13 = vpack.c.bf16 %v1620_v62, %v1094_v27  ;;  %v1627_v58 = vpack.c.bf16 %v1619_v10, %v1093_v18 }
 0x374   :  { %1789 = vmatprep.mubr.bf16.mxu0 %v1628_v13 }
 0x375   :  { %1790 = vmatmul.mubr.bf16.vlgmr.msra.gmra.mxu0 %v1627_v58 }
 0x435   :  { %v4644_v2 = vpop.f32.mrf.mxu0 }
 0x437   :  { %v4645_v12 = vpop.f32.mrf.mxu0 }
 0x438   :  { %v4646_v15 = vadd.f32 %v4645_v12, %v4644_v2  ;;  %v4548_v12 = vld [vmem:[%s8924_s8 + $0x3] ss:$8 sm:$0x3] }
 0x439   :  { %v4647_v49 = vpop.f32.mrf.mxu0 }
 0x43a   :  { %v1800_v16 = vsub.f32 %v9743_v5, %v4646_v15  ;;  %v4552_v5 = vld [vmem:[%s8924_s8 + $0x7] ss:$8 sm:$0x3] }
 0x43b   :  { %v4648_v51 = vpop.f32.mrf.mxu0 }
 0x43c   :  { %v4649_v48 = vadd.f32 %v4648_v51, %v4647_v49  ;;  %v9761_v49 = vld [vmem:[#allocation44_spill] sm:$0xff]  ;;  %v9762_v51 = vld [vmem:[#allocation45_spill] sm:$0xff] }
 0x43e   :  { %v1801_v9 = vsub.f32 %v9744_v21, %v4649_v48 }
 0x440   :  { %v1802_v53 = vpack.c.bf16 %v1801_v9, %v1800_v16 }
 0x442   :  { %1932 = vmatmul.mubr.bf16.vlgmr.msra.gmra.mxu1 %v1802_v53 }
 0x443   :  { %3314 = vmatprep.mubr.bf16.mxu1 %v9745_v47  ;;  %v4549_v47 = vld [vmem:[%s8924_s8 + $0x4] ss:$8 sm:$0x3] }
 0x502   :  { %v1933_v43 = vpop.f32.mrf.mxu1 }
 0x503   :  { %v1942_v59 = vmul.f32 %v1933_v43, %v9746_v8 }
 0x504   :  { %v1935_v0 = vpop.f32.mrf.mxu1 }
 0x505   :  { %v6779_v55 = vadd.f32 %v1942_v59, %v1093_v18  ;;  %v1943_v38 = vmul.f32 %v1935_v0, %v9746_v8 }
 0x506   :  { %v1937_v4 = vpop.f32.mrf.mxu1 }
 0x507   :  { %9747 = vst [vmem:[#allocation67_spill] sm:$0xff] %v6779_v55  ;;  %v6782_v42 = vadd.f32 %v1943_v38, %v1094_v27  ;;  %1964 = vrot.lane.b32.xlu0 %v6779_v55, %s9665_s15  ;;  %v1944_v32 = vmul.f32 %v1937_v4, %v9746_v8  ;;  %v4546_v27 = vld [vmem:[%s8924_s8 + $0x1] ss:$8 sm:$0x3]  ;;  %v6883_v17 = vmul.f32 %v6779_v55, %v9759_v36 }
 0x508   :  { %v1939_v37 = vpop.f32.mrf.mxu1  ;;  %v6887_v2 = vmul.f32 %v6779_v55, %v9760_v35  ;;  %v6894_v15 = vmul.f32 %v6779_v55, %v9761_v49  ;;  %v6898_v48 = vmul.f32 %v6779_v55, %v9762_v51  ;;  %v4550_v4 = vld [vmem:[%s8924_s8 + $0x5] ss:$8 sm:$0x3] }
 0x509   :  { %9748 = vst [vmem:[#allocation68_spill] sm:$0xff] %v6782_v42  ;;  %1966 = vrot.lane.b32.xlu1 %v6782_v42, %s9665_s15  ;;  %v1945_v25 = vmul.f32 %v1939_v37, %v9746_v8  ;;  %v6816_v14 = vadd.f32 %v1944_v32, %v1619_v10  ;;  %v9751_v10 = vld [vmem:[#allocation37_spill] sm:$0xff]  ;;  %v6902_v16 = vmul.f32 %v6782_v42, %v9759_v36  ;;  %v4551_v37 = vld [vmem:[%s8924_s8 + $0x6] ss:$8 sm:$0x3] }
 0x50a   :  { %v6864_v60 = vrot.slane %v1956_v19, %v9751_v10  ;;  %v6870_v58 = vrot.slane %v4546_v27, %v9751_v10  ;;  %v6876_v50 = vrot.slane %v4547_v30, %v9751_v10  ;;  %v6906_v9 = vmul.f32 %v6782_v42, %v9760_v35 }
 0x50b   :  { %1991 = vrot.lane.b32.xlu0 %v6779_v55, %s9671_s19  ;;  %9749 = vst [vmem:[#allocation161_spill] sm:$0xff] %v6816_v14  ;;  %v6820_v18 = vadd.f32 %v1945_v25, %v1620_v62  ;;  %v9753_v62 = vld [vmem:[#allocation38_spill] sm:$0xff]  ;;  %v6913_v43 = vmul.f32 %v6782_v42, %v9761_v49  ;;  %v6917_v59 = vmul.f32 %v6782_v42, %v9762_v51 }
 0x50c   :  { %9752 = vst [vmem:[#allocation163_spill] sm:$0xff] %v6864_v60  ;;  %v6867_v13 = vrot.slane %v1956_v19, %v9753_v62  ;;  %9755 = vst [vmem:[#allocation165_spill] sm:$0xff] %v6870_v58  ;;  %v6873_v34 = vrot.slane %v4546_v27, %v9753_v62  ;;  %v6879_v54 = vrot.slane %v4547_v30, %v9753_v62 }
 0x50d   :  { %1993 = vrot.lane.b32.xlu1 %v6782_v42, %s9671_s19  ;;  %9750 = vst [vmem:[#allocation162_spill] sm:$0xff] %v6820_v18  ;;  %9757 = vst [vmem:[#allocation167_spill] sm:$0xff] %v6876_v50  ;;  %v6921_v0 = vmul.f32 %v6816_v14, %v9759_v36  ;;  %v6925_v38 = vmul.f32 %v6816_v14, %v9760_v35  ;;  %v6935_v32 = vmul.f32 %v6816_v14, %v9761_v49 }
 0x50e   :  { %9754 = vst [vmem:[#allocation164_spill] sm:$0xff] %v6867_v13  ;;  %9756 = vst [vmem:[#allocation166_spill] sm:$0xff] %v6873_v34  ;;  %v6939_v25 = vmul.f32 %v6816_v14, %v9762_v51  ;;  %v6943_v19 = vmul.f32 %v6820_v18, %v9759_v36  ;;  %v6947_v27 = vmul.f32 %v6820_v18, %v9760_v35  ;;  %v2482_v36 = vld [vmem:[%s8924_s8] ss:$8 sm:$0x3] }
 0x50f   :  { %2026 = vrot.lane.b32.xlu0 %v6779_v55, %s9676_s27  ;;  %9758 = vst [vmem:[#allocation168_spill] sm:$0xff] %v6879_v54  ;;  %9763 = vst [vmem:[#allocation69_spill] sm:$0xff] %v6921_v0  ;;  %v6950_v8 = vrot.slane %v4548_v12, %v9751_v10  ;;  %v6953_v21 = vrot.slane %v4548_v12, %v9753_v62  ;;  %v6967_v35 = vmul.f32 %v6820_v18, %v9762_v51  ;;  %v9800_v0 = vld [vmem:[#allocation50_spill] sm:$0xff] }
 0x510   :  { %9764 = vst [vmem:[#allocation75_spill] sm:$0xff] %v6925_v38  ;;  %9765 = vst [vmem:[#allocation73_spill] sm:$0xff] %v6935_v32  ;;  %v6977_v63 = vrot.slane %v4549_v47, %v9753_v62  ;;  %v6983_v51 = vrot.slane %v4550_v4, %v9751_v10  ;;  %v6989_v56 = vrot.slane %v4551_v37, %v9751_v10 }
 0x511   :  { %2028 = vrot.lane.b32.xlu1 %v6782_v42, %s9676_s27  ;;  %9766 = vst [vmem:[#allocation76_spill] sm:$0xff] %v6939_v25  ;;  %9767 = vst [vmem:[#allocation77_spill] sm:$0xff] %v6943_v19  ;;  %v7001_v6 = vrot.slane %v4552_v5, %v9751_v10  ;;  %v7007_v23 = vrot.slane %v2482_v36, %v9751_v10  ;;  %v7043_v41 = vrot.slane %v4556_v40, %v9751_v10  ;;  %v9799_v25 = vld [vmem:[#allocation108_spill] sm:$0xff] }
 0x512   :  { %9768 = vst [vmem:[#allocation79_spill] sm:$0xff] %v6947_v27  ;;  %9769 = vst [vmem:[#allocation80_spill] sm:$0xff] %v6950_v8  ;;  %v7046_v3 = vrot.slane %v4556_v40, %v9753_v62 }
 0x513   :  { %2061 = vrot.lane.b32.xlu0 %v6779_v55, %s9680_s14  ;;  %9770 = vst [vmem:[#allocation81_spill] sm:$0xff] %v6953_v21  ;;  %9772 = vst [vmem:[#allocation43_spill] sm:$0xff] %v6967_v35  ;;  %v9795_v35 = vld [vmem:[#allocation47_spill] sm:$0xff] }
 0x514   :  { %9774 = vst [vmem:[#allocation101_spill] sm:$0xff] %v6977_v63  ;;  %9775 = vst [vmem:[#allocation104_spill] sm:$0xff] %v6983_v51 }
 0x515   :  { %2063 = vrot.lane.b32.xlu1 %v6782_v42, %s9680_s14  ;;  %9777 = vst [vmem:[#allocation52_spill] sm:$0xff] %v6989_v56  ;;  %9779 = vst [vmem:[#allocation58_spill] sm:$0xff] %v7001_v6 }
 0x516   :  { %9781 = vst [vmem:[#allocation116_spill] sm:$0xff] %v7007_v23  ;;  %9789 = vst [vmem:[#allocation72_spill] sm:$0xff] %v7043_v41  ;;  %v9798_v41 = vld [vmem:[#allocation49_spill] sm:$0xff] }
 0x517   :  { %2112 = vrot.lane.b32.xlu0 %v6779_v55, %s9686_s17  ;;  %9790 = vst [vmem:[#allocation84_spill] sm:$0xff] %v7046_v3 }
 0x519   :  { %2114 = vrot.lane.b32.xlu1 %v6782_v42, %s9686_s17 }
 0x51b   :  { %2147 = vrot.lane.b32.xlu0 %v6779_v55, %s9690_s2 }
 0x51d   :  { %2149 = vrot.lane.b32.xlu1 %v6782_v42, %s9690_s2 }
 0x51f   :  { %2182 = vrot.lane.b32.xlu0 %v6779_v55, %s9691_s22 }
 0x521   :  { %2184 = vrot.lane.b32.xlu1 %v6782_v42, %s9691_s22 }
 0x523   :  { %2217 = vrot.lane.b32.xlu0 %v6779_v55, %s9692_s0  ;;  %v6974_v55 = vrot.slane %v4549_v47, %v9751_v10  ;;  %v4554_v47 = vld [vmem:[%s8924_s8 + $0x2] ss:$8 sm:$0x3] }
 0x524   :  { %v7027_v61 = vrot.slane %v4554_v47, %v9751_v10  ;;  %v7030_v29 = vrot.slane %v4554_v47, %v9753_v62 }
 0x525   :  { %2219 = vrot.lane.b32.xlu1 %v6782_v42, %s9692_s0  ;;  %9773 = vst [vmem:[#allocation46_spill] sm:$0xff] %v6974_v55 }
 0x526   :  { %9785 = vst [vmem:[#allocation118_spill] sm:$0xff] %v7027_v61  ;;  %9786 = vst [vmem:[#allocation119_spill] sm:$0xff] %v7030_v29 }
 0x527   :  { %2490 = vrot.lane.b32.xlu0 %v6816_v14, %s9665_s15 }
 0x529   :  { %2492 = vrot.lane.b32.xlu1 %v6820_v18, %s9665_s15 }
 0x52b   :  { %2517 = vrot.lane.b32.xlu0 %v6816_v14, %s9671_s19 }
 0x52d   :  { %2519 = vrot.lane.b32.xlu1 %v6820_v18, %s9671_s19 }
 0x52f   :  { %2552 = vrot.lane.b32.xlu0 %v6816_v14, %s9676_s27 }
 0x531   :  { %2554 = vrot.lane.b32.xlu1 %v6820_v18, %s9676_s27 }
 0x533   :  { %2587 = vrot.lane.b32.xlu0 %v6816_v14, %s9680_s14 }
 0x535   :  { %2589 = vrot.lane.b32.xlu1 %v6820_v18, %s9680_s14 }
 0x537   :  { %2638 = vrot.lane.b32.xlu0 %v6816_v14, %s9686_s17 }
 0x539   :  { %2640 = vrot.lane.b32.xlu1 %v6820_v18, %s9686_s17 }
 0x53b   :  { %2673 = vrot.lane.b32.xlu0 %v6816_v14, %s9690_s2 }
 0x53d   :  { %2675 = vrot.lane.b32.xlu1 %v6820_v18, %s9690_s2 }
 0x53f   :  { %2708 = vrot.lane.b32.xlu0 %v6816_v14, %s9691_s22 }
 0x541   :  { %2710 = vrot.lane.b32.xlu1 %v6820_v18, %s9691_s22 }
 0x543   :  { %2743 = vrot.lane.b32.xlu0 %v6816_v14, %s9692_s0  ;;  %v6963_v14 = vmul.f32 %v6820_v18, %v9761_v49  ;;  %v4553_v49 = vld [vmem:[%s8924_s8 + $0x1] ss:$8 sm:$0x3] }
 0x544   :  { %v7018_v24 = vrot.slane %v4553_v49, %v9751_v10 }
 0x545   :  { %2745 = vrot.lane.b32.xlu1 %v6820_v18, %s9692_s0  ;;  %9771 = vst [vmem:[#allocation63_spill] sm:$0xff] %v6963_v14  ;;  %v6986_v18 = vrot.slane %v4550_v4, %v9753_v62  ;;  %v7004_v4 = vrot.slane %v4552_v5, %v9753_v62  ;;  %v7021_v5 = vrot.slane %v4553_v49, %v9753_v62 }
 0x546   :  { %9783 = vst [vmem:[#allocation113_spill] sm:$0xff] %v7018_v24 }
 0x547   :  { %9776 = vst [vmem:[#allocation51_spill] sm:$0xff] %v6986_v18  ;;  %9780 = vst [vmem:[#allocation115_spill] sm:$0xff] %v7004_v4 }
 0x548   :  { %9784 = vst [vmem:[#allocation117_spill] sm:$0xff] %v7021_v5 }
 0x579   :  { %v1965_v53 = vpop.permute.xlu0 %1964 }
 0x57b   :  { %v1967_v30 = vpop.permute.xlu1 %1966 }
 0x57c   :  { %v1968_v12 = vsel %vm500_vm7, %v1965_v53, %v1967_v30  ;;  %v1969_v42 = vsel %vm500_vm7, %v1967_v30, %v1965_v53  ;;  %v6992_v53 = vrot.slane %v4551_v37, %v9753_v62  ;;  %v4555_v30 = vld [vmem:[%s8924_s8 + $0x3] ss:$8 sm:$0x3]  ;;  %v7010_v37 = vrot.slane %v2482_v36, %v9753_v62  ;;  %v4557_v36 = vld [vmem:[%s8924_s8 + $0x5] ss:$8 sm:$0x3] }
 0x57d   :  { %v1992_v11 = vpop.permute.xlu0 %1991  ;;  %v1981_v52 = vmul.f32 %v6864_v60, %v1969_v42  ;;  %v1982_v45 = vmul.f32 %v6867_v13, %v1968_v12  ;;  %v7033_v42 = vrot.slane %v4555_v30, %v9751_v10  ;;  %v7036_v12 = vrot.slane %v4555_v30, %v9753_v62 }
 0x57e   :  { %9778 = vst [vmem:[#allocation57_spill] sm:$0xff] %v6992_v53  ;;  %9782 = vst [vmem:[#allocation109_spill] sm:$0xff] %v7010_v37  ;;  %v7051_v30 = vrot.slane %v4557_v36, %v9751_v10  ;;  %v7054_v22 = vrot.slane %v4557_v36, %v9753_v62 }
 0x57f   :  { %v1994_v28 = vpop.permute.xlu1 %1993  ;;  %9787 = vst [vmem:[#allocation120_spill] sm:$0xff] %v7033_v42  ;;  %9788 = vst [vmem:[#allocation71_spill] sm:$0xff] %v7036_v12  ;;  %v1983_v7 = vmul.f32 %v1981_v52, %v9793_v33  ;;  %v1989_v32 = vmul.f32 %v1981_v52, %v9799_v25  ;;  %v1990_v38 = vmul.f32 %v1982_v45, %v9799_v25 }
 0x580   :  { %v1995_v49 = vsel %vm532_vm0, %v1992_v11, %v1994_v28  ;;  %v1996_v13 = vsel %vm532_vm0, %v1994_v28, %v1992_v11  ;;  %9791 = vst [vmem:[#allocation85_spill] sm:$0xff] %v7051_v30  ;;  %9792 = vst [vmem:[#allocation89_spill] sm:$0xff] %v7054_v22  ;;  %v1984_v28 = vmul.f32 %v1982_v45, %v9793_v33  ;;  %v9794_v11 = vld [vmem:[#allocation106_spill] sm:$0xff]  ;;  %v9797_v30 = vld [vmem:[#allocation107_spill] sm:$0xff] }
 0x581   :  { %v2027_v60 = vpop.permute.xlu0 %2026  ;;  %v2008_v47 = vmul.f32 %v6870_v58, %v1996_v13  ;;  %v2009_v44 = vmul.f32 %v6873_v34, %v1995_v49  ;;  %v1985_v20 = vmul.f32 %v1981_v52, %v9794_v11  ;;  %v1986_v39 = vmul.f32 %v1982_v45, %v9794_v11  ;;  %v9796_v49 = vld [vmem:[#allocation48_spill] sm:$0xff] }
 0x582   :  { %v1987_v36 = vmul.f32 %v1981_v52, %v9797_v30  ;;  %v1988_v22 = vmul.f32 %v1982_v45, %v9797_v30  ;;  %v9807_v30 = vld [vmem:[#allocation70_spill] sm:$0xff] }
 0x583   :  { %v2029_v40 = vpop.permute.xlu1 %2028  ;;  %v2010_v3 = vmul.f32 %v2008_v47, %v9795_v35  ;;  %v2011_v13 = vmul.f32 %v2009_v44, %v9795_v35  ;;  %v2014_v34 = vmul.f32 %v2008_v47, %v9796_v49  ;;  %v2015_v58 = vmul.f32 %v2009_v44, %v9796_v49  ;;  %v9806_v49 = vld [vmem:[#allocation66_spill] sm:$0xff] }
 0x584   :  { %v2018_v14 = vmul.f32 %v2008_v47, %v9798_v41  ;;  %v2019_v27 = vmul.f32 %v2009_v44, %v9798_v41  ;;  %v2022_v1 = vmul.f32 %v2008_v47, %v9800_v0  ;;  %v2023_v31 = vmul.f32 %v2009_v44, %v9800_v0 }
 0x585   :  { %v2062_v19 = vpop.permute.xlu0 %2061  ;;  %v2012_v26 = vadd.f32 %v2010_v3, %v1983_v7  ;;  %v2013_v57 = vadd.f32 %v2011_v13, %v1984_v28  ;;  %v2016_v12 = vadd.f32 %v2014_v34, %v1985_v20  ;;  %v2017_v42 = vadd.f32 %v2015_v58, %v1986_v39  ;;  %v9802_v13 = vld [vmem:[#allocation54_spill] sm:$0xff] }
 0x586   :  { %v2030_v61 = vsel %vm572_vm1, %v2027_v60, %v2029_v40  ;;  %v2031_v41 = vsel %vm572_vm1, %v2029_v40, %v2027_v60  ;;  %v2020_v47 = vadd.f32 %v2018_v14, %v1987_v36  ;;  %v2021_v25 = vadd.f32 %v2019_v27, %v1988_v22  ;;  %v9801_v60 = vld [vmem:[#allocation53_spill] sm:$0xff]  ;;  %v9803_v14 = vld [vmem:[#allocation55_spill] sm:$0xff] }
 0x587   :  { %v2064_v29 = vpop.permute.xlu1 %2063  ;;  %v2043_v3 = vmul.f32 %v6876_v50, %v2031_v41  ;;  %v2044_v20 = vmul.f32 %v6879_v54, %v2030_v61  ;;  %v2024_v7 = vadd.f32 %v2022_v1, %v1989_v32  ;;  %v2025_v44 = vadd.f32 %v2023_v31, %v1990_v38  ;;  %v9805_v50 = vld [vmem:[#allocation62_spill] sm:$0xff] }
 0x588   :  { %v2065_v52 = vsel %vm612_vm2, %v2062_v19, %v2064_v29  ;;  %v2066_v45 = vsel %vm612_vm2, %v2064_v29, %v2062_v19  ;;  %v9804_v19 = vld [vmem:[#allocation56_spill] sm:$0xff] }
 0x589   :  { %v2113_v39 = vpop.permute.xlu0 %2112  ;;  %v2078_v58 = vmul.f32 %v6950_v8, %v2066_v45  ;;  %v2079_v34 = vmul.f32 %v6953_v21, %v2065_v52  ;;  %v2045_v28 = vmul.f32 %v2043_v3, %v9801_v60  ;;  %v2046_v40 = vmul.f32 %v2044_v20, %v9801_v60 }
 0x58a   :  { %v2049_v0 = vmul.f32 %v2043_v3, %v9802_v13  ;;  %v2050_v29 = vmul.f32 %v2044_v20, %v9802_v13  ;;  %v2053_v41 = vmul.f32 %v2043_v3, %v9803_v14  ;;  %v2054_v61 = vmul.f32 %v2044_v20, %v9803_v14 }
 0x58b   :  { %v2115_v22 = vpop.permute.xlu1 %2114  ;;  %v2057_v1 = vmul.f32 %v2043_v3, %v9804_v19  ;;  %v2058_v31 = vmul.f32 %v2044_v20, %v9804_v19  ;;  %v2047_v38 = vadd.f32 %v2045_v28, %v2012_v26  ;;  %v2048_v32 = vadd.f32 %v2046_v40, %v2013_v57  ;;  %v9808_v26 = vld [vmem:[#allocation74_spill] sm:$0xff] }
 0x58c   :  { %v2051_v27 = vadd.f32 %v2049_v0, %v2016_v12  ;;  %v2052_v36 = vadd.f32 %v2050_v29, %v2017_v42  ;;  %v2055_v52 = vadd.f32 %v2053_v41, %v2020_v47  ;;  %v2056_v45 = vadd.f32 %v2054_v61, %v2021_v25  ;;  %v4558_v42 = vld [vmem:[%s8924_s8 + $0x6] ss:$8 sm:$0x3] }
 0x58d   :  { %v2059_v21 = vadd.f32 %v2057_v1, %v2024_v7  ;;  %v2060_v8 = vadd.f32 %v2058_v31, %v2025_v44  ;;  %v2148_v54 = vpop.permute.xlu0 %2147  ;;  %v2080_v13 = vmul.f32 %v2078_v58, %v9805_v50  ;;  %v2081_v60 = vmul.f32 %v2079_v34, %v9805_v50 }
 0x58e   :  { %v2084_v35 = vmul.f32 %v2078_v58, %v9806_v49  ;;  %v2085_v14 = vmul.f32 %v2079_v34, %v9806_v49  ;;  %v2088_v20 = vmul.f32 %v2078_v58, %v9807_v30  ;;  %v2089_v57 = vmul.f32 %v2079_v34, %v9807_v30 }
 0x58f   :  { %v2150_v3 = vpop.permute.xlu1 %2149  ;;  %v2092_v0 = vmul.f32 %v2078_v58, %v9808_v26  ;;  %v2093_v25 = vmul.f32 %v2079_v34, %v9808_v26  ;;  %v2082_v12 = vadd.f32 %v2080_v13, %v2047_v38  ;;  %v2083_v47 = vadd.f32 %v2081_v60, %v2048_v32 }
 0x590   :  { %v2086_v7 = vadd.f32 %v2084_v35, %v2051_v27  ;;  %v2087_v44 = vadd.f32 %v2085_v14, %v2052_v36  ;;  %v2090_v28 = vadd.f32 %v2088_v20, %v2055_v52  ;;  %v2091_v40 = vadd.f32 %v2089_v57, %v2056_v45  ;;  %v9811_v36 = vld [vmem:[#allocation78_spill] sm:$0xff]  ;;  %v9813_v20 = vld [vmem:[#allocation83_spill] sm:$0xff] }
 0x591   :  { %v2094_v29 = vadd.f32 %v2092_v0, %v2059_v21  ;;  %v2095_v41 = vadd.f32 %v2093_v25, %v2060_v8  ;;  %v2098_v61 = vadd.f32 %v6883_v17, %v2082_v12  ;;  %v7106_v58 = vrot.slane %v4558_v42, %v9751_v10  ;;  %v2183_v8 = vpop.permute.xlu0 %2182  ;;  %v9812_v52 = vld [vmem:[#allocation82_spill] sm:$0xff] }
 0x592   :  { %v2102_v1 = vadd.f32 %v6887_v2, %v2086_v7  ;;  %v7109_v34 = vrot.slane %v4558_v42, %v9753_v62  ;;  %v2106_v13 = vadd.f32 %v6894_v15, %v2090_v28  ;;  %v2099_v60 = vadd.f32 %v6902_v16, %v2083_v47  ;;  %v9814_v25 = vld [vmem:[#allocation86_spill] sm:$0xff] }
 0x593   :  { %v2185_v31 = vpop.permute.xlu1 %2184  ;;  %9809 = vst [vmem:[#allocation92_spill] sm:$0xff] %v7106_v58  ;;  %v2110_v35 = vadd.f32 %v6898_v48, %v2094_v29  ;;  %v2103_v21 = vadd.f32 %v6906_v9, %v2087_v44  ;;  %v2116_v17 = vsel %vm672_vm3, %v2113_v39, %v2115_v22  ;;  %v2117_v2 = vsel %vm672_vm3, %v2115_v22, %v2113_v39 }
 0x594   :  { %9810 = vst [vmem:[#allocation121_spill] sm:$0xff] %v7109_v34  ;;  %v2151_v14 = vsel %vm712_vm4, %v2148_v54, %v2150_v3  ;;  %v2152_v38 = vsel %vm712_vm4, %v2150_v3, %v2148_v54  ;;  %v2107_v15 = vadd.f32 %v6913_v43, %v2091_v40  ;;  %v2111_v48 = vadd.f32 %v6917_v59, %v2095_v41 }
 0x595   :  { %v2129_v16 = vmul.f32 %v6974_v55, %v2116_v17  ;;  %v2130_v9 = vmul.f32 %v6977_v63, %v2117_v2  ;;  %v2164_v32 = vmul.f32 %v6983_v51, %v2151_v14  ;;  %v2165_v27 = vmul.f32 %v6986_v18, %v2152_v38  ;;  %v2218_v40 = vpop.permute.xlu0 %2217  ;;  %v9815_v17 = vld [vmem:[#allocation87_spill] sm:$0xff]  ;;  %v9816_v38 = vld [vmem:[#allocation88_spill] sm:$0xff] }
 0x596   :  { %v2186_v39 = vsel %vm752_vm5, %v2183_v8, %v2185_v31  ;;  %v2187_v22 = vsel %vm752_vm5, %v2185_v31, %v2183_v8 }
 0x597   :  { %v2131_v54 = vmul.f32 %v2129_v16, %v9811_v36  ;;  %v2132_v43 = vmul.f32 %v2130_v9, %v9811_v36  ;;  %v2135_v59 = vmul.f32 %v2129_v16, %v9812_v52  ;;  %v2136_v45 = vmul.f32 %v2130_v9, %v9812_v52  ;;  %v2220_v3 = vpop.permute.xlu1 %2219 }
 0x598   :  { %v2139_v57 = vmul.f32 %v2129_v16, %v9813_v20  ;;  %v2140_v0 = vmul.f32 %v2130_v9, %v9813_v20  ;;  %v2143_v42 = vmul.f32 %v2129_v16, %v9814_v25  ;;  %v2144_v12 = vmul.f32 %v2130_v9, %v9814_v25  ;;  %v9817_v16 = vld [vmem:[#allocation90_spill] sm:$0xff] }
 0x599   :  { %v2133_v47 = vadd.f32 %v2131_v54, %v2098_v61  ;;  %v2134_v7 = vadd.f32 %v2132_v43, %v2099_v60  ;;  %v2137_v44 = vadd.f32 %v2135_v59, %v2102_v1  ;;  %v2138_v28 = vadd.f32 %v2136_v45, %v2103_v21  ;;  %v9818_v60 = vld [vmem:[#allocation91_spill] sm:$0xff] }
 0x59a   :  { %v2141_v29 = vadd.f32 %v2139_v57, %v2106_v13  ;;  %v2142_v41 = vadd.f32 %v2140_v0, %v2107_v15  ;;  %v2145_v31 = vadd.f32 %v2143_v42, %v2110_v35  ;;  %v2146_v8 = vadd.f32 %v2144_v12, %v2111_v48 }
 0x59b   :  { %v2166_v2 = vmul.f32 %v2164_v32, %v9815_v17  ;;  %v2167_v14 = vmul.f32 %v2165_v27, %v9815_v17  ;;  %v2170_v18 = vmul.f32 %v2164_v32, %v9816_v38  ;;  %v2171_v51 = vmul.f32 %v2165_v27, %v9816_v38  ;;  %v2493_v9 = vpop.permute.xlu1 %2492 }
 0x59c   :  { %v2174_v63 = vmul.f32 %v2164_v32, %v9817_v16  ;;  %v2175_v61 = vmul.f32 %v2165_v27, %v9817_v16  ;;  %v2178_v1 = vmul.f32 %v2164_v32, %v9818_v60  ;;  %v2179_v21 = vmul.f32 %v2165_v27, %v9818_v60  ;;  %v2491_v27 = vpop.permute.xlu0 %2490 }
 0x59d   :  { %v2168_v13 = vadd.f32 %v2166_v2, %v2133_v47  ;;  %v2169_v15 = vadd.f32 %v2167_v14, %v2134_v7  ;;  %v2172_v35 = vadd.f32 %v2170_v18, %v2137_v44  ;;  %v2173_v48 = vadd.f32 %v2171_v51, %v2138_v28  ;;  %v9820_v7 = vld [vmem:[#allocation94_spill] sm:$0xff] }
 0x59e   :  { %v2176_v54 = vadd.f32 %v2174_v63, %v2141_v29  ;;  %v2177_v43 = vadd.f32 %v2175_v61, %v2142_v41  ;;  %v2180_v59 = vadd.f32 %v2178_v1, %v2145_v31  ;;  %v2181_v45 = vadd.f32 %v2179_v21, %v2146_v8  ;;  %v9822_v41 = vld [vmem:[#allocation98_spill] sm:$0xff] }
 0x59f   :  { %v2199_v57 = vmul.f32 %v6989_v56, %v2186_v39  ;;  %v2200_v0 = vmul.f32 %v6992_v53, %v2187_v22  ;;  %v2221_v42 = vsel %vm792_vm6, %v2218_v40, %v2220_v3  ;;  %v2222_v32 = vsel %vm792_vm6, %v2220_v3, %v2218_v40  ;;  %v9819_v39 = vld [vmem:[#allocation93_spill] sm:$0xff]  ;;  %v9821_v3 = vld [vmem:[#allocation95_spill] sm:$0xff]  ;;  %v9824_v53 = vld [vmem:[#allocation100_spill] sm:$0xff] }
 0x5a0   :  { %v2234_v12 = vmul.f32 %v7001_v6, %v2221_v42  ;;  %v2235_v18 = vmul.f32 %v7004_v4, %v2222_v32  ;;  %v2494_v63 = vsel %vm500_vm7, %v2491_v27, %v2493_v9  ;;  %v2495_v51 = vsel %vm500_vm7, %v2493_v9, %v2491_v27  ;;  %v9823_v27 = vld [vmem:[#allocation99_spill] sm:$0xff] }
 0x5a1   :  { %v2201_v47 = vmul.f32 %v2199_v57, %v9819_v39  ;;  %v2202_v22 = vmul.f32 %v2200_v0, %v9819_v39  ;;  %v2205_v44 = vmul.f32 %v2199_v57, %v9820_v7  ;;  %v2206_v28 = vmul.f32 %v2200_v0, %v9820_v7 }
 0x5a2   :  { %v2209_v40 = vmul.f32 %v2199_v57, %v9821_v3  ;;  %v2210_v29 = vmul.f32 %v2200_v0, %v9821_v3  ;;  %v2213_v31 = vmul.f32 %v2199_v57, %v9822_v41  ;;  %v2214_v8 = vmul.f32 %v2200_v0, %v9822_v41  ;;  %v9825_v3 = vld [vmem:[#allocation102_spill] sm:$0xff] }
 0x5a3   :  { %v2203_v2 = vadd.f32 %v2201_v47, %v2168_v13  ;;  %v2204_v14 = vadd.f32 %v2202_v22, %v2169_v15  ;;  %v2207_v61 = vadd.f32 %v2205_v44, %v2172_v35  ;;  %v2208_v1 = vadd.f32 %v2206_v28, %v2173_v48  ;;  %v9826_v13 = vld [vmem:[#allocation103_spill] sm:$0xff]  ;;  %v2520_v48 = vpop.permute.xlu1 %2519 }
 0x5a4   :  { %v2211_v21 = vadd.f32 %v2209_v40, %v2176_v54  ;;  %v2212_v9 = vadd.f32 %v2210_v29, %v2177_v43  ;;  %v2215_v42 = vadd.f32 %v2213_v31, %v2180_v59  ;;  %v2216_v32 = vadd.f32 %v2214_v8, %v2181_v45  ;;  %v2518_v40 = vpop.permute.xlu0 %2517  ;;  %v4559_v29 = vld [vmem:[%s8924_s8 + $0x7] ss:$8 sm:$0x3]  ;;  %v9827_v31 = vld [vmem:[#allocation110_spill] sm:$0xff] }
 0x5a5   :  { %v2236_v4 = vmul.f32 %v2234_v12, %v9823_v27  ;;  %v2237_v6 = vmul.f32 %v2235_v18, %v9823_v27  ;;  %v2240_v56 = vmul.f32 %v2234_v12, %v9824_v53  ;;  %v2241_v55 = vmul.f32 %v2235_v18, %v9824_v53  ;;  %v9841_v53 = vld [vmem:[#allocation118_spill] sm:$0xff] }
 0x5a6   :  { %v2244_v57 = vmul.f32 %v2234_v12, %v9825_v3  ;;  %v2245_v0 = vmul.f32 %v2235_v18, %v9825_v3  ;;  %v2248_v15 = vmul.f32 %v2234_v12, %v9826_v13  ;;  %v2249_v35 = vmul.f32 %v2235_v18, %v9826_v13  ;;  %v9828_v3 = vld [vmem:[#allocation111_spill] sm:$0xff] }
 0x5a7   :  { %v2238_v54 = vadd.f32 %v2236_v4, %v2203_v2  ;;  %v2239_v43 = vadd.f32 %v2237_v6, %v2204_v14  ;;  %v2242_v59 = vadd.f32 %v2240_v56, %v2207_v61  ;;  %v2243_v45 = vadd.f32 %v2241_v55, %v2208_v1  ;;  %v9829_v6 = vld [vmem:[#allocation112_spill] sm:$0xff]  ;;  %v9830_v2 = vld [vmem:[#allocation114_spill] sm:$0xff] }
 0x5a8   :  { %v2246_v47 = vadd.f32 %v2244_v57, %v2211_v21  ;;  %v2247_v22 = vadd.f32 %v2245_v0, %v2212_v9  ;;  %v2250_v44 = vadd.f32 %v2248_v15, %v2215_v42  ;;  %v2251_v28 = vadd.f32 %v2249_v35, %v2216_v32  ;;  %v2555_v35 = vpop.permute.xlu1 %2554 }
 0x5a9   :  { %v2252_v8 = vadd.f32 %v2238_v54, %v9827_v31  ;;  %v2253_v12 = vadd.f32 %v2239_v43, %v9827_v31  ;;  %v2256_v18 = vadd.f32 %v2242_v59, %v9828_v3  ;;  %v2257_v4 = vadd.f32 %v2243_v45, %v9828_v3 }
 0x5aa   :  { %v2260_v56 = vadd.f32 %v2246_v47, %v9829_v6  ;;  %v2261_v55 = vadd.f32 %v2247_v22, %v9829_v6  ;;  %v2264_v14 = vadd.f32 %v2250_v44, %v9830_v2  ;;  %v2265_v61 = vadd.f32 %v2251_v28, %v9830_v2 }
 0x5ab   :  { %v7188_v1 = vmax.f32 %v2252_v8, 0.0  ;;  %v7190_v21 = vmax.f32 %v2253_v12, 0.0  ;;  %v7193_v9 = vrot.slane %v4559_v29, %v9751_v10  ;;  %v7196_v42 = vrot.slane %v4559_v29, %v9753_v62  ;;  %v2553_v29 = vpop.permute.xlu0 %2552  ;;  %v9838_v62 = vld [vmem:[#allocation49_spill] sm:$0xff] }
 0x5ac   :  { %v7198_v32 = vmax.f32 %v2256_v18, 0.0  ;;  %v7200_v57 = vmax.f32 %v2257_v4, 0.0  ;;  %v7202_v0 = vmax.f32 %v2260_v56, 0.0  ;;  %v7204_v15 = vmax.f32 %v2261_v55, 0.0  ;;  %v9835_v18 = vld [vmem:[#allocation107_spill] sm:$0xff] }
 0x5ad   :  { %9831 = vst [vmem:[#allocation122_spill] sm:$0xff] %v7188_v1  ;;  %9832 = vst [vmem:[#allocation96_spill] sm:$0xff] %v7193_v9  ;;  %v2507_v54 = vmul.f32 %v7007_v23, %v2495_v51  ;;  %v2508_v43 = vmul.f32 %v7010_v37, %v2494_v63  ;;  %v2521_v59 = vsel %vm532_vm0, %v2518_v40, %v2520_v48  ;;  %v7212_v47 = vmax.f32 %v2264_v14, 0.0  ;;  %v9836_v55 = vld [vmem:[#allocation47_spill] sm:$0xff]  ;;  %v2590_v23 = vpop.permute.xlu1 %2589 }
 0x5ae   :  { %9833 = vst [vmem:[#allocation97_spill] sm:$0xff] %v7196_v42  ;;  %9834 = vst [vmem:[#allocation123_spill] sm:$0xff] %v7198_v32  ;;  %v2522_v45 = vsel %vm532_vm0, %v2520_v48, %v2518_v40  ;;  %v7214_v22 = vmax.f32 %v2265_v61, 0.0  ;;  %v2535_v28 = vmul.f32 %v7021_v5, %v2521_v59  ;;  %v2556_v63 = vsel %vm572_vm1, %v2553_v29, %v2555_v35  ;;  %v9837_v59 = vld [vmem:[#allocation48_spill] sm:$0xff]  ;;  %v9842_v42 = vld [vmem:[#allocation119_spill] sm:$0xff] }
 0x5af   :  { %v2534_v44 = vmul.f32 %v7018_v24, %v2522_v45  ;;  %v2509_v8 = vmul.f32 %v2507_v54, %v9793_v33  ;;  %v2510_v51 = vmul.f32 %v2508_v43, %v9793_v33  ;;  %v2557_v12 = vsel %vm572_vm1, %v2555_v35, %v2553_v29  ;;  %v9839_v29 = vld [vmem:[#allocation50_spill] sm:$0xff]  ;;  %v9840_v5 = vld [vmem:[#allocation108_spill] sm:$0xff] }
 0x5b0   :  { %v2511_v48 = vmul.f32 %v2507_v54, %v9794_v11  ;;  %v2512_v40 = vmul.f32 %v2508_v43, %v9794_v11  ;;  %v2513_v4 = vmul.f32 %v2507_v54, %v9835_v18  ;;  %v2514_v56 = vmul.f32 %v2508_v43, %v9835_v18 }
 0x5b1   :  { %v2536_v14 = vmul.f32 %v2534_v44, %v9836_v55  ;;  %v2537_v61 = vmul.f32 %v2535_v28, %v9836_v55  ;;  %v2540_v45 = vmul.f32 %v2534_v44, %v9837_v59  ;;  %v2541_v33 = vmul.f32 %v2535_v28, %v9837_v59  ;;  %v2588_v59 = vpop.permute.xlu0 %2587 }
 0x5b2   :  { %v2544_v10 = vmul.f32 %v2534_v44, %v9838_v62  ;;  %v2545_v35 = vmul.f32 %v2535_v28, %v9838_v62  ;;  %v2548_v37 = vmul.f32 %v2534_v44, %v9839_v29  ;;  %v2549_v11 = vmul.f32 %v2535_v28, %v9839_v29 }
 0x5b3   :  { %v2515_v24 = vmul.f32 %v2507_v54, %v9840_v5  ;;  %v2516_v18 = vmul.f32 %v2508_v43, %v9840_v5  ;;  %v2538_v2 = vadd.f32 %v2536_v14, %v2509_v8  ;;  %v2539_v6 = vadd.f32 %v2537_v61, %v2510_v51  ;;  %v9843_v43 = vld [vmem:[#allocation120_spill] sm:$0xff]  ;;  %v9844_v51 = vld [vmem:[#allocation71_spill] sm:$0xff] }
 0x5b4   :  { %v2542_v55 = vadd.f32 %v2540_v45, %v2511_v48  ;;  %v2543_v3 = vadd.f32 %v2541_v33, %v2512_v40  ;;  %v2546_v31 = vadd.f32 %v2544_v10, %v2513_v4  ;;  %v2547_v13 = vadd.f32 %v2545_v35, %v2514_v56  ;;  %v9845_v33 = vld [vmem:[#allocation53_spill] sm:$0xff]  ;;  %v9846_v4 = vld [vmem:[#allocation54_spill] sm:$0xff]  ;;  %v9847_v56 = vld [vmem:[#allocation55_spill] sm:$0xff] }
 0x5b5   :  { %v2569_v27 = vmul.f32 %v9841_v53, %v2557_v12  ;;  %v2570_v62 = vmul.f32 %v9842_v42, %v2556_v63  ;;  %v2591_v44 = vsel %vm612_vm2, %v2588_v59, %v2590_v23  ;;  %v2592_v28 = vsel %vm612_vm2, %v2590_v23, %v2588_v59  ;;  %v9848_v45 = vld [vmem:[#allocation125_spill] sm:$0xff] }
 0x5b6   :  { %v2550_v54 = vadd.f32 %v2548_v37, %v2515_v24  ;;  %v2551_v29 = vadd.f32 %v2549_v11, %v2516_v18  ;;  %v2604_v8 = vmul.f32 %v9843_v43, %v2592_v28  ;;  %v2605_v48 = vmul.f32 %v9844_v51, %v2591_v44  ;;  %v9849_v24 = vld [vmem:[#allocation129_spill] sm:$0xff] }
 0x5b7   :  { %v2571_v10 = vmul.f32 %v2569_v27, %v9845_v33  ;;  %v2572_v40 = vmul.f32 %v2570_v62, %v9845_v33  ;;  %v2575_v12 = vmul.f32 %v2569_v27, %v9846_v4  ;;  %v2576_v63 = vmul.f32 %v2570_v62, %v9846_v4 }
 0x5b8   :  { %v2579_v14 = vmul.f32 %v2569_v27, %v9847_v56  ;;  %v2583_v61 = vmul.f32 %v2569_v27, %v9804_v19  ;;  %v2268_v23 = vmul.f32 %v7188_v1, %v9848_v45  ;;  %v2270_v37 = vmul.f32 %v7198_v32, %v9849_v24 }
 0x5b9   :  { %v2573_v11 = vadd.f32 %v2571_v10, %v2538_v2  ;;  %v2574_v18 = vadd.f32 %v2572_v40, %v2539_v6  ;;  %v2580_v59 = vmul.f32 %v2570_v62, %v9847_v56  ;;  %v2584_v35 = vmul.f32 %v2570_v62, %v9804_v19 }
 0x5ba   :  { %v2577_v44 = vadd.f32 %v2575_v12, %v2542_v55  ;;  %v2578_v28 = vadd.f32 %v2576_v63, %v2543_v3  ;;  %v2581_v33 = vadd.f32 %v2579_v14, %v2546_v31  ;;  %v2585_v4 = vadd.f32 %v2583_v61, %v2550_v54 }
 0x5bb   :  { %v2606_v5 = vmul.f32 %v2604_v8, %v9805_v50  ;;  %v2607_v27 = vmul.f32 %v2605_v48, %v9805_v50  ;;  %v2610_v51 = vmul.f32 %v2604_v8, %v9806_v49  ;;  %v2611_v43 = vmul.f32 %v2605_v48, %v9806_v49  ;;  %v9850_v50 = vld [vmem:[#allocation131_spill] sm:$0xff] }
 0x5bc   :  { %v2614_v42 = vmul.f32 %v2604_v8, %v9807_v30  ;;  %v2615_v6 = vmul.f32 %v2605_v48, %v9807_v30  ;;  %v2618_v2 = vmul.f32 %v2604_v8, %v9808_v26  ;;  %v2619_v62 = vmul.f32 %v2605_v48, %v9808_v26  ;;  %v9851_v8 = vld [vmem:[#allocation132_spill] sm:$0xff] }
 0x5bd   :  { %v2582_v55 = vadd.f32 %v2580_v59, %v2547_v13  ;;  %v2586_v3 = vadd.f32 %v2584_v35, %v2551_v29  ;;  %v2608_v31 = vadd.f32 %v2606_v5, %v2573_v11  ;;  %v2612_v54 = vadd.f32 %v2610_v51, %v2577_v44  ;;  %v9852_v51 = vld [vmem:[#allocation69_spill] sm:$0xff]  ;;  %v9855_v35 = vld [vmem:[#allocation76_spill] sm:$0xff] }
 0x5be   :  { %v2609_v10 = vadd.f32 %v2607_v27, %v2574_v18  ;;  %v2613_v40 = vadd.f32 %v2611_v43, %v2578_v28  ;;  %v2616_v12 = vadd.f32 %v2614_v42, %v2581_v33  ;;  %v2620_v63 = vadd.f32 %v2618_v2, %v2585_v4  ;;  %v2641_v42 = vpop.permute.xlu1 %2640  ;;  %v9853_v4 = vld [vmem:[#allocation75_spill] sm:$0xff]  ;;  %v9854_v18 = vld [vmem:[#allocation73_spill] sm:$0xff] }
 0x5bf   :  { %v2617_v14 = vadd.f32 %v2615_v6, %v2582_v55  ;;  %v2272_v61 = vadd.f32 %v2270_v37, %v2268_v23  ;;  %v2274_v49 = vmul.f32 %v7202_v0, %v9850_v50  ;;  %v2269_v30 = vmul.f32 %v7190_v21, %v9848_v45  ;;  %v2639_v37 = vpop.permute.xlu0 %2638  ;;  %v9856_v28 = vld [vmem:[#allocation77_spill] sm:$0xff]  ;;  %v9857_v2 = vld [vmem:[#allocation79_spill] sm:$0xff] }
 0x5c0   :  { %v2621_v19 = vadd.f32 %v2619_v62, %v2586_v3  ;;  %v2278_v48 = vmul.f32 %v7212_v47, %v9851_v8  ;;  %v2271_v5 = vmul.f32 %v7200_v57, %v9849_v24  ;;  %v2275_v13 = vmul.f32 %v7204_v15, %v9850_v50 }
 0x5c1   :  { %v2276_v29 = vadd.f32 %v2274_v49, %v2272_v61  ;;  %v2279_v43 = vmul.f32 %v7214_v22, %v9851_v8  ;;  %v2624_v33 = vadd.f32 %v9852_v51, %v2608_v31  ;;  %v2628_v23 = vadd.f32 %v9853_v4, %v2612_v54  ;;  %v9858_v31 = vld [vmem:[#allocation63_spill] sm:$0xff]  ;;  %v9859_v61 = vld [vmem:[#allocation72_spill] sm:$0xff] }
 0x5c2   :  { %v2273_v11 = vadd.f32 %v2271_v5, %v2269_v30  ;;  %v2632_v59 = vadd.f32 %v9854_v18, %v2616_v12  ;;  %v2636_v44 = vadd.f32 %v9855_v35, %v2620_v63  ;;  %v2625_v27 = vadd.f32 %v9856_v28, %v2609_v10  ;;  %v9860_v5 = vld [vmem:[#allocation84_spill] sm:$0xff]  ;;  %v9861_v63 = vld [vmem:[#allocation43_spill] sm:$0xff] }
 0x5c3   :  { %v2280_v6 = vadd.f32 %v2278_v48, %v2276_v29  ;;  %v2629_v62 = vadd.f32 %v9857_v2, %v2613_v40  ;;  %v2642_v49 = vsel %vm672_vm3, %v2639_v37, %v2641_v42  ;;  %v2643_v55 = vsel %vm672_vm3, %v2641_v42, %v2639_v37  ;;  %v9862_v48 = vld [vmem:[#allocation133_spill] sm:$0xff]  ;;  %v9863_v29 = vld [vmem:[#allocation134_spill] sm:$0xff]  ;;  %v9864_v4 = vld [vmem:[#allocation135_spill] sm:$0xff]  ;;  %v2674_v56 = vpop.permute.xlu0 %2673 }
 0x5c4   :  { %v2277_v3 = vadd.f32 %v2275_v13, %v2273_v11  ;;  %v2633_v54 = vadd.f32 %v9858_v31, %v2617_v14  ;;  %v2655_v30 = vmul.f32 %v9859_v61, %v2642_v49  ;;  %v2656_v12 = vmul.f32 %v9860_v5, %v2643_v55 }
 0x5c5   :  { %2282 = vrot.lane.b32.xlu0 %v2280_v6, %s9665_s15  ;;  %v2637_v10 = vadd.f32 %v9861_v63, %v2621_v19  ;;  %v2290_v40 = vmul.f32 %v7188_v1, %v9862_v48  ;;  %v2292_v51 = vmul.f32 %v7198_v32, %v9863_v29  ;;  %v2296_v42 = vmul.f32 %v7202_v0, %v9864_v4 }
 0x5c6   :  { %v2281_v13 = vadd.f32 %v2279_v43, %v2277_v3  ;;  %v2657_v14 = vmul.f32 %v2655_v30, %v9811_v36  ;;  %v2658_v37 = vmul.f32 %v2656_v12, %v9811_v36  ;;  %v2661_v11 = vmul.f32 %v2655_v30, %v9812_v52  ;;  %v9865_v43 = vld [vmem:[#allocation136_spill] sm:$0xff]  ;;  %v2676_v3 = vpop.permute.xlu1 %2675 }
 0x5c7   :  { %v2662_v18 = vmul.f32 %v2656_v12, %v9812_v52  ;;  %v2665_v19 = vmul.f32 %v2655_v30, %v9813_v20  ;;  %v2666_v35 = vmul.f32 %v2656_v12, %v9813_v20  ;;  %v2669_v28 = vmul.f32 %v2655_v30, %v9814_v25  ;;  %v2709_v5 = vpop.permute.xlu0 %2708 }
 0x5c8   :  { %2284 = vrot.lane.b32.xlu1 %v2281_v13, %s9665_s15  ;;  %v2659_v6 = vadd.f32 %v2657_v14, %v2624_v33  ;;  %v2670_v2 = vmul.f32 %v2656_v12, %v9814_v25  ;;  %v2300_v49 = vmul.f32 %v7212_v47, %v9865_v43  ;;  %v2291_v55 = vmul.f32 %v7190_v21, %v9862_v48  ;;  %v9871_v25 = vld [vmem:[#allocation140_spill] sm:$0xff] }
 0x5c9   :  { %v2660_v31 = vadd.f32 %v2658_v37, %v2625_v27  ;;  %v2663_v63 = vadd.f32 %v2661_v11, %v2628_v23  ;;  %v2664_v52 = vadd.f32 %v2662_v18, %v2629_v62  ;;  %v2667_v36 = vadd.f32 %v2665_v19, %v2632_v59  ;;  %v9866_v59 = vld [vmem:[#allocation85_spill] sm:$0xff]  ;;  %v9869_v11 = vld [vmem:[#allocation138_spill] sm:$0xff]  ;;  %v9870_v19 = vld [vmem:[#allocation139_spill] sm:$0xff] }
 0x5ca   :  { %v2668_v26 = vadd.f32 %v2666_v35, %v2633_v54  ;;  %v2671_v20 = vadd.f32 %v2669_v28, %v2636_v44  ;;  %v2294_v30 = vadd.f32 %v2292_v51, %v2290_v40  ;;  %v2293_v33 = vmul.f32 %v7200_v57, %v9863_v29  ;;  %v9867_v44 = vld [vmem:[#allocation89_spill] sm:$0xff] }
 0x5cb   :  { %v2672_v13 = vadd.f32 %v2670_v2, %v2637_v10  ;;  %v2297_v12 = vmul.f32 %v7204_v15, %v9864_v4  ;;  %v2677_v14 = vsel %vm712_vm4, %v2674_v56, %v2676_v3  ;;  %v2678_v27 = vsel %vm712_vm4, %v2676_v3, %v2674_v56  ;;  %v9868_v51 = vld [vmem:[#allocation137_spill] sm:$0xff] }
 0x5cc   :  { %v2298_v23 = vadd.f32 %v2296_v42, %v2294_v30  ;;  %v2295_v62 = vadd.f32 %v2293_v33, %v2291_v55  ;;  %v2690_v54 = vmul.f32 %v9866_v59, %v2677_v14  ;;  %v2691_v37 = vmul.f32 %v9867_v44, %v2678_v27 }
 0x5cd   :  { %v2301_v40 = vmul.f32 %v7214_v22, %v9865_v43  ;;  %v2314_v10 = vmul.f32 %v7188_v1, %v9868_v51  ;;  %v2316_v18 = vmul.f32 %v7198_v32, %v9869_v11  ;;  %v2320_v35 = vmul.f32 %v7202_v0, %v9870_v19 }
 0x5ce   :  { %v2302_v28 = vadd.f32 %v2300_v49, %v2298_v23  ;;  %v2299_v56 = vadd.f32 %v2297_v12, %v2295_v62  ;;  %v2692_v42 = vmul.f32 %v2690_v54, %v9815_v17  ;;  %v2693_v2 = vmul.f32 %v2691_v37, %v9815_v17  ;;  %v2711_v23 = vpop.permute.xlu1 %2710 }
 0x5cf   :  { %v2696_v55 = vmul.f32 %v2690_v54, %v9816_v38  ;;  %v2697_v3 = vmul.f32 %v2691_v37, %v9816_v38  ;;  %v2700_v30 = vmul.f32 %v2690_v54, %v9817_v16  ;;  %v2701_v33 = vmul.f32 %v2691_v37, %v9817_v16 }
 0x5d0   :  { %2304 = vrot.lane.b32.xlu0 %v2302_v28, %s9671_s19  ;;  %v2303_v14 = vadd.f32 %v2301_v40, %v2299_v56  ;;  %v2704_v27 = vmul.f32 %v2690_v54, %v9818_v60  ;;  %v2324_v49 = vmul.f32 %v7212_v47, %v9871_v25  ;;  %v2315_v12 = vmul.f32 %v7190_v21, %v9868_v51 }
 0x5d1   :  { %v2694_v62 = vadd.f32 %v2692_v42, %v2659_v6  ;;  %v2695_v17 = vadd.f32 %v2693_v2, %v2660_v31  ;;  %v2698_v44 = vadd.f32 %v2696_v55, %v2663_v63  ;;  %v2699_v38 = vadd.f32 %v2697_v3, %v2664_v52 }
 0x5d2   :  { %2306 = vrot.lane.b32.xlu1 %v2303_v14, %s9671_s19  ;;  %v2702_v59 = vadd.f32 %v2700_v30, %v2667_v36  ;;  %v2703_v16 = vadd.f32 %v2701_v33, %v2668_v26  ;;  %v2318_v28 = vadd.f32 %v2316_v18, %v2314_v10  ;;  %v2317_v54 = vmul.f32 %v7200_v57, %v9869_v11  ;;  %v9873_v18 = vld [vmem:[#allocation142_spill] sm:$0xff]  ;;  %v9874_v30 = vld [vmem:[#allocation95_spill] sm:$0xff] }
 0x5d3   :  { %v2705_v40 = vmul.f32 %v2691_v37, %v9818_v60  ;;  %v2706_v56 = vadd.f32 %v2704_v27, %v2671_v20  ;;  %v2712_v61 = vsel %vm752_vm5, %v2709_v5, %v2711_v23  ;;  %v2713_v6 = vsel %vm752_vm5, %v2711_v23, %v2709_v5  ;;  %v9872_v37 = vld [vmem:[#allocation141_spill] sm:$0xff] }
 0x5d4   :  { %v2322_v31 = vadd.f32 %v2320_v35, %v2318_v28  ;;  %v2319_v52 = vadd.f32 %v2317_v54, %v2315_v12  ;;  %v2321_v36 = vmul.f32 %v7204_v15, %v9870_v19  ;;  %v2725_v26 = vmul.f32 %v7106_v58, %v2712_v61  ;;  %v9885_v58 = vld [vmem:[#allocation111_spill] sm:$0xff] }
 0x5d5   :  { %v2325_v63 = vmul.f32 %v7214_v22, %v9871_v25  ;;  %v2726_v10 = vmul.f32 %v7109_v34, %v2713_v6  ;;  %v2338_v20 = vmul.f32 %v7188_v1, %v9872_v37  ;;  %v2340_v42 = vmul.f32 %v7198_v32, %v9873_v18 }
 0x5d6   :  { %v2326_v2 = vadd.f32 %v2324_v49, %v2322_v31  ;;  %v2323_v5 = vadd.f32 %v2321_v36, %v2319_v52  ;;  %v2727_v35 = vmul.f32 %v2725_v26, %v9819_v39  ;;  %v2731_v55 = vmul.f32 %v2725_v26, %v9820_v7  ;;  %v9875_v49 = vld [vmem:[#allocation143_spill] sm:$0xff]  ;;  %v2746_v36 = vpop.permute.xlu1 %2745 }
 0x5d7   :  { %v2728_v3 = vmul.f32 %v2726_v10, %v9819_v39  ;;  %v2732_v61 = vmul.f32 %v2726_v10, %v9820_v7  ;;  %v2735_v33 = vmul.f32 %v2725_v26, %v9874_v30  ;;  %v2736_v14 = vmul.f32 %v2726_v10, %v9874_v30 }
 0x5d8   :  { %v2707_v27 = vadd.f32 %v2705_v40, %v2672_v13  ;;  %2328 = vrot.lane.b32.xlu0 %v2326_v2, %s9676_s27  ;;  %v2327_v12 = vadd.f32 %v2325_v63, %v2323_v5  ;;  %v2739_v23 = vmul.f32 %v2725_v26, %v9822_v41  ;;  %v2344_v28 = vmul.f32 %v7202_v0, %v9875_v49  ;;  %v2744_v2 = vpop.permute.xlu0 %2743  ;;  %v9876_v63 = vld [vmem:[#allocation144_spill] sm:$0xff] }
 0x5d9   :  { %v2729_v54 = vadd.f32 %v2727_v35, %v2694_v62  ;;  %v2730_v6 = vadd.f32 %v2728_v3, %v2695_v17  ;;  %v2733_v31 = vadd.f32 %v2731_v55, %v2698_v44  ;;  %v2734_v52 = vadd.f32 %v2732_v61, %v2699_v38  ;;  %v9878_v3 = vld [vmem:[#allocation145_spill] sm:$0xff] }
 0x5da   :  { %2330 = vrot.lane.b32.xlu1 %v2327_v12, %s9676_s27  ;;  %v2737_v7 = vadd.f32 %v2735_v33, %v2702_v59  ;;  %v2738_v39 = vadd.f32 %v2736_v14, %v2703_v16  ;;  %v2740_v30 = vmul.f32 %v2726_v10, %v9822_v41  ;;  %v2342_v13 = vadd.f32 %v2340_v42, %v2338_v20  ;;  %v9877_v20 = vld [vmem:[#allocation97_spill] sm:$0xff]  ;;  %v9879_v33 = vld [vmem:[#allocation146_spill] sm:$0xff] }
 0x5db   :  { %v2741_v40 = vadd.f32 %v2739_v23, %v2706_v56  ;;  %v2348_v26 = vmul.f32 %v7212_v47, %v9876_v63  ;;  %v2339_v5 = vmul.f32 %v7190_v21, %v9872_v37  ;;  %v2341_v17 = vmul.f32 %v7200_v57, %v9873_v18  ;;  %v9880_v23 = vld [vmem:[#allocation99_spill] sm:$0xff] }
 0x5dc   :  { %v2346_v38 = vadd.f32 %v2344_v28, %v2342_v13  ;;  %v2345_v44 = vmul.f32 %v7204_v15, %v9875_v49  ;;  %v2747_v16 = vsel %vm792_vm6, %v2744_v2, %v2746_v36  ;;  %v2748_v59 = vsel %vm792_vm6, %v2746_v36, %v2744_v2  ;;  %v9881_v13 = vld [vmem:[#allocation100_spill] sm:$0xff] }
 0x5dd   :  { %v2343_v62 = vadd.f32 %v2341_v17, %v2339_v5  ;;  %v2349_v56 = vmul.f32 %v7214_v22, %v9876_v63  ;;  %v2760_v10 = vmul.f32 %v7193_v9, %v2747_v16  ;;  %v2761_v42 = vmul.f32 %v9877_v20, %v2748_v59  ;;  %v9882_v17 = vld [vmem:[#allocation102_spill] sm:$0xff] }
 0x5de   :  { %v2742_v35 = vadd.f32 %v2740_v30, %v2707_v27  ;;  %v2350_v55 = vadd.f32 %v2348_v26, %v2346_v38  ;;  %v2378_v61 = vmul.f32 %v7188_v1, %v9878_v3  ;;  %v2380_v14 = vmul.f32 %v7198_v32, %v9879_v33  ;;  %v9883_v26 = vld [vmem:[#allocation103_spill] sm:$0xff]  ;;  %v9884_v9 = vld [vmem:[#allocation110_spill] sm:$0xff] }
 0x5df   :  { %v2347_v12 = vadd.f32 %v2345_v44, %v2343_v62  ;;  %v2762_v28 = vmul.f32 %v2760_v10, %v9880_v23  ;;  %v2763_v36 = vmul.f32 %v2761_v42, %v9880_v23  ;;  %v2766_v2 = vmul.f32 %v2760_v10, %v9881_v13 }
 0x5e0   :  { %2352 = vrot.lane.b32.xlu0 %v2350_v55, %s9680_s14  ;;  %v2767_v5 = vmul.f32 %v2761_v42, %v9881_v13  ;;  %v2770_v30 = vmul.f32 %v2760_v10, %v9882_v17  ;;  %v2771_v27 = vmul.f32 %v2761_v42, %v9882_v17  ;;  %v2774_v38 = vmul.f32 %v2760_v10, %v9883_v26  ;;  %v9888_v10 = vld [vmem:[#allocation147_spill] sm:$0xff] }
 0x5e1   :  { %v2351_v16 = vadd.f32 %v2349_v56, %v2347_v12  ;;  %v2764_v59 = vadd.f32 %v2762_v28, %v2729_v54  ;;  %v2765_v41 = vadd.f32 %v2763_v36, %v2730_v6  ;;  %v2768_v44 = vadd.f32 %v2766_v2, %v2733_v31  ;;  %v9886_v54 = vld [vmem:[#allocation112_spill] sm:$0xff] }
 0x5e2   :  { %v2769_v62 = vadd.f32 %v2767_v5, %v2734_v52  ;;  %v2772_v60 = vadd.f32 %v2770_v30, %v2737_v7  ;;  %v2773_v20 = vadd.f32 %v2771_v27, %v2738_v39  ;;  %v2775_v23 = vmul.f32 %v2761_v42, %v9883_v26  ;;  %v9887_v39 = vld [vmem:[#allocation114_spill] sm:$0xff]  ;;  %v9889_v42 = vld [vmem:[#allocation148_spill] sm:$0xff] }
 0x5e3   :  { %2354 = vrot.lane.b32.xlu1 %v2351_v16, %s9680_s14  ;;  %v2776_v55 = vadd.f32 %v2774_v38, %v2741_v40  ;;  %v2778_v13 = vadd.f32 %v2764_v59, %v9884_v9  ;;  %v2779_v34 = vadd.f32 %v2765_v41, %v9884_v9  ;;  %v2782_v17 = vadd.f32 %v2768_v44, %v9885_v58  ;;  %v9892_v59 = vld [vmem:[#allocation151_spill] sm:$0xff] }
 0x5e4   :  { %v2777_v53 = vadd.f32 %v2775_v23, %v2742_v35  ;;  %v2783_v56 = vadd.f32 %v2769_v62, %v9885_v58  ;;  %v2786_v6 = vadd.f32 %v2772_v60, %v9886_v54  ;;  %v2787_v31 = vadd.f32 %v2773_v20, %v9886_v54 }
 0x5e5   :  { %v7408_v7 = vmax.f32 %v2778_v13, 0.0  ;;  %v2790_v52 = vadd.f32 %v2776_v55, %v9887_v39  ;;  %v2384_v40 = vmul.f32 %v7202_v0, %v9888_v10  ;;  %v2388_v12 = vmul.f32 %v7212_v47, %v9889_v42 }
 0x5e6   :  { %v7415_v41 = vmax.f32 %v2779_v34, 0.0  ;;  %v7417_v28 = vmax.f32 %v2782_v17, 0.0  ;;  %v7419_v35 = vmax.f32 %v2783_v56, 0.0  ;;  %v2791_v60 = vadd.f32 %v2777_v53, %v9887_v39  ;;  %v9890_v17 = vld [vmem:[#allocation149_spill] sm:$0xff]  ;;  %v9895_v39 = vld [vmem:[#allocation154_spill] sm:$0xff] }
 0x5e7   :  { %v7422_v23 = vmax.f32 %v2786_v6, 0.0  ;;  %v2382_v20 = vadd.f32 %v2380_v14, %v2378_v61  ;;  %v2379_v36 = vmul.f32 %v7190_v21, %v9878_v3  ;;  %v2381_v13 = vmul.f32 %v7200_v57, %v9879_v33  ;;  %v9891_v14 = vld [vmem:[#allocation150_spill] sm:$0xff] }
 0x5e8   :  { %v7428_v2 = vmax.f32 %v2787_v31, 0.0  ;;  %v7430_v5 = vmax.f32 %v2790_v52, 0.0  ;;  %v7432_v34 = vmax.f32 %v2791_v60, 0.0  ;;  %v2402_v30 = vmul.f32 %v7188_v1, %v9890_v17  ;;  %v9893_v52 = vld [vmem:[#allocation152_spill] sm:$0xff] }
 0x5e9   :  { %v2386_v27 = vadd.f32 %v2384_v40, %v2382_v20  ;;  %v2383_v53 = vadd.f32 %v2381_v13, %v2379_v36  ;;  %v2385_v61 = vmul.f32 %v7204_v15, %v9888_v10  ;;  %v2404_v38 = vmul.f32 %v7198_v32, %v9891_v14  ;;  %v9894_v36 = vld [vmem:[#allocation153_spill] sm:$0xff] }
 0x5ea   :  { %v2389_v16 = vmul.f32 %v7214_v22, %v9889_v42  ;;  %v2408_v44 = vmul.f32 %v7202_v0, %v9892_v59  ;;  %v2403_v62 = vmul.f32 %v7190_v21, %v9890_v17  ;;  %v2405_v55 = vmul.f32 %v7200_v57, %v9891_v14 }
 0x5eb   :  { %v2390_v56 = vadd.f32 %v2388_v12, %v2386_v27  ;;  %v2387_v6 = vadd.f32 %v2385_v61, %v2383_v53  ;;  %v2406_v31 = vadd.f32 %v2404_v38, %v2402_v30  ;;  %v2412_v40 = vmul.f32 %v7212_v47, %v9893_v52  ;;  %v9896_v61 = vld [vmem:[#allocation155_spill] sm:$0xff] }
 0x5ec   :  { %v2407_v60 = vadd.f32 %v2405_v55, %v2403_v62  ;;  %v2409_v20 = vmul.f32 %v7204_v15, %v9892_v59  ;;  %v2426_v13 = vmul.f32 %v7188_v1, %v9894_v36  ;;  %v2428_v54 = vmul.f32 %v7198_v32, %v9895_v39 }
 0x5ed   :  { %2392 = vrot.lane.b32.xlu0 %v2390_v56, %s9686_s17  ;;  %v2391_v58 = vadd.f32 %v2389_v16, %v2387_v6  ;;  %v2410_v9 = vadd.f32 %v2408_v44, %v2406_v31  ;;  %v2413_v12 = vmul.f32 %v7214_v22, %v9893_v52  ;;  %v2427_v30 = vmul.f32 %v7190_v21, %v9894_v36  ;;  %v9897_v56 = vld [vmem:[#allocation156_spill] sm:$0xff]  ;;  %v9898_v44 = vld [vmem:[#allocation157_spill] sm:$0xff]  ;;  %v9899_v31 = vld [vmem:[#allocation158_spill] sm:$0xff] }
 0x5ee   :  { %v2411_v27 = vadd.f32 %v2409_v20, %v2407_v60  ;;  %v2430_v53 = vadd.f32 %v2428_v54, %v2426_v13  ;;  %v2432_v38 = vmul.f32 %v7202_v0, %v9896_v61  ;;  %v2429_v62 = vmul.f32 %v7200_v57, %v9895_v39 }
 0x5ef   :  { %2394 = vrot.lane.b32.xlu1 %v2391_v58, %s9686_s17  ;;  %v2414_v55 = vadd.f32 %v2412_v40, %v2410_v9  ;;  %v2436_v16 = vmul.f32 %v7212_v47, %v9897_v56  ;;  %v2450_v6 = vmul.f32 %v7188_v1, %v9898_v44  ;;  %v2452_v26 = vmul.f32 %v7198_v32, %v9899_v31  ;;  %v9900_v58 = vld [vmem:[#allocation159_spill] sm:$0xff] }
 0x5f0   :  { %v2415_v60 = vadd.f32 %v2413_v12, %v2411_v27  ;;  %v2434_v54 = vadd.f32 %v2432_v38, %v2430_v53  ;;  %v2431_v20 = vadd.f32 %v2429_v62, %v2427_v30  ;;  %v2433_v13 = vmul.f32 %v7204_v15, %v9896_v61 }
 0x5f1   :  { %2416 = vrot.lane.b32.xlu0 %v2414_v55, %s9690_s2  ;;  %v2454_v46 = vadd.f32 %v2452_v26, %v2450_v6  ;;  %v2456_v9 = vmul.f32 %v7202_v0, %v9900_v58  ;;  %v2451_v40 = vmul.f32 %v7190_v21, %v9898_v44  ;;  %v2453_v1 = vmul.f32 %v7200_v57, %v9899_v31  ;;  %v9901_v55 = vld [vmem:[#allocation160_spill] sm:$0xff] }
 0x5f2   :  { %v2438_v52 = vadd.f32 %v2436_v16, %v2434_v54  ;;  %v2435_v32 = vadd.f32 %v2433_v13, %v2431_v20  ;;  %v2437_v12 = vmul.f32 %v7214_v22, %v9897_v56  ;;  %v2457_v30 = vmul.f32 %v7204_v15, %v9900_v58 }
 0x5f3   :  { %2418 = vrot.lane.b32.xlu1 %v2415_v60, %s9690_s2  ;;  %v2458_v26 = vadd.f32 %v2456_v9, %v2454_v46  ;;  %v2455_v27 = vadd.f32 %v2453_v1, %v2451_v40  ;;  %v2794_v53 = vmul.f32 %v7408_v7, %v9848_v45  ;;  %v2796_v38 = vmul.f32 %v7417_v28, %v9849_v24 }
 0x5f4   :  { %v2439_v62 = vadd.f32 %v2437_v12, %v2435_v32  ;;  %v2460_v16 = vmul.f32 %v7212_v47, %v9901_v55  ;;  %v2461_v6 = vmul.f32 %v7214_v22, %v9901_v55  ;;  %v2795_v54 = vmul.f32 %v7415_v41, %v9848_v45 }
 0x5f5   :  { %2440 = vrot.lane.b32.xlu0 %v2438_v52, %s9691_s22  ;;  %v2459_v46 = vadd.f32 %v2457_v30, %v2455_v27  ;;  %v2798_v1 = vadd.f32 %v2796_v38, %v2794_v53  ;;  %v2800_v60 = vmul.f32 %v7422_v23, %v9850_v50  ;;  %v2797_v20 = vmul.f32 %v7419_v35, %v9849_v24 }
 0x5f6   :  { %v2462_v32 = vadd.f32 %v2460_v16, %v2458_v26  ;;  %v2804_v13 = vmul.f32 %v7430_v5, %v9851_v8  ;;  %v2816_v9 = vmul.f32 %v7408_v7, %v9862_v48  ;;  %v2818_v40 = vmul.f32 %v7417_v28, %v9863_v29 }
 0x5f7   :  { %2442 = vrot.lane.b32.xlu1 %v2439_v62, %s9691_s22  ;;  %v2802_v52 = vadd.f32 %v2800_v60, %v2798_v1  ;;  %v2799_v12 = vadd.f32 %v2797_v20, %v2795_v54  ;;  %v2801_v30 = vmul.f32 %v7428_v2, %v9850_v50  ;;  %v2805_v27 = vmul.f32 %v7432_v34, %v9851_v8 }
 0x5f8   :  { %v2820_v26 = vadd.f32 %v2818_v40, %v2816_v9  ;;  %v2822_v53 = vmul.f32 %v7422_v23, %v9864_v4  ;;  %v2817_v38 = vmul.f32 %v7415_v41, %v9862_v48  ;;  %v2819_v16 = vmul.f32 %v7419_v35, %v9863_v29  ;;  %v9998_v29 = vld [vmem:[#allocation47_spill] sm:$0xff] }
 0x5f9   :  { %2464 = vrot.lane.b32.xlu0 %v2462_v32, %s9692_s0  ;;  %v2463_v62 = vadd.f32 %v2461_v6, %v2459_v46  ;;  %v2806_v54 = vadd.f32 %v2804_v13, %v2802_v52  ;;  %v2803_v1 = vadd.f32 %v2801_v30, %v2799_v12  ;;  %v2823_v60 = vmul.f32 %v7428_v2, %v9864_v4 }
 0x5fa   :  { %v2824_v20 = vadd.f32 %v2822_v53, %v2820_v26  ;;  %v2821_v8 = vadd.f32 %v2819_v16, %v2817_v38  ;;  %v2840_v9 = vmul.f32 %v7408_v7, %v9868_v51  ;;  %v2842_v40 = vmul.f32 %v7417_v28, %v9869_v11 }
 0x5fb   :  { %2466 = vrot.lane.b32.xlu1 %v2463_v62, %s9692_s0  ;;  %v2807_v48 = vadd.f32 %v2805_v27, %v2803_v1  ;;  %v2826_v32 = vmul.f32 %v7430_v5, %v9865_v43  ;;  %v2841_v6 = vmul.f32 %v7415_v41, %v9868_v51  ;;  %v2846_v52 = vmul.f32 %v7422_v23, %v9870_v19 }
 0x5fc   :  { %v2825_v46 = vadd.f32 %v2823_v60, %v2821_v8  ;;  %v2844_v13 = vadd.f32 %v2842_v40, %v2840_v9  ;;  %v2843_v12 = vmul.f32 %v7419_v35, %v9869_v11  ;;  %v2864_v30 = vmul.f32 %v7408_v7, %v9872_v37  ;;  %v9996_v11 = vld [vmem:[#allocation105_spill] sm:$0xff] }
 0x5fd   :  { %2808 = vrot.lane.b32.xlu0 %v2806_v54, %s9665_s15  ;;  %v2866_v27 = vmul.f32 %v7417_v28, %v9873_v18  ;;  %v2828_v26 = vadd.f32 %v2826_v32, %v2824_v20  ;;  %v2827_v53 = vmul.f32 %v7432_v34, %v9865_v43  ;;  %v2847_v16 = vmul.f32 %v7428_v2, %v9870_v19 }
 0x5fe   :  { %v2848_v8 = vadd.f32 %v2846_v52, %v2844_v13  ;;  %v2845_v38 = vadd.f32 %v2843_v12, %v2841_v6  ;;  %v2865_v54 = vmul.f32 %v7415_v41, %v9872_v37  ;;  %v2867_v1 = vmul.f32 %v7419_v35, %v9873_v18 }
 0x5ff   :  { %2810 = vrot.lane.b32.xlu1 %v2807_v48, %s9665_s15  ;;  %v2868_v62 = vadd.f32 %v2866_v27, %v2864_v30  ;;  %v2829_v60 = vadd.f32 %v2827_v53, %v2825_v46  ;;  %v2850_v20 = vmul.f32 %v7430_v5, %v9871_v25  ;;  %v2870_v9 = vmul.f32 %v7422_v23, %v9875_v49 }
 0x600   :  { %v2849_v48 = vadd.f32 %v2847_v16, %v2845_v38  ;;  %v2869_v40 = vadd.f32 %v2867_v1, %v2865_v54  ;;  %v2904_v32 = vmul.f32 %v7408_v7, %v9878_v3  ;;  %v2906_v6 = vmul.f32 %v7417_v28, %v9879_v33 }
 0x601   :  { %2830 = vrot.lane.b32.xlu0 %v2828_v26, %s9671_s19  ;;  %v2852_v13 = vadd.f32 %v2850_v20, %v2848_v8  ;;  %v2851_v46 = vmul.f32 %v7432_v34, %v9871_v25  ;;  %v2905_v52 = vmul.f32 %v7415_v41, %v9878_v3  ;;  %v2872_v12 = vadd.f32 %v2870_v9, %v2868_v62 }
 0x602   :  { %v2871_v30 = vmul.f32 %v7428_v2, %v9875_v49  ;;  %v2908_v27 = vadd.f32 %v2906_v6, %v2904_v32  ;;  %v2907_v26 = vmul.f32 %v7419_v35, %v9879_v33  ;;  %v2910_v53 = vmul.f32 %v7422_v23, %v9888_v10 }
 0x603   :  { %2832 = vrot.lane.b32.xlu1 %v2829_v60, %s9671_s19  ;;  %v2928_v8 = vmul.f32 %v7408_v7, %v9890_v17  ;;  %v2930_v38 = vmul.f32 %v7417_v28, %v9891_v14  ;;  %v2853_v16 = vadd.f32 %v2851_v46, %v2849_v48  ;;  %v2874_v62 = vmul.f32 %v7430_v5, %v9876_v63  ;;  %v4764_v60 = vld [vmem:[%s9697_s18 + $0x78] sm:$0xff]  }
 0x604   :  { %v2873_v54 = vadd.f32 %v2871_v30, %v2869_v40  ;;  %v2909_v1 = vadd.f32 %v2907_v26, %v2905_v52  ;;  %v2912_v20 = vadd.f32 %v2910_v53, %v2908_v27  ;;  %v2911_v9 = vmul.f32 %v7428_v2, %v9888_v10  ;;  %v4765_v48 = vld [vmem:[%s9697_s18 + $0x38] sm:$0xff]   ;;  %4650 = vmatprep.subr.bf16.mxu0 %v4764_v60 }
 0x605   :  { %2854 = vrot.lane.b32.xlu0 %v2852_v13, %s9676_s27  ;;  %v2929_v32 = vmul.f32 %v7415_v41, %v9890_v17  ;;  %v2931_v6 = vmul.f32 %v7419_v35, %v9891_v14  ;;  %v2876_v40 = vadd.f32 %v2874_v62, %v2872_v12  ;;  %v2875_v13 = vmul.f32 %v7432_v34, %v9876_v63 }
 0x606   :  { %v2932_v46 = vadd.f32 %v2930_v38, %v2928_v8  ;;  %v2914_v52 = vmul.f32 %v7430_v5, %v9889_v42  ;;  %v2913_v30 = vadd.f32 %v2911_v9, %v2909_v1  ;;  %v2952_v27 = vmul.f32 %v7408_v7, %v9894_v36  ;;  %v4766_v38 = vld [vmem:[%s9697_s18 + $0x70] sm:$0xff]   ;;  %4651 = vmatpush3.bf16.msra.mxu0 %v4765_v48 }
 0x607   :  { %2856 = vrot.lane.b32.xlu1 %v2853_v16, %s9676_s27  ;;  %v2954_v26 = vmul.f32 %v7417_v28, %v9895_v39  ;;  %v2877_v53 = vadd.f32 %v2875_v13, %v2873_v54  ;;  %v2934_v12 = vmul.f32 %v7422_v23, %v9892_v59  ;;  %v2933_v16 = vadd.f32 %v2931_v6, %v2929_v32  ;;  %v4767_v9 = vld [vmem:[%s9697_s18 + $0x30] sm:$0xff]  }
 0x608   :  { %v2953_v8 = vmul.f32 %v7415_v41, %v9894_v36  ;;  %v2916_v62 = vadd.f32 %v2914_v52, %v2912_v20  ;;  %v2915_v1 = vmul.f32 %v7432_v34, %v9889_v42  ;;  %v2935_v60 = vmul.f32 %v7428_v2, %v9892_v59  ;;  %v9902_v52 = vld [vmem:[#allocation152_spill] sm:$0xff]  ;;  %4652 = vmatprep.subr.bf16.mxu0 %v4766_v38  ;;  %v9914_v42 = vld [vmem:[#allocation167_spill] sm:$0xff] }
 0x609   :  { %2878 = vrot.lane.b32.xlu0 %v2876_v40, %s9680_s14  ;;  %v2955_v54 = vmul.f32 %v7419_v35, %v9895_v39  ;;  %v2936_v32 = vadd.f32 %v2934_v12, %v2932_v46  ;;  %v2956_v6 = vadd.f32 %v2954_v26, %v2952_v27  ;;  %v2976_v20 = vmul.f32 %v7408_v7, %v9898_v44 }
 0x60a   :  { %v2978_v40 = vmul.f32 %v7417_v28, %v9899_v31  ;;  %v2917_v13 = vadd.f32 %v2915_v1, %v2913_v30  ;;  %v2938_v36 = vmul.f32 %v7430_v5, %v9902_v52  ;;  %v2937_v48 = vadd.f32 %v2935_v60, %v2933_v16  ;;  %v4768_v30 = vld [vmem:[%s9697_s18 + $0x68] sm:$0xff]   ;;  %4653 = vmatpush3.bf16.msra.mxu0 %v4767_v9 }
 0x60b   :  { %2880 = vrot.lane.b32.xlu1 %v2877_v53, %s9680_s14  ;;  %v2957_v39 = vadd.f32 %v2955_v54, %v2953_v8  ;;  %v2958_v53 = vmul.f32 %v7422_v23, %v9896_v61  ;;  %v2977_v46 = vmul.f32 %v7415_v41, %v9898_v44  ;;  %v2979_v27 = vmul.f32 %v7419_v35, %v9899_v31  ;;  %v4769_v16 = vld [vmem:[%s9697_s18 + $0x28] sm:$0xff]  }
 0x60c   :  { %v2959_v26 = vmul.f32 %v7428_v2, %v9896_v61  ;;  %v2980_v12 = vadd.f32 %v2978_v40, %v2976_v20  ;;  %v2940_v8 = vadd.f32 %v2938_v36, %v2936_v32  ;;  %v2939_v38 = vmul.f32 %v7432_v34, %v9902_v52  ;;  %4654 = vmatprep.subr.bf16.mxu0 %v4768_v30  ;;  %v9912_v52 = vld [vmem:[#allocation163_spill] sm:$0xff] }
 0x60d   :  { %2918 = vrot.lane.b32.xlu0 %v2916_v62, %s9686_s17  ;;  %v2960_v62 = vadd.f32 %v2958_v53, %v2956_v6  ;;  %v2982_v60 = vmul.f32 %v7422_v23, %v9900_v58  ;;  %v2981_v54 = vadd.f32 %v2979_v27, %v2977_v46  ;;  %v2962_v20 = vmul.f32 %v7430_v5, %v9897_v56  ;;  %v9903_v6 = vld [vmem:[#allocation59_spill] sm:$0xff]  ;;  %v9904_v53 = vld [vmem:[#allocation60_spill] sm:$0xff] }
 0x60e   :  { %v2961_v1 = vadd.f32 %v2959_v26, %v2957_v39  ;;  %v2941_v9 = vadd.f32 %v2939_v38, %v2937_v48  ;;  %v2963_v40 = vmul.f32 %v7432_v34, %v9897_v56  ;;  %v2983_v32 = vmul.f32 %v7428_v2, %v9900_v58  ;;  %4655 = vmatpush3.bf16.msra.mxu0 %v4769_v16  ;;  %v9911_v56 = vld [vmem:[#allocation166_spill] sm:$0xff] }
 0x60f   :  { %2920 = vrot.lane.b32.xlu1 %v2917_v13, %s9686_s17  ;;  %v2984_v36 = vadd.f32 %v2982_v60, %v2980_v12  ;;  %v2888_v39 = vmul.f32 %v7408_v7, %v9903_v6  ;;  %v2964_v13 = vadd.f32 %v2962_v20, %v2960_v62  ;;  %v2889_v48 = vmul.f32 %v7415_v41, %v9903_v6  ;;  %v4772_v62 = vld [vmem:[%s9697_s18 + $0x58] sm:$0xff]  }
 0x610   :  { %v2890_v46 = vmul.f32 %v7417_v28, %v9904_v53  ;;  %v2891_v27 = vmul.f32 %v7419_v35, %v9904_v53  ;;  %v2965_v30 = vadd.f32 %v2963_v40, %v2961_v1  ;;  %v2986_v26 = vmul.f32 %v7430_v5, %v9901_v55  ;;  %v4770_v28 = vld [vmem:[%s9697_s18 + $0x60] sm:$0xff]   ;;  %v4773_v40 = vld [vmem:[%s9697_s18 + $0x18] sm:$0xff]  }
 0x611   :  { %2942 = vrot.lane.b32.xlu0 %v2940_v8, %s9690_s2  ;;  %v2985_v12 = vadd.f32 %v2983_v32, %v2981_v54  ;;  %v9905_v8 = vld [vmem:[#allocation61_spill] sm:$0xff]  ;;  %v4771_v35 = vld [vmem:[%s9697_s18 + $0x20] sm:$0xff]   ;;  %v2987_v60 = vmul.f32 %v7432_v34, %v9901_v55  ;;  %4656 = vmatprep.subr.bf16.mxu0 %v4770_v28  ;;  %v2365_v58 = vmul.f32 %v7200_v57, %v9904_v53 }
 0x612   :  { %v2892_v7 = vadd.f32 %v2890_v46, %v2888_v39  ;;  %v2893_v16 = vadd.f32 %v2891_v27, %v2889_v48  ;;  %v2894_v38 = vmul.f32 %v7422_v23, %v9905_v8  ;;  %v2895_v41 = vmul.f32 %v7428_v2, %v9905_v8  ;;  %v9906_v23 = vld [vmem:[#allocation64_spill] sm:$0xff]  ;;  %4657 = vmatpush3.bf16.msra.mxu0 %v4771_v35  ;;  %v4775_v46 = vld [vmem:[%s9697_s18 + $0x10] sm:$0xff]  }
 0x613   :  { %2944 = vrot.lane.b32.xlu1 %v2941_v9, %s9690_s2  ;;  %v2988_v1 = vadd.f32 %v2986_v26, %v2984_v36  ;;  %v2898_v54 = vmul.f32 %v7430_v5, %v9906_v23  ;;  %v2899_v20 = vmul.f32 %v7432_v34, %v9906_v23  ;;  %v2989_v36 = vadd.f32 %v2987_v60, %v2985_v12  ;;  %v4774_v5 = vld [vmem:[%s9697_s18 + $0x50] sm:$0xff]   ;;  %v4785_v48 = vld [vmem:[%s9703_s3 + $0x64] ss:$8 sps:$4 sm:$0xff]   ;;  %v4789_v28 = vld [vmem:[%s9703_s3 + $0x40] ss:$8 sps:$4 sm:$0xff]  }
 0x614   :  { %v2896_v2 = vadd.f32 %v2894_v38, %v2892_v7  ;;  %v2897_v9 = vadd.f32 %v2895_v41, %v2893_v16  ;;  %4658 = vmatprep.subr.bf16.mxu0 %v4772_v62  ;;  %v4780_v34 = vld [vmem:[%s9703_s3 + $0x70] ss:$8 sps:$4 sm:$0xff]   ;;  %v4776_v27 = vld [vmem:[%s9697_s18 + $0x48] sm:$0xff]   ;;  %v4788_v26 = vld [vmem:[%s9703_s3 + $0x54] ss:$8 sps:$4 sm:$0xff]  }
 0x615   :  { %2966 = vrot.lane.b32.xlu0 %v2964_v13, %s9691_s22  ;;  %v4782_v13 = vld [vmem:[%s9703_s3 + $0x74] ss:$8 sps:$4 sm:$0xff]   ;;  %v4777_v12 = vld [vmem:[%s9697_s18 + $0x8] sm:$0xff]   ;;  %v4778_v7 = vld [vmem:[%s9697_s18 + $0x40] sm:$0xff]  }
 0x616   :  { %v7683_v32 = vadd.f32 %v2898_v54, %v2896_v2  ;;  %v7685_v39 = vadd.f32 %v2899_v20, %v2897_v9  ;;  %4659 = vmatpush3.bf16.msra.mxu0 %v4773_v40  ;;  %3282 = vmatprep.subr.bf16.mxu1 %v4782_v13  ;;  %v4786_v16 = vld [vmem:[%s9703_s3 + $0x50] ss:$8 sps:$4 sm:$0xff]   ;;  %v4791_v38 = vld [vmem:[%s9703_s3 + $0x44] ss:$8 sps:$4 sm:$0xff]   ;;  %v4794_v35 = vld [vmem:[%s9703_s3 + $0x34] ss:$8 sps:$4 sm:$0xff]  }
 0x617   :  { %2968 = vrot.lane.b32.xlu1 %v2965_v30, %s9691_s22  ;;  %4660 = vmatprep.subr.bf16.mxu0 %v4774_v5  ;;  %v4783_v30 = vld [vmem:[%s9703_s3 + $0x60] ss:$8 sps:$4 sm:$0xff]   ;;  %v4792_v62 = vld [vmem:[%s9703_s3 + $0x30] ss:$8 sps:$4 sm:$0xff]  }
 0x618   :  { %3283 = vmatpush1.bf16.msra.mxu1 %v4780_v34  ;;  %v4779_v41 = vld [vmem:[%s9697_s18] sm:$0xff]  }
 0x619   :  { %2990 = vrot.lane.b32.xlu0 %v2988_v1, %s9692_s0  ;;  %3284 = vmatprep.subr.bf16.mxu1 %v4785_v48 }
 0x61a   :  { %4661 = vmatpush3.bf16.msra.mxu0 %v4775_v46 }
 0x61b   :  { %2992 = vrot.lane.b32.xlu1 %v2989_v36, %s9692_s0  ;;  %4662 = vmatprep.subr.bf16.mxu0 %v4776_v27 }
 0x61c   :  { %3285 = vmatpush1.bf16.msra.mxu1 %v4783_v30 }
 0x61d   :  { %3286 = vmatprep.subr.bf16.mxu1 %v4788_v26 }
 0x61e   :  { %4663 = vmatpush3.bf16.msra.mxu0 %v4777_v12  ;;  %v9907_v12 = vld [vmem:[#allocation122_spill] sm:$0xff] }
 0x61f   :  { %4664 = vmatprep.subr.bf16.mxu0 %v4778_v7  ;;  %v2362_v7 = vmul.f32 %v9907_v12, %v9903_v6 }
 0x620   :  { %3287 = vmatpush1.bf16.msra.mxu1 %v4786_v16  ;;  %v2363_v16 = vmul.f32 %v7190_v21, %v9903_v6 }
 0x621   :  { %3288 = vmatprep.subr.bf16.mxu1 %v4791_v38 }
 0x622   :  { %4665 = vmatpush3.bf16.msra.mxu0 %v4779_v41  ;;  %v2367_v17 = vadd.f32 %v2365_v58, %v2363_v16 }
 0x624   :  { %3289 = vmatpush1.bf16.msra.mxu1 %v4789_v28 }
 0x625   :  { %3290 = vmatprep.subr.bf16.mxu1 %v4794_v35 }
 0x628   :  { %3291 = vmatpush1.bf16.msra.mxu1 %v4792_v62  ;;  %v9909_v62 = vld [vmem:[#allocation123_spill] sm:$0xff] }
 0x629   :  { %v2364_v55 = vmul.f32 %v9909_v62, %v9904_v53  ;;  %v9913_v53 = vld [vmem:[#allocation164_spill] sm:$0xff] }
 0x62b   :  { %v2366_v14 = vadd.f32 %v2364_v55, %v2362_v7  ;;  %v9916_v55 = vld [vmem:[#allocation80_spill] sm:$0xff] }
 0x637   :  { %v2283_v1 = vpop.permute.xlu0 %2282 }
 0x63a   :  { %v2285_v60 = vpop.permute.xlu1 %2284 }
 0x63b   :  { %v2286_v31 = vsel %vm500_vm7, %v2283_v1, %v2285_v60  ;;  %v2287_v12 = vsel %vm500_vm7, %v2285_v60, %v2283_v1  ;;  %v9915_v60 = vld [vmem:[#allocation168_spill] sm:$0xff] }
 0x63c   :  { %v2288_v57 = vmul.f32 %v2287_v12, %v9912_v52  ;;  %v2289_v59 = vmul.f32 %v2286_v31, %v9913_v53  ;;  %v2368_v52 = vmul.f32 %v7202_v0, %v9905_v8  ;;  %v2369_v31 = vmul.f32 %v7204_v15, %v9905_v8 }
 0x63e   :  { %v2371_v16 = vadd.f32 %v2369_v31, %v2367_v17  ;;  %v9918_v17 = vld [vmem:[#allocation113_spill] sm:$0xff] }
 0x642   :  { %v2305_v54 = vpop.permute.xlu0 %2304 }
 0x644   :  { %v2307_v2 = vpop.permute.xlu1 %2306 }
 0x645   :  { %v2308_v28 = vsel %vm532_vm0, %v2305_v54, %v2307_v2  ;;  %v2309_v35 = vsel %vm532_vm0, %v2307_v2, %v2305_v54  ;;  %v9910_v54 = vld [vmem:[#allocation165_spill] sm:$0xff] }
 0x646   :  { %v2310_v2 = vmul.f32 %v2309_v35, %v9910_v54  ;;  %v2311_v62 = vmul.f32 %v2308_v28, %v9911_v56  ;;  %v9919_v54 = vld [vmem:[#allocation117_spill] sm:$0xff] }
 0x648   :  { %v2312_v35 = vadd.f32 %v2310_v2, %v2288_v57  ;;  %v2313_v56 = vadd.f32 %v2311_v62, %v2289_v59  ;;  %v2370_v59 = vadd.f32 %v2368_v52, %v2366_v14 }
 0x64a   :  { %v2329_v9 = vpop.permute.xlu0 %2328 }
 0x64c   :  { %v2331_v20 = vpop.permute.xlu1 %2330 }
 0x64d   :  { %v2332_v6 = vsel %vm572_vm1, %v2329_v9, %v2331_v20  ;;  %v2333_v44 = vsel %vm572_vm1, %v2331_v20, %v2329_v9 }
 0x64e   :  { %v2334_v1 = vmul.f32 %v2333_v44, %v9914_v42  ;;  %v2335_v10 = vmul.f32 %v2332_v6, %v9915_v60  ;;  %v9917_v44 = vld [vmem:[#allocation81_spill] sm:$0xff]  ;;  %v9920_v60 = vld [vmem:[#allocation116_spill] sm:$0xff] }
 0x650   :  { %v2337_v7 = vadd.f32 %v2335_v10, %v2313_v56  ;;  %v2373_v10 = vmul.f32 %v7214_v22, %v9906_v23  ;;  %v9923_v22 = vld [vmem:[#allocation119_spill] sm:$0xff] }
 0x652   :  { %v2353_v40 = vpop.permute.xlu0 %2352 }
 0x655   :  { %v2355_v36 = vpop.permute.xlu1 %2354 }
 0x656   :  { %v2356_v33 = vsel %vm612_vm2, %v2353_v40, %v2355_v36  ;;  %v2357_v9 = vsel %vm612_vm2, %v2355_v36, %v2353_v40  ;;  %v2336_v36 = vadd.f32 %v2334_v1, %v2312_v35  ;;  %v9922_v35 = vld [vmem:[#allocation118_spill] sm:$0xff] }
 0x657   :  { %v2358_v42 = vmul.f32 %v2357_v9, %v9916_v55  ;;  %v2359_v6 = vmul.f32 %v2356_v33, %v9917_v44  ;;  %v2375_v55 = vadd.f32 %v2373_v10, %v2371_v16 }
 0x659   :  { %v2360_v57 = vadd.f32 %v2358_v42, %v2336_v36  ;;  %v2361_v1 = vadd.f32 %v2359_v6, %v2337_v7 }
 0x65f   :  { %v2393_v5 = vpop.permute.xlu0 %2392 }
 0x661   :  { %v2395_v34 = vpop.permute.xlu1 %2394 }
 0x663   :  { %v7736_v13 = vpop.permute.xlu0 %2416 }
 0x665   :  { %v7738_v48 = vpop.permute.xlu1 %2418 }
 0x666   :  { %v2420_v16 = vsel %vm712_vm4, %v7736_v13, %v7738_v48 }
 0x667   :  { %v7740_v46 = vpop.permute.xlu0 %2440 }
 0x669   :  { %v7742_v27 = vpop.permute.xlu1 %2442 }
 0x66b   :  { %v7744_v30 = vpop.permute.xlu0 %2464 }
 0x66d   :  { %v7746_v26 = vpop.permute.xlu1 %2466 }
 0x66f   :  { %v2809_v38 = vpop.permute.xlu0 %2808 }
 0x671   :  { %v2811_v21 = vpop.permute.xlu1 %2810 }
 0x672   :  { %v2812_v0 = vsel %vm500_vm7, %v2809_v38, %v2811_v21  ;;  %v2813_v15 = vsel %vm500_vm7, %v2811_v21, %v2809_v38  ;;  %v2396_v38 = vsel %vm672_vm3, %v2393_v5, %v2395_v34  ;;  %v2397_v21 = vsel %vm672_vm3, %v2395_v34, %v2393_v5  ;;  %v9924_v5 = vld [vmem:[#allocation120_spill] sm:$0xff] }
 0x673   :  { %v2831_v61 = vpop.permute.xlu0 %2830  ;;  %v2814_v9 = vmul.f32 %v2813_v15, %v9920_v60  ;;  %v9926_v15 = vld [vmem:[#allocation46_spill] sm:$0xff]  ;;  %v9929_v60 = vld [vmem:[#allocation51_spill] sm:$0xff] }
 0x675   :  { %v2833_v20 = vpop.permute.xlu1 %2832 }
 0x676   :  { %v2834_v53 = vsel %vm532_vm0, %v2831_v61, %v2833_v20  ;;  %v2835_v40 = vsel %vm532_vm0, %v2833_v20, %v2831_v61  ;;  %v2372_v61 = vmul.f32 %v7212_v47, %v9906_v23  ;;  %v9921_v20 = vld [vmem:[#allocation109_spill] sm:$0xff] }
 0x677   :  { %v2855_v58 = vpop.permute.xlu0 %2854  ;;  %v2836_v14 = vmul.f32 %v2835_v40, %v9918_v17  ;;  %v2837_v2 = vmul.f32 %v2834_v53, %v9919_v54  ;;  %v2815_v47 = vmul.f32 %v2812_v0, %v9921_v20  ;;  %v9925_v40 = vld [vmem:[#allocation71_spill] sm:$0xff]  ;;  %v2377_v0 = vadd.f32 %v2375_v55, %v2361_v1 }
 0x678   :  { %v2444_v54 = vsel %vm752_vm5, %v7740_v46, %v7742_v27 }
 0x679   :  { %v2857_v28 = vpop.permute.xlu1 %2856  ;;  %v2838_v6 = vadd.f32 %v2836_v14, %v2814_v9  ;;  %v2839_v53 = vadd.f32 %v2837_v2, %v2815_v47  ;;  %v2445_v2 = vsel %vm752_vm5, %v7742_v27, %v7740_v46  ;;  %v2468_v27 = vsel %vm792_vm6, %v7744_v30, %v7746_v26 }
 0x67a   :  { %v2858_v33 = vsel %vm572_vm1, %v2855_v58, %v2857_v28  ;;  %v2859_v12 = vsel %vm572_vm1, %v2857_v28, %v2855_v58  ;;  %v2374_v58 = vadd.f32 %v2372_v61, %v2370_v59  ;;  %v2421_v61 = vsel %vm712_vm4, %v7738_v48, %v7736_v13 }
 0x67b   :  { %v2879_v62 = vpop.permute.xlu0 %2878  ;;  %v2860_v56 = vmul.f32 %v2859_v12, %v9922_v35  ;;  %v2861_v52 = vmul.f32 %v2858_v33, %v9923_v22  ;;  %v2398_v33 = vmul.f32 %v2396_v38, %v9926_v15  ;;  %v9927_v12 = vld [vmem:[#allocation101_spill] sm:$0xff]  ;;  %v9928_v38 = vld [vmem:[#allocation104_spill] sm:$0xff]  ;;  %v2423_v13 = vmul.f32 %v2421_v61, %v9929_v60 }
 0x67c   :  { %v2376_v28 = vadd.f32 %v2374_v58, %v2360_v57  ;;  %v2399_v59 = vmul.f32 %v2397_v21, %v9927_v12  ;;  %v2422_v21 = vmul.f32 %v2420_v16, %v9928_v38  ;;  %v9930_v35 = vld [vmem:[#allocation52_spill] sm:$0xff]  ;;  %v9931_v22 = vld [vmem:[#allocation57_spill] sm:$0xff] }
 0x67d   :  { %v2881_v31 = vpop.permute.xlu1 %2880  ;;  %v2862_v10 = vadd.f32 %v2860_v56, %v2838_v6  ;;  %v2863_v17 = vadd.f32 %v2861_v52, %v2839_v53  ;;  %v2446_v56 = vmul.f32 %v2444_v54, %v9930_v35  ;;  %v2447_v52 = vmul.f32 %v2445_v2, %v9931_v22  ;;  %v9932_v6 = vld [vmem:[#allocation72_spill] sm:$0xff]  ;;  %v9936_v15 = vld [vmem:[#allocation85_spill] sm:$0xff] }
 0x67e   :  { %v2882_v42 = vsel %vm612_vm2, %v2879_v62, %v2881_v31  ;;  %v2883_v44 = vsel %vm612_vm2, %v2881_v31, %v2879_v62  ;;  %v2400_v20 = vadd.f32 %v2398_v33, %v2376_v28  ;;  %v2401_v47 = vadd.f32 %v2399_v59, %v2377_v0  ;;  %v9934_v28 = vld [vmem:[#allocation58_spill] sm:$0xff]  ;;  %v9937_v12 = vld [vmem:[#allocation89_spill] sm:$0xff]  ;;  %v9938_v54 = vld [vmem:[#allocation92_spill] sm:$0xff] }
 0x67f   :  { %v2884_v34 = vmul.f32 %v2883_v44, %v9924_v5  ;;  %v2885_v36 = vmul.f32 %v2882_v42, %v9925_v40  ;;  %v2919_v7 = vpop.permute.xlu0 %2918  ;;  %v2469_v31 = vsel %vm792_vm6, %v7746_v26, %v7744_v30  ;;  %v9933_v5 = vld [vmem:[#allocation84_spill] sm:$0xff]  ;;  %v2470_v0 = vmul.f32 %v2468_v27, %v9934_v28  ;;  %v9935_v30 = vld [vmem:[#allocation115_spill] sm:$0xff]  ;;  %v9942_v27 = vld [vmem:[#allocation65_spill] sm:$0xff] }
 0x680   :  { %v2471_v26 = vmul.f32 %v2469_v31, %v9935_v30  ;;  %v9946_v28 = vld [vmem:[#allocation162_spill] sm:$0xff] }
 0x681   :  { %v2921_v14 = vpop.permute.xlu1 %2920  ;;  %v2886_v62 = vadd.f32 %v2884_v34, %v2862_v10  ;;  %v2887_v57 = vadd.f32 %v2885_v36, %v2863_v17  ;;  %v2424_v36 = vadd.f32 %v2422_v21, %v2400_v20 }
 0x682   :  { %v2922_v48 = vsel %vm672_vm3, %v2919_v7, %v2921_v14  ;;  %v2923_v9 = vsel %vm672_vm3, %v2921_v14, %v2919_v7  ;;  %v2425_v7 = vadd.f32 %v2423_v13, %v2401_v47 }
 0x683   :  { %v2943_v1 = vpop.permute.xlu0 %2942  ;;  %v2902_v42 = vadd.f32 %v7683_v32, %v2886_v62  ;;  %v2903_v44 = vadd.f32 %v7685_v39, %v2887_v57  ;;  %v2924_v53 = vmul.f32 %v2922_v48, %v9932_v6  ;;  %v2925_v34 = vmul.f32 %v2923_v9, %v9933_v5  ;;  %v9939_v62 = vld [vmem:[#allocation121_spill] sm:$0xff] }
 0x684   :  { %v2448_v61 = vadd.f32 %v2446_v56, %v2424_v36  ;;  %v2449_v32 = vadd.f32 %v2447_v52, %v2425_v7  ;;  %v9940_v56 = vld [vmem:[#allocation96_spill] sm:$0xff]  ;;  %v9941_v52 = vld [vmem:[#allocation97_spill] sm:$0xff] }
 0x685   :  { %v2945_v46 = vpop.permute.xlu1 %2944  ;;  %v2926_v17 = vadd.f32 %v2924_v53, %v2902_v42  ;;  %v2927_v14 = vadd.f32 %v2925_v34, %v2903_v44  ;;  %v9943_v53 = vld [vmem:[#allocation67_spill] sm:$0xff]  ;;  %v9944_v34 = vld [vmem:[#allocation68_spill] sm:$0xff]  ;;  %v9945_v36 = vld [vmem:[#allocation161_spill] sm:$0xff] }
 0x686   :  { %v2946_v58 = vsel %vm712_vm4, %v2943_v1, %v2945_v46  ;;  %v2947_v55 = vsel %vm712_vm4, %v2945_v46, %v2943_v1  ;;  %v2472_v38 = vadd.f32 %v2470_v0, %v2448_v61  ;;  %v2473_v21 = vadd.f32 %v2471_v26, %v2449_v32  ;;  %v4803_v61 = vld [vmem:[%s9703_s3 + $0x4] ss:$8 sps:$4 sm:$0xff]  }
 0x687   :  { %v2967_v40 = vpop.permute.xlu0 %2966  ;;  %v2948_v33 = vmul.f32 %v2946_v58, %v9936_v15  ;;  %v2949_v59 = vmul.f32 %v2947_v55, %v9937_v12  ;;  %v4795_v15 = vld [vmem:[%s9703_s3 + $0x20] ss:$8 sps:$4 sm:$0xff]   ;;  %v4798_v12 = vld [vmem:[%s9703_s3 + $0x10] ss:$8 sps:$4 sm:$0xff]  }
 0x688   :  { %v2474_v31 = vadd.f32 %v2472_v38, %v9942_v27  ;;  %v2475_v58 = vadd.f32 %v2473_v21, %v9942_v27 }
 0x689   :  { %v2969_v16 = vpop.permute.xlu1 %2968  ;;  %v2950_v60 = vadd.f32 %v2948_v33, %v2926_v17  ;;  %v2951_v13 = vadd.f32 %v2949_v59, %v2927_v14  ;;  %v4797_v33 = vld [vmem:[%s9703_s3 + $0x24] ss:$8 sps:$4 sm:$0xff]   ;;  %v4800_v59 = vld [vmem:[%s9703_s3 + $0x14] ss:$8 sps:$4 sm:$0xff]  }
 0x68a   :  { %v2970_v39 = vsel %vm752_vm5, %v2967_v40, %v2969_v16  ;;  %v2971_v10 = vsel %vm752_vm5, %v2969_v16, %v2967_v40  ;;  %v2476_v5 = vadd.f32 %v2474_v31, %v9943_v53  ;;  %v2477_v40 = vadd.f32 %v2475_v58, %v9944_v34  ;;  %3292 = vmatprep.subr.bf16.mxu1 %v4797_v33  ;;  %v4801_v16 = vld [vmem:[%s9703_s3] ss:$8 sps:$4 sm:$0xff]  }
 0x68b   :  { %v2972_v2 = vmul.f32 %v2970_v39, %v9938_v54  ;;  %v2973_v57 = vmul.f32 %v2971_v10, %v9939_v62  ;;  %v2991_v1 = vpop.permute.xlu0 %2990  ;;  %3293 = vmatpush1.bf16.msra.mxu1 %v4795_v15  ;;  %v3339_v58 = vld [vmem:[%s8924_s8] ss:$8 sm:$0x3]  ;;  %v4594_v15 = vld [vmem:[%s8924_s8 + $0x3] ss:$8 sm:$0x3] }
 0x68c   :  { %3294 = vmatprep.subr.bf16.mxu1 %v4800_v59  ;;  %v9956_v53 = vld [vmem:[#allocation38_spill] sm:$0xff]  ;;  %v9964_v33 = vld [vmem:[#allocation44_spill] sm:$0xff]  ;;  %v9965_v59 = vld [vmem:[#allocation45_spill] sm:$0xff] }
 0x68d   :  { %v2993_v48 = vpop.permute.xlu1 %2992  ;;  %v2974_v47 = vadd.f32 %v2972_v2, %v2950_v60  ;;  %v2975_v35 = vadd.f32 %v2973_v57, %v2951_v13  ;;  %v9947_v2 = vld [vmem:[#allocation12_spill] sm:$0xff]  ;;  %v9948_v57 = vld [vmem:[#allocation13_spill] sm:$0xff]  ;;  %v9949_v60 = vld [vmem:[#allocation14_spill] sm:$0xff] }
 0x68e   :  { %v2994_v9 = vsel %vm792_vm6, %v2991_v1, %v2993_v48  ;;  %v2995_v20 = vsel %vm792_vm6, %v2993_v48, %v2991_v1 }
 0x68f   :  { %v2996_v22 = vmul.f32 %v2994_v9, %v9940_v56  ;;  %v2997_v46 = vmul.f32 %v2995_v20, %v9941_v52  ;;  %3295 = vmatpush1.bf16.msra.mxu1 %v4798_v12 }
 0x690   :  { %3296 = vmatprep.subr.bf16.mxu1 %v4803_v61 }
 0x691   :  { %v2998_v55 = vadd.f32 %v2996_v22, %v2974_v47  ;;  %v2999_v42 = vadd.f32 %v2997_v46, %v2975_v35 }
 0x693   :  { %v3000_v44 = vadd.f32 %v2998_v55, %v9942_v27  ;;  %v3001_v6 = vadd.f32 %v2999_v42, %v9942_v27  ;;  %3297 = vmatpush1.bf16.msra.mxu1 %v4801_v16  ;;  %v4592_v55 = vld [vmem:[%s8924_s8 + $0x1] ss:$8 sm:$0x3]  ;;  %v4593_v42 = vld [vmem:[%s8924_s8 + $0x2] ss:$8 sm:$0x3] }
 0x695   :  { %v3002_v7 = vadd.f32 %v3000_v44, %v9945_v36  ;;  %v3003_v0 = vadd.f32 %v3001_v6, %v9946_v28  ;;  %v9954_v44 = vld [vmem:[#allocation37_spill] sm:$0xff]  ;;  %v9962_v28 = vld [vmem:[#allocation40_spill] sm:$0xff] }
 0x696   :  { %v7988_v6 = vrot.slane %v3339_v58, %v9954_v44  ;;  %v7994_v34 = vrot.slane %v4592_v55, %v9954_v44  ;;  %v8000_v36 = vrot.slane %v4593_v42, %v9954_v44 }
 0x697   :  { %v3011_v30 = vpack.c.bf16 %v3003_v0, %v2477_v40  ;;  %v3010_v26 = vpack.c.bf16 %v3002_v7, %v2476_v5 }
 0x698   :  { %9955 = vst [vmem:[#allocation130_spill] sm:$0xff] %v7988_v6  ;;  %9958 = vst [vmem:[#allocation16_spill] sm:$0xff] %v7994_v34 }
 0x699   :  { %3172 = vmatprep.mubr.bf16.mxu0 %v3011_v30  ;;  %9960 = vst [vmem:[#allocation18_spill] sm:$0xff] %v8000_v36  ;;  %v9963_v30 = vld [vmem:[#allocation41_spill] sm:$0xff] }
 0x69a   :  { %3173 = vmatmul.mubr.bf16.vlgmr.msra.gmra.mxu0 %v3010_v26 }
 0x75a   :  { %v4666_v32 = vpop.f32.mrf.mxu0 }
 0x75c   :  { %v4667_v39 = vpop.f32.mrf.mxu0 }
 0x75d   :  { %v4668_v17 = vadd.f32 %v4667_v39, %v4666_v32 }
 0x75e   :  { %v4669_v10 = vpop.f32.mrf.mxu0 }
 0x75f   :  { %v3183_v62 = vsub.f32 %v9947_v2, %v4668_v17 }
 0x760   :  { %v4670_v14 = vpop.f32.mrf.mxu0 }
 0x761   :  { %v4671_v54 = vadd.f32 %v4670_v14, %v4669_v10  ;;  %v4595_v10 = vld [vmem:[%s8924_s8 + $0x4] ss:$8 sm:$0x3] }
 0x763   :  { %v3184_v1 = vsub.f32 %v9948_v57, %v4671_v54  ;;  %v4597_v57 = vld [vmem:[%s8924_s8 + $0x6] ss:$8 sm:$0x3] }
 0x765   :  { %v3185_v38 = vpack.c.bf16 %v3184_v1, %v3183_v62  ;;  %v4596_v62 = vld [vmem:[%s8924_s8 + $0x5] ss:$8 sm:$0x3] }
 0x767   :  { %3315 = vmatmul.mubr.bf16.vlgmr.msra.gmra.mxu1 %v3185_v38 }
 0x827   :  { %v3316_v21 = vpop.f32.mrf.mxu1 }
 0x828   :  { %v3325_v13 = vmul.f32 %v3316_v21, %v9949_v60 }
 0x829   :  { %v3318_v48 = vpop.f32.mrf.mxu1 }
 0x82a   :  { %v7903_v9 = vadd.f32 %v3325_v13, %v2476_v5  ;;  %v3326_v20 = vmul.f32 %v3318_v48, %v9949_v60  ;;  %v7991_v5 = vrot.slane %v3339_v58, %v9956_v53  ;;  %v8074_v48 = vrot.slane %v4594_v15, %v9954_v44 }
 0x82b   :  { %v3320_v35 = vpop.f32.mrf.mxu1 }
 0x82c   :  { %9950 = vst [vmem:[#allocation124_spill] sm:$0xff] %v7903_v9  ;;  %v7906_v47 = vadd.f32 %v3326_v20, %v2477_v40  ;;  %3347 = vrot.lane.b32.xlu0 %v7903_v9, %s9665_s15  ;;  %v3327_v22 = vmul.f32 %v3320_v35, %v9949_v60  ;;  %9957 = vst [vmem:[#allocation15_spill] sm:$0xff] %v7991_v5  ;;  %v7997_v40 = vrot.slane %v4592_v55, %v9956_v53  ;;  %v4598_v35 = vld [vmem:[%s8924_s8 + $0x7] ss:$8 sm:$0x3] }
 0x82d   :  { %v3322_v56 = vpop.f32.mrf.mxu1  ;;  %v8011_v26 = vmul.f32 %v7903_v9, %v9963_v30  ;;  %v8018_v12 = vmul.f32 %v7903_v9, %v9964_v33  ;;  %v8022_v16 = vmul.f32 %v7903_v9, %v9965_v59  ;;  %9972 = vst [vmem:[#allocation43_spill] sm:$0xff] %v8074_v48  ;;  %v8077_v20 = vrot.slane %v4594_v15, %v9956_v53 }
 0x82e   :  { %9951 = vst [vmem:[#allocation126_spill] sm:$0xff] %v7906_v47  ;;  %3349 = vrot.lane.b32.xlu1 %v7906_v47, %s9665_s15  ;;  %v3328_v52 = vmul.f32 %v3322_v56, %v9949_v60  ;;  %v7940_v46 = vadd.f32 %v3327_v22, %v3002_v7  ;;  %9959 = vst [vmem:[#allocation17_spill] sm:$0xff] %v7997_v40  ;;  %v8003_v7 = vrot.slane %v4593_v42, %v9956_v53  ;;  %v3865_v56 = vld [vmem:[%s8924_s8] ss:$8 sm:$0x3] }
 0x82f   :  { %v8026_v61 = vmul.f32 %v7906_v47, %v9962_v28  ;;  %v8030_v32 = vmul.f32 %v7906_v47, %v9963_v30  ;;  %v8037_v17 = vmul.f32 %v7906_v47, %v9964_v33  ;;  %v8041_v14 = vmul.f32 %v7906_v47, %v9965_v59  ;;  %9973 = vst [vmem:[#allocation122_spill] sm:$0xff] %v8077_v20 }
 0x830   :  { %3374 = vrot.lane.b32.xlu0 %v7903_v9, %s9671_s19  ;;  %9952 = vst [vmem:[#allocation127_spill] sm:$0xff] %v7940_v46  ;;  %v7944_v31 = vadd.f32 %v3328_v52, %v3003_v0  ;;  %9961 = vst [vmem:[#allocation69_spill] sm:$0xff] %v8003_v7  ;;  %v8007_v0 = vmul.f32 %v7903_v9, %v9962_v28  ;;  %v8045_v54 = vmul.f32 %v7940_v46, %v9962_v28 }
 0x831   :  { %v8049_v2 = vmul.f32 %v7940_v46, %v9963_v30  ;;  %v8059_v1 = vmul.f32 %v7940_v46, %v9964_v33  ;;  %v8063_v38 = vmul.f32 %v7940_v46, %v9965_v59  ;;  %v8098_v42 = vrot.slane %v4595_v10, %v9954_v44 }
 0x832   :  { %3376 = vrot.lane.b32.xlu1 %v7906_v47, %s9671_s19  ;;  %9953 = vst [vmem:[#allocation128_spill] sm:$0xff] %v7944_v31  ;;  %9966 = vst [vmem:[#allocation75_spill] sm:$0xff] %v8045_v54  ;;  %v8067_v21 = vmul.f32 %v7944_v31, %v9962_v28  ;;  %v8071_v60 = vmul.f32 %v7944_v31, %v9963_v30  ;;  %v8087_v22 = vmul.f32 %v7944_v31, %v9964_v33  ;;  %v4599_v30 = vld [vmem:[%s8924_s8 + $0x1] ss:$8 sm:$0x3] }
 0x833   :  { %9967 = vst [vmem:[#allocation73_spill] sm:$0xff] %v8049_v2  ;;  %9968 = vst [vmem:[#allocation76_spill] sm:$0xff] %v8059_v1  ;;  %v8091_v52 = vmul.f32 %v7944_v31, %v9965_v59  ;;  %v8101_v28 = vrot.slane %v4595_v10, %v9956_v53  ;;  %v8107_v33 = vrot.slane %v4596_v62, %v9954_v44  ;;  %v4600_v10 = vld [vmem:[%s8924_s8 + $0x2] ss:$8 sm:$0x3]  ;;  %v10003_v2 = vld [vmem:[#allocation50_spill] sm:$0xff] }
 0x834   :  { %3409 = vrot.lane.b32.xlu0 %v7903_v9, %s9676_s27  ;;  %9969 = vst [vmem:[#allocation77_spill] sm:$0xff] %v8063_v38  ;;  %9970 = vst [vmem:[#allocation79_spill] sm:$0xff] %v8067_v21  ;;  %v8110_v59 = vrot.slane %v4596_v62, %v9956_v53  ;;  %v8128_v62 = vrot.slane %v4598_v35, %v9956_v53  ;;  %v8142_v3 = vrot.slane %v4599_v30, %v9954_v44  ;;  %v10002_v21 = vld [vmem:[#allocation108_spill] sm:$0xff] }
 0x835   :  { %9971 = vst [vmem:[#allocation63_spill] sm:$0xff] %v8071_v60  ;;  %9974 = vst [vmem:[#allocation123_spill] sm:$0xff] %v8087_v22  ;;  %v8151_v63 = vrot.slane %v4600_v10, %v9954_v44  ;;  %v8154_v49 = vrot.slane %v4600_v10, %v9956_v53 }
 0x836   :  { %3411 = vrot.lane.b32.xlu1 %v7906_v47, %s9676_s27  ;;  %9975 = vst [vmem:[#allocation165_spill] sm:$0xff] %v8091_v52  ;;  %9976 = vst [vmem:[#allocation166_spill] sm:$0xff] %v8098_v42 }
 0x837   :  { %9977 = vst [vmem:[#allocation163_spill] sm:$0xff] %v8101_v28  ;;  %9978 = vst [vmem:[#allocation164_spill] sm:$0xff] %v8107_v33 }
 0x838   :  { %3444 = vrot.lane.b32.xlu0 %v7903_v9, %s9680_s14  ;;  %9979 = vst [vmem:[#allocation167_spill] sm:$0xff] %v8110_v59  ;;  %9983 = vst [vmem:[#allocation113_spill] sm:$0xff] %v8128_v62 }
 0x839   :  { %9986 = vst [vmem:[#allocation109_spill] sm:$0xff] %v8142_v3  ;;  %9988 = vst [vmem:[#allocation119_spill] sm:$0xff] %v8151_v63 }
 0x83a   :  { %3446 = vrot.lane.b32.xlu1 %v7906_v47, %s9680_s14  ;;  %9989 = vst [vmem:[#allocation120_spill] sm:$0xff] %v8154_v49 }
 0x83c   :  { %3495 = vrot.lane.b32.xlu0 %v7903_v9, %s9686_s17 }
 0x83e   :  { %3497 = vrot.lane.b32.xlu1 %v7906_v47, %s9686_s17 }
 0x840   :  { %3530 = vrot.lane.b32.xlu0 %v7903_v9, %s9690_s2 }
 0x842   :  { %3532 = vrot.lane.b32.xlu1 %v7906_v47, %s9690_s2 }
 0x844   :  { %3565 = vrot.lane.b32.xlu0 %v7903_v9, %s9691_s22 }
 0x846   :  { %3567 = vrot.lane.b32.xlu1 %v7906_v47, %s9691_s22 }
 0x848   :  { %3600 = vrot.lane.b32.xlu0 %v7903_v9, %s9692_s0  ;;  %v4602_v9 = vld [vmem:[%s8924_s8 + $0x4] ss:$8 sm:$0x3] }
 0x849   :  { %v8167_v18 = vrot.slane %v4602_v9, %v9954_v44  ;;  %v8170_v37 = vrot.slane %v4602_v9, %v9956_v53 }
 0x84a   :  { %3602 = vrot.lane.b32.xlu1 %v7906_v47, %s9692_s0  ;;  %v8131_v47 = vrot.slane %v3865_v56, %v9954_v44 }
 0x84b   :  { %9992 = vst [vmem:[#allocation101_spill] sm:$0xff] %v8167_v18  ;;  %9993 = vst [vmem:[#allocation104_spill] sm:$0xff] %v8170_v37  ;;  %v10001_v37 = vld [vmem:[#allocation49_spill] sm:$0xff] }
 0x84c   :  { %3873 = vrot.lane.b32.xlu0 %v7940_v46, %s9665_s15  ;;  %9984 = vst [vmem:[#allocation117_spill] sm:$0xff] %v8131_v47 }
 0x84e   :  { %3875 = vrot.lane.b32.xlu1 %v7944_v31, %s9665_s15 }
 0x850   :  { %3900 = vrot.lane.b32.xlu0 %v7940_v46, %s9671_s19 }
 0x852   :  { %3902 = vrot.lane.b32.xlu1 %v7944_v31, %s9671_s19 }
 0x854   :  { %3935 = vrot.lane.b32.xlu0 %v7940_v46, %s9676_s27 }
 0x856   :  { %3937 = vrot.lane.b32.xlu1 %v7944_v31, %s9676_s27 }
 0x858   :  { %3970 = vrot.lane.b32.xlu0 %v7940_v46, %s9680_s14 }
 0x85a   :  { %3972 = vrot.lane.b32.xlu1 %v7944_v31, %s9680_s14 }
 0x85c   :  { %4021 = vrot.lane.b32.xlu0 %v7940_v46, %s9686_s17 }
 0x85e   :  { %4023 = vrot.lane.b32.xlu1 %v7944_v31, %s9686_s17 }
 0x860   :  { %4056 = vrot.lane.b32.xlu0 %v7940_v46, %s9690_s2 }
 0x862   :  { %4058 = vrot.lane.b32.xlu1 %v7944_v31, %s9690_s2 }
 0x864   :  { %4091 = vrot.lane.b32.xlu0 %v7940_v46, %s9691_s22 }
 0x866   :  { %4093 = vrot.lane.b32.xlu1 %v7944_v31, %s9691_s22 }
 0x868   :  { %4126 = vrot.lane.b32.xlu0 %v7940_v46, %s9692_s0  ;;  %v8125_v46 = vrot.slane %v4598_v35, %v9954_v44  ;;  %v8145_v35 = vrot.slane %v4599_v30, %v9956_v53 }
 0x86a   :  { %4128 = vrot.lane.b32.xlu1 %v7944_v31, %s9692_s0  ;;  %v8113_v31 = vrot.slane %v4597_v57, %v9954_v44  ;;  %9982 = vst [vmem:[#allocation81_spill] sm:$0xff] %v8125_v46  ;;  %9987 = vst [vmem:[#allocation118_spill] sm:$0xff] %v8145_v35 }
 0x86c   :  { %9980 = vst [vmem:[#allocation168_spill] sm:$0xff] %v8113_v31 }
 0x89e   :  { %v3348_v39 = vpop.permute.xlu0 %3347 }
 0x8a0   :  { %v3350_v13 = vpop.permute.xlu1 %3349 }
 0x8a1   :  { %v3351_v58 = vsel %vm500_vm7, %v3348_v39, %v3350_v13  ;;  %v3352_v55 = vsel %vm500_vm7, %v3350_v13, %v3348_v39  ;;  %v8116_v39 = vrot.slane %v4597_v57, %v9956_v53  ;;  %v4601_v13 = vld [vmem:[%s8924_s8 + $0x3] ss:$8 sm:$0x3]  ;;  %v8134_v57 = vrot.slane %v3865_v56, %v9956_v53  ;;  %v4603_v56 = vld [vmem:[%s8924_s8 + $0x5] ss:$8 sm:$0x3] }
 0x8a2   :  { %v3375_v15 = vpop.permute.xlu0 %3374  ;;  %v3364_v27 = vmul.f32 %v7988_v6, %v3352_v55  ;;  %v3365_v23 = vmul.f32 %v7991_v5, %v3351_v58  ;;  %v8157_v55 = vrot.slane %v4601_v13, %v9954_v44  ;;  %v8160_v58 = vrot.slane %v4601_v13, %v9956_v53 }
 0x8a3   :  { %9981 = vst [vmem:[#allocation80_spill] sm:$0xff] %v8116_v39  ;;  %9985 = vst [vmem:[#allocation116_spill] sm:$0xff] %v8134_v57  ;;  %v8175_v13 = vrot.slane %v4603_v56, %v9954_v44  ;;  %v8178_v19 = vrot.slane %v4603_v56, %v9956_v53 }
 0x8a4   :  { %v3377_v8 = vpop.permute.xlu1 %3376  ;;  %9990 = vst [vmem:[#allocation71_spill] sm:$0xff] %v8157_v55  ;;  %9991 = vst [vmem:[#allocation46_spill] sm:$0xff] %v8160_v58  ;;  %v3366_v51 = vmul.f32 %v3364_v27, %v9996_v11  ;;  %v3372_v38 = vmul.f32 %v3364_v27, %v10002_v21  ;;  %v3373_v1 = vmul.f32 %v3365_v23, %v10002_v21 }
 0x8a5   :  { %v3378_v30 = vsel %vm532_vm0, %v3375_v15, %v3377_v8  ;;  %v3379_v5 = vsel %vm532_vm0, %v3377_v8, %v3375_v15  ;;  %9994 = vst [vmem:[#allocation51_spill] sm:$0xff] %v8175_v13  ;;  %9995 = vst [vmem:[#allocation52_spill] sm:$0xff] %v8178_v19  ;;  %v3367_v8 = vmul.f32 %v3365_v23, %v9996_v11  ;;  %v9997_v15 = vld [vmem:[#allocation106_spill] sm:$0xff]  ;;  %v10000_v13 = vld [vmem:[#allocation107_spill] sm:$0xff] }
 0x8a6   :  { %v3410_v6 = vpop.permute.xlu0 %3409  ;;  %v3391_v10 = vmul.f32 %v7994_v34, %v3379_v5  ;;  %v3392_v25 = vmul.f32 %v7997_v40, %v3378_v30  ;;  %v3368_v43 = vmul.f32 %v3364_v27, %v9997_v15  ;;  %v3369_v4 = vmul.f32 %v3365_v23, %v9997_v15  ;;  %v9999_v30 = vld [vmem:[#allocation48_spill] sm:$0xff] }
 0x8a7   :  { %v3370_v56 = vmul.f32 %v3364_v27, %v10000_v13  ;;  %v3371_v19 = vmul.f32 %v3365_v23, %v10000_v13  ;;  %v10010_v13 = vld [vmem:[#allocation70_spill] sm:$0xff] }
 0x8a8   :  { %v3412_v9 = vpop.permute.xlu1 %3411  ;;  %v3393_v52 = vmul.f32 %v3391_v10, %v9998_v29  ;;  %v3394_v5 = vmul.f32 %v3392_v25, %v9998_v29  ;;  %v3397_v40 = vmul.f32 %v3391_v10, %v9999_v30  ;;  %v3398_v34 = vmul.f32 %v3392_v25, %v9999_v30  ;;  %v10009_v30 = vld [vmem:[#allocation66_spill] sm:$0xff] }
 0x8a9   :  { %v3401_v18 = vmul.f32 %v3391_v10, %v10001_v37  ;;  %v3402_v22 = vmul.f32 %v3392_v25, %v10001_v37  ;;  %v3405_v54 = vmul.f32 %v3391_v10, %v10003_v2  ;;  %v3406_v50 = vmul.f32 %v3392_v25, %v10003_v2 }
 0x8aa   :  { %v3445_v60 = vpop.permute.xlu0 %3444  ;;  %v3395_v24 = vadd.f32 %v3393_v52, %v3366_v51  ;;  %v3396_v45 = vadd.f32 %v3394_v5, %v3367_v8  ;;  %v3399_v58 = vadd.f32 %v3397_v40, %v3368_v43  ;;  %v3400_v55 = vadd.f32 %v3398_v34, %v3369_v4  ;;  %v10005_v5 = vld [vmem:[#allocation54_spill] sm:$0xff] }
 0x8ab   :  { %v3413_v63 = vsel %vm572_vm1, %v3410_v6, %v3412_v9  ;;  %v3414_v37 = vsel %vm572_vm1, %v3412_v9, %v3410_v6  ;;  %v3403_v10 = vadd.f32 %v3401_v18, %v3370_v56  ;;  %v3404_v21 = vadd.f32 %v3402_v22, %v3371_v19  ;;  %v10004_v6 = vld [vmem:[#allocation53_spill] sm:$0xff] }
 0x8ac   :  { %v3447_v49 = vpop.permute.xlu1 %3446  ;;  %v3426_v25 = vmul.f32 %v8000_v36, %v3414_v37  ;;  %v3427_v43 = vmul.f32 %v8003_v7, %v3413_v63  ;;  %v3407_v51 = vadd.f32 %v3405_v54, %v3372_v38  ;;  %v3408_v34 = vadd.f32 %v3406_v50, %v3373_v1  ;;  %v10008_v36 = vld [vmem:[#allocation62_spill] sm:$0xff] }
 0x8ad   :  { %v3448_v27 = vsel %vm612_vm2, %v3445_v60, %v3447_v49  ;;  %v3449_v23 = vsel %vm612_vm2, %v3447_v49, %v3445_v60  ;;  %v10006_v49 = vld [vmem:[#allocation55_spill] sm:$0xff]  ;;  %v10007_v60 = vld [vmem:[#allocation56_spill] sm:$0xff] }
 0x8ae   :  { %v3496_v4 = vpop.permute.xlu0 %3495  ;;  %v3461_v40 = vmul.f32 %v8074_v48, %v3449_v23  ;;  %v3462_v52 = vmul.f32 %v8077_v20, %v3448_v27  ;;  %v3428_v8 = vmul.f32 %v3426_v25, %v10004_v6  ;;  %v3429_v9 = vmul.f32 %v3427_v43, %v10004_v6 }
 0x8af   :  { %v3432_v2 = vmul.f32 %v3426_v25, %v10005_v5  ;;  %v3433_v18 = vmul.f32 %v3427_v43, %v10005_v5  ;;  %v3436_v37 = vmul.f32 %v3426_v25, %v10006_v49  ;;  %v3437_v63 = vmul.f32 %v3427_v43, %v10006_v49 }
 0x8b0   :  { %v3498_v19 = vpop.permute.xlu1 %3497  ;;  %v3440_v54 = vmul.f32 %v3426_v25, %v10007_v60  ;;  %v3441_v50 = vmul.f32 %v3427_v43, %v10007_v60  ;;  %v3430_v1 = vadd.f32 %v3428_v8, %v3395_v24  ;;  %v3431_v38 = vadd.f32 %v3429_v9, %v3396_v45  ;;  %v10011_v24 = vld [vmem:[#allocation74_spill] sm:$0xff] }
 0x8b1   :  { %v3434_v22 = vadd.f32 %v3432_v2, %v3399_v58  ;;  %v3435_v56 = vadd.f32 %v3433_v18, %v3400_v55  ;;  %v3438_v27 = vadd.f32 %v3436_v37, %v3403_v10  ;;  %v3439_v23 = vadd.f32 %v3437_v63, %v3404_v21  ;;  %v4604_v55 = vld [vmem:[%s8924_s8 + $0x6] ss:$8 sm:$0x3] }
 0x8b2   :  { %v3442_v20 = vadd.f32 %v3440_v54, %v3407_v51  ;;  %v3443_v48 = vadd.f32 %v3441_v50, %v3408_v34  ;;  %v3531_v7 = vpop.permute.xlu0 %3530  ;;  %v3463_v5 = vmul.f32 %v3461_v40, %v10008_v36  ;;  %v3464_v6 = vmul.f32 %v3462_v52, %v10008_v36 }
 0x8b3   :  { %v3467_v29 = vmul.f32 %v3461_v40, %v10009_v30  ;;  %v3468_v49 = vmul.f32 %v3462_v52, %v10009_v30  ;;  %v3471_v43 = vmul.f32 %v3461_v40, %v10010_v13  ;;  %v3472_v45 = vmul.f32 %v3462_v52, %v10010_v13 }
 0x8b4   :  { %v3533_v25 = vpop.permute.xlu1 %3532  ;;  %v3475_v2 = vmul.f32 %v3461_v40, %v10011_v24  ;;  %v3476_v21 = vmul.f32 %v3462_v52, %v10011_v24  ;;  %v3465_v58 = vadd.f32 %v3463_v5, %v3430_v1  ;;  %v3466_v10 = vadd.f32 %v3464_v6, %v3431_v38 }
 0x8b5   :  { %v3469_v51 = vadd.f32 %v3467_v29, %v3434_v22  ;;  %v3470_v34 = vadd.f32 %v3468_v49, %v3435_v56  ;;  %v3473_v8 = vadd.f32 %v3471_v43, %v3438_v27  ;;  %v3474_v9 = vadd.f32 %v3472_v45, %v3439_v23  ;;  %v10014_v56 = vld [vmem:[#allocation78_spill] sm:$0xff]  ;;  %v10016_v43 = vld [vmem:[#allocation83_spill] sm:$0xff] }
 0x8b6   :  { %v3477_v18 = vadd.f32 %v3475_v2, %v3442_v20  ;;  %v3478_v37 = vadd.f32 %v3476_v21, %v3443_v48  ;;  %v3481_v63 = vadd.f32 %v8007_v0, %v3465_v58  ;;  %v8230_v40 = vrot.slane %v4604_v55, %v9954_v44  ;;  %v3566_v48 = vpop.permute.xlu0 %3565  ;;  %v10015_v27 = vld [vmem:[#allocation82_spill] sm:$0xff] }
 0x8b7   :  { %v3485_v54 = vadd.f32 %v8011_v26, %v3469_v51  ;;  %v8233_v52 = vrot.slane %v4604_v55, %v9956_v53  ;;  %v3489_v5 = vadd.f32 %v8018_v12, %v3473_v8  ;;  %v3482_v6 = vadd.f32 %v8026_v61, %v3466_v10  ;;  %v10017_v21 = vld [vmem:[#allocation86_spill] sm:$0xff] }
 0x8b8   :  { %v3568_v50 = vpop.permute.xlu1 %3567  ;;  %10012 = vst [vmem:[#allocation57_spill] sm:$0xff] %v8230_v40  ;;  %v3493_v29 = vadd.f32 %v8022_v16, %v3477_v18  ;;  %v3486_v20 = vadd.f32 %v8030_v32, %v3470_v34  ;;  %v3499_v0 = vsel %vm672_vm3, %v3496_v4, %v3498_v19  ;;  %v3500_v26 = vsel %vm672_vm3, %v3498_v19, %v3496_v4 }
 0x8b9   :  { %10013 = vst [vmem:[#allocation72_spill] sm:$0xff] %v8233_v52  ;;  %v3534_v49 = vsel %vm712_vm4, %v3531_v7, %v3533_v25  ;;  %v3535_v1 = vsel %vm712_vm4, %v3533_v25, %v3531_v7  ;;  %v3490_v12 = vadd.f32 %v8037_v17, %v3474_v9  ;;  %v3494_v16 = vadd.f32 %v8041_v14, %v3478_v37 }
 0x8ba   :  { %v3512_v61 = vmul.f32 %v8098_v42, %v3499_v0  ;;  %v3513_v32 = vmul.f32 %v8101_v28, %v3500_v26  ;;  %v3547_v38 = vmul.f32 %v8107_v33, %v3534_v49  ;;  %v3548_v22 = vmul.f32 %v8110_v59, %v3535_v1  ;;  %v3601_v9 = vpop.permute.xlu0 %3600  ;;  %v10018_v0 = vld [vmem:[#allocation87_spill] sm:$0xff]  ;;  %v10019_v1 = vld [vmem:[#allocation88_spill] sm:$0xff] }
 0x8bb   :  { %v3569_v4 = vsel %vm752_vm5, %v3566_v48, %v3568_v50  ;;  %v3570_v19 = vsel %vm752_vm5, %v3568_v50, %v3566_v48 }
 0x8bc   :  { %v3514_v7 = vmul.f32 %v3512_v61, %v10014_v56  ;;  %v3515_v17 = vmul.f32 %v3513_v32, %v10014_v56  ;;  %v3518_v14 = vmul.f32 %v3512_v61, %v10015_v27  ;;  %v3519_v23 = vmul.f32 %v3513_v32, %v10015_v27  ;;  %v3603_v25 = vpop.permute.xlu1 %3602 }
 0x8bd   :  { %v3522_v45 = vmul.f32 %v3512_v61, %v10016_v43  ;;  %v3523_v2 = vmul.f32 %v3513_v32, %v10016_v43  ;;  %v3526_v55 = vmul.f32 %v3512_v61, %v10017_v21  ;;  %v3527_v58 = vmul.f32 %v3513_v32, %v10017_v21  ;;  %v10020_v61 = vld [vmem:[#allocation90_spill] sm:$0xff] }
 0x8be   :  { %v3516_v10 = vadd.f32 %v3514_v7, %v3481_v63  ;;  %v3517_v51 = vadd.f32 %v3515_v17, %v3482_v6  ;;  %v3520_v34 = vadd.f32 %v3518_v14, %v3485_v54  ;;  %v3521_v8 = vadd.f32 %v3519_v23, %v3486_v20  ;;  %v10021_v6 = vld [vmem:[#allocation91_spill] sm:$0xff] }
 0x8bf   :  { %v3524_v18 = vadd.f32 %v3522_v45, %v3489_v5  ;;  %v3525_v37 = vadd.f32 %v3523_v2, %v3490_v12  ;;  %v3528_v50 = vadd.f32 %v3526_v55, %v3493_v29  ;;  %v3529_v48 = vadd.f32 %v3527_v58, %v3494_v16 }
 0x8c0   :  { %v3549_v26 = vmul.f32 %v3547_v38, %v10018_v0  ;;  %v3550_v49 = vmul.f32 %v3548_v22, %v10018_v0  ;;  %v3553_v59 = vmul.f32 %v3547_v38, %v10019_v1  ;;  %v3554_v33 = vmul.f32 %v3548_v22, %v10019_v1  ;;  %v3876_v32 = vpop.permute.xlu1 %3875 }
 0x8c1   :  { %v3557_v28 = vmul.f32 %v3547_v38, %v10020_v61  ;;  %v3558_v63 = vmul.f32 %v3548_v22, %v10020_v61  ;;  %v3561_v54 = vmul.f32 %v3547_v38, %v10021_v6  ;;  %v3562_v20 = vmul.f32 %v3548_v22, %v10021_v6  ;;  %v3874_v22 = vpop.permute.xlu0 %3873 }
 0x8c2   :  { %v3551_v5 = vadd.f32 %v3549_v26, %v3516_v10  ;;  %v3552_v12 = vadd.f32 %v3550_v49, %v3517_v51  ;;  %v3555_v29 = vadd.f32 %v3553_v59, %v3520_v34  ;;  %v3556_v16 = vadd.f32 %v3554_v33, %v3521_v8  ;;  %v10023_v51 = vld [vmem:[#allocation94_spill] sm:$0xff] }
 0x8c3   :  { %v3559_v7 = vadd.f32 %v3557_v28, %v3524_v18  ;;  %v3560_v17 = vadd.f32 %v3558_v63, %v3525_v37  ;;  %v3563_v14 = vadd.f32 %v3561_v54, %v3528_v50  ;;  %v3564_v23 = vadd.f32 %v3562_v20, %v3529_v48  ;;  %v10025_v37 = vld [vmem:[#allocation98_spill] sm:$0xff] }
 0x8c4   :  { %v3582_v45 = vmul.f32 %v8113_v31, %v3569_v4  ;;  %v3583_v2 = vmul.f32 %v8116_v39, %v3570_v19  ;;  %v3604_v55 = vsel %vm792_vm6, %v3601_v9, %v3603_v25  ;;  %v3605_v38 = vsel %vm792_vm6, %v3603_v25, %v3601_v9  ;;  %v10022_v4 = vld [vmem:[#allocation93_spill] sm:$0xff]  ;;  %v10024_v25 = vld [vmem:[#allocation95_spill] sm:$0xff]  ;;  %v10027_v39 = vld [vmem:[#allocation100_spill] sm:$0xff] }
 0x8c5   :  { %v3617_v58 = vmul.f32 %v8125_v46, %v3604_v55  ;;  %v3618_v33 = vmul.f32 %v8128_v62, %v3605_v38  ;;  %v3877_v28 = vsel %vm500_vm7, %v3874_v22, %v3876_v32  ;;  %v3878_v59 = vsel %vm500_vm7, %v3876_v32, %v3874_v22  ;;  %v10026_v22 = vld [vmem:[#allocation99_spill] sm:$0xff] }
 0x8c6   :  { %v3584_v10 = vmul.f32 %v3582_v45, %v10022_v4  ;;  %v3585_v19 = vmul.f32 %v3583_v2, %v10022_v4  ;;  %v3588_v34 = vmul.f32 %v3582_v45, %v10023_v51  ;;  %v3589_v8 = vmul.f32 %v3583_v2, %v10023_v51 }
 0x8c7   :  { %v3592_v9 = vmul.f32 %v3582_v45, %v10024_v25  ;;  %v3593_v18 = vmul.f32 %v3583_v2, %v10024_v25  ;;  %v3596_v50 = vmul.f32 %v3582_v45, %v10025_v37  ;;  %v3597_v48 = vmul.f32 %v3583_v2, %v10025_v37  ;;  %v10028_v25 = vld [vmem:[#allocation102_spill] sm:$0xff] }
 0x8c8   :  { %v3586_v26 = vadd.f32 %v3584_v10, %v3551_v5  ;;  %v3587_v49 = vadd.f32 %v3585_v19, %v3552_v12  ;;  %v3590_v63 = vadd.f32 %v3588_v34, %v3555_v29  ;;  %v3591_v54 = vadd.f32 %v3589_v8, %v3556_v16  ;;  %v10029_v5 = vld [vmem:[#allocation103_spill] sm:$0xff]  ;;  %v3903_v16 = vpop.permute.xlu1 %3902 }
 0x8c9   :  { %v3594_v20 = vadd.f32 %v3592_v9, %v3559_v7  ;;  %v3595_v32 = vadd.f32 %v3593_v18, %v3560_v17  ;;  %v3598_v55 = vadd.f32 %v3596_v50, %v3563_v14  ;;  %v3599_v38 = vadd.f32 %v3597_v48, %v3564_v23  ;;  %v3901_v9 = vpop.permute.xlu0 %3900  ;;  %v4605_v18 = vld [vmem:[%s8924_s8 + $0x7] ss:$8 sm:$0x3]  ;;  %v10030_v50 = vld [vmem:[#allocation110_spill] sm:$0xff] }
 0x8ca   :  { %v3619_v62 = vmul.f32 %v3617_v58, %v10026_v22  ;;  %v3620_v46 = vmul.f32 %v3618_v33, %v10026_v22  ;;  %v3623_v31 = vmul.f32 %v3617_v58, %v10027_v39  ;;  %v3624_v42 = vmul.f32 %v3618_v33, %v10027_v39  ;;  %v10044_v39 = vld [vmem:[#allocation119_spill] sm:$0xff] }
 0x8cb   :  { %v3627_v45 = vmul.f32 %v3617_v58, %v10028_v25  ;;  %v3628_v2 = vmul.f32 %v3618_v33, %v10028_v25  ;;  %v3631_v12 = vmul.f32 %v3617_v58, %v10029_v5  ;;  %v3632_v29 = vmul.f32 %v3618_v33, %v10029_v5  ;;  %v10031_v25 = vld [vmem:[#allocation111_spill] sm:$0xff] }
 0x8cc   :  { %v3621_v7 = vadd.f32 %v3619_v62, %v3586_v26  ;;  %v3622_v17 = vadd.f32 %v3620_v46, %v3587_v49  ;;  %v3625_v14 = vadd.f32 %v3623_v31, %v3590_v63  ;;  %v3626_v23 = vadd.f32 %v3624_v42, %v3591_v54  ;;  %v10032_v46 = vld [vmem:[#allocation112_spill] sm:$0xff]  ;;  %v10033_v26 = vld [vmem:[#allocation114_spill] sm:$0xff] }
 0x8cd   :  { %v3629_v10 = vadd.f32 %v3627_v45, %v3594_v20  ;;  %v3630_v19 = vadd.f32 %v3628_v2, %v3595_v32  ;;  %v3633_v34 = vadd.f32 %v3631_v12, %v3598_v55  ;;  %v3634_v8 = vadd.f32 %v3632_v29, %v3599_v38  ;;  %v3938_v29 = vpop.permute.xlu1 %3937 }
 0x8ce   :  { %v3635_v48 = vadd.f32 %v3621_v7, %v10030_v50  ;;  %v3636_v58 = vadd.f32 %v3622_v17, %v10030_v50  ;;  %v3639_v33 = vadd.f32 %v3625_v14, %v10031_v25  ;;  %v3640_v62 = vadd.f32 %v3626_v23, %v10031_v25 }
 0x8cf   :  { %v3643_v31 = vadd.f32 %v3629_v10, %v10032_v46  ;;  %v3644_v42 = vadd.f32 %v3630_v19, %v10032_v46  ;;  %v3647_v49 = vadd.f32 %v3633_v34, %v10033_v26  ;;  %v3648_v63 = vadd.f32 %v3634_v8, %v10033_v26  ;;  %v3936_v34 = vpop.permute.xlu0 %3935 }
 0x8d0   :  { %v8312_v54 = vmax.f32 %v3635_v48, 0.0  ;;  %v8314_v20 = vmax.f32 %v3636_v58, 0.0  ;;  %v8317_v32 = vrot.slane %v4605_v18, %v9954_v44  ;;  %v8320_v55 = vrot.slane %v4605_v18, %v9956_v53  ;;  %v10038_v48 = vld [vmem:[#allocation107_spill] sm:$0xff] }
 0x8d1   :  { %v8322_v38 = vmax.f32 %v3639_v33, 0.0  ;;  %v8324_v45 = vmax.f32 %v3640_v62, 0.0  ;;  %v8326_v2 = vmax.f32 %v3643_v31, 0.0  ;;  %v8328_v12 = vmax.f32 %v3644_v42, 0.0  ;;  %v10039_v62 = vld [vmem:[#allocation47_spill] sm:$0xff] }
 0x8d2   :  { %10034 = vst [vmem:[#allocation84_spill] sm:$0xff] %v8312_v54  ;;  %10035 = vst [vmem:[#allocation58_spill] sm:$0xff] %v8317_v32  ;;  %v3890_v7 = vmul.f32 %v8131_v47, %v3878_v59  ;;  %v3891_v17 = vmul.f32 %v8134_v57, %v3877_v28  ;;  %v3904_v44 = vsel %vm532_vm0, %v3901_v9, %v3903_v16  ;;  %v8336_v14 = vmax.f32 %v3647_v49, 0.0  ;;  %v10040_v49 = vld [vmem:[#allocation48_spill] sm:$0xff]  ;;  %v3973_v47 = vpop.permute.xlu1 %3972 }
 0x8d3   :  { %10036 = vst [vmem:[#allocation115_spill] sm:$0xff] %v8320_v55  ;;  %10037 = vst [vmem:[#allocation85_spill] sm:$0xff] %v8322_v38  ;;  %v3905_v53 = vsel %vm532_vm0, %v3903_v16, %v3901_v9  ;;  %v8338_v23 = vmax.f32 %v3648_v63, 0.0  ;;  %v3918_v19 = vmul.f32 %v8145_v35, %v3904_v44  ;;  %v3939_v28 = vsel %vm572_vm1, %v3936_v34, %v3938_v29  ;;  %v10041_v44 = vld [vmem:[#allocation49_spill] sm:$0xff]  ;;  %v10043_v35 = vld [vmem:[#allocation108_spill] sm:$0xff] }
 0x8d4   :  { %v3917_v10 = vmul.f32 %v8142_v3, %v3905_v53  ;;  %v3892_v8 = vmul.f32 %v3890_v7, %v9996_v11  ;;  %v3893_v59 = vmul.f32 %v3891_v17, %v9996_v11  ;;  %v3940_v18 = vsel %vm572_vm1, %v3938_v29, %v3936_v34  ;;  %v10042_v34 = vld [vmem:[#allocation50_spill] sm:$0xff]  ;;  %v10045_v55 = vld [vmem:[#allocation120_spill] sm:$0xff] }
 0x8d5   :  { %v3894_v16 = vmul.f32 %v3890_v7, %v9997_v15  ;;  %v3895_v9 = vmul.f32 %v3891_v17, %v9997_v15  ;;  %v3896_v58 = vmul.f32 %v3890_v7, %v10038_v48  ;;  %v3897_v33 = vmul.f32 %v3891_v17, %v10038_v48 }
 0x8d6   :  { %v3919_v31 = vmul.f32 %v3917_v10, %v10039_v62  ;;  %v3920_v42 = vmul.f32 %v3918_v19, %v10039_v62  ;;  %v3923_v11 = vmul.f32 %v3917_v10, %v10040_v49  ;;  %v3924_v63 = vmul.f32 %v3918_v19, %v10040_v49  ;;  %v3971_v49 = vpop.permute.xlu0 %3970 }
 0x8d7   :  { %v3927_v53 = vmul.f32 %v3917_v10, %v10041_v44  ;;  %v3928_v29 = vmul.f32 %v3918_v19, %v10041_v44  ;;  %v3931_v57 = vmul.f32 %v3917_v10, %v10042_v34  ;;  %v3932_v15 = vmul.f32 %v3918_v19, %v10042_v34 }
 0x8d8   :  { %v3898_v3 = vmul.f32 %v3890_v7, %v10043_v35  ;;  %v3899_v48 = vmul.f32 %v3891_v17, %v10043_v35  ;;  %v3921_v26 = vadd.f32 %v3919_v31, %v3892_v8  ;;  %v3922_v46 = vadd.f32 %v3920_v42, %v3893_v59  ;;  %v10046_v35 = vld [vmem:[#allocation71_spill] sm:$0xff]  ;;  %v10047_v8 = vld [vmem:[#allocation46_spill] sm:$0xff] }
 0x8d9   :  { %v3925_v62 = vadd.f32 %v3923_v11, %v3894_v16  ;;  %v3926_v25 = vadd.f32 %v3924_v63, %v3895_v9  ;;  %v3929_v50 = vadd.f32 %v3927_v53, %v3896_v58  ;;  %v3930_v5 = vadd.f32 %v3928_v29, %v3897_v33  ;;  %v10048_v16 = vld [vmem:[#allocation53_spill] sm:$0xff]  ;;  %v10049_v33 = vld [vmem:[#allocation54_spill] sm:$0xff]  ;;  %v10050_v31 = vld [vmem:[#allocation55_spill] sm:$0xff] }
 0x8da   :  { %v3952_v22 = vmul.f32 %v10044_v39, %v3940_v18  ;;  %v3953_v44 = vmul.f32 %v10045_v55, %v3939_v28  ;;  %v3974_v10 = vsel %vm612_vm2, %v3971_v49, %v3973_v47  ;;  %v3975_v19 = vsel %vm612_vm2, %v3973_v47, %v3971_v49  ;;  %v10051_v63 = vld [vmem:[#allocation125_spill] sm:$0xff] }
 0x8db   :  { %v3933_v7 = vadd.f32 %v3931_v57, %v3898_v3  ;;  %v3934_v34 = vadd.f32 %v3932_v15, %v3899_v48  ;;  %v3987_v17 = vmul.f32 %v10046_v35, %v3975_v19  ;;  %v3988_v59 = vmul.f32 %v10047_v8, %v3974_v10  ;;  %v10052_v47 = vld [vmem:[#allocation129_spill] sm:$0xff] }
 0x8dc   :  { %v3954_v9 = vmul.f32 %v3952_v22, %v10048_v16  ;;  %v3955_v58 = vmul.f32 %v3953_v44, %v10048_v16  ;;  %v3958_v18 = vmul.f32 %v3952_v22, %v10049_v33  ;;  %v3959_v28 = vmul.f32 %v3953_v44, %v10049_v33 }
 0x8dd   :  { %v3962_v42 = vmul.f32 %v3952_v22, %v10050_v31  ;;  %v3966_v11 = vmul.f32 %v3952_v22, %v10007_v60  ;;  %v3651_v3 = vmul.f32 %v8312_v54, %v10051_v63  ;;  %v3653_v57 = vmul.f32 %v8322_v38, %v10052_v47 }
 0x8de   :  { %v3956_v53 = vadd.f32 %v3954_v9, %v3921_v26  ;;  %v3957_v29 = vadd.f32 %v3955_v58, %v3922_v46  ;;  %v3963_v15 = vmul.f32 %v3953_v44, %v10050_v31  ;;  %v3967_v48 = vmul.f32 %v3953_v44, %v10007_v60  ;;  %v10053_v31 = vld [vmem:[#allocation131_spill] sm:$0xff] }
 0x8df   :  { %v3960_v49 = vadd.f32 %v3958_v18, %v3925_v62  ;;  %v3961_v10 = vadd.f32 %v3959_v28, %v3926_v25  ;;  %v3964_v19 = vadd.f32 %v3962_v42, %v3929_v50  ;;  %v3968_v16 = vadd.f32 %v3966_v11, %v3933_v7 }
 0x8e0   :  { %v3989_v33 = vmul.f32 %v3987_v17, %v10008_v36  ;;  %v3990_v22 = vmul.f32 %v3988_v59, %v10008_v36  ;;  %v3993_v8 = vmul.f32 %v3987_v17, %v10009_v30  ;;  %v3994_v35 = vmul.f32 %v3988_v59, %v10009_v30 }
 0x8e1   :  { %v3997_v55 = vmul.f32 %v3987_v17, %v10010_v13  ;;  %v3998_v46 = vmul.f32 %v3988_v59, %v10010_v13  ;;  %v4001_v26 = vmul.f32 %v3987_v17, %v10011_v24  ;;  %v4002_v60 = vmul.f32 %v3988_v59, %v10011_v24  ;;  %v10054_v17 = vld [vmem:[#allocation132_spill] sm:$0xff]  ;;  %v10055_v59 = vld [vmem:[#allocation75_spill] sm:$0xff] }
 0x8e2   :  { %v3965_v62 = vadd.f32 %v3963_v15, %v3930_v5  ;;  %v3969_v25 = vadd.f32 %v3967_v48, %v3934_v34  ;;  %v3991_v50 = vadd.f32 %v3989_v33, %v3956_v53  ;;  %v3995_v44 = vadd.f32 %v3993_v8, %v3960_v49  ;;  %v4022_v53 = vpop.permute.xlu0 %4021  ;;  %v10057_v15 = vld [vmem:[#allocation76_spill] sm:$0xff]  ;;  %v10058_v49 = vld [vmem:[#allocation77_spill] sm:$0xff] }
 0x8e3   :  { %v3992_v7 = vadd.f32 %v3990_v22, %v3957_v29  ;;  %v3996_v9 = vadd.f32 %v3994_v35, %v3961_v10  ;;  %v3999_v58 = vadd.f32 %v3997_v55, %v3964_v19  ;;  %v4003_v36 = vadd.f32 %v4001_v26, %v3968_v16  ;;  %v4024_v55 = vpop.permute.xlu1 %4023  ;;  %v10059_v19 = vld [vmem:[#allocation79_spill] sm:$0xff] }
 0x8e4   :  { %v4000_v18 = vadd.f32 %v3998_v46, %v3965_v62  ;;  %v3655_v28 = vadd.f32 %v3653_v57, %v3651_v3  ;;  %v3657_v30 = vmul.f32 %v8326_v2, %v10053_v31  ;;  %v3652_v13 = vmul.f32 %v8314_v20, %v10051_v63  ;;  %v10056_v3 = vld [vmem:[#allocation73_spill] sm:$0xff]  ;;  %v10060_v22 = vld [vmem:[#allocation63_spill] sm:$0xff] }
 0x8e5   :  { %v4004_v42 = vadd.f32 %v4002_v60, %v3969_v25  ;;  %v3661_v24 = vmul.f32 %v8336_v14, %v10054_v17  ;;  %v3654_v5 = vmul.f32 %v8324_v45, %v10052_v47  ;;  %v3658_v34 = vmul.f32 %v8328_v12, %v10053_v31  ;;  %v10061_v25 = vld [vmem:[#allocation123_spill] sm:$0xff] }
 0x8e6   :  { %v3659_v35 = vadd.f32 %v3657_v30, %v3655_v28  ;;  %v3662_v8 = vmul.f32 %v8338_v23, %v10054_v17  ;;  %v4007_v11 = vadd.f32 %v10055_v59, %v3991_v50  ;;  %v4011_v57 = vadd.f32 %v10056_v3, %v3995_v44  ;;  %v10062_v44 = vld [vmem:[#allocation101_spill] sm:$0xff]  ;;  %v10063_v30 = vld [vmem:[#allocation104_spill] sm:$0xff] }
 0x8e7   :  { %v3656_v29 = vadd.f32 %v3654_v5, %v3652_v13  ;;  %v4015_v48 = vadd.f32 %v10057_v15, %v3999_v58  ;;  %v4019_v10 = vadd.f32 %v10058_v49, %v4003_v36  ;;  %v4008_v16 = vadd.f32 %v10059_v19, %v3992_v7  ;;  %v10064_v36 = vld [vmem:[#allocation165_spill] sm:$0xff] }
 0x8e8   :  { %v3663_v33 = vadd.f32 %v3661_v24, %v3659_v35  ;;  %v4012_v46 = vadd.f32 %v10060_v22, %v3996_v9  ;;  %v4025_v26 = vsel %vm672_vm3, %v4022_v53, %v4024_v55  ;;  %v4026_v60 = vsel %vm672_vm3, %v4024_v55, %v4022_v53  ;;  %v10065_v13 = vld [vmem:[#allocation133_spill] sm:$0xff]  ;;  %v10066_v24 = vld [vmem:[#allocation134_spill] sm:$0xff]  ;;  %v10067_v35 = vld [vmem:[#allocation135_spill] sm:$0xff]  ;;  %v4059_v22 = vpop.permute.xlu1 %4058 }
 0x8e9   :  { %v3660_v62 = vadd.f32 %v3658_v34, %v3656_v29  ;;  %v4016_v50 = vadd.f32 %v10061_v25, %v4000_v18  ;;  %v4038_v28 = vmul.f32 %v10062_v44, %v4025_v26  ;;  %v4039_v58 = vmul.f32 %v10063_v30, %v4026_v60 }
 0x8ea   :  { %3665 = vrot.lane.b32.xlu0 %v3663_v33, %s9665_s15  ;;  %v4020_v7 = vadd.f32 %v10064_v36, %v4004_v42  ;;  %v3673_v9 = vmul.f32 %v8312_v54, %v10065_v13  ;;  %v3675_v5 = vmul.f32 %v8322_v38, %v10066_v24  ;;  %v3679_v55 = vmul.f32 %v8326_v2, %v10067_v35  ;;  %v4057_v36 = vpop.permute.xlu0 %4056 }
 0x8eb   :  { %v3664_v34 = vadd.f32 %v3662_v8, %v3660_v62  ;;  %v4040_v18 = vmul.f32 %v4038_v28, %v10014_v56  ;;  %v4041_v59 = vmul.f32 %v4039_v58, %v10014_v56  ;;  %v4044_v3 = vmul.f32 %v4038_v28, %v10015_v27  ;;  %v10068_v8 = vld [vmem:[#allocation136_spill] sm:$0xff] }
 0x8ec   :  { %v4045_v53 = vmul.f32 %v4039_v58, %v10015_v27  ;;  %v4048_v42 = vmul.f32 %v4038_v28, %v10016_v43  ;;  %v4049_v29 = vmul.f32 %v4039_v58, %v10016_v43  ;;  %v4052_v15 = vmul.f32 %v4038_v28, %v10017_v21 }
 0x8ed   :  { %3667 = vrot.lane.b32.xlu1 %v3664_v34, %s9665_s15  ;;  %v4042_v49 = vadd.f32 %v4040_v18, %v4007_v11  ;;  %v4053_v19 = vmul.f32 %v4039_v58, %v10017_v21  ;;  %v3683_v33 = vmul.f32 %v8336_v14, %v10068_v8  ;;  %v3674_v56 = vmul.f32 %v8314_v20, %v10065_v13 }
 0x8ee   :  { %v4043_v26 = vadd.f32 %v4041_v59, %v4008_v16  ;;  %v4046_v27 = vadd.f32 %v4044_v3, %v4011_v57  ;;  %v4047_v60 = vadd.f32 %v4045_v53, %v4012_v46  ;;  %v4050_v62 = vadd.f32 %v4048_v42, %v4015_v48  ;;  %v10069_v48 = vld [vmem:[#allocation51_spill] sm:$0xff]  ;;  %v10072_v59 = vld [vmem:[#allocation138_spill] sm:$0xff]  ;;  %v4092_v30 = vpop.permute.xlu0 %4091 }
 0x8ef   :  { %v4051_v25 = vadd.f32 %v4049_v29, %v4016_v50  ;;  %v4054_v43 = vadd.f32 %v4052_v15, %v4019_v10  ;;  %v3677_v28 = vadd.f32 %v3675_v5, %v3673_v9  ;;  %v3676_v11 = vmul.f32 %v8324_v45, %v10066_v24  ;;  %v10070_v10 = vld [vmem:[#allocation52_spill] sm:$0xff]  ;;  %v10071_v5 = vld [vmem:[#allocation137_spill] sm:$0xff]  ;;  %v10073_v53 = vld [vmem:[#allocation139_spill] sm:$0xff] }
 0x8f0   :  { %v4055_v34 = vadd.f32 %v4053_v19, %v4020_v7  ;;  %v3680_v21 = vmul.f32 %v8328_v12, %v10067_v35  ;;  %v4060_v58 = vsel %vm712_vm4, %v4057_v36, %v4059_v22  ;;  %v4061_v16 = vsel %vm712_vm4, %v4059_v22, %v4057_v36 }
 0x8f1   :  { %v3681_v57 = vadd.f32 %v3679_v55, %v3677_v28  ;;  %v3678_v46 = vadd.f32 %v3676_v11, %v3674_v56  ;;  %v4073_v50 = vmul.f32 %v10069_v48, %v4060_v58  ;;  %v4074_v18 = vmul.f32 %v10070_v10, %v4061_v16  ;;  %v10074_v16 = vld [vmem:[#allocation140_spill] sm:$0xff] }
 0x8f2   :  { %v3684_v9 = vmul.f32 %v8338_v23, %v10068_v8  ;;  %v3697_v7 = vmul.f32 %v8312_v54, %v10071_v5  ;;  %v3699_v3 = vmul.f32 %v8322_v38, %v10072_v59  ;;  %v3703_v42 = vmul.f32 %v8326_v2, %v10073_v53 }
 0x8f3   :  { %v3685_v29 = vadd.f32 %v3683_v33, %v3681_v57  ;;  %v3682_v15 = vadd.f32 %v3680_v21, %v3678_v46  ;;  %v4075_v55 = vmul.f32 %v4073_v50, %v10018_v0  ;;  %v4076_v19 = vmul.f32 %v4074_v18, %v10018_v0  ;;  %v4094_v0 = vpop.permute.xlu1 %4093 }
 0x8f4   :  { %v4079_v56 = vmul.f32 %v4073_v50, %v10019_v1  ;;  %v4080_v22 = vmul.f32 %v4074_v18, %v10019_v1  ;;  %v4083_v36 = vmul.f32 %v4073_v50, %v10020_v61  ;;  %v4084_v28 = vmul.f32 %v4074_v18, %v10020_v61 }
 0x8f5   :  { %3687 = vrot.lane.b32.xlu0 %v3685_v29, %s9671_s19  ;;  %v3686_v11 = vadd.f32 %v3684_v9, %v3682_v15  ;;  %v4087_v58 = vmul.f32 %v4073_v50, %v10021_v6  ;;  %v3707_v33 = vmul.f32 %v8336_v14, %v10074_v16  ;;  %v3698_v21 = vmul.f32 %v8314_v20, %v10071_v5 }
 0x8f6   :  { %v4077_v57 = vadd.f32 %v4075_v55, %v4042_v49  ;;  %v4078_v46 = vadd.f32 %v4076_v19, %v4043_v26  ;;  %v4081_v10 = vadd.f32 %v4079_v56, %v4046_v27  ;;  %v4082_v1 = vadd.f32 %v4080_v22, %v4047_v60  ;;  %v10077_v22 = vld [vmem:[#allocation95_spill] sm:$0xff] }
 0x8f7   :  { %3689 = vrot.lane.b32.xlu1 %v3686_v11, %s9671_s19  ;;  %v4085_v48 = vadd.f32 %v4083_v36, %v4050_v62  ;;  %v4086_v61 = vadd.f32 %v4084_v28, %v4051_v25  ;;  %v3701_v29 = vadd.f32 %v3699_v3, %v3697_v7  ;;  %v3700_v50 = vmul.f32 %v8324_v45, %v10072_v59 }
 0x8f8   :  { %v4088_v9 = vmul.f32 %v4074_v18, %v10021_v6  ;;  %v4089_v15 = vadd.f32 %v4087_v58, %v4054_v43  ;;  %v4095_v44 = vsel %vm752_vm5, %v4092_v30, %v4094_v0  ;;  %v4096_v49 = vsel %vm752_vm5, %v4094_v0, %v4092_v30  ;;  %v10075_v6 = vld [vmem:[#allocation141_spill] sm:$0xff]  ;;  %v10076_v18 = vld [vmem:[#allocation142_spill] sm:$0xff] }
 0x8f9   :  { %v3705_v26 = vadd.f32 %v3703_v42, %v3701_v29  ;;  %v3702_v27 = vadd.f32 %v3700_v50, %v3698_v21  ;;  %v3704_v60 = vmul.f32 %v8328_v12, %v10073_v53  ;;  %v4108_v62 = vmul.f32 %v8230_v40, %v4095_v44  ;;  %v10088_v40 = vld [vmem:[#allocation111_spill] sm:$0xff] }
 0x8fa   :  { %v3708_v25 = vmul.f32 %v8338_v23, %v10074_v16  ;;  %v4109_v7 = vmul.f32 %v8233_v52, %v4096_v49  ;;  %v3721_v43 = vmul.f32 %v8312_v54, %v10075_v6  ;;  %v3723_v3 = vmul.f32 %v8322_v38, %v10076_v18 }
 0x8fb   :  { %v3709_v55 = vadd.f32 %v3707_v33, %v3705_v26  ;;  %v3706_v30 = vadd.f32 %v3704_v60, %v3702_v27  ;;  %v4110_v42 = vmul.f32 %v4108_v62, %v10022_v4  ;;  %v4114_v19 = vmul.f32 %v4108_v62, %v10023_v51  ;;  %v10078_v33 = vld [vmem:[#allocation143_spill] sm:$0xff] }
 0x8fc   :  { %v4111_v56 = vmul.f32 %v4109_v7, %v10022_v4  ;;  %v4115_v44 = vmul.f32 %v4109_v7, %v10023_v51  ;;  %v4118_v36 = vmul.f32 %v4108_v62, %v10077_v22  ;;  %v4119_v28 = vmul.f32 %v4109_v7, %v10077_v22  ;;  %v4129_v4 = vpop.permute.xlu1 %4128 }
 0x8fd   :  { %v4090_v11 = vadd.f32 %v4088_v9, %v4055_v34  ;;  %3711 = vrot.lane.b32.xlu0 %v3709_v55, %s9676_s27  ;;  %v3710_v58 = vadd.f32 %v3708_v25, %v3706_v30  ;;  %v4122_v21 = vmul.f32 %v4108_v62, %v10025_v37  ;;  %v3727_v0 = vmul.f32 %v8326_v2, %v10078_v33  ;;  %v4127_v55 = vpop.permute.xlu0 %4126  ;;  %v10079_v25 = vld [vmem:[#allocation144_spill] sm:$0xff] }
 0x8fe   :  { %v4112_v29 = vadd.f32 %v4110_v42, %v4077_v57  ;;  %v4113_v50 = vadd.f32 %v4111_v56, %v4078_v46  ;;  %v4116_v49 = vadd.f32 %v4114_v19, %v4081_v10  ;;  %v4117_v26 = vadd.f32 %v4115_v44, %v4082_v1  ;;  %v10081_v19 = vld [vmem:[#allocation145_spill] sm:$0xff]  ;;  %v10082_v44 = vld [vmem:[#allocation146_spill] sm:$0xff] }
 0x8ff   :  { %3713 = vrot.lane.b32.xlu1 %v3710_v58, %s9676_s27  ;;  %v4120_v51 = vadd.f32 %v4118_v36, %v4085_v48  ;;  %v4121_v27 = vadd.f32 %v4119_v28, %v4086_v61  ;;  %v4123_v60 = vmul.f32 %v4109_v7, %v10025_v37  ;;  %v3725_v34 = vadd.f32 %v3723_v3, %v3721_v43  ;;  %v10080_v7 = vld [vmem:[#allocation115_spill] sm:$0xff] }
 0x900   :  { %v4124_v9 = vadd.f32 %v4122_v21, %v4089_v15  ;;  %v3731_v62 = vmul.f32 %v8336_v14, %v10079_v25  ;;  %v3722_v30 = vmul.f32 %v8314_v20, %v10075_v6  ;;  %v3724_v10 = vmul.f32 %v8324_v45, %v10076_v18  ;;  %v10083_v28 = vld [vmem:[#allocation99_spill] sm:$0xff] }
 0x901   :  { %v3729_v57 = vadd.f32 %v3727_v0, %v3725_v34  ;;  %v3728_v46 = vmul.f32 %v8328_v12, %v10078_v33  ;;  %v4130_v48 = vsel %vm792_vm6, %v4127_v55, %v4129_v4  ;;  %v4131_v37 = vsel %vm792_vm6, %v4129_v4, %v4127_v55  ;;  %v10084_v0 = vld [vmem:[#allocation100_spill] sm:$0xff]  ;;  %v10085_v55 = vld [vmem:[#allocation102_spill] sm:$0xff] }
 0x902   :  { %v3726_v1 = vadd.f32 %v3724_v10, %v3722_v30  ;;  %v3732_v61 = vmul.f32 %v8338_v23, %v10079_v25  ;;  %v4143_v15 = vmul.f32 %v8317_v32, %v4130_v48  ;;  %v4144_v43 = vmul.f32 %v10080_v7, %v4131_v37  ;;  %v10087_v32 = vld [vmem:[#allocation110_spill] sm:$0xff] }
 0x903   :  { %v4125_v3 = vadd.f32 %v4123_v60, %v4090_v11  ;;  %v3733_v42 = vadd.f32 %v3731_v62, %v3729_v57  ;;  %v3761_v56 = vmul.f32 %v8312_v54, %v10081_v19  ;;  %v3763_v22 = vmul.f32 %v8322_v38, %v10082_v44  ;;  %v10086_v62 = vld [vmem:[#allocation103_spill] sm:$0xff] }
 0x904   :  { %v3730_v36 = vadd.f32 %v3728_v46, %v3726_v1  ;;  %v4145_v58 = vmul.f32 %v4143_v15, %v10083_v28  ;;  %v4146_v21 = vmul.f32 %v4144_v43, %v10083_v28  ;;  %v4149_v4 = vmul.f32 %v4143_v15, %v10084_v0 }
 0x905   :  { %3735 = vrot.lane.b32.xlu0 %v3733_v42, %s9680_s14  ;;  %v4150_v34 = vmul.f32 %v4144_v43, %v10084_v0  ;;  %v4153_v11 = vmul.f32 %v4143_v15, %v10085_v55  ;;  %v4154_v60 = vmul.f32 %v4144_v43, %v10085_v55  ;;  %v4157_v30 = vmul.f32 %v4143_v15, %v10086_v62  ;;  %v10091_v15 = vld [vmem:[#allocation147_spill] sm:$0xff] }
 0x906   :  { %v3734_v10 = vadd.f32 %v3732_v61, %v3730_v36  ;;  %v4147_v57 = vadd.f32 %v4145_v58, %v4112_v29  ;;  %v4148_v48 = vadd.f32 %v4146_v21, %v4113_v50  ;;  %v4151_v46 = vadd.f32 %v4149_v4, %v4116_v49  ;;  %v10089_v29 = vld [vmem:[#allocation112_spill] sm:$0xff] }
 0x907   :  { %v4152_v37 = vadd.f32 %v4150_v34, %v4117_v26  ;;  %v4155_v1 = vadd.f32 %v4153_v11, %v4120_v51  ;;  %v4156_v7 = vadd.f32 %v4154_v60, %v4121_v27  ;;  %v4158_v28 = vmul.f32 %v4144_v43, %v10086_v62  ;;  %v10090_v51 = vld [vmem:[#allocation114_spill] sm:$0xff]  ;;  %v10092_v43 = vld [vmem:[#allocation148_spill] sm:$0xff]  ;;  %v10093_v62 = vld [vmem:[#allocation149_spill] sm:$0xff] }
 0x908   :  { %3737 = vrot.lane.b32.xlu1 %v3734_v10, %s9680_s14  ;;  %v4159_v42 = vadd.f32 %v4157_v30, %v4124_v9  ;;  %v4161_v0 = vadd.f32 %v4147_v57, %v10087_v32  ;;  %v4162_v52 = vadd.f32 %v4148_v48, %v10087_v32  ;;  %v4165_v55 = vadd.f32 %v4151_v46, %v10088_v40  ;;  %v10095_v46 = vld [vmem:[#allocation151_spill] sm:$0xff] }
 0x909   :  { %v4160_v39 = vadd.f32 %v4158_v28, %v4125_v3  ;;  %v4166_v61 = vadd.f32 %v4152_v37, %v10088_v40  ;;  %v4169_v50 = vadd.f32 %v4155_v1, %v10089_v29  ;;  %v4170_v49 = vadd.f32 %v4156_v7, %v10089_v29 }
 0x90a   :  { %v8532_v26 = vmax.f32 %v4161_v0, 0.0  ;;  %v4173_v27 = vadd.f32 %v4159_v42, %v10090_v51  ;;  %v3767_v9 = vmul.f32 %v8326_v2, %v10091_v15  ;;  %v3771_v36 = vmul.f32 %v8336_v14, %v10092_v43 }
 0x90b   :  { %v8539_v32 = vmax.f32 %v4162_v52, 0.0  ;;  %v8541_v58 = vmax.f32 %v4165_v55, 0.0  ;;  %v8543_v3 = vmax.f32 %v4166_v61, 0.0  ;;  %v4174_v40 = vadd.f32 %v4160_v39, %v10090_v51  ;;  %v10096_v61 = vld [vmem:[#allocation152_spill] sm:$0xff]  ;;  %v10097_v51 = vld [vmem:[#allocation153_spill] sm:$0xff] }
 0x90c   :  { %v8546_v21 = vmax.f32 %v4169_v50, 0.0  ;;  %v3765_v7 = vadd.f32 %v3763_v22, %v3761_v56  ;;  %v3762_v4 = vmul.f32 %v8314_v20, %v10081_v19  ;;  %v3764_v34 = vmul.f32 %v8324_v45, %v10082_v44  ;;  %v10094_v22 = vld [vmem:[#allocation150_spill] sm:$0xff] }
 0x90d   :  { %v8552_v11 = vmax.f32 %v4170_v49, 0.0  ;;  %v8554_v60 = vmax.f32 %v4173_v27, 0.0  ;;  %v8556_v52 = vmax.f32 %v4174_v40, 0.0  ;;  %v3785_v30 = vmul.f32 %v8312_v54, %v10093_v62 }
 0x90e   :  { %v3769_v10 = vadd.f32 %v3767_v9, %v3765_v7  ;;  %v3766_v39 = vadd.f32 %v3764_v34, %v3762_v4  ;;  %v3768_v56 = vmul.f32 %v8328_v12, %v10091_v15  ;;  %v3787_v57 = vmul.f32 %v8322_v38, %v10094_v22  ;;  %v10098_v9 = vld [vmem:[#allocation154_spill] sm:$0xff] }
 0x90f   :  { %v3772_v48 = vmul.f32 %v8338_v23, %v10092_v43  ;;  %v3791_v37 = vmul.f32 %v8326_v2, %v10095_v46  ;;  %v3786_v1 = vmul.f32 %v8314_v20, %v10093_v62  ;;  %v3788_v28 = vmul.f32 %v8324_v45, %v10094_v22 }
 0x910   :  { %v3773_v42 = vadd.f32 %v3771_v36, %v3769_v10  ;;  %v3770_v0 = vadd.f32 %v3768_v56, %v3766_v39  ;;  %v3789_v55 = vadd.f32 %v3787_v57, %v3785_v30  ;;  %v3795_v29 = vmul.f32 %v8336_v14, %v10096_v61  ;;  %v10099_v39 = vld [vmem:[#allocation155_spill] sm:$0xff] }
 0x911   :  { %v3790_v50 = vadd.f32 %v3788_v28, %v3786_v1  ;;  %v3792_v49 = vmul.f32 %v8328_v12, %v10095_v46  ;;  %v3809_v27 = vmul.f32 %v8312_v54, %v10097_v51  ;;  %v3811_v40 = vmul.f32 %v8322_v38, %v10098_v9  ;;  %v10100_v28 = vld [vmem:[#allocation156_spill] sm:$0xff] }
 0x912   :  { %3775 = vrot.lane.b32.xlu0 %v3773_v42, %s9686_s17  ;;  %v3774_v7 = vadd.f32 %v3772_v48, %v3770_v0  ;;  %v3793_v4 = vadd.f32 %v3791_v37, %v3789_v55  ;;  %v3796_v36 = vmul.f32 %v8338_v23, %v10096_v61  ;;  %v3810_v34 = vmul.f32 %v8314_v20, %v10097_v51  ;;  %v10101_v37 = vld [vmem:[#allocation157_spill] sm:$0xff]  ;;  %v10102_v0 = vld [vmem:[#allocation158_spill] sm:$0xff] }
 0x913   :  { %v3794_v30 = vadd.f32 %v3792_v49, %v3790_v50  ;;  %v3813_v10 = vadd.f32 %v3811_v40, %v3809_v27  ;;  %v3815_v56 = vmul.f32 %v8326_v2, %v10099_v39  ;;  %v3812_v57 = vmul.f32 %v8324_v45, %v10098_v9 }
 0x914   :  { %3777 = vrot.lane.b32.xlu1 %v3774_v7, %s9686_s17  ;;  %v3797_v1 = vadd.f32 %v3795_v29, %v3793_v4  ;;  %v3819_v48 = vmul.f32 %v8336_v14, %v10100_v28  ;;  %v3833_v42 = vmul.f32 %v8312_v54, %v10101_v37  ;;  %v3835_v55 = vmul.f32 %v8322_v38, %v10102_v0  ;;  %v10103_v7 = vld [vmem:[#allocation159_spill] sm:$0xff] }
 0x915   :  { %v3798_v50 = vadd.f32 %v3796_v36, %v3794_v30  ;;  %v3817_v49 = vadd.f32 %v3815_v56, %v3813_v10  ;;  %v3814_v27 = vadd.f32 %v3812_v57, %v3810_v34  ;;  %v3816_v40 = vmul.f32 %v8328_v12, %v10099_v39 }
 0x916   :  { %3799 = vrot.lane.b32.xlu0 %v3797_v1, %s9690_s2  ;;  %v3837_v41 = vadd.f32 %v3835_v55, %v3833_v42  ;;  %v3839_v29 = vmul.f32 %v8326_v2, %v10103_v7  ;;  %v3834_v4 = vmul.f32 %v8314_v20, %v10101_v37  ;;  %v3836_v54 = vmul.f32 %v8324_v45, %v10102_v0  ;;  %v10104_v42 = vld [vmem:[#allocation160_spill] sm:$0xff] }
 0x917   :  { %v3821_v61 = vadd.f32 %v3819_v48, %v3817_v49  ;;  %v3818_v38 = vadd.f32 %v3816_v40, %v3814_v27  ;;  %v3820_v36 = vmul.f32 %v8338_v23, %v10100_v28  ;;  %v3840_v34 = vmul.f32 %v8328_v12, %v10103_v7 }
 0x918   :  { %3801 = vrot.lane.b32.xlu1 %v3798_v50, %s9690_s2  ;;  %v3841_v30 = vadd.f32 %v3839_v29, %v3837_v41  ;;  %v3838_v10 = vadd.f32 %v3836_v54, %v3834_v4  ;;  %v4177_v56 = vmul.f32 %v8532_v26, %v10051_v63  ;;  %v4179_v57 = vmul.f32 %v8541_v58, %v10052_v47 }
 0x919   :  { %v3822_v1 = vadd.f32 %v3820_v36, %v3818_v38  ;;  %v3843_v48 = vmul.f32 %v8336_v14, %v10104_v42  ;;  %v3844_v55 = vmul.f32 %v8338_v23, %v10104_v42  ;;  %v4178_v49 = vmul.f32 %v8539_v32, %v10051_v63 }
 0x91a   :  { %3823 = vrot.lane.b32.xlu0 %v3821_v61, %s9691_s22  ;;  %v3842_v41 = vadd.f32 %v3840_v34, %v3838_v10  ;;  %v4181_v54 = vadd.f32 %v4179_v57, %v4177_v56  ;;  %v4183_v50 = vmul.f32 %v8546_v21, %v10053_v31  ;;  %v4180_v27 = vmul.f32 %v8543_v3, %v10052_v47 }
 0x91b   :  { %v3845_v38 = vadd.f32 %v3843_v48, %v3841_v30  ;;  %v4187_v40 = vmul.f32 %v8554_v60, %v10054_v17  ;;  %v4199_v29 = vmul.f32 %v8532_v26, %v10065_v13  ;;  %v4201_v63 = vmul.f32 %v8541_v58, %v10066_v24 }
 0x91c   :  { %3825 = vrot.lane.b32.xlu1 %v3822_v1, %s9691_s22  ;;  %v4185_v61 = vadd.f32 %v4183_v50, %v4181_v54  ;;  %v4182_v4 = vadd.f32 %v4180_v27, %v4178_v49  ;;  %v4184_v36 = vmul.f32 %v8552_v11, %v10053_v31  ;;  %v4188_v47 = vmul.f32 %v8556_v52, %v10054_v17 }
 0x91d   :  { %v4203_v34 = vadd.f32 %v4201_v63, %v4199_v29  ;;  %v4205_v30 = vmul.f32 %v8546_v21, %v10067_v35  ;;  %v4200_v10 = vmul.f32 %v8539_v32, %v10065_v13  ;;  %v4202_v56 = vmul.f32 %v8543_v3, %v10066_v24 }
 0x91e   :  { %3847 = vrot.lane.b32.xlu0 %v3845_v38, %s9692_s0  ;;  %v3846_v57 = vadd.f32 %v3844_v55, %v3842_v41  ;;  %v4189_v1 = vadd.f32 %v4187_v40, %v4185_v61  ;;  %v4186_v48 = vadd.f32 %v4184_v36, %v4182_v4  ;;  %v4206_v31 = vmul.f32 %v8552_v11, %v10067_v35 }
 0x91f   :  { %v4207_v49 = vadd.f32 %v4205_v30, %v4203_v34  ;;  %v4204_v17 = vadd.f32 %v4202_v56, %v4200_v10  ;;  %v4223_v54 = vmul.f32 %v8532_v26, %v10071_v5  ;;  %v4225_v50 = vmul.f32 %v8541_v58, %v10072_v59 }
 0x920   :  { %3849 = vrot.lane.b32.xlu1 %v3846_v57, %s9692_s0  ;;  %v4190_v13 = vadd.f32 %v4188_v47, %v4186_v48  ;;  %v4209_v24 = vmul.f32 %v8554_v60, %v10068_v8  ;;  %v4224_v55 = vmul.f32 %v8539_v32, %v10071_v5  ;;  %v4229_v35 = vmul.f32 %v8546_v21, %v10073_v53 }
 0x921   :  { %v4208_v41 = vadd.f32 %v4206_v31, %v4204_v17  ;;  %v4227_v27 = vadd.f32 %v4225_v50, %v4223_v54  ;;  %v4226_v38 = vmul.f32 %v8543_v3, %v10072_v59  ;;  %v4247_v40 = vmul.f32 %v8532_v26, %v10075_v6 }
 0x922   :  { %4191 = vrot.lane.b32.xlu0 %v4189_v1, %s9665_s15  ;;  %v4249_v29 = vmul.f32 %v8541_v58, %v10076_v18  ;;  %v4211_v63 = vadd.f32 %v4209_v24, %v4207_v49  ;;  %v4210_v5 = vmul.f32 %v8556_v52, %v10068_v8  ;;  %v4230_v36 = vmul.f32 %v8552_v11, %v10073_v53 }
 0x923   :  { %v4231_v61 = vadd.f32 %v4229_v35, %v4227_v27  ;;  %v4228_v4 = vadd.f32 %v4226_v38, %v4224_v55  ;;  %v4248_v47 = vmul.f32 %v8539_v32, %v10075_v6  ;;  %v4250_v34 = vmul.f32 %v8543_v3, %v10076_v18 }
 0x924   :  { %4193 = vrot.lane.b32.xlu1 %v4190_v13, %s9665_s15  ;;  %v4251_v59 = vadd.f32 %v4249_v29, %v4247_v40  ;;  %v4212_v30 = vadd.f32 %v4210_v5, %v4208_v41  ;;  %v4233_v10 = vmul.f32 %v8554_v60, %v10074_v16  ;;  %v4253_v8 = vmul.f32 %v8546_v21, %v10078_v33 }
 0x925   :  { %v4232_v56 = vadd.f32 %v4230_v36, %v4228_v4  ;;  %v4252_v57 = vadd.f32 %v4250_v34, %v4248_v47  ;;  %v4287_v53 = vmul.f32 %v8532_v26, %v10081_v19  ;;  %v4289_v6 = vmul.f32 %v8541_v58, %v10082_v44 }
 0x926   :  { %4213 = vrot.lane.b32.xlu0 %v4211_v63, %s9671_s19  ;;  %v4235_v1 = vadd.f32 %v4233_v10, %v4231_v61  ;;  %v4234_v18 = vmul.f32 %v8556_v52, %v10074_v16  ;;  %v4288_v48 = vmul.f32 %v8539_v32, %v10081_v19  ;;  %v4255_v31 = vadd.f32 %v4253_v8, %v4251_v59 }
 0x927   :  { %v4254_v49 = vmul.f32 %v8552_v11, %v10078_v33  ;;  %v4291_v17 = vadd.f32 %v4289_v6, %v4287_v53  ;;  %v4290_v54 = vmul.f32 %v8543_v3, %v10082_v44  ;;  %v4293_v50 = vmul.f32 %v8546_v21, %v10091_v15 }
 0x928   :  { %4215 = vrot.lane.b32.xlu1 %v4212_v30, %s9671_s19  ;;  %v4311_v13 = vmul.f32 %v8532_v26, %v10093_v62  ;;  %v4313_v16 = vmul.f32 %v8541_v58, %v10094_v22  ;;  %v4236_v19 = vadd.f32 %v4234_v18, %v4232_v56  ;;  %v4257_v24 = vmul.f32 %v8554_v60, %v10079_v25  ;;  %s10132_s19 = sld [smem:[#allocation172_spill]] }
 0x929   :  { %v4256_v33 = vadd.f32 %v4254_v49, %v4252_v57  ;;  %v4292_v55 = vadd.f32 %v4290_v54, %v4288_v48  ;;  %v4295_v41 = vadd.f32 %v4293_v50, %v4291_v17  ;;  %v4294_v44 = vmul.f32 %v8552_v11, %v10091_v15  ;;  %v10105_v57 = vld [vmem:[#allocation152_spill] sm:$0xff] }
 0x92a   :  { %4237 = vrot.lane.b32.xlu0 %v4235_v1, %s9676_s27  ;;  %v4312_v27 = vmul.f32 %v8539_v32, %v10093_v62  ;;  %v4314_v35 = vmul.f32 %v8543_v3, %v10094_v22  ;;  %v4259_v38 = vadd.f32 %v4257_v24, %v4255_v31  ;;  %v4258_v40 = vmul.f32 %v8556_v52, %v10079_v25  ;;  %v10106_v24 = vld [vmem:[#allocation59_spill] sm:$0xff] }
 0x92b   :  { %v4315_v29 = vadd.f32 %v4313_v16, %v4311_v13  ;;  %v4297_v63 = vmul.f32 %v8554_v60, %v10092_v43  ;;  %v4296_v5 = vadd.f32 %v4294_v44, %v4292_v55  ;;  %v4335_v15 = vmul.f32 %v8532_v26, %v10097_v51  ;;  %v10107_v44 = vld [vmem:[#allocation60_spill] sm:$0xff] }
 0x92c   :  { %4239 = vrot.lane.b32.xlu1 %v4236_v19, %s9676_s27  ;;  %v4337_v62 = vmul.f32 %v8541_v58, %v10098_v9  ;;  %v4260_v22 = vadd.f32 %v4258_v40, %v4256_v33  ;;  %v4317_v61 = vmul.f32 %v8546_v21, %v10095_v46  ;;  %v4316_v4 = vadd.f32 %v4314_v35, %v4312_v27 }
 0x92d   :  { %v4336_v25 = vmul.f32 %v8539_v32, %v10097_v51  ;;  %v4299_v36 = vadd.f32 %v4297_v63, %v4295_v41  ;;  %v4298_v59 = vmul.f32 %v8556_v52, %v10092_v43  ;;  %v4318_v47 = vmul.f32 %v8552_v11, %v10095_v46 }
 0x92e   :  { %4261 = vrot.lane.b32.xlu0 %v4259_v38, %s9680_s14  ;;  %v4338_v34 = vmul.f32 %v8543_v3, %v10098_v9  ;;  %v4319_v30 = vadd.f32 %v4317_v61, %v4315_v29  ;;  %v4339_v10 = vadd.f32 %v4337_v62, %v4335_v15  ;;  %v4359_v8 = vmul.f32 %v8532_v26, %v10101_v37  ;;  %v10108_v29 = vld [vmem:[#allocation61_spill] sm:$0xff]  ;;  %v10109_v62 = vld [vmem:[#allocation64_spill] sm:$0xff] }
 0x92f   :  { %v4361_v51 = vmul.f32 %v8541_v58, %v10102_v0  ;;  %v4300_v56 = vadd.f32 %v4298_v59, %v4296_v5  ;;  %v4321_v43 = vmul.f32 %v8554_v60, %v10105_v57  ;;  %v4320_v46 = vadd.f32 %v4318_v47, %v4316_v4 }
 0x930   :  { %4263 = vrot.lane.b32.xlu1 %v4260_v22, %s9680_s14  ;;  %v4340_v53 = vadd.f32 %v4338_v34, %v4336_v25  ;;  %v4341_v9 = vmul.f32 %v8546_v21, %v10099_v39  ;;  %v4360_v6 = vmul.f32 %v8539_v32, %v10101_v37  ;;  %v4362_v1 = vmul.f32 %v8543_v3, %v10102_v0 }
 0x931   :  { %v4342_v18 = vmul.f32 %v8552_v11, %v10099_v39  ;;  %v4363_v48 = vadd.f32 %v4361_v51, %v4359_v8  ;;  %v4323_v31 = vadd.f32 %v4321_v43, %v4319_v30  ;;  %v4322_v49 = vmul.f32 %v8556_v52, %v10105_v57 }
 0x932   :  { %4301 = vrot.lane.b32.xlu0 %v4299_v36, %s9686_s17  ;;  %v4343_v17 = vadd.f32 %v4341_v9, %v4339_v10  ;;  %v4365_v50 = vmul.f32 %v8546_v21, %v10103_v7  ;;  %v4364_v13 = vadd.f32 %v4362_v1, %v4360_v6  ;;  %v4345_v0 = vmul.f32 %v8554_v60, %v10100_v28 }
 0x933   :  { %v4344_v54 = vadd.f32 %v4342_v18, %v4340_v53  ;;  %v4324_v37 = vadd.f32 %v4322_v49, %v4320_v46  ;;  %v4346_v39 = vmul.f32 %v8556_v52, %v10100_v28  ;;  %v4366_v19 = vmul.f32 %v8552_v11, %v10103_v7  ;;  %v10113_v18 = vld [vmem:[#allocation16_spill] sm:$0xff] }
 0x934   :  { %4303 = vrot.lane.b32.xlu1 %v4300_v56, %s9686_s17  ;;  %v4367_v16 = vadd.f32 %v4365_v50, %v4363_v48  ;;  %v4271_v33 = vmul.f32 %v8532_v26, %v10106_v24  ;;  %v4347_v55 = vadd.f32 %v4345_v0, %v4343_v17  ;;  %v4272_v41 = vmul.f32 %v8539_v32, %v10106_v24  ;;  %v10112_v56 = vld [vmem:[#allocation85_spill] sm:$0xff]  ;;  %v10116_v0 = vld [vmem:[#allocation15_spill] sm:$0xff] }
 0x935   :  { %v4273_v27 = vmul.f32 %v8541_v58, %v10107_v44  ;;  %v4274_v35 = vmul.f32 %v8543_v3, %v10107_v44  ;;  %v4348_v28 = vadd.f32 %v4346_v39, %v4344_v54  ;;  %v4369_v38 = vmul.f32 %v8554_v60, %v10104_v42 }
 0x936   :  { %4325 = vrot.lane.b32.xlu0 %v4323_v31, %s9690_s2  ;;  %v4368_v7 = vadd.f32 %v4366_v19, %v4364_v13  ;;  %v4277_v63 = vmul.f32 %v8546_v21, %v10108_v29  ;;  %v4278_v32 = vmul.f32 %v8552_v11, %v10108_v29  ;;  %v4370_v58 = vmul.f32 %v8556_v52, %v10104_v42  ;;  %v10114_v31 = vld [vmem:[#allocation17_spill] sm:$0xff]  ;;  %v10115_v13 = vld [vmem:[#allocation130_spill] sm:$0xff] }
 0x937   :  { %v4275_v26 = vadd.f32 %v4273_v27, %v4271_v33  ;;  %v4276_v40 = vadd.f32 %v4274_v35, %v4272_v41  ;;  %v4371_v5 = vadd.f32 %v4369_v38, %v4367_v16  ;;  %v4281_v22 = vmul.f32 %v8554_v60, %v10109_v62  ;;  %v10110_v60 = vld [vmem:[#allocation84_spill] sm:$0xff]  ;;  %v10117_v16 = vld [vmem:[#allocation18_spill] sm:$0xff]  ;;  %v10119_v35 = vld [vmem:[#allocation43_spill] sm:$0xff] }
 0x938   :  { %4327 = vrot.lane.b32.xlu1 %v4324_v37, %s9690_s2  ;;  %v4282_v61 = vmul.f32 %v8556_v52, %v10109_v62  ;;  %v4372_v21 = vadd.f32 %v4370_v58, %v4368_v7  ;;  %v3745_v30 = vmul.f32 %v10110_v60, %v10106_v24  ;;  %v3746_v52 = vmul.f32 %v8314_v20, %v10106_v24  ;;  %v10118_v24 = vld [vmem:[#allocation69_spill] sm:$0xff]  ;;  %v10120_v38 = vld [vmem:[#allocation122_spill] sm:$0xff] }
 0x939   :  { %v4279_v3 = vadd.f32 %v4277_v63, %v4275_v26  ;;  %v4280_v15 = vadd.f32 %v4278_v32, %v4276_v40  ;;  %v3747_v57 = vmul.f32 %v10112_v56, %v10107_v44  ;;  %v3748_v43 = vmul.f32 %v8324_v45, %v10107_v44 }
 0x93a   :  { %4349 = vrot.lane.b32.xlu0 %v4347_v55, %s9691_s22  ;;  %v3751_v55 = vmul.f32 %v8326_v2, %v10108_v29  ;;  %v3752_v41 = vmul.f32 %v8328_v12, %v10108_v29  ;;  %v3755_v2 = vmul.f32 %v8336_v14, %v10109_v62  ;;  %v3756_v12 = vmul.f32 %v8338_v23, %v10109_v62  ;;  %v10122_v62 = vld [vmem:[#allocation163_spill] sm:$0xff] }
 0x93b   :  { %v8777_v4 = vadd.f32 %v4281_v22, %v4279_v3  ;;  %v8779_v11 = vadd.f32 %v4282_v61, %v4280_v15  ;;  %v3749_v54 = vadd.f32 %v3747_v57, %v3745_v30  ;;  %v3750_v50 = vadd.f32 %v3748_v43, %v3746_v52  ;;  %v10123_v52 = vld [vmem:[#allocation164_spill] sm:$0xff] }
 0x93c   :  { %4351 = vrot.lane.b32.xlu1 %v4348_v28, %s9691_s22 }
 0x93d   :  { %v3753_v32 = vadd.f32 %v3751_v55, %v3749_v54 }
 0x93e   :  { %4373 = vrot.lane.b32.xlu0 %v4371_v5, %s9692_s0  ;;  %v3754_v5 = vadd.f32 %v3752_v41, %v3750_v50  ;;  %v10129_v41 = vld [vmem:[#allocation65_spill] sm:$0xff] }
 0x940   :  { %4375 = vrot.lane.b32.xlu1 %v4372_v21, %s9692_s0  ;;  %v3757_v21 = vadd.f32 %v3755_v2, %v3753_v32 }
 0x95c   :  { %v3666_v42 = vpop.permute.xlu0 %3665 }
 0x95f   :  { %v3668_v25 = vpop.permute.xlu1 %3667 }
 0x960   :  { %v3669_v9 = vsel %vm500_vm7, %v3666_v42, %v3668_v25  ;;  %v3670_v20 = vsel %vm500_vm7, %v3668_v25, %v3666_v42  ;;  %v3758_v42 = vadd.f32 %v3756_v12, %v3754_v5 }
 0x961   :  { %v3671_v37 = vmul.f32 %v3670_v20, %v10115_v13  ;;  %v3672_v39 = vmul.f32 %v3669_v9, %v10116_v0  ;;  %v10125_v20 = vld [vmem:[#allocation168_spill] sm:$0xff] }
 0x967   :  { %v3688_v36 = vpop.permute.xlu0 %3687 }
 0x969   :  { %v3690_v59 = vpop.permute.xlu1 %3689 }
 0x96a   :  { %v3691_v8 = vsel %vm532_vm0, %v3688_v36, %v3690_v59  ;;  %v3692_v51 = vsel %vm532_vm0, %v3690_v59, %v3688_v36 }
 0x96b   :  { %v3693_v48 = vmul.f32 %v3692_v51, %v10113_v18  ;;  %v3694_v49 = vmul.f32 %v3691_v8, %v10114_v31  ;;  %v10124_v51 = vld [vmem:[#allocation167_spill] sm:$0xff] }
 0x96d   :  { %v3695_v44 = vadd.f32 %v3693_v48, %v3671_v37  ;;  %v3696_v27 = vadd.f32 %v3694_v49, %v3672_v39  ;;  %v10127_v37 = vld [vmem:[#allocation81_spill] sm:$0xff] }
 0x96e   :  { %v10128_v39 = vld [vmem:[#allocation113_spill] sm:$0xff] }
 0x96f   :  { %v3712_v47 = vpop.permute.xlu0 %3711 }
 0x971   :  { %v3714_v34 = vpop.permute.xlu1 %3713 }
 0x972   :  { %v3715_v6 = vsel %vm572_vm1, %v3712_v47, %v3714_v34  ;;  %v3716_v1 = vsel %vm572_vm1, %v3714_v34, %v3712_v47  ;;  %v10121_v34 = vld [vmem:[#allocation166_spill] sm:$0xff] }
 0x973   :  { %v3717_v19 = vmul.f32 %v3716_v1, %v10117_v16  ;;  %v3718_v33 = vmul.f32 %v3715_v6, %v10118_v24  ;;  %v10126_v1 = vld [vmem:[#allocation80_spill] sm:$0xff] }
 0x975   :  { %v3719_v40 = vadd.f32 %v3717_v19, %v3695_v44  ;;  %v3720_v63 = vadd.f32 %v3718_v33, %v3696_v27 }
 0x977   :  { %v3736_v53 = vpop.permute.xlu0 %3735 }
 0x97a   :  { %v3738_v46 = vpop.permute.xlu1 %3737 }
 0x97b   :  { %v3739_v45 = vsel %vm612_vm2, %v3736_v53, %v3738_v46  ;;  %v3740_v17 = vsel %vm612_vm2, %v3738_v46, %v3736_v53 }
 0x97c   :  { %v3741_v28 = vmul.f32 %v3740_v17, %v10119_v35  ;;  %v3742_v7 = vmul.f32 %v3739_v45, %v10120_v38 }
 0x97e   :  { %v3743_v3 = vadd.f32 %v3741_v28, %v3719_v40  ;;  %v3744_v15 = vadd.f32 %v3742_v7, %v3720_v63  ;;  %v10130_v28 = vld [vmem:[#allocation124_spill] sm:$0xff]  ;;  %v10131_v7 = vld [vmem:[#allocation126_spill] sm:$0xff] }
 0x980   :  { %v3759_v14 = vadd.f32 %v3757_v21, %v3743_v3  ;;  %v3760_v47 = vadd.f32 %v3758_v42, %v3744_v15 }
 0x984   :  { %v3776_v26 = vpop.permute.xlu0 %3775 }
 0x986   :  { %v3778_v58 = vpop.permute.xlu1 %3777 }
 0x987   :  { %v3779_v22 = vsel %vm672_vm3, %v3776_v26, %v3778_v58  ;;  %v3780_v61 = vsel %vm672_vm3, %v3778_v58, %v3776_v26 }
 0x988   :  { %v3800_v29 = vpop.permute.xlu0 %3799  ;;  %v3781_v23 = vmul.f32 %v3779_v22, %v10121_v34  ;;  %v3782_v60 = vmul.f32 %v3780_v61, %v10122_v62  ;;  %v10134_v61 = vld [vmem:[#allocation118_spill] sm:$0xff] }
 0x98a   :  { %v3802_v25 = vpop.permute.xlu1 %3801  ;;  %v3783_v46 = vadd.f32 %v3781_v23, %v3759_v14  ;;  %v3784_v9 = vadd.f32 %v3782_v60, %v3760_v47  ;;  %v10137_v47 = vld [vmem:[#allocation119_spill] sm:$0xff]  ;;  %v10138_v23 = vld [vmem:[#allocation120_spill] sm:$0xff] }
 0x98b   :  { %v3803_v36 = vsel %vm712_vm4, %v3800_v29, %v3802_v25  ;;  %v3804_v59 = vsel %vm712_vm4, %v3802_v25, %v3800_v29  ;;  %v10133_v29 = vld [vmem:[#allocation109_spill] sm:$0xff] }
 0x98c   :  { %v3824_v30 = vpop.permute.xlu0 %3823  ;;  %v3805_v8 = vmul.f32 %v3803_v36, %v10123_v52  ;;  %v3806_v56 = vmul.f32 %v3804_v59, %v10124_v51  ;;  %v10135_v25 = vld [vmem:[#allocation117_spill] sm:$0xff]  ;;  %v10136_v59 = vld [vmem:[#allocation116_spill] sm:$0xff] }
 0x98e   :  { %v3826_v57 = vpop.permute.xlu1 %3825  ;;  %v3807_v31 = vadd.f32 %v3805_v8, %v3783_v46  ;;  %v3808_v49 = vadd.f32 %v3806_v56, %v3784_v9  ;;  %v10139_v56 = vld [vmem:[#allocation71_spill] sm:$0xff] }
 0x98f   :  { %v3827_v43 = vsel %vm752_vm5, %v3824_v30, %v3826_v57  ;;  %v3828_v53 = vsel %vm752_vm5, %v3826_v57, %v3824_v30 }
 0x990   :  { %v3829_v6 = vmul.f32 %v3827_v43, %v10125_v20  ;;  %v3830_v18 = vmul.f32 %v3828_v53, %v10126_v1  ;;  %v3848_v48 = vpop.permute.xlu0 %3847  ;;  %v10140_v43 = vld [vmem:[#allocation46_spill] sm:$0xff] }
 0x992   :  { %v3850_v45 = vpop.permute.xlu1 %3849  ;;  %v3831_v50 = vadd.f32 %v3829_v6, %v3807_v31  ;;  %v3832_v13 = vadd.f32 %v3830_v18, %v3808_v49 }
 0x993   :  { %v3851_v17 = vsel %vm792_vm6, %v3848_v48, %v3850_v45  ;;  %v3852_v54 = vsel %vm792_vm6, %v3850_v45, %v3848_v48 }
 0x994   :  { %v3853_v0 = vmul.f32 %v3851_v17, %v10127_v37  ;;  %v3854_v16 = vmul.f32 %v3852_v54, %v10128_v39  ;;  %v4192_v19 = vpop.permute.xlu0 %4191  ;;  %v10141_v37 = vld [vmem:[#allocation101_spill] sm:$0xff]  ;;  %v10142_v39 = vld [vmem:[#allocation104_spill] sm:$0xff] }
 0x996   :  { %v3855_v24 = vadd.f32 %v3853_v0, %v3831_v50  ;;  %v3856_v33 = vadd.f32 %v3854_v16, %v3832_v13  ;;  %v4194_v55 = vpop.permute.xlu1 %4193 }
 0x997   :  { %v4195_v3 = vsel %vm500_vm7, %v4192_v19, %v4194_v55  ;;  %v4196_v15 = vsel %vm500_vm7, %v4194_v55, %v4192_v19  ;;  %v10144_v55 = vld [vmem:[#allocation52_spill] sm:$0xff] }
 0x998   :  { %v3857_v44 = vadd.f32 %v3855_v24, %v10129_v41  ;;  %v3858_v27 = vadd.f32 %v3856_v33, %v10129_v41  ;;  %v4214_v35 = vpop.permute.xlu0 %4213  ;;  %v4197_v36 = vmul.f32 %v4196_v15, %v10135_v25  ;;  %v4198_v14 = vmul.f32 %v4195_v3, %v10136_v59  ;;  %v10143_v24 = vld [vmem:[#allocation51_spill] sm:$0xff] }
 0x99a   :  { %v3859_v38 = vadd.f32 %v3857_v44, %v10130_v28  ;;  %v3860_v26 = vadd.f32 %v3858_v27, %v10131_v7  ;;  %v4216_v40 = vpop.permute.xlu1 %4215  ;;  %v10145_v7 = vld [vmem:[#allocation57_spill] sm:$0xff] }
 0x99b   :  { %v4217_v32 = vsel %vm532_vm0, %v4214_v35, %v4216_v40  ;;  %v4218_v5 = vsel %vm532_vm0, %v4216_v40, %v4214_v35 }
 0x99c   :  { %3861 = vst [vmem:[%s10132_s19] sm:$0xff] %v3859_v38  ;;  %3862 = vst [vmem:[%s10132_s19 + $0x8] sm:$0xff] %v3860_v26  ;;  %v4238_v63 = vpop.permute.xlu0 %4237  ;;  %v4219_v22 = vmul.f32 %v4218_v5, %v10133_v29  ;;  %v4220_v21 = vmul.f32 %v4217_v32, %v10134_v61  ;;  %v10146_v26 = vld [vmem:[#allocation72_spill] sm:$0xff]  ;;  %v10147_v29 = vld [vmem:[#allocation58_spill] sm:$0xff] }
 0x99d   :  { %v10148_v61 = vld [vmem:[#allocation115_spill] sm:$0xff] }
 0x99e   :  { %v4240_v58 = vpop.permute.xlu1 %4239  ;;  %v4221_v8 = vadd.f32 %v4219_v22, %v4197_v36  ;;  %v4222_v51 = vadd.f32 %v4220_v21, %v4198_v14  ;;  %v10149_v14 = vld [vmem:[#allocation127_spill] sm:$0xff] }
 0x99f   :  { %v4241_v2 = vsel %vm572_vm1, %v4238_v63, %v4240_v58  ;;  %v4242_v12 = vsel %vm572_vm1, %v4240_v58, %v4238_v63 }
 0x9a0   :  { %v4262_v42 = vpop.permute.xlu0 %4261  ;;  %v4243_v34 = vmul.f32 %v4242_v12, %v10137_v47  ;;  %v4244_v62 = vmul.f32 %v4241_v2, %v10138_v23 }
 0x9a2   :  { %v4264_v60 = vpop.permute.xlu1 %4263  ;;  %v4245_v9 = vadd.f32 %v4243_v34, %v4221_v8  ;;  %v4246_v20 = vadd.f32 %v4244_v62, %v4222_v51  ;;  %v10150_v34 = vld [vmem:[#allocation128_spill] sm:$0xff] }
 0x9a3   :  { %v4265_v30 = vsel %vm612_vm2, %v4262_v42, %v4264_v60  ;;  %v4266_v52 = vsel %vm612_vm2, %v4264_v60, %v4262_v42 }
 0x9a4   :  { %v4267_v57 = vmul.f32 %v4266_v52, %v10139_v56  ;;  %v4268_v53 = vmul.f32 %v4265_v30, %v10140_v43  ;;  %v4302_v46 = vpop.permute.xlu0 %4301 }
 0x9a6   :  { %v4304_v6 = vpop.permute.xlu1 %4303  ;;  %v4269_v1 = vadd.f32 %v4267_v57, %v4245_v9  ;;  %v4270_v18 = vadd.f32 %v4268_v53, %v4246_v20 }
 0x9a7   :  { %v4305_v31 = vsel %vm672_vm3, %v4302_v46, %v4304_v6  ;;  %v4306_v49 = vsel %vm672_vm3, %v4304_v6, %v4302_v46 }
 0x9a8   :  { %v4326_v48 = vpop.permute.xlu0 %4325  ;;  %v4285_v50 = vadd.f32 %v8777_v4, %v4269_v1  ;;  %v4286_v13 = vadd.f32 %v8779_v11, %v4270_v18  ;;  %v4307_v0 = vmul.f32 %v4305_v31, %v10141_v37  ;;  %v4308_v16 = vmul.f32 %v4306_v49, %v10142_v39 }
 0x9aa   :  { %v4328_v45 = vpop.permute.xlu1 %4327  ;;  %v4309_v38 = vadd.f32 %v4307_v0, %v4285_v50  ;;  %v4310_v4 = vadd.f32 %v4308_v16, %v4286_v13 }
 0x9ab   :  { %v4329_v17 = vsel %vm712_vm4, %v4326_v48, %v4328_v45  ;;  %v4330_v54 = vsel %vm712_vm4, %v4328_v45, %v4326_v48 }
 0x9ac   :  { %v4350_v19 = vpop.permute.xlu0 %4349  ;;  %v4331_v33 = vmul.f32 %v4329_v17, %v10143_v24  ;;  %v4332_v44 = vmul.f32 %v4330_v54, %v10144_v55 }
 0x9ae   :  { %v4352_v27 = vpop.permute.xlu1 %4351  ;;  %v4333_v32 = vadd.f32 %v4331_v33, %v4309_v38  ;;  %v4334_v5 = vadd.f32 %v4332_v44, %v4310_v4 }
 0x9af   :  { %v4353_v35 = vsel %vm752_vm5, %v4350_v19, %v4352_v27  ;;  %v4354_v28 = vsel %vm752_vm5, %v4352_v27, %v4350_v19 }
 0x9b0   :  { %v4355_v11 = vmul.f32 %v4353_v35, %v10145_v7  ;;  %v4356_v40 = vmul.f32 %v4354_v28, %v10146_v26  ;;  %v4374_v63 = vpop.permute.xlu0 %4373 }
 0x9b2   :  { %v4376_v58 = vpop.permute.xlu1 %4375  ;;  %v4357_v2 = vadd.f32 %v4355_v11, %v4333_v32  ;;  %v4358_v12 = vadd.f32 %v4356_v40, %v4334_v5 }
 0x9b3   :  { %v4377_v3 = vsel %vm792_vm6, %v4374_v63, %v4376_v58  ;;  %v4378_v15 = vsel %vm792_vm6, %v4376_v58, %v4374_v63 }
 0x9b4   :  { %v4379_v22 = vmul.f32 %v4377_v3, %v10147_v29  ;;  %v4380_v21 = vmul.f32 %v4378_v15, %v10148_v61 }
 0x9b6   :  { %v4381_v42 = vadd.f32 %v4379_v22, %v4357_v2  ;;  %v4382_v25 = vadd.f32 %v4380_v21, %v4358_v12 }
 0x9b8   :  { %v4383_v36 = vadd.f32 %v4381_v42, %v10129_v41  ;;  %v4384_v59 = vadd.f32 %v4382_v25, %v10129_v41 }
 0x9ba   :  { %v4385_v47 = vadd.f32 %v4383_v36, %v10149_v14  ;;  %v4386_v23 = vadd.f32 %v4384_v59, %v10150_v34 }
 0x9bc   :  { %4387 = vst [vmem:[%s10132_s19 + $0x10] sm:$0xff] %v4385_v47  ;;  %4388 = vst [vmem:[%s10132_s19 + $0x18] sm:$0xff] %v4386_v23 }
 0x9bd   :  { %4393 = vsyncpa [#allocation6], 1 }
 0x9be   :  { %4394 = vsyncpa [#allocation8], 1 }

</bundles_post_ra>
